<compile_context>
chip_gen: v6e
topology: v6e:2x2x1
jax: 0.10.0
libtpu: 0.0.40
codegen_flags: <defaults>
</compile_context>

<pallas_src>
import functools

import jax
import jax.numpy as jnp
from jax.experimental import pallas as pl
from jax.experimental.pallas import tpu as pltpu


def _round_up(x, m):
    return (x + m - 1) // m * m


def basic_block_kernel(x_ref, w1_ref, s1_ref, b1_ref, w2_ref, s2_ref, b2_ref,
                       mask_ref, out_ref, col_ref, mid_ref, acc_ref,
                       *, C, Spad, M_in, M_mid, shifts):
    # x_ref   : (C, Stot_in)  f32  zero-padded flattened input with zero-plane lane margins
    # w1/w2   : (3, C, 9*C)   bf16 conv weights, group = kd, columns ordered (kh, kw, cin)
    # s1/b1   : (C, 1)        f32  folded BN1 scale / bias
    # s2/b2   : (C, 1)        f32  folded BN2 scale / bias (sd_prob pre-folded)
    # mask_ref: (1, Spad)     f32  1.0 at interior voxels of the padded volume, else 0.0
    # out_ref : (C, Spad)     f32  output at padded resolution (wrapper un-pads)
    # col_ref : VMEM (9*C, Spad)  bf16 im2col scratch for ONE kd tap group
    # mid_ref : VMEM (C, Stot_mid) bf16 conv1 activation, margin-padded for conv2
    # acc_ref : VMEM (C, Spad)    f32  matmul accumulator (reused by both convs)

    # ---- conv1: 3 tap-group matmuls (K = 9*C each), bf16 im2col, f32 accumulation ----
    for g in range(3):
        for j in range(9):
            s = shifts[g * 9 + j]
            col_ref[j * C:(j + 1) * C, :] = (
                x_ref[:, M_in + s:M_in + s + Spad].astype(jnp.bfloat16))
        p = jnp.dot(w1_ref[g], col_ref[...], preferred_element_type=jnp.float32)
        if g == 0:
            acc_ref[...] = p
        else:
            acc_ref[...] += p

    # ---- BN1 (folded) + ReLU; mask ring/tail so conv2 sees exact zero padding --------
    mid = jnp.maximum(acc_ref[...] * s1_ref[...] + b1_ref[...], 0.0) * mask_ref[...]
    mid_ref[:, :M_mid] = jnp.zeros((C, M_mid), jnp.bfloat16)        # tiny margins only;
    mid_ref[:, M_mid + Spad:] = jnp.zeros((C, M_mid), jnp.bfloat16)  # re-done every step
    mid_ref[:, M_mid:M_mid + Spad] = mid.astype(jnp.bfloat16)

    # ---- conv2: same tap-group structure -----------------------------------------------
    for g in range(3):
        for j in range(9):
            s = shifts[g * 9 + j]
            col_ref[j * C:(j + 1) * C, :] = mid_ref[:, M_mid + s:M_mid + s + Spad]
        p = jnp.dot(w2_ref[g], col_ref[...], preferred_element_type=jnp.float32)
        if g == 0:
            acc_ref[...] = p
        else:
            acc_ref[...] += p

    # ---- BN2 (sd_prob folded in) + residual + final ReLU (all f32) --------------------
    residual = x_ref[:, M_in:M_in + Spad]
    out_ref[...] = jnp.maximum(acc_ref[...] * s2_ref[...] + b2_ref[...] + residual, 0.0)


def basic_block_forward(x_ncdhw, params, *, sd_prob=1.0, eps=1e-5):
    """x_ncdhw: (N, C, D, H, W) float32, PyTorch layout. Returns same layout."""
    N, Cin, D, H, W = x_ncdhw.shape
    Cout = params["w1"].shape[0]
    assert Cin == Cout, "no downsample branch => inplanes must equal planes"
    C = Cout

    Dp, Hp, Wp = D + 2, H + 2, W + 2
    HW = Hp * Wp
    S = Dp * HW                                  # padded flattened volume
    Spad = _round_up(S, 128)                     # lane-dense length
    shift_max = HW + Wp + 1                      # largest |tap shift| in flat coords

    # Lane margins expressed as whole zero D-planes so ONE jnp.pad builds the buffer.
    d_lo = -(-shift_max // HW)                   # margin planes before the padded volume
    d_hi = -(-((Spad - S) + shift_max) // HW)    # margin planes after it
    M_in = d_lo * HW
    Stot_in = (d_lo + Dp + d_hi) * HW
    M_mid = _round_up(shift_max, 128)            # aligned margin for the mid scratch
    Stot_mid = M_mid + Spad + M_mid

    # single pad: conv zero-ring + flat-shift margins + round-up tail, one HBM pass
    x_buf = jnp.pad(x_ncdhw.astype(jnp.float32),
                    ((0, 0), (0, 0), (1 + d_lo, 1 + d_hi), (1, 1), (1, 1)))
    x_buf = x_buf.reshape(N, C, Stot_in)

    # torch conv weight (O, I, kD, kH, kW) -> (3, O, 9*I): group = kd, cols (kh, kw, i)
    def prep_w(w):
        wa = jnp.transpose(w, (0, 2, 3, 4, 1)).reshape(C, 27 * C)
        return wa.reshape(C, 3, 9 * C).transpose(1, 0, 2).astype(jnp.bfloat16)

    w1g = prep_w(params["w1"])
    w2g = prep_w(params["w2"])

    # flattened-volume lane shift of tap (kd, kh, kw)  (same order as weight columns)
    shifts = tuple((kd - 1) * HW + (kh - 1) * Wp + (kw - 1)
                   for kd in range(3) for kh in range(3) for kw in range(3))

    # eval-mode BatchNorm folded to scale/bias; sd_prob folded into BN2
    s1 = params["g1"] / jnp.sqrt(params["rv1"] + eps)
    b1 = params["b1"] - params["rm1"] * s1
    s2 = params["g2"] / jnp.sqrt(params["rv2"] + eps)
    b2 = params["b2"] - params["rm2"] * s2
    s2 = sd_prob * s2
    b2 = sd_prob * b2
    s1, b1, s2, b2 = (v.reshape(C, 1).astype(jnp.float32) for v in (s1, b1, s2, b2))

    # interior-voxel mask over the padded, lane-rounded flat volume
    q = jnp.arange(Spad)
    dq, r = q // HW, q % HW
    hq, wq = r // Wp, r % Wp
    interior = ((dq >= 1) & (dq <= D) & (hq >= 1) & (hq <= H) &
                (wq >= 1) & (wq <= W))
    mask = interior.astype(jnp.float32).reshape(1, Spad)

    kernel = functools.partial(basic_block_kernel, C=C, Spad=Spad,
                               M_in=M_in, M_mid=M_mid, shifts=shifts)

    out_flat = pl.pallas_call(
        kernel,
        out_shape=jax.ShapeDtypeStruct((N, C, Spad), jnp.float32),
        grid=(N,),
        in_specs=[
            pl.BlockSpec((None, C, Stot_in), lambda n: (n, 0, 0)),
            pl.BlockSpec((3, C, 9 * C), lambda n: (0, 0, 0)),
            pl.BlockSpec((C, 1), lambda n: (0, 0)),
            pl.BlockSpec((C, 1), lambda n: (0, 0)),
            pl.BlockSpec((3, C, 9 * C), lambda n: (0, 0, 0)),
            pl.BlockSpec((C, 1), lambda n: (0, 0)),
            pl.BlockSpec((C, 1), lambda n: (0, 0)),
            pl.BlockSpec((1, Spad), lambda n: (0, 0)),
        ],
        out_specs=pl.BlockSpec((None, C, Spad), lambda n: (n, 0, 0)),
        scratch_shapes=[
            pltpu.VMEM((9 * C, Spad), jnp.bfloat16),    # im2col (one kd tap group)
            pltpu.VMEM((C, Stot_mid), jnp.bfloat16),    # conv1 activation, margin-padded
            pltpu.VMEM((C, Spad), jnp.float32),         # f32 matmul accumulator
        ],
        compiler_params=pltpu.CompilerParams(
            dimension_semantics=("parallel",),
            vmem_limit_bytes=48 * 1024 * 1024,
        ),
    )(x_buf, w1g, s1, b1, w2g, s2, b2, mask)

    # drop the lane round-up tail and the conv zero-padding ring -> NCDHW
    out = out_flat[:, :, :S].reshape(N, C, Dp, Hp, Wp)
    return out[:, :, 1:1 + D, 1:1 + H, 1:1 + W]


def reference_forward(x, params, *, sd_prob=1.0, eps=1e-5):
    """Pure-JAX (f32) reference mirroring the PyTorch eval-mode forward."""
    def conv(v, w):
        return jax.lax.conv_general_dilated(
            v, w, window_strides=(1, 1, 1), padding="SAME",
            dimension_numbers=("NCDHW", "OIDHW", "NCDHW"))

    def bn(v, g, b, rm, rv):
        s = g / jnp.sqrt(rv + eps)
        return v * s[None, :, None, None, None] + (b - rm * s)[None, :, None, None, None]

    out = jnp.maximum(bn(conv(x, params["w1"]), params["g1"], params["b1"],
                         params["rm1"], params["rv1"]), 0.0)
    out = bn(conv(out, params["w2"]), params["g2"], params["b2"],
             params["rm2"], params["rv2"])
    out = sd_prob * out + x
    return jnp.maximum(out, 0.0)


def init_params(key, inplanes, planes):
    ks = jax.random.split(key, 10)
    return {
        "w1": 0.1 * jax.random.normal(ks[0], (planes, inplanes, 3, 3, 3), jnp.float32),
        "w2": 0.1 * jax.random.normal(ks[1], (planes, planes, 3, 3, 3), jnp.float32),
        "g1": jax.random.uniform(ks[2], (planes,), jnp.float32, 0.7, 1.3),
        "b1": 0.1 * jax.random.normal(ks[3], (planes,), jnp.float32),
        "rm1": 0.1 * jax.random.normal(ks[4], (planes,), jnp.float32),
        "rv1": jax.random.uniform(ks[5], (planes,), jnp.float32, 0.7, 1.3),
        "g2": jax.random.uniform(ks[6], (planes,), jnp.float32, 0.7, 1.3),
        "b2": 0.1 * jax.random.normal(ks[7], (planes,), jnp.float32),
        "rm2": 0.1 * jax.random.normal(ks[8], (planes,), jnp.float32),
        "rv2": jax.random.uniform(ks[9], (planes,), jnp.float32, 0.7, 1.3),
    }


if __name__ == "__main__":
    key = jax.random.PRNGKey(0)
    kx, kp = jax.random.split(key)

    N, C, D, H, W = 2, 16, 8, 8, 8          # inplanes == planes == 16, no downsample
    sd_prob = 1.0                            # module default

    x = jax.random.normal(kx, (N, C, D, H, W), jnp.float32)
    params = init_params(kp, C, C)

    out = jax.block_until_ready(basic_block_forward(x, params, sd_prob=sd_prob))
    ref = jax.block_until_ready(reference_forward(x, params, sd_prob=sd_prob))

    assert out.shape == ref.shape == (N, C, D, H, W)
    assert bool(jnp.all(jnp.isfinite(out)))
    # Tolerances account for bf16 MXU inputs (f32 accumulation / epilogue); an indexing
    # or fold bug would give mean error ~O(1), far above these thresholds.
    err = jnp.abs(out - ref)
    max_err = float(jnp.max(err))
    mean_err = float(jnp.mean(err))
    assert max_err < 3e-1 and mean_err < 2e-2, (max_err, mean_err)

    print("KERNEL_OK")
</pallas_src>

<mosaic_0001>
module attributes {stable_mosaic.version = 11 : i64} {
  func.func @basic_block_kernel(%arg0: i32, %arg1: memref<1x16x1400xf32, #tpu.memory_space<vmem>>, %arg2: memref<3x16x144xbf16, #tpu.memory_space<vmem>>, %arg3: memref<16x1xf32, #tpu.memory_space<vmem>>, %arg4: memref<16x1xf32, #tpu.memory_space<vmem>>, %arg5: memref<3x16x144xbf16, #tpu.memory_space<vmem>>, %arg6: memref<16x1xf32, #tpu.memory_space<vmem>>, %arg7: memref<16x1xf32, #tpu.memory_space<vmem>>, %arg8: memref<1x1024xf32, #tpu.memory_space<vmem>>, %arg9: memref<1x16x1024xf32, #tpu.memory_space<vmem>>, %arg10: memref<144x1024xbf16, #tpu.memory_space<vmem>>, %arg11: memref<16x1280xbf16, #tpu.memory_space<vmem>>, %arg12: memref<16x1024xf32, #tpu.memory_space<vmem>>) attributes {dimension_semantics = [#tpu.dimension_semantics<parallel>], iteration_bounds = array<i64: 2>, scalar_prefetch = 0 : i64, scratch_operands = 3 : i64, tpu.core_type = #tpu.core_type<tc>, window_params = [{transform_indices = @transform_0, window_bounds = array<i64: 1, 16, 1400>}, {pipeline_mode = #tpu.pipeline_mode<synchronous>, transform_indices = @transform_1, window_bounds = array<i64: 3, 16, 144>}, {pipeline_mode = #tpu.pipeline_mode<synchronous>, transform_indices = @transform_2, window_bounds = array<i64: 16, 1>}, {pipeline_mode = #tpu.pipeline_mode<synchronous>, transform_indices = @transform_3, window_bounds = array<i64: 16, 1>}, {pipeline_mode = #tpu.pipeline_mode<synchronous>, transform_indices = @transform_4, window_bounds = array<i64: 3, 16, 144>}, {pipeline_mode = #tpu.pipeline_mode<synchronous>, transform_indices = @transform_5, window_bounds = array<i64: 16, 1>}, {pipeline_mode = #tpu.pipeline_mode<synchronous>, transform_indices = @transform_6, window_bounds = array<i64: 16, 1>}, {pipeline_mode = #tpu.pipeline_mode<synchronous>, transform_indices = @transform_7, window_bounds = array<i64: 1, 1024>}, {transform_indices = @transform_8, window_bounds = array<i64: 1, 16, 1024>}]} {
    %c0 = arith.constant 0 : index
    %c0_0 = arith.constant 0 : index
    %c89 = arith.constant 89 : index
    %0 = vector.load %arg1[%c0, %c0_0, %c89] : memref<1x16x1400xf32, #tpu.memory_space<vmem>>, vector<1x16x1024xf32>
    %1 = vector.shape_cast %0 : vector<1x16x1024xf32> to vector<16x1024xf32>
    %2 = arith.truncf %1 : vector<16x1024xf32> to vector<16x1024xbf16>
    %c0_1 = arith.constant 0 : index
    %c0_2 = arith.constant 0 : index
    %3 = vector.load %arg10[%c0_1, %c0_2] : memref<144x1024xbf16, #tpu.memory_space<vmem>>, vector<16x1024xbf16>
    tpu.vector_store %arg10[%c0_1, %c0_2], %2 {strides = array<i32>} : memref<144x1024xbf16, #tpu.memory_space<vmem>>, vector<16x1024xbf16>,
    %c0_3 = arith.constant 0 : index
    %c0_4 = arith.constant 0 : index
    %c90 = arith.constant 90 : index
    %4 = vector.load %arg1[%c0_3, %c0_4, %c90] : memref<1x16x1400xf32, #tpu.memory_space<vmem>>, vector<1x16x1024xf32>
    %5 = vector.shape_cast %4 : vector<1x16x1024xf32> to vector<16x1024xf32>
    %6 = arith.truncf %5 : vector<16x1024xf32> to vector<16x1024xbf16>
    %c16 = arith.constant 16 : index
    %c0_5 = arith.constant 0 : index
    %7 = vector.load %arg10[%c16, %c0_5] : memref<144x1024xbf16, #tpu.memory_space<vmem>>, vector<16x1024xbf16>
    tpu.vector_store %arg10[%c16, %c0_5], %6 {strides = array<i32>} : memref<144x1024xbf16, #tpu.memory_space<vmem>>, vector<16x1024xbf16>,
    %c0_6 = arith.constant 0 : index
    %c0_7 = arith.constant 0 : index
    %c91 = arith.constant 91 : index
    %8 = vector.load %arg1[%c0_6, %c0_7, %c91] : memref<1x16x1400xf32, #tpu.memory_space<vmem>>, vector<1x16x1024xf32>
    %9 = vector.shape_cast %8 : vector<1x16x1024xf32> to vector<16x1024xf32>
    %10 = arith.truncf %9 : vector<16x1024xf32> to vector<16x1024xbf16>
    %c32 = arith.constant 32 : index
    %c0_8 = arith.constant 0 : index
    %11 = vector.load %arg10[%c32, %c0_8] : memref<144x1024xbf16, #tpu.memory_space<vmem>>, vector<16x1024xbf16>
    tpu.vector_store %arg10[%c32, %c0_8], %10 {strides = array<i32>} : memref<144x1024xbf16, #tpu.memory_space<vmem>>, vector<16x1024xbf16>,
    %c0_9 = arith.constant 0 : index
    %c0_10 = arith.constant 0 : index
    %c99 = arith.constant 99 : index
    %12 = vector.load %arg1[%c0_9, %c0_10, %c99] : memref<1x16x1400xf32, #tpu.memory_space<vmem>>, vector<1x16x1024xf32>
    %13 = vector.shape_cast %12 : vector<1x16x1024xf32> to vector<16x1024xf32>
    %14 = arith.truncf %13 : vector<16x1024xf32> to vector<16x1024xbf16>
    %c48 = arith.constant 48 : index
    %c0_11 = arith.constant 0 : index
    %15 = vector.load %arg10[%c48, %c0_11] : memref<144x1024xbf16, #tpu.memory_space<vmem>>, vector<16x1024xbf16>
    tpu.vector_store %arg10[%c48, %c0_11], %14 {strides = array<i32>} : memref<144x1024xbf16, #tpu.memory_space<vmem>>, vector<16x1024xbf16>,
    %c0_12 = arith.constant 0 : index
    %c0_13 = arith.constant 0 : index
    %c100 = arith.constant 100 : index
    %16 = vector.load %arg1[%c0_12, %c0_13, %c100] : memref<1x16x1400xf32, #tpu.memory_space<vmem>>, vector<1x16x1024xf32>
    %17 = vector.shape_cast %16 : vector<1x16x1024xf32> to vector<16x1024xf32>
    %18 = arith.truncf %17 : vector<16x1024xf32> to vector<16x1024xbf16>
    %c64 = arith.constant 64 : index
    %c0_14 = arith.constant 0 : index
    %19 = vector.load %arg10[%c64, %c0_14] : memref<144x1024xbf16, #tpu.memory_space<vmem>>, vector<16x1024xbf16>
    tpu.vector_store %arg10[%c64, %c0_14], %18 {strides = array<i32>} : memref<144x1024xbf16, #tpu.memory_space<vmem>>, vector<16x1024xbf16>,
    %c0_15 = arith.constant 0 : index
    %c0_16 = arith.constant 0 : index
    %c101 = arith.constant 101 : index
    %20 = vector.load %arg1[%c0_15, %c0_16, %c101] : memref<1x16x1400xf32, #tpu.memory_space<vmem>>, vector<1x16x1024xf32>
    %21 = vector.shape_cast %20 : vector<1x16x1024xf32> to vector<16x1024xf32>
    %22 = arith.truncf %21 : vector<16x1024xf32> to vector<16x1024xbf16>
    %c80 = arith.constant 80 : index
    %c0_17 = arith.constant 0 : index
    %23 = vector.load %arg10[%c80, %c0_17] : memref<144x1024xbf16, #tpu.memory_space<vmem>>, vector<16x1024xbf16>
    tpu.vector_store %arg10[%c80, %c0_17], %22 {strides = array<i32>} : memref<144x1024xbf16, #tpu.memory_space<vmem>>, vector<16x1024xbf16>,
    %c0_18 = arith.constant 0 : index
    %c0_19 = arith.constant 0 : index
    %c109 = arith.constant 109 : index
    %24 = vector.load %arg1[%c0_18, %c0_19, %c109] : memref<1x16x1400xf32, #tpu.memory_space<vmem>>, vector<1x16x1024xf32>
    %25 = vector.shape_cast %24 : vector<1x16x1024xf32> to vector<16x1024xf32>
    %26 = arith.truncf %25 : vector<16x1024xf32> to vector<16x1024xbf16>
    %c96 = arith.constant 96 : index
    %c0_20 = arith.constant 0 : index
    %27 = vector.load %arg10[%c96, %c0_20] : memref<144x1024xbf16, #tpu.memory_space<vmem>>, vector<16x1024xbf16>
    tpu.vector_store %arg10[%c96, %c0_20], %26 {strides = array<i32>} : memref<144x1024xbf16, #tpu.memory_space<vmem>>, vector<16x1024xbf16>,
    %c0_21 = arith.constant 0 : index
    %c0_22 = arith.constant 0 : index
    %c110 = arith.constant 110 : index
    %28 = vector.load %arg1[%c0_21, %c0_22, %c110] : memref<1x16x1400xf32, #tpu.memory_space<vmem>>, vector<1x16x1024xf32>
    %29 = vector.shape_cast %28 : vector<1x16x1024xf32> to vector<16x1024xf32>
    %30 = arith.truncf %29 : vector<16x1024xf32> to vector<16x1024xbf16>
    %c112 = arith.constant 112 : index
    %c0_23 = arith.constant 0 : index
    %31 = vector.load %arg10[%c112, %c0_23] : memref<144x1024xbf16, #tpu.memory_space<vmem>>, vector<16x1024xbf16>
    tpu.vector_store %arg10[%c112, %c0_23], %30 {strides = array<i32>} : memref<144x1024xbf16, #tpu.memory_space<vmem>>, vector<16x1024xbf16>,
    %c0_24 = arith.constant 0 : index
    %c0_25 = arith.constant 0 : index
    %c111 = arith.constant 111 : index
    %32 = vector.load %arg1[%c0_24, %c0_25, %c111] : memref<1x16x1400xf32, #tpu.memory_space<vmem>>, vector<1x16x1024xf32>
    %33 = vector.shape_cast %32 : vector<1x16x1024xf32> to vector<16x1024xf32>
    %34 = arith.truncf %33 : vector<16x1024xf32> to vector<16x1024xbf16>
    %c128 = arith.constant 128 : index
    %c0_26 = arith.constant 0 : index
    %35 = vector.load %arg10[%c128, %c0_26] : memref<144x1024xbf16, #tpu.memory_space<vmem>>, vector<16x1024xbf16>
    tpu.vector_store %arg10[%c128, %c0_26], %34 {strides = array<i32>} : memref<144x1024xbf16, #tpu.memory_space<vmem>>, vector<16x1024xbf16>,
    %c0_27 = arith.constant 0 : index
    %c0_28 = arith.constant 0 : index
    %c0_29 = arith.constant 0 : index
    %36 = vector.load %arg2[%c0_27, %c0_28, %c0_29] : memref<3x16x144xbf16, #tpu.memory_space<vmem>>, vector<1x16x144xbf16>
    %37 = vector.shape_cast %36 : vector<1x16x144xbf16> to vector<16x144xbf16>
    %c0_30 = arith.constant 0 : index
    %c0_31 = arith.constant 0 : index
    %38 = vector.load %arg10[%c0_30, %c0_31] : memref<144x1024xbf16, #tpu.memory_space<vmem>>, vector<144x1024xbf16>
    %cst = arith.constant dense<0.000000e+00> : vector<16x1024xf32>
    %39 = tpu.matmul %37, %38, %cst {dimension_numbers = #tpu.dot_dimension_numbers<[1], [0], [0], [1], [0, 0, 1, 1], [], []>} : vector<16x144xbf16>, vector<144x1024xbf16>, vector<16x1024xf32> -> vector<16x1024xf32>
    %c0_32 = arith.constant 0 : index
    %c0_33 = arith.constant 0 : index
    %40 = vector.load %arg12[%c0_32, %c0_33] : memref<16x1024xf32, #tpu.memory_space<vmem>>, vector<16x1024xf32>
    tpu.vector_store %arg12[%c0_32, %c0_33], %39 {strides = array<i32>} : memref<16x1024xf32, #tpu.memory_space<vmem>>, vector<16x1024xf32>,
    %c0_34 = arith.constant 0 : index
    %c0_35 = arith.constant 0 : index
    %c189 = arith.constant 189 : index
    %41 = vector.load %arg1[%c0_34, %c0_35, %c189] : memref<1x16x1400xf32, #tpu.memory_space<vmem>>, vector<1x16x1024xf32>
    %42 = vector.shape_cast %41 : vector<1x16x1024xf32> to vector<16x1024xf32>
    %43 = arith.truncf %42 : vector<16x1024xf32> to vector<16x1024xbf16>
    %c0_36 = arith.constant 0 : index
    %c0_37 = arith.constant 0 : index
    %44 = vector.load %arg10[%c0_36, %c0_37] : memref<144x1024xbf16, #tpu.memory_space<vmem>>, vector<16x1024xbf16>
    tpu.vector_store %arg10[%c0_36, %c0_37], %43 {strides = array<i32>} : memref<144x1024xbf16, #tpu.memory_space<vmem>>, vector<16x1024xbf16>,
    %c0_38 = arith.constant 0 : index
    %c0_39 = arith.constant 0 : index
    %c190 = arith.constant 190 : index
    %45 = vector.load %arg1[%c0_38, %c0_39, %c190] : memref<1x16x1400xf32, #tpu.memory_space<vmem>>, vector<1x16x1024xf32>
    %46 = vector.shape_cast %45 : vector<1x16x1024xf32> to vector<16x1024xf32>
    %47 = arith.truncf %46 : vector<16x1024xf32> to vector<16x1024xbf16>
    %c16_40 = arith.constant 16 : index
    %c0_41 = arith.constant 0 : index
    %48 = vector.load %arg10[%c16_40, %c0_41] : memref<144x1024xbf16, #tpu.memory_space<vmem>>, vector<16x1024xbf16>
    tpu.vector_store %arg10[%c16_40, %c0_41], %47 {strides = array<i32>} : memref<144x1024xbf16, #tpu.memory_space<vmem>>, vector<16x1024xbf16>,
    %c0_42 = arith.constant 0 : index
    %c0_43 = arith.constant 0 : index
    %c191 = arith.constant 191 : index
    %49 = vector.load %arg1[%c0_42, %c0_43, %c191] : memref<1x16x1400xf32, #tpu.memory_space<vmem>>, vector<1x16x1024xf32>
    %50 = vector.shape_cast %49 : vector<1x16x1024xf32> to vector<16x1024xf32>
    %51 = arith.truncf %50 : vector<16x1024xf32> to vector<16x1024xbf16>
    %c32_44 = arith.constant 32 : index
    %c0_45 = arith.constant 0 : index
    %52 = vector.load %arg10[%c32_44, %c0_45] : memref<144x1024xbf16, #tpu.memory_space<vmem>>, vector<16x1024xbf16>
    tpu.vector_store %arg10[%c32_44, %c0_45], %51 {strides = array<i32>} : memref<144x1024xbf16, #tpu.memory_space<vmem>>, vector<16x1024xbf16>,
    %c0_46 = arith.constant 0 : index
    %c0_47 = arith.constant 0 : index
    %c199 = arith.constant 199 : index
    %53 = vector.load %arg1[%c0_46, %c0_47, %c199] : memref<1x16x1400xf32, #tpu.memory_space<vmem>>, vector<1x16x1024xf32>
    %54 = vector.shape_cast %53 : vector<1x16x1024xf32> to vector<16x1024xf32>
    %55 = arith.truncf %54 : vector<16x1024xf32> to vector<16x1024xbf16>
    %c48_48 = arith.constant 48 : index
    %c0_49 = arith.constant 0 : index
    %56 = vector.load %arg10[%c48_48, %c0_49] : memref<144x1024xbf16, #tpu.memory_space<vmem>>, vector<16x1024xbf16>
    tpu.vector_store %arg10[%c48_48, %c0_49], %55 {strides = array<i32>} : memref<144x1024xbf16, #tpu.memory_space<vmem>>, vector<16x1024xbf16>,
    %c0_50 = arith.constant 0 : index
    %c0_51 = arith.constant 0 : index
    %c200 = arith.constant 200 : index
    %57 = vector.load %arg1[%c0_50, %c0_51, %c200] : memref<1x16x1400xf32, #tpu.memory_space<vmem>>, vector<1x16x1024xf32>
    %58 = vector.shape_cast %57 : vector<1x16x1024xf32> to vector<16x1024xf32>
    %59 = arith.truncf %58 : vector<16x1024xf32> to vector<16x1024xbf16>
    %c64_52 = arith.constant 64 : index
    %c0_53 = arith.constant 0 : index
    %60 = vector.load %arg10[%c64_52, %c0_53] : memref<144x1024xbf16, #tpu.memory_space<vmem>>, vector<16x1024xbf16>
    tpu.vector_store %arg10[%c64_52, %c0_53], %59 {strides = array<i32>} : memref<144x1024xbf16, #tpu.memory_space<vmem>>, vector<16x1024xbf16>,
    %c0_54 = arith.constant 0 : index
    %c0_55 = arith.constant 0 : index
    %c201 = arith.constant 201 : index
    %61 = vector.load %arg1[%c0_54, %c0_55, %c201] : memref<1x16x1400xf32, #tpu.memory_space<vmem>>, vector<1x16x1024xf32>
    %62 = vector.shape_cast %61 : vector<1x16x1024xf32> to vector<16x1024xf32>
    %63 = arith.truncf %62 : vector<16x1024xf32> to vector<16x1024xbf16>
    %c80_56 = arith.constant 80 : index
    %c0_57 = arith.constant 0 : index
    %64 = vector.load %arg10[%c80_56, %c0_57] : memref<144x1024xbf16, #tpu.memory_space<vmem>>, vector<16x1024xbf16>
    tpu.vector_store %arg10[%c80_56, %c0_57], %63 {strides = array<i32>} : memref<144x1024xbf16, #tpu.memory_space<vmem>>, vector<16x1024xbf16>,
    %c0_58 = arith.constant 0 : index
    %c0_59 = arith.constant 0 : index
    %c209 = arith.constant 209 : index
    %65 = vector.load %arg1[%c0_58, %c0_59, %c209] : memref<1x16x1400xf32, #tpu.memory_space<vmem>>, vector<1x16x1024xf32>
    %66 = vector.shape_cast %65 : vector<1x16x1024xf32> to vector<16x1024xf32>
    %67 = arith.truncf %66 : vector<16x1024xf32> to vector<16x1024xbf16>
    %c96_60 = arith.constant 96 : index
    %c0_61 = arith.constant 0 : index
    %68 = vector.load %arg10[%c96_60, %c0_61] : memref<144x1024xbf16, #tpu.memory_space<vmem>>, vector<16x1024xbf16>
    tpu.vector_store %arg10[%c96_60, %c0_61], %67 {strides = array<i32>} : memref<144x1024xbf16, #tpu.memory_space<vmem>>, vector<16x1024xbf16>,
    %c0_62 = arith.constant 0 : index
    %c0_63 = arith.constant 0 : index
    %c210 = arith.constant 210 : index
    %69 = vector.load %arg1[%c0_62, %c0_63, %c210] : memref<1x16x1400xf32, #tpu.memory_space<vmem>>, vector<1x16x1024xf32>
    %70 = vector.shape_cast %69 : vector<1x16x1024xf32> to vector<16x1024xf32>
    %71 = arith.truncf %70 : vector<16x1024xf32> to vector<16x1024xbf16>
    %c112_64 = arith.constant 112 : index
    %c0_65 = arith.constant 0 : index
    %72 = vector.load %arg10[%c112_64, %c0_65] : memref<144x1024xbf16, #tpu.memory_space<vmem>>, vector<16x1024xbf16>
    tpu.vector_store %arg10[%c112_64, %c0_65], %71 {strides = array<i32>} : memref<144x1024xbf16, #tpu.memory_space<vmem>>, vector<16x1024xbf16>,
    %c0_66 = arith.constant 0 : index
    %c0_67 = arith.constant 0 : index
    %c211 = arith.constant 211 : index
    %73 = vector.load %arg1[%c0_66, %c0_67, %c211] : memref<1x16x1400xf32, #tpu.memory_space<vmem>>, vector<1x16x1024xf32>
    %74 = vector.shape_cast %73 : vector<1x16x1024xf32> to vector<16x1024xf32>
    %75 = arith.truncf %74 : vector<16x1024xf32> to vector<16x1024xbf16>
    %c128_68 = arith.constant 128 : index
    %c0_69 = arith.constant 0 : index
    %76 = vector.load %arg10[%c128_68, %c0_69] : memref<144x1024xbf16, #tpu.memory_space<vmem>>, vector<16x1024xbf16>
    tpu.vector_store %arg10[%c128_68, %c0_69], %75 {strides = array<i32>} : memref<144x1024xbf16, #tpu.memory_space<vmem>>, vector<16x1024xbf16>,
    %c1 = arith.constant 1 : index
    %c0_70 = arith.constant 0 : index
    %c0_71 = arith.constant 0 : index
    %77 = vector.load %arg2[%c1, %c0_70, %c0_71] : memref<3x16x144xbf16, #tpu.memory_space<vmem>>, vector<1x16x144xbf16>
    %78 = vector.shape_cast %77 : vector<1x16x144xbf16> to vector<16x144xbf16>
    %c0_72 = arith.constant 0 : index
    %c0_73 = arith.constant 0 : index
    %79 = vector.load %arg10[%c0_72, %c0_73] : memref<144x1024xbf16, #tpu.memory_space<vmem>>, vector<144x1024xbf16>
    %cst_74 = arith.constant dense<0.000000e+00> : vector<16x1024xf32>
    %80 = tpu.matmul %78, %79, %cst_74 {dimension_numbers = #tpu.dot_dimension_numbers<[1], [0], [0], [1], [0, 0, 1, 1], [], []>} : vector<16x144xbf16>, vector<144x1024xbf16>, vector<16x1024xf32> -> vector<16x1024xf32>
    %c0_75 = arith.constant 0 : index
    %c0_76 = arith.constant 0 : index
    %81 = vector.load %arg12[%c0_75, %c0_76] : memref<16x1024xf32, #tpu.memory_space<vmem>>, vector<16x1024xf32>
    %82 = arith.addf %81, %80 : vector<16x1024xf32>
    %c0_77 = arith.constant 0 : index
    %c0_78 = arith.constant 0 : index
    %83 = vector.load %arg12[%c0_77, %c0_78] : memref<16x1024xf32, #tpu.memory_space<vmem>>, vector<16x1024xf32>
    tpu.vector_store %arg12[%c0_77, %c0_78], %82 {strides = array<i32>} : memref<16x1024xf32, #tpu.memory_space<vmem>>, vector<16x1024xf32>,
    %c0_79 = arith.constant 0 : index
    %c0_80 = arith.constant 0 : index
    %c289 = arith.constant 289 : index
    %84 = vector.load %arg1[%c0_79, %c0_80, %c289] : memref<1x16x1400xf32, #tpu.memory_space<vmem>>, vector<1x16x1024xf32>
    %85 = vector.shape_cast %84 : vector<1x16x1024xf32> to vector<16x1024xf32>
    %86 = arith.truncf %85 : vector<16x1024xf32> to vector<16x1024xbf16>
    %c0_81 = arith.constant 0 : index
    %c0_82 = arith.constant 0 : index
    %87 = vector.load %arg10[%c0_81, %c0_82] : memref<144x1024xbf16, #tpu.memory_space<vmem>>, vector<16x1024xbf16>
    tpu.vector_store %arg10[%c0_81, %c0_82], %86 {strides = array<i32>} : memref<144x1024xbf16, #tpu.memory_space<vmem>>, vector<16x1024xbf16>,
    %c0_83 = arith.constant 0 : index
    %c0_84 = arith.constant 0 : index
    %c290 = arith.constant 290 : index
    %88 = vector.load %arg1[%c0_83, %c0_84, %c290] : memref<1x16x1400xf32, #tpu.memory_space<vmem>>, vector<1x16x1024xf32>
    %89 = vector.shape_cast %88 : vector<1x16x1024xf32> to vector<16x1024xf32>
    %90 = arith.truncf %89 : vector<16x1024xf32> to vector<16x1024xbf16>
    %c16_85 = arith.constant 16 : index
    %c0_86 = arith.constant 0 : index
    %91 = vector.load %arg10[%c16_85, %c0_86] : memref<144x1024xbf16, #tpu.memory_space<vmem>>, vector<16x1024xbf16>
    tpu.vector_store %arg10[%c16_85, %c0_86], %90 {strides = array<i32>} : memref<144x1024xbf16, #tpu.memory_space<vmem>>, vector<16x1024xbf16>,
    %c0_87 = arith.constant 0 : index
    %c0_88 = arith.constant 0 : index
    %c291 = arith.constant 291 : index
    %92 = vector.load %arg1[%c0_87, %c0_88, %c291] : memref<1x16x1400xf32, #tpu.memory_space<vmem>>, vector<1x16x1024xf32>
    %93 = vector.shape_cast %92 : vector<1x16x1024xf32> to vector<16x1024xf32>
    %94 = arith.truncf %93 : vector<16x1024xf32> to vector<16x1024xbf16>
    %c32_89 = arith.constant 32 : index
    %c0_90 = arith.constant 0 : index
    %95 = vector.load %arg10[%c32_89, %c0_90] : memref<144x1024xbf16, #tpu.memory_space<vmem>>, vector<16x1024xbf16>
    tpu.vector_store %arg10[%c32_89, %c0_90], %94 {strides = array<i32>} : memref<144x1024xbf16, #tpu.memory_space<vmem>>, vector<16x1024xbf16>,
    %c0_91 = arith.constant 0 : index
    %c0_92 = arith.constant 0 : index
    %c299 = arith.constant 299 : index
    %96 = vector.load %arg1[%c0_91, %c0_92, %c299] : memref<1x16x1400xf32, #tpu.memory_space<vmem>>, vector<1x16x1024xf32>
    %97 = vector.shape_cast %96 : vector<1x16x1024xf32> to vector<16x1024xf32>
    %98 = arith.truncf %97 : vector<16x1024xf32> to vector<16x1024xbf16>
    %c48_93 = arith.constant 48 : index
    %c0_94 = arith.constant 0 : index
    %99 = vector.load %arg10[%c48_93, %c0_94] : memref<144x1024xbf16, #tpu.memory_space<vmem>>, vector<16x1024xbf16>
    tpu.vector_store %arg10[%c48_93, %c0_94], %98 {strides = array<i32>} : memref<144x1024xbf16, #tpu.memory_space<vmem>>, vector<16x1024xbf16>,
    %c0_95 = arith.constant 0 : index
    %c0_96 = arith.constant 0 : index
    %c300 = arith.constant 300 : index
    %100 = vector.load %arg1[%c0_95, %c0_96, %c300] : memref<1x16x1400xf32, #tpu.memory_space<vmem>>, vector<1x16x1024xf32>
    %101 = vector.shape_cast %100 : vector<1x16x1024xf32> to vector<16x1024xf32>
    %102 = arith.truncf %101 : vector<16x1024xf32> to vector<16x1024xbf16>
    %c64_97 = arith.constant 64 : index
    %c0_98 = arith.constant 0 : index
    %103 = vector.load %arg10[%c64_97, %c0_98] : memref<144x1024xbf16, #tpu.memory_space<vmem>>, vector<16x1024xbf16>
    tpu.vector_store %arg10[%c64_97, %c0_98], %102 {strides = array<i32>} : memref<144x1024xbf16, #tpu.memory_space<vmem>>, vector<16x1024xbf16>,
    %c0_99 = arith.constant 0 : index
    %c0_100 = arith.constant 0 : index
    %c301 = arith.constant 301 : index
    %104 = vector.load %arg1[%c0_99, %c0_100, %c301] : memref<1x16x1400xf32, #tpu.memory_space<vmem>>, vector<1x16x1024xf32>
    %105 = vector.shape_cast %104 : vector<1x16x1024xf32> to vector<16x1024xf32>
    %106 = arith.truncf %105 : vector<16x1024xf32> to vector<16x1024xbf16>
    %c80_101 = arith.constant 80 : index
    %c0_102 = arith.constant 0 : index
    %107 = vector.load %arg10[%c80_101, %c0_102] : memref<144x1024xbf16, #tpu.memory_space<vmem>>, vector<16x1024xbf16>
    tpu.vector_store %arg10[%c80_101, %c0_102], %106 {strides = array<i32>} : memref<144x1024xbf16, #tpu.memory_space<vmem>>, vector<16x1024xbf16>,
    %c0_103 = arith.constant 0 : index
    %c0_104 = arith.constant 0 : index
    %c309 = arith.constant 309 : index
    %108 = vector.load %arg1[%c0_103, %c0_104, %c309] : memref<1x16x1400xf32, #tpu.memory_space<vmem>>, vector<1x16x1024xf32>
    %109 = vector.shape_cast %108 : vector<1x16x1024xf32> to vector<16x1024xf32>
    %110 = arith.truncf %109 : vector<16x1024xf32> to vector<16x1024xbf16>
    %c96_105 = arith.constant 96 : index
    %c0_106 = arith.constant 0 : index
    %111 = vector.load %arg10[%c96_105, %c0_106] : memref<144x1024xbf16, #tpu.memory_space<vmem>>, vector<16x1024xbf16>
    tpu.vector_store %arg10[%c96_105, %c0_106], %110 {strides = array<i32>} : memref<144x1024xbf16, #tpu.memory_space<vmem>>, vector<16x1024xbf16>,
    %c0_107 = arith.constant 0 : index
    %c0_108 = arith.constant 0 : index
    %c310 = arith.constant 310 : index
    %112 = vector.load %arg1[%c0_107, %c0_108, %c310] : memref<1x16x1400xf32, #tpu.memory_space<vmem>>, vector<1x16x1024xf32>
    %113 = vector.shape_cast %112 : vector<1x16x1024xf32> to vector<16x1024xf32>
    %114 = arith.truncf %113 : vector<16x1024xf32> to vector<16x1024xbf16>
    %c112_109 = arith.constant 112 : index
    %c0_110 = arith.constant 0 : index
    %115 = vector.load %arg10[%c112_109, %c0_110] : memref<144x1024xbf16, #tpu.memory_space<vmem>>, vector<16x1024xbf16>
    tpu.vector_store %arg10[%c112_109, %c0_110], %114 {strides = array<i32>} : memref<144x1024xbf16, #tpu.memory_space<vmem>>, vector<16x1024xbf16>,
    %c0_111 = arith.constant 0 : index
    %c0_112 = arith.constant 0 : index
    %c311 = arith.constant 311 : index
    %116 = vector.load %arg1[%c0_111, %c0_112, %c311] : memref<1x16x1400xf32, #tpu.memory_space<vmem>>, vector<1x16x1024xf32>
    %117 = vector.shape_cast %116 : vector<1x16x1024xf32> to vector<16x1024xf32>
    %118 = arith.truncf %117 : vector<16x1024xf32> to vector<16x1024xbf16>
    %c128_113 = arith.constant 128 : index
    %c0_114 = arith.constant 0 : index
    %119 = vector.load %arg10[%c128_113, %c0_114] : memref<144x1024xbf16, #tpu.memory_space<vmem>>, vector<16x1024xbf16>
    tpu.vector_store %arg10[%c128_113, %c0_114], %118 {strides = array<i32>} : memref<144x1024xbf16, #tpu.memory_space<vmem>>, vector<16x1024xbf16>,
    %c2 = arith.constant 2 : index
    %c0_115 = arith.constant 0 : index
    %c0_116 = arith.constant 0 : index
    %120 = vector.load %arg2[%c2, %c0_115, %c0_116] : memref<3x16x144xbf16, #tpu.memory_space<vmem>>, vector<1x16x144xbf16>
    %121 = vector.shape_cast %120 : vector<1x16x144xbf16> to vector<16x144xbf16>
    %c0_117 = arith.constant 0 : index
    %c0_118 = arith.constant 0 : index
    %122 = vector.load %arg10[%c0_117, %c0_118] : memref<144x1024xbf16, #tpu.memory_space<vmem>>, vector<144x1024xbf16>
    %cst_119 = arith.constant dense<0.000000e+00> : vector<16x1024xf32>
    %123 = tpu.matmul %121, %122, %cst_119 {dimension_numbers = #tpu.dot_dimension_numbers<[1], [0], [0], [1], [0, 0, 1, 1], [], []>} : vector<16x144xbf16>, vector<144x1024xbf16>, vector<16x1024xf32> -> vector<16x1024xf32>
    %c0_120 = arith.constant 0 : index
    %c0_121 = arith.constant 0 : index
    %124 = vector.load %arg12[%c0_120, %c0_121] : memref<16x1024xf32, #tpu.memory_space<vmem>>, vector<16x1024xf32>
    %125 = arith.addf %124, %123 : vector<16x1024xf32>
    %c0_122 = arith.constant 0 : index
    %c0_123 = arith.constant 0 : index
    %126 = vector.load %arg12[%c0_122, %c0_123] : memref<16x1024xf32, #tpu.memory_space<vmem>>, vector<16x1024xf32>
    tpu.vector_store %arg12[%c0_122, %c0_123], %125 {strides = array<i32>} : memref<16x1024xf32, #tpu.memory_space<vmem>>, vector<16x1024xf32>,
    %c0_124 = arith.constant 0 : index
    %c0_125 = arith.constant 0 : index
    %127 = vector.load %arg12[%c0_124, %c0_125] : memref<16x1024xf32, #tpu.memory_space<vmem>>, vector<16x1024xf32>
    %c0_126 = arith.constant 0 : index
    %c0_127 = arith.constant 0 : index
    %128 = vector.load %arg3[%c0_126, %c0_127] : memref<16x1xf32, #tpu.memory_space<vmem>>, vector<16x1xf32>
    %129 = vector.broadcast %128 : vector<16x1xf32> to vector<16x1024xf32>
    %130 = arith.mulf %127, %129 : vector<16x1024xf32>
    %c0_128 = arith.constant 0 : index
    %c0_129 = arith.constant 0 : index
    %131 = vector.load %arg4[%c0_128, %c0_129] : memref<16x1xf32, #tpu.memory_space<vmem>>, vector<16x1xf32>
    %132 = vector.broadcast %131 : vector<16x1xf32> to vector<16x1024xf32>
    %133 = arith.addf %130, %132 : vector<16x1024xf32>
    %cst_130 = arith.constant 0.000000e+00 : f32
    %134 = vector.broadcast %cst_130 : f32 to vector<16x1024xf32>
    %135 = arith.maximumf %133, %134 : vector<16x1024xf32>
    %c0_131 = arith.constant 0 : index
    %c0_132 = arith.constant 0 : index
    %136 = vector.load %arg8[%c0_131, %c0_132] : memref<1x1024xf32, #tpu.memory_space<vmem>>, vector<1x1024xf32>
    %137 = vector.broadcast %136 : vector<1x1024xf32> to vector<16x1024xf32>
    %138 = arith.mulf %135, %137 : vector<16x1024xf32>
    %cst_133 = arith.constant 0.000000e+00 : bf16
    %139 = vector.broadcast %cst_133 : bf16 to vector<16x128xbf16>
    %c0_134 = arith.constant 0 : index
    %c0_135 = arith.constant 0 : index
    %140 = vector.load %arg11[%c0_134, %c0_135] : memref<16x1280xbf16, #tpu.memory_space<vmem>>, vector<16x128xbf16>
    tpu.vector_store %arg11[%c0_134, %c0_135], %139 {strides = array<i32>} : memref<16x1280xbf16, #tpu.memory_space<vmem>>, vector<16x128xbf16>,
    %cst_136 = arith.constant 0.000000e+00 : bf16
    %141 = vector.broadcast %cst_136 : bf16 to vector<16x128xbf16>
    %c0_137 = arith.constant 0 : index
    %c1152 = arith.constant 1152 : index
    %142 = vector.load %arg11[%c0_137, %c1152] : memref<16x1280xbf16, #tpu.memory_space<vmem>>, vector<16x128xbf16>
    tpu.vector_store %arg11[%c0_137, %c1152], %141 {strides = array<i32>} : memref<16x1280xbf16, #tpu.memory_space<vmem>>, vector<16x128xbf16>,
    %143 = arith.truncf %138 : vector<16x1024xf32> to vector<16x1024xbf16>
    %c0_138 = arith.constant 0 : index
    %c128_139 = arith.constant 128 : index
    %144 = vector.load %arg11[%c0_138, %c128_139] : memref<16x1280xbf16, #tpu.memory_space<vmem>>, vector<16x1024xbf16>
    tpu.vector_store %arg11[%c0_138, %c128_139], %143 {strides = array<i32>} : memref<16x1280xbf16, #tpu.memory_space<vmem>>, vector<16x1024xbf16>,
    %c0_140 = arith.constant 0 : index
    %c17 = arith.constant 17 : index
    %145 = vector.load %arg11[%c0_140, %c17] : memref<16x1280xbf16, #tpu.memory_space<vmem>>, vector<16x1024xbf16>
    %c0_141 = arith.constant 0 : index
    %c0_142 = arith.constant 0 : index
    %146 = vector.load %arg10[%c0_141, %c0_142] : memref<144x1024xbf16, #tpu.memory_space<vmem>>, vector<16x1024xbf16>
    tpu.vector_store %arg10[%c0_141, %c0_142], %145 {strides = array<i32>} : memref<144x1024xbf16, #tpu.memory_space<vmem>>, vector<16x1024xbf16>,
    %c0_143 = arith.constant 0 : index
    %c18 = arith.constant 18 : index
    %147 = vector.load %arg11[%c0_143, %c18] : memref<16x1280xbf16, #tpu.memory_space<vmem>>, vector<16x1024xbf16>
    %c16_144 = arith.constant 16 : index
    %c0_145 = arith.constant 0 : index
    %148 = vector.load %arg10[%c16_144, %c0_145] : memref<144x1024xbf16, #tpu.memory_space<vmem>>, vector<16x1024xbf16>
    tpu.vector_store %arg10[%c16_144, %c0_145], %147 {strides = array<i32>} : memref<144x1024xbf16, #tpu.memory_space<vmem>>, vector<16x1024xbf16>,
    %c0_146 = arith.constant 0 : index
    %c19 = arith.constant 19 : index
    %149 = vector.load %arg11[%c0_146, %c19] : memref<16x1280xbf16, #tpu.memory_space<vmem>>, vector<16x1024xbf16>
    %c32_147 = arith.constant 32 : index
    %c0_148 = arith.constant 0 : index
    %150 = vector.load %arg10[%c32_147, %c0_148] : memref<144x1024xbf16, #tpu.memory_space<vmem>>, vector<16x1024xbf16>
    tpu.vector_store %arg10[%c32_147, %c0_148], %149 {strides = array<i32>} : memref<144x1024xbf16, #tpu.memory_space<vmem>>, vector<16x1024xbf16>,
    %c0_149 = arith.constant 0 : index
    %c27 = arith.constant 27 : index
    %151 = vector.load %arg11[%c0_149, %c27] : memref<16x1280xbf16, #tpu.memory_space<vmem>>, vector<16x1024xbf16>
    %c48_150 = arith.constant 48 : index
    %c0_151 = arith.constant 0 : index
    %152 = vector.load %arg10[%c48_150, %c0_151] : memref<144x1024xbf16, #tpu.memory_space<vmem>>, vector<16x1024xbf16>
    tpu.vector_store %arg10[%c48_150, %c0_151], %151 {strides = array<i32>} : memref<144x1024xbf16, #tpu.memory_space<vmem>>, vector<16x1024xbf16>,
    %c0_152 = arith.constant 0 : index
    %c28 = arith.constant 28 : index
    %153 = vector.load %arg11[%c0_152, %c28] : memref<16x1280xbf16, #tpu.memory_space<vmem>>, vector<16x1024xbf16>
    %c64_153 = arith.constant 64 : index
    %c0_154 = arith.constant 0 : index
    %154 = vector.load %arg10[%c64_153, %c0_154] : memref<144x1024xbf16, #tpu.memory_space<vmem>>, vector<16x1024xbf16>
    tpu.vector_store %arg10[%c64_153, %c0_154], %153 {strides = array<i32>} : memref<144x1024xbf16, #tpu.memory_space<vmem>>, vector<16x1024xbf16>,
    %c0_155 = arith.constant 0 : index
    %c29 = arith.constant 29 : index
    %155 = vector.load %arg11[%c0_155, %c29] : memref<16x1280xbf16, #tpu.memory_space<vmem>>, vector<16x1024xbf16>
    %c80_156 = arith.constant 80 : index
    %c0_157 = arith.constant 0 : index
    %156 = vector.load %arg10[%c80_156, %c0_157] : memref<144x1024xbf16, #tpu.memory_space<vmem>>, vector<16x1024xbf16>
    tpu.vector_store %arg10[%c80_156, %c0_157], %155 {strides = array<i32>} : memref<144x1024xbf16, #tpu.memory_space<vmem>>, vector<16x1024xbf16>,
    %c0_158 = arith.constant 0 : index
    %c37 = arith.constant 37 : index
    %157 = vector.load %arg11[%c0_158, %c37] : memref<16x1280xbf16, #tpu.memory_space<vmem>>, vector<16x1024xbf16>
    %c96_159 = arith.constant 96 : index
    %c0_160 = arith.constant 0 : index
    %158 = vector.load %arg10[%c96_159, %c0_160] : memref<144x1024xbf16, #tpu.memory_space<vmem>>, vector<16x1024xbf16>
    tpu.vector_store %arg10[%c96_159, %c0_160], %157 {strides = array<i32>} : memref<144x1024xbf16, #tpu.memory_space<vmem>>, vector<16x1024xbf16>,
    %c0_161 = arith.constant 0 : index
    %c38 = arith.constant 38 : index
    %159 = vector.load %arg11[%c0_161, %c38] : memref<16x1280xbf16, #tpu.memory_space<vmem>>, vector<16x1024xbf16>
    %c112_162 = arith.constant 112 : index
    %c0_163 = arith.constant 0 : index
    %160 = vector.load %arg10[%c112_162, %c0_163] : memref<144x1024xbf16, #tpu.memory_space<vmem>>, vector<16x1024xbf16>
    tpu.vector_store %arg10[%c112_162, %c0_163], %159 {strides = array<i32>} : memref<144x1024xbf16, #tpu.memory_space<vmem>>, vector<16x1024xbf16>,
    %c0_164 = arith.constant 0 : index
    %c39 = arith.constant 39 : index
    %161 = vector.load %arg11[%c0_164, %c39] : memref<16x1280xbf16, #tpu.memory_space<vmem>>, vector<16x1024xbf16>
    %c128_165 = arith.constant 128 : index
    %c0_166 = arith.constant 0 : index
    %162 = vector.load %arg10[%c128_165, %c0_166] : memref<144x1024xbf16, #tpu.memory_space<vmem>>, vector<16x1024xbf16>
    tpu.vector_store %arg10[%c128_165, %c0_166], %161 {strides = array<i32>} : memref<144x1024xbf16, #tpu.memory_space<vmem>>, vector<16x1024xbf16>,
    %c0_167 = arith.constant 0 : index
    %c0_168 = arith.constant 0 : index
    %c0_169 = arith.constant 0 : index
    %163 = vector.load %arg5[%c0_167, %c0_168, %c0_169] : memref<3x16x144xbf16, #tpu.memory_space<vmem>>, vector<1x16x144xbf16>
    %164 = vector.shape_cast %163 : vector<1x16x144xbf16> to vector<16x144xbf16>
    %c0_170 = arith.constant 0 : index
    %c0_171 = arith.constant 0 : index
    %165 = vector.load %arg10[%c0_170, %c0_171] : memref<144x1024xbf16, #tpu.memory_space<vmem>>, vector<144x1024xbf16>
    %cst_172 = arith.constant dense<0.000000e+00> : vector<16x1024xf32>
    %166 = tpu.matmul %164, %165, %cst_172 {dimension_numbers = #tpu.dot_dimension_numbers<[1], [0], [0], [1], [0, 0, 1, 1], [], []>} : vector<16x144xbf16>, vector<144x1024xbf16>, vector<16x1024xf32> -> vector<16x1024xf32>
    %c0_173 = arith.constant 0 : index
    %c0_174 = arith.constant 0 : index
    %167 = vector.load %arg12[%c0_173, %c0_174] : memref<16x1024xf32, #tpu.memory_space<vmem>>, vector<16x1024xf32>
    tpu.vector_store %arg12[%c0_173, %c0_174], %166 {strides = array<i32>} : memref<16x1024xf32, #tpu.memory_space<vmem>>, vector<16x1024xf32>,
    %c0_175 = arith.constant 0 : index
    %c117 = arith.constant 117 : index
    %168 = vector.load %arg11[%c0_175, %c117] : memref<16x1280xbf16, #tpu.memory_space<vmem>>, vector<16x1024xbf16>
    %c0_176 = arith.constant 0 : index
    %c0_177 = arith.constant 0 : index
    %169 = vector.load %arg10[%c0_176, %c0_177] : memref<144x1024xbf16, #tpu.memory_space<vmem>>, vector<16x1024xbf16>
    tpu.vector_store %arg10[%c0_176, %c0_177], %168 {strides = array<i32>} : memref<144x1024xbf16, #tpu.memory_space<vmem>>, vector<16x1024xbf16>,
    %c0_178 = arith.constant 0 : index
    %c118 = arith.constant 118 : index
    %170 = vector.load %arg11[%c0_178, %c118] : memref<16x1280xbf16, #tpu.memory_space<vmem>>, vector<16x1024xbf16>
    %c16_179 = arith.constant 16 : index
    %c0_180 = arith.constant 0 : index
    %171 = vector.load %arg10[%c16_179, %c0_180] : memref<144x1024xbf16, #tpu.memory_space<vmem>>, vector<16x1024xbf16>
    tpu.vector_store %arg10[%c16_179, %c0_180], %170 {strides = array<i32>} : memref<144x1024xbf16, #tpu.memory_space<vmem>>, vector<16x1024xbf16>,
    %c0_181 = arith.constant 0 : index
    %c119 = arith.constant 119 : index
    %172 = vector.load %arg11[%c0_181, %c119] : memref<16x1280xbf16, #tpu.memory_space<vmem>>, vector<16x1024xbf16>
    %c32_182 = arith.constant 32 : index
    %c0_183 = arith.constant 0 : index
    %173 = vector.load %arg10[%c32_182, %c0_183] : memref<144x1024xbf16, #tpu.memory_space<vmem>>, vector<16x1024xbf16>
    tpu.vector_store %arg10[%c32_182, %c0_183], %172 {strides = array<i32>} : memref<144x1024xbf16, #tpu.memory_space<vmem>>, vector<16x1024xbf16>,
    %c0_184 = arith.constant 0 : index
    %c127 = arith.constant 127 : index
    %174 = vector.load %arg11[%c0_184, %c127] : memref<16x1280xbf16, #tpu.memory_space<vmem>>, vector<16x1024xbf16>
    %c48_185 = arith.constant 48 : index
    %c0_186 = arith.constant 0 : index
    %175 = vector.load %arg10[%c48_185, %c0_186] : memref<144x1024xbf16, #tpu.memory_space<vmem>>, vector<16x1024xbf16>
    tpu.vector_store %arg10[%c48_185, %c0_186], %174 {strides = array<i32>} : memref<144x1024xbf16, #tpu.memory_space<vmem>>, vector<16x1024xbf16>,
    %c0_187 = arith.constant 0 : index
    %c128_188 = arith.constant 128 : index
    %176 = vector.load %arg11[%c0_187, %c128_188] : memref<16x1280xbf16, #tpu.memory_space<vmem>>, vector<16x1024xbf16>
    %c64_189 = arith.constant 64 : index
    %c0_190 = arith.constant 0 : index
    %177 = vector.load %arg10[%c64_189, %c0_190] : memref<144x1024xbf16, #tpu.memory_space<vmem>>, vector<16x1024xbf16>
    tpu.vector_store %arg10[%c64_189, %c0_190], %176 {strides = array<i32>} : memref<144x1024xbf16, #tpu.memory_space<vmem>>, vector<16x1024xbf16>,
    %c0_191 = arith.constant 0 : index
    %c129 = arith.constant 129 : index
    %178 = vector.load %arg11[%c0_191, %c129] : memref<16x1280xbf16, #tpu.memory_space<vmem>>, vector<16x1024xbf16>
    %c80_192 = arith.constant 80 : index
    %c0_193 = arith.constant 0 : index
    %179 = vector.load %arg10[%c80_192, %c0_193] : memref<144x1024xbf16, #tpu.memory_space<vmem>>, vector<16x1024xbf16>
    tpu.vector_store %arg10[%c80_192, %c0_193], %178 {strides = array<i32>} : memref<144x1024xbf16, #tpu.memory_space<vmem>>, vector<16x1024xbf16>,
    %c0_194 = arith.constant 0 : index
    %c137 = arith.constant 137 : index
    %180 = vector.load %arg11[%c0_194, %c137] : memref<16x1280xbf16, #tpu.memory_space<vmem>>, vector<16x1024xbf16>
    %c96_195 = arith.constant 96 : index
    %c0_196 = arith.constant 0 : index
    %181 = vector.load %arg10[%c96_195, %c0_196] : memref<144x1024xbf16, #tpu.memory_space<vmem>>, vector<16x1024xbf16>
    tpu.vector_store %arg10[%c96_195, %c0_196], %180 {strides = array<i32>} : memref<144x1024xbf16, #tpu.memory_space<vmem>>, vector<16x1024xbf16>,
    %c0_197 = arith.constant 0 : index
    %c138 = arith.constant 138 : index
    %182 = vector.load %arg11[%c0_197, %c138] : memref<16x1280xbf16, #tpu.memory_space<vmem>>, vector<16x1024xbf16>
    %c112_198 = arith.constant 112 : index
    %c0_199 = arith.constant 0 : index
    %183 = vector.load %arg10[%c112_198, %c0_199] : memref<144x1024xbf16, #tpu.memory_space<vmem>>, vector<16x1024xbf16>
    tpu.vector_store %arg10[%c112_198, %c0_199], %182 {strides = array<i32>} : memref<144x1024xbf16, #tpu.memory_space<vmem>>, vector<16x1024xbf16>,
    %c0_200 = arith.constant 0 : index
    %c139 = arith.constant 139 : index
    %184 = vector.load %arg11[%c0_200, %c139] : memref<16x1280xbf16, #tpu.memory_space<vmem>>, vector<16x1024xbf16>
    %c128_201 = arith.constant 128 : index
    %c0_202 = arith.constant 0 : index
    %185 = vector.load %arg10[%c128_201, %c0_202] : memref<144x1024xbf16, #tpu.memory_space<vmem>>, vector<16x1024xbf16>
    tpu.vector_store %arg10[%c128_201, %c0_202], %184 {strides = array<i32>} : memref<144x1024xbf16, #tpu.memory_space<vmem>>, vector<16x1024xbf16>,
    %c1_203 = arith.constant 1 : index
    %c0_204 = arith.constant 0 : index
    %c0_205 = arith.constant 0 : index
    %186 = vector.load %arg5[%c1_203, %c0_204, %c0_205] : memref<3x16x144xbf16, #tpu.memory_space<vmem>>, vector<1x16x144xbf16>
    %187 = vector.shape_cast %186 : vector<1x16x144xbf16> to vector<16x144xbf16>
    %c0_206 = arith.constant 0 : index
    %c0_207 = arith.constant 0 : index
    %188 = vector.load %arg10[%c0_206, %c0_207] : memref<144x1024xbf16, #tpu.memory_space<vmem>>, vector<144x1024xbf16>
    %cst_208 = arith.constant dense<0.000000e+00> : vector<16x1024xf32>
    %189 = tpu.matmul %187, %188, %cst_208 {dimension_numbers = #tpu.dot_dimension_numbers<[1], [0], [0], [1], [0, 0, 1, 1], [], []>} : vector<16x144xbf16>, vector<144x1024xbf16>, vector<16x1024xf32> -> vector<16x1024xf32>
    %c0_209 = arith.constant 0 : index
    %c0_210 = arith.constant 0 : index
    %190 = vector.load %arg12[%c0_209, %c0_210] : memref<16x1024xf32, #tpu.memory_space<vmem>>, vector<16x1024xf32>
    %191 = arith.addf %190, %189 : vector<16x1024xf32>
    %c0_211 = arith.constant 0 : index
    %c0_212 = arith.constant 0 : index
    %192 = vector.load %arg12[%c0_211, %c0_212] : memref<16x1024xf32, #tpu.memory_space<vmem>>, vector<16x1024xf32>
    tpu.vector_store %arg12[%c0_211, %c0_212], %191 {strides = array<i32>} : memref<16x1024xf32, #tpu.memory_space<vmem>>, vector<16x1024xf32>,
    %c0_213 = arith.constant 0 : index
    %c217 = arith.constant 217 : index
    %193 = vector.load %arg11[%c0_213, %c217] : memref<16x1280xbf16, #tpu.memory_space<vmem>>, vector<16x1024xbf16>
    %c0_214 = arith.constant 0 : index
    %c0_215 = arith.constant 0 : index
    %194 = vector.load %arg10[%c0_214, %c0_215] : memref<144x1024xbf16, #tpu.memory_space<vmem>>, vector<16x1024xbf16>
    tpu.vector_store %arg10[%c0_214, %c0_215], %193 {strides = array<i32>} : memref<144x1024xbf16, #tpu.memory_space<vmem>>, vector<16x1024xbf16>,
    %c0_216 = arith.constant 0 : index
    %c218 = arith.constant 218 : index
    %195 = vector.load %arg11[%c0_216, %c218] : memref<16x1280xbf16, #tpu.memory_space<vmem>>, vector<16x1024xbf16>
    %c16_217 = arith.constant 16 : index
    %c0_218 = arith.constant 0 : index
    %196 = vector.load %arg10[%c16_217, %c0_218] : memref<144x1024xbf16, #tpu.memory_space<vmem>>, vector<16x1024xbf16>
    tpu.vector_store %arg10[%c16_217, %c0_218], %195 {strides = array<i32>} : memref<144x1024xbf16, #tpu.memory_space<vmem>>, vector<16x1024xbf16>,
    %c0_219 = arith.constant 0 : index
    %c219 = arith.constant 219 : index
    %197 = vector.load %arg11[%c0_219, %c219] : memref<16x1280xbf16, #tpu.memory_space<vmem>>, vector<16x1024xbf16>
    %c32_220 = arith.constant 32 : index
    %c0_221 = arith.constant 0 : index
    %198 = vector.load %arg10[%c32_220, %c0_221] : memref<144x1024xbf16, #tpu.memory_space<vmem>>, vector<16x1024xbf16>
    tpu.vector_store %arg10[%c32_220, %c0_221], %197 {strides = array<i32>} : memref<144x1024xbf16, #tpu.memory_space<vmem>>, vector<16x1024xbf16>,
    %c0_222 = arith.constant 0 : index
    %c227 = arith.constant 227 : index
    %199 = vector.load %arg11[%c0_222, %c227] : memref<16x1280xbf16, #tpu.memory_space<vmem>>, vector<16x1024xbf16>
    %c48_223 = arith.constant 48 : index
    %c0_224 = arith.constant 0 : index
    %200 = vector.load %arg10[%c48_223, %c0_224] : memref<144x1024xbf16, #tpu.memory_space<vmem>>, vector<16x1024xbf16>
    tpu.vector_store %arg10[%c48_223, %c0_224], %199 {strides = array<i32>} : memref<144x1024xbf16, #tpu.memory_space<vmem>>, vector<16x1024xbf16>,
    %c0_225 = arith.constant 0 : index
    %c228 = arith.constant 228 : index
    %201 = vector.load %arg11[%c0_225, %c228] : memref<16x1280xbf16, #tpu.memory_space<vmem>>, vector<16x1024xbf16>
    %c64_226 = arith.constant 64 : index
    %c0_227 = arith.constant 0 : index
    %202 = vector.load %arg10[%c64_226, %c0_227] : memref<144x1024xbf16, #tpu.memory_space<vmem>>, vector<16x1024xbf16>
    tpu.vector_store %arg10[%c64_226, %c0_227], %201 {strides = array<i32>} : memref<144x1024xbf16, #tpu.memory_space<vmem>>, vector<16x1024xbf16>,
    %c0_228 = arith.constant 0 : index
    %c229 = arith.constant 229 : index
    %203 = vector.load %arg11[%c0_228, %c229] : memref<16x1280xbf16, #tpu.memory_space<vmem>>, vector<16x1024xbf16>
    %c80_229 = arith.constant 80 : index
    %c0_230 = arith.constant 0 : index
    %204 = vector.load %arg10[%c80_229, %c0_230] : memref<144x1024xbf16, #tpu.memory_space<vmem>>, vector<16x1024xbf16>
    tpu.vector_store %arg10[%c80_229, %c0_230], %203 {strides = array<i32>} : memref<144x1024xbf16, #tpu.memory_space<vmem>>, vector<16x1024xbf16>,
    %c0_231 = arith.constant 0 : index
    %c237 = arith.constant 237 : index
    %205 = vector.load %arg11[%c0_231, %c237] : memref<16x1280xbf16, #tpu.memory_space<vmem>>, vector<16x1024xbf16>
    %c96_232 = arith.constant 96 : index
    %c0_233 = arith.constant 0 : index
    %206 = vector.load %arg10[%c96_232, %c0_233] : memref<144x1024xbf16, #tpu.memory_space<vmem>>, vector<16x1024xbf16>
    tpu.vector_store %arg10[%c96_232, %c0_233], %205 {strides = array<i32>} : memref<144x1024xbf16, #tpu.memory_space<vmem>>, vector<16x1024xbf16>,
    %c0_234 = arith.constant 0 : index
    %c238 = arith.constant 238 : index
    %207 = vector.load %arg11[%c0_234, %c238] : memref<16x1280xbf16, #tpu.memory_space<vmem>>, vector<16x1024xbf16>
    %c112_235 = arith.constant 112 : index
    %c0_236 = arith.constant 0 : index
    %208 = vector.load %arg10[%c112_235, %c0_236] : memref<144x1024xbf16, #tpu.memory_space<vmem>>, vector<16x1024xbf16>
    tpu.vector_store %arg10[%c112_235, %c0_236], %207 {strides = array<i32>} : memref<144x1024xbf16, #tpu.memory_space<vmem>>, vector<16x1024xbf16>,
    %c0_237 = arith.constant 0 : index
    %c239 = arith.constant 239 : index
    %209 = vector.load %arg11[%c0_237, %c239] : memref<16x1280xbf16, #tpu.memory_space<vmem>>, vector<16x1024xbf16>
    %c128_238 = arith.constant 128 : index
    %c0_239 = arith.constant 0 : index
    %210 = vector.load %arg10[%c128_238, %c0_239] : memref<144x1024xbf16, #tpu.memory_space<vmem>>, vector<16x1024xbf16>
    tpu.vector_store %arg10[%c128_238, %c0_239], %209 {strides = array<i32>} : memref<144x1024xbf16, #tpu.memory_space<vmem>>, vector<16x1024xbf16>,
    %c2_240 = arith.constant 2 : index
    %c0_241 = arith.constant 0 : index
    %c0_242 = arith.constant 0 : index
    %211 = vector.load %arg5[%c2_240, %c0_241, %c0_242] : memref<3x16x144xbf16, #tpu.memory_space<vmem>>, vector<1x16x144xbf16>
    %212 = vector.shape_cast %211 : vector<1x16x144xbf16> to vector<16x144xbf16>
    %c0_243 = arith.constant 0 : index
    %c0_244 = arith.constant 0 : index
    %213 = vector.load %arg10[%c0_243, %c0_244] : memref<144x1024xbf16, #tpu.memory_space<vmem>>, vector<144x1024xbf16>
    %cst_245 = arith.constant dense<0.000000e+00> : vector<16x1024xf32>
    %214 = tpu.matmul %212, %213, %cst_245 {dimension_numbers = #tpu.dot_dimension_numbers<[1], [0], [0], [1], [0, 0, 1, 1], [], []>} : vector<16x144xbf16>, vector<144x1024xbf16>, vector<16x1024xf32> -> vector<16x1024xf32>
    %c0_246 = arith.constant 0 : index
    %c0_247 = arith.constant 0 : index
    %215 = vector.load %arg12[%c0_246, %c0_247] : memref<16x1024xf32, #tpu.memory_space<vmem>>, vector<16x1024xf32>
    %216 = arith.addf %215, %214 : vector<16x1024xf32>
    %c0_248 = arith.constant 0 : index
    %c0_249 = arith.constant 0 : index
    %217 = vector.load %arg12[%c0_248, %c0_249] : memref<16x1024xf32, #tpu.memory_space<vmem>>, vector<16x1024xf32>
    tpu.vector_store %arg12[%c0_248, %c0_249], %216 {strides = array<i32>} : memref<16x1024xf32, #tpu.memory_space<vmem>>, vector<16x1024xf32>,
    %c0_250 = arith.constant 0 : index
    %c0_251 = arith.constant 0 : index
    %c200_252 = arith.constant 200 : index
    %218 = vector.load %arg1[%c0_250, %c0_251, %c200_252] : memref<1x16x1400xf32, #tpu.memory_space<vmem>>, vector<1x16x1024xf32>
    %219 = vector.shape_cast %218 : vector<1x16x1024xf32> to vector<16x1024xf32>
    %c0_253 = arith.constant 0 : index
    %c0_254 = arith.constant 0 : index
    %220 = vector.load %arg12[%c0_253, %c0_254] : memref<16x1024xf32, #tpu.memory_space<vmem>>, vector<16x1024xf32>
    %c0_255 = arith.constant 0 : index
    %c0_256 = arith.constant 0 : index
    %221 = vector.load %arg6[%c0_255, %c0_256] : memref<16x1xf32, #tpu.memory_space<vmem>>, vector<16x1xf32>
    %222 = vector.broadcast %221 : vector<16x1xf32> to vector<16x1024xf32>
    %223 = arith.mulf %220, %222 : vector<16x1024xf32>
    %c0_257 = arith.constant 0 : index
    %c0_258 = arith.constant 0 : index
    %224 = vector.load %arg7[%c0_257, %c0_258] : memref<16x1xf32, #tpu.memory_space<vmem>>, vector<16x1xf32>
    %225 = vector.broadcast %224 : vector<16x1xf32> to vector<16x1024xf32>
    %226 = arith.addf %223, %225 : vector<16x1024xf32>
    %227 = arith.addf %226, %219 : vector<16x1024xf32>
    %cst_259 = arith.constant 0.000000e+00 : f32
    %228 = vector.broadcast %cst_259 : f32 to vector<16x1024xf32>
    %229 = arith.maximumf %227, %228 : vector<16x1024xf32>
    %c0_260 = arith.constant 0 : index
    %c0_261 = arith.constant 0 : index
    %c0_262 = arith.constant 0 : index
    %230 = vector.load %arg9[%c0_260, %c0_261, %c0_262] : memref<1x16x1024xf32, #tpu.memory_space<vmem>>, vector<1x16x1024xf32>
    %231 = vector.shape_cast %230 : vector<1x16x1024xf32> to vector<16x1024xf32>
    %232 = vector.shape_cast %229 : vector<16x1024xf32> to vector<1x16x1024xf32>
    tpu.vector_store %arg9[%c0_260, %c0_261, %c0_262], %232 {strides = array<i32>} : memref<1x16x1024xf32, #tpu.memory_space<vmem>>, vector<1x16x1024xf32>,
    return
  }
  func.func @transform_0(%arg0: i32) -> (i32, i32, i32) {
    %c0_i32 = arith.constant 0 : i32
    %c0_i32_0 = arith.constant 0 : i32
    %c0_i32_1 = arith.constant 0 : i32
    return %arg0, %c0_i32, %c0_i32_0 : i32, i32, i32
  }
  func.func @transform_1(%arg0: i32) -> (i32, i32, i32) {
    %c0_i32 = arith.constant 0 : i32
    %c0_i32_0 = arith.constant 0 : i32
    %c0_i32_1 = arith.constant 0 : i32
    %c0_i32_2 = arith.constant 0 : i32
    return %c0_i32, %c0_i32_0, %c0_i32_1 : i32, i32, i32
  }
  func.func @transform_2(%arg0: i32) -> (i32, i32) {
    %c0_i32 = arith.constant 0 : i32
    %c0_i32_0 = arith.constant 0 : i32
    %c0_i32_1 = arith.constant 0 : i32
    return %c0_i32, %c0_i32_0 : i32, i32
  }
  func.func @transform_3(%arg0: i32) -> (i32, i32) {
    %c0_i32 = arith.constant 0 : i32
    %c0_i32_0 = arith.constant 0 : i32
    %c0_i32_1 = arith.constant 0 : i32
    return %c0_i32, %c0_i32_0 : i32, i32
  }
  func.func @transform_4(%arg0: i32) -> (i32, i32, i32) {
    %c0_i32 = arith.constant 0 : i32
    %c0_i32_0 = arith.constant 0 : i32
    %c0_i32_1 = arith.constant 0 : i32
    %c0_i32_2 = arith.constant 0 : i32
    return %c0_i32, %c0_i32_0, %c0_i32_1 : i32, i32, i32
  }
  func.func @transform_5(%arg0: i32) -> (i32, i32) {
    %c0_i32 = arith.constant 0 : i32
    %c0_i32_0 = arith.constant 0 : i32
    %c0_i32_1 = arith.constant 0 : i32
    return %c0_i32, %c0_i32_0 : i32, i32
  }
  func.func @transform_6(%arg0: i32) -> (i32, i32) {
    %c0_i32 = arith.constant 0 : i32
    %c0_i32_0 = arith.constant 0 : i32
    %c0_i32_1 = arith.constant 0 : i32
    return %c0_i32, %c0_i32_0 : i32, i32
  }
  func.func @transform_7(%arg0: i32) -> (i32, i32) {
    %c0_i32 = arith.constant 0 : i32
    %c0_i32_0 = arith.constant 0 : i32
    %c0_i32_1 = arith.constant 0 : i32
    return %c0_i32, %c0_i32_0 : i32, i32
  }
  func.func @transform_8(%arg0: i32) -> (i32, i32, i32) {
    %c0_i32 = arith.constant 0 : i32
    %c0_i32_0 = arith.constant 0 : i32
    %c0_i32_1 = arith.constant 0 : i32
    return %arg0, %c0_i32, %c0_i32_0 : i32, i32, i32
  }
}

</mosaic_0001>

<bundles_post_ra>
// kernel: tpu_custom_call.1
= control target key start
LH: loop header
LB: loop body
LE: loop exit
PB: predicated region body
PF: predicated region fallthrough
CT: control target
= control target key end

     0   :  { %s16436_s0 = inlined_call_operand.hbm [shape: f32[2,16,1400], index: 0, kind: input, shape index: {}]   ;;  %s16437_s1 = inlined_call_operand.vmem [shape: bf16[3,16,144], index: 1, kind: input, shape index: {}]   ;;  %s16438_s2 = inlined_call_operand.vmem [shape: f32[16,1], index: 2, kind: input, shape index: {}]   ;;  %s16439_s3 = inlined_call_operand.vmem [shape: f32[16,1], index: 3, kind: input, shape index: {}]   ;;  %s16440_s4 = inlined_call_operand.hbm [shape: bf16[3,16,144], index: 4, kind: input, shape index: {}]   ;;  %s16441_s5 = inlined_call_operand.vmem [shape: f32[16,1], index: 5, kind: input, shape index: {}]   ;;  %s16442_s6 = inlined_call_operand.vmem [shape: f32[16,1], index: 6, kind: input, shape index: {}]   ;;  %s16443_s7 = inlined_call_operand.vmem [shape: f32[1,1024], index: 7, kind: input, shape index: {}]   ;;  %s16444_s8 = inlined_call_operand.hbm [shape: f32[2,16,1024], index: 8, kind: output, shape index: {}]  }
   0x1   :  { %16563 = sst [smem:[#allocation56_spill]] %s16440_s4 }
   0x2   :  { %13 = vsyncpa [#allocation6], 0 }
   0x3   :  { %15 = vsyncpa [#allocation6 + $0x1], 0 }
   0x4   :  { %16 = vsyncpa [#allocation9], 0 }
   0x5   :  { %17 = vsyncpa [#allocation7], 0 }
   0x6   :  { %19 = vsyncpa [#allocation7 + $0x1], 0  ;;  %s11806_s27 = smov 0   ;;  %s11808_s28 = smov 0  }
   0x7   :  { %s11810_s29 = smov 0   ;;  %s11812_s30 = smov 0  }
   0x8 LB: > { %s11827_s9 = sadd.s32 4294967295, %s11705_s30   ;;  %s10400_s10 = sadd.s32 4294967294, %s11705_s30   ;;  %s11705_s30 = sphi %s11812_s30, %s16872_s30   ;;  %s11701_s29 = sphi %s11810_s29, %s16875_s29   ;;  %s11697_s28 = sphi %s11808_s28, %s16874_s28   ;;  %s11693_s27 = sphi %s11806_s27, %s16873_s27  }
   0x9   : > { %p45_p0 = scmp.ne.s32.totalorder %s11697_s28, %s11693_s27  ;;  %p16447_p1 = scmp.eq.s32.totalorder %s11827_s9, 0 }
   0xa   : > { %p222_p3 = scmp.eq.s32.totalorder %s10400_s10, 1  ;;  %p10401_p5 = scmp.ge.s32.totalorder %s11705_s30, 1 }
   0xb   : > { %p11836_p4 = por %p16447_p1, %p45_p0  ;;  %p229_p7 = scmp.lt.s32.totalorder %s11705_s30, 3 }
   0xc   : > { %p11841_p6 = por %p222_p3, %p45_p0  ;;  %s11707_s14 = smov [#allocation8]  }
   0xd   : > { %s16564_s11 = scalar_select %p11836_p4, 1, 0 }
   0xe   : > { %s16565_s12 = scalar_select %p11841_p6, 1, 0 }
   0xf   : > { %p11846_p8 = pnand %p10401_p5, %p229_p7  ;;  %s250_s15 = sshll.u32 %s11707_s14, 4  ;;  %s251_s15 = int_to_ptr.vmem [resolvable:$true] %s250_s15 }
  0x10   : > { %s11860_s17 = sadd.s32 1, %s11705_s30   ;;  %s32_s18 = sadd.s32 1, %s11701_s29 }
  0x11   : > { %s16566_s13 = scalar_select %p11846_p8, 1, 0 }
  0x12   : > { %p11453_p9 = pneg %p11846_p8  ;;  %16568 = sst [smem:[#allocation14_spill]] %s11860_s17 }
  0x13   : > { %s29_s19 = ssub.s32 %s11705_s30, %s11860_s17  ;;  %s11594_s20 = scalar_lea.vmem %s251_s15, 768 }
  0x14   : > { %p11855_p11 = pnand %p11453_p9, %p16447_p1  ;;  %p11595_p13 = scmp.ne.s32.totalorder %s251_s15, %s11594_s20 }
  0x15   : > { %p11602_p5 = scmp.lt.s32.totalorder %s251_s15, %s251_s15  ;;  %p11603_p7 = scmp.lt.s32.totalorder %s11594_s20, %s11594_s20 }
  0x16   : > { %p11585_p12 = pneg %p11855_p11 }
  0x17   : > { %p11604_p10 = por %p11603_p7, %p11602_p5 }
  0x18   : > { %p11597_p0 = pnand %p11595_p13, %p11585_p12 }
  0x1a   : > { %p11598_p3 = pneg %p11597_p0 }
  0x1c   : > { %p11605_p2 = pnand %p11604_p10, %p11598_p3 }
  0x1e   : > { %11608 = shalt.err (!%p11605_p2)
}
  0x1f   : > { %s11708_s21 = smov 128   ;;  %s11709_s22 = smov 8  }
  0x20   : > { %s16569_s4 = sld [smem:[#allocation56_spill]]  ;;  %p30_p9 = scmp.eq.s32.totalorder %s29_s19, 0 }
  0x21   : > { %p39_p12 = scmp.ne.s32.totalorder %s11701_s29, %s11697_s28  ;;  %p40_p10 = scmp.eq.s32.totalorder %s11705_s30, 0 }
  0x22   : > { %p11466_p2 = scmp.lt.s32.totalorder %s11705_s30, 2  ;;  %p16570_p0 = scmp.eq.s32.totalorder %s11827_s9, 1 }
  0x23   : > { %s11877_s25 = scalar_select %p30_p9, %s11701_s29, %s32_s18  }
  0x24   : > { %p41_p13 = por %p40_p10, %p39_p12  ;;  %p11881_p3 = por %p16570_p0, %p39_p12 }
  0x25   : > { %s273_s10 = sand.u32 1, %s11701_s29   ;;  %s11443_s14 = smul.u32 2816, %s11705_s30 }
  0x26   : > { %11456 = dma.hbm_to_vmem [thread:$0]  (!%p11855_p11), %s16569_s4, 768, %s251_s15, [#allocation9], %s11708_s21, %s11708_s21, %s11709_s22  }
  0x27   : > { %s16571_s26 = scalar_select %p11881_p3, 1, 0 }
  0x28   : > { %s11442_s20 = smul.u32 176, %s273_s10  ;;  %s11890_s23 = scalar_lea.hbm %s16436_s0, %s11443_s14 }
  0x29   : > { %p11892_p11 = pnand %p11466_p2, %p41_p13  ;;  %s11898_s21 = scalar_lea.sflag [#allocation6], %s273_s10 }
  0x2a   : > { %s277_s18 = scalar_lea.vmem [#allocation5], %s11442_s20  ;;  %s11609_s22 = scalar_lea.hbm %s11890_s23, 2816 }
  0x2b   : > { %s284_s19 = sshll.u32 %s277_s18, 4  ;;  %p11610_p5 = scmp.ne.s32.totalorder %s11890_s23, %s11609_s22  ;;  %s11896_s19 = int_to_ptr.vmem [resolvable:$true] %s284_s19 }
  0x2c   : > { %p11611_p7 = pneg %p11892_p11  ;;  %s11614_s14 = scalar_lea.hbm %s16436_s0, 5632 }
  0x2d   : > { %p11615_p10 = scmp.lt.s32.totalorder %s11890_s23, %s16436_s0  ;;  %p11616_p2 = scmp.lt.s32.totalorder %s11614_s14, %s11609_s22 }
  0x2e   : > { %p11612_p9 = pnand %p11611_p7, %p11610_p5 }
  0x2f   : > { %p11617_p13 = por %p11616_p2, %p11615_p10 }
  0x30   : > { %p11613_p12 = pneg %p11612_p9 }
  0x32   : > { %p11618_p0 = pnand %p11617_p13, %p11613_p12 }
  0x34   : > { %11621 = shalt.err (!%p11618_p0)
}
  0x35   : > { %s11622_s10 = scalar_lea.vmem %s11896_s19, 2816  ;;  %s11710_s20 = smov [#allocation5]  }
  0x36   : > { %p11623_p1 = scmp.ne.s32.totalorder %s11896_s19, %s11622_s10  ;;  %s11627_s18 = sshll.u32 %s11710_s20, 4  ;;  %s11628_s18 = int_to_ptr.vmem [resolvable:$false] %s11627_s18 }
  0x37   : > { %s11629_s17 = scalar_lea.vmem %s11628_s18, 5632  ;;  %p11630_p9 = scmp.lt.s32.totalorder %s11896_s19, %s11628_s18 }
  0x38   : > { %p11625_p6 = pnand %p11623_p1, %p11611_p7  ;;  %p11631_p3 = scmp.lt.s32.totalorder %s11629_s17, %s11622_s10 }
  0x3a   : > { %p11626_p5 = pneg %p11625_p6  ;;  %p11632_p4 = por %p11631_p3, %p11630_p9 }
  0x3c   : > { %p11633_p8 = pnand %p11632_p4, %p11626_p5 }
  0x3e   : > { %11636 = shalt.err (!%p11633_p8)
}
  0x3f   : > { %s11711_s4 = smov 1408   ;;  %s11712_s22 = smov 88  }
  0x40   : > { %11460 = dma.hbm_to_vmem [thread:$0]  (!%p11892_p11), %s11890_s23, 2816, %s11896_s19, %s11898_s21, %s11711_s4, %s11711_s4, %s11712_s22  }
  0x41   : > { %p16573_p1 = scmp.ne.s32.totalorder %s16566_s13, 0 }
  0x43   : > { %296 = sbr.rel (%p16573_p1) target bundleno = 1826 (0x722), region = 52 }
  0x48   : > { %s11922_s24 = sand.u32 1, %s11697_s28   ;;  %p16574_p4 = scmp.ne.s32.totalorder %s16564_s11, 0 }
  0x49   : > { %s11444_s14 = smul.u32 176, %s11922_s24  ;;  %s299_s16 = scalar_lea.sflag [#allocation6], %s11922_s24 }
  0x4b   : > { %s11926_s10 = scalar_lea.vmem [#allocation5], %s11444_s14 }
  0x4c   : > { %11680 = dma.done.wait (%p16574_p4), %s299_s16, 2816  }
  0x4d   : > { %11682 = vsyncadd (%p16574_p4), %s299_s16, 4294964480  ;;  %p16575_p6 = scmp.eq.s32.totalorder %s11827_s9, 0 }
  0x4f   : > { %11684 = dma.done.wait (%p16575_p6), [#allocation9], 768   ;;  %p16576_p8 = pmov %p16575_p6 }
  0x50   : > { %v11937_v0 = vld [vmem:[%s11926_s10 + $0x20] sm:$0xff]  ;;  %v11940_v1 = vld [vmem:[%s11926_s10 + $0x28] sm:$0xff]  ;;  %v11951_v5 = vld [vmem:[%s11926_s10 + $0x30] sm:$0xff]  ;;  %s16454_s11 = smov 39   ;;  %s16468_s13 = smov 38   ;;  %vm1927_vm0 = vcmask 130048  }
  0x51   : > { %11686 = vsyncadd (%p16576_p8), [#allocation9], 4294966528  ;;  %v340_v2 = vld [vmem:[%s11926_s10] sm:$0xff]  ;;  %v11945_v3 = vpack.c.bf16 %v11940_v1, %v11937_v0  ;;  %v11948_v4 = vld [vmem:[%s11926_s10 + $0x8] sm:$0xff]  ;;  %s16485_s23 = smov 37   ;;  %v11255_v31 = vpack.c.bf16 %v11951_v5, %v11940_v1  ;;  %s16510_s15 = smov 29  }
  0x52   : > { %v11954_v6 = vld [vmem:[%s11926_s10 + $0x38] sm:$0xff]  ;;  %v11957_v7 = vpack.c.bf16 %v11948_v4, %v340_v2  ;;  %v11960_v8 = vld [vmem:[%s11926_s10 + $0x10] sm:$0xff]  ;;  %v11979_v13 = vld [vmem:[%s11926_s10 + $0x60] sm:$0xff]  ;;  %s16512_s19 = smov 28   ;;  %s16533_s21 = smov 27   ;;  %vm434_vm1 = vcmask 1043456  }
  0x53   : > { %v11963_v9 = vld [vmem:[%s11926_s10 + $0x18] sm:$0xff]  ;;  %408 = vrot.lane.b32.xlu1 %v11945_v3, %s16454_s11  ;;  %v11969_v10 = vpack.c.bf16 %v11954_v6, %v11951_v5  ;;  %v11982_v14 = vld [vmem:[%s11926_s10 + $0x40] sm:$0xff]  ;;  %v11996_v18 = vld [vmem:[%s11926_s10 + $0x68] sm:$0xff]  ;;  %v11253_v29 = vpack.c.bf16 %v11960_v8, %v11948_v4  ;;  %s11719_s20 = smov 19   ;;  %s11720_s18 = smov 18   ;;  %vm16518_vm2 = vcmask 318464  }
  0x54   : > { %404 = vrot.lane.b32.xlu0 %v11957_v7, %s16454_s11  ;;  %v11975_v11 = vpack.c.bf16 %v11963_v9, %v11960_v8  ;;  %v349_v12 = vld [vmem:[%s11926_s10 + $0x58] sm:$0xff]  ;;  %v11988_v16 = vld [vmem:[%s11926_s10 + $0x80] sm:$0xff]  ;;  %v11999_v19 = vld [vmem:[%s11926_s10 + $0x70] sm:$0xff]  ;;  %v12005_v20 = vpack.c.bf16 %v11982_v14, %v11982_v14  ;;  %v11254_v28 = vpack.c.bf16 %v11937_v0, %v11963_v9  ;;  %v11256_v30 = vpack.c.bf16 %v11982_v14, %v11954_v6  ;;  %s16451_s17 = smov 17   ;;  %s11722_s14 = smov 67  }
  0x55   : > { %v11985_v15 = vld [vmem:[%s11926_s10 + $0x78] sm:$0xff]  ;;  %v11993_v17 = vpack.c.bf16 %v11979_v13, %v349_v12  ;;  %v12017_v22 = vpack.c.bf16 %v11999_v19, %v11996_v18  ;;  %v12023_v24 = vld [vmem:[%s11926_s10 + $0x88] sm:$0xff]  ;;  %v12026_v25 = vld [vmem:[%s11926_s10 + $0x90] sm:$0xff]  ;;  %v11258_v32 = vpack.c.bf16 %v11996_v18, %v11979_v13  ;;  %s11723_s16 = smov 66   ;;  %s11724_s4 = smov 46   ;;  %vm1198_vm3 = vcmask 154624  }
  0x56   : > { %v12011_v21 = vpack.c.bf16 %v11988_v16, %v11985_v15  ;;  %v12020_v23 = vld [vmem:[%s11926_s10 + $0x98] sm:$0xff]  ;;  %v12038_v27 = vpack.c.bf16 %v12026_v25, %v12023_v24  ;;  %v11260_v33 = vpack.c.bf16 %v12023_v24, %v11988_v16  ;;  %v11259_v34 = vpack.c.bf16 %v11985_v15, %v11999_v19  ;;  %v2136_v9 = vld [vmem:[%s11926_s10 + $0xa0] sm:$0xff]  ;;  %s11725_s22 = smov 47   ;;  %p16869_p11 = scmp.ne.s32.totalorder %s16571_s26, 0 }
  0x57   : > { %410 = vrot.lane.b32.xlu1 %v11969_v10, %s16454_s11  ;;  %v12032_v26 = vpack.c.bf16 %v12020_v23, %v12020_v23  ;;  %v11261_v35 = vpack.c.bf16 %v12020_v23, %v12026_v25  ;;  %v11262_v1 = vpack.c.bf16 %v2136_v9, %v2136_v9  ;;  %v2248_v5 = vld [vmem:[%s11926_s10 + $0x18] sm:$0xff]  ;;  %v2249_v13 = vld [vmem:[%s11926_s10 + $0x20] sm:$0xff]  ;;  %vm1325_vm4 = vcmask 146432  }
  0x58   : > { %406 = vrot.lane.b32.xlu0 %v11975_v11, %s16454_s11  ;;  %v12340_v16 = vpack.c.bf16 %v2249_v13, %v2248_v5  ;;  %v2252_v19 = vld [vmem:[%s11926_s10 + $0x38] sm:$0xff]  ;;  %v2253_v24 = vld [vmem:[%s11926_s10 + $0x40] sm:$0xff]  ;;  %v3019_v13 = vld [vmem:[%s11926_s10 + $0x70] sm:$0xff]  ;;  %vm1071_vm5 = vcmask 220160   ;;  %vm944_vm6 = vcmask 228352   ;;  %vm817_vm7 = vcmask 236544  }
  0x59   : > { %v2255_v25 = vld [vmem:[%s11926_s10 + $0x60] sm:$0xff]  ;;  %vm16528_vm8 = vcmask 302080   ;;  %vm16519_vm9 = vcmask 310272   ;;  %vm16517_vm10 = vcmask 138240   ;;  %vm2214_vm11 = vcmask 547840  }
  0x5a   : > { %vm3103_vm12 = vcmask 375808   ;;  %vm2976_vm13 = vcmask 384000   ;;  %vm2849_vm14 = vcmask 449536   ;;  %vm16542_vm15 = vcmask 457728  }
  0x5b   : > { %414 = vrot.lane.b32.xlu1 %v11993_v17, %s16454_s11 }
  0x5c   : > { %412 = vrot.lane.b32.xlu0 %v12005_v20, %s16454_s11 }
  0x5f   : > { %418 = vrot.lane.b32.xlu1 %v12011_v21, %s16454_s11 }
  0x60   : > { %416 = vrot.lane.b32.xlu0 %v12017_v22, %s16454_s11 }
  0x63   : > { %422 = vrot.lane.b32.xlu1 %v12032_v26, %s16454_s11 }
  0x64   : > { %420 = vrot.lane.b32.xlu0 %v12038_v27, %s16454_s11  ;;  %s11728_s11 = smov 57  }
  0x67   : > { %534 = vrot.lane.b32.xlu1 %v11975_v11, %s16468_s13 }
  0x68   : > { %532 = vrot.lane.b32.xlu0 %v11957_v7, %s16468_s13 }
  0x6b   : > { %538 = vrot.lane.b32.xlu1 %v11969_v10, %s16468_s13 }
  0x6c   : > { %536 = vrot.lane.b32.xlu0 %v11945_v3, %s16468_s13 }
  0x6f   : > { %542 = vrot.lane.b32.xlu1 %v11993_v17, %s16468_s13 }
  0x70   : > { %540 = vrot.lane.b32.xlu0 %v12005_v20, %s16468_s13 }
  0x73   : > { %546 = vrot.lane.b32.xlu1 %v12011_v21, %s16468_s13 }
  0x74   : > { %544 = vrot.lane.b32.xlu0 %v12017_v22, %s16468_s13 }
  0x77   : > { %550 = vrot.lane.b32.xlu1 %v12032_v26, %s16468_s13 }
  0x78   : > { %548 = vrot.lane.b32.xlu0 %v12038_v27, %s16468_s13  ;;  %s11729_s13 = smov 65  }
  0x7b   : > { %661 = vrot.lane.b32.xlu1 %v11975_v11, %s16485_s23 }
  0x7c   : > { %659 = vrot.lane.b32.xlu0 %v11957_v7, %s16485_s23 }
  0x7f   : > { %665 = vrot.lane.b32.xlu1 %v11969_v10, %s16485_s23 }
  0x80   : > { %663 = vrot.lane.b32.xlu0 %v11945_v3, %s16485_s23 }
  0x83   : > { %669 = vrot.lane.b32.xlu1 %v11993_v17, %s16485_s23 }
  0x84   : > { %667 = vrot.lane.b32.xlu0 %v12005_v20, %s16485_s23 }
  0x87   : > { %673 = vrot.lane.b32.xlu1 %v12011_v21, %s16485_s23 }
  0x88   : > { %671 = vrot.lane.b32.xlu0 %v12017_v22, %s16485_s23 }
  0x8b   : > { %677 = vrot.lane.b32.xlu1 %v12032_v26, %s16485_s23 }
  0x8c   : > { %675 = vrot.lane.b32.xlu0 %v12038_v27, %s16485_s23  ;;  %s11730_s23 = smov 45  }
  0x8f   : > { %788 = vrot.lane.b32.xlu1 %v11975_v11, %s16510_s15 }
  0x90   : > { %786 = vrot.lane.b32.xlu0 %v11957_v7, %s16510_s15 }
  0x93   : > { %792 = vrot.lane.b32.xlu1 %v11969_v10, %s16510_s15 }
  0x94   : > { %790 = vrot.lane.b32.xlu0 %v11945_v3, %s16510_s15 }
  0x97   : > { %796 = vrot.lane.b32.xlu1 %v11993_v17, %s16510_s15 }
  0x98   : > { %794 = vrot.lane.b32.xlu0 %v12005_v20, %s16510_s15 }
  0x9b   : > { %800 = vrot.lane.b32.xlu1 %v12011_v21, %s16510_s15 }
  0x9c   : > { %798 = vrot.lane.b32.xlu0 %v12017_v22, %s16510_s15 }
  0x9f   : > { %804 = vrot.lane.b32.xlu1 %v12032_v26, %s16510_s15 }
  0xa0   : > { %802 = vrot.lane.b32.xlu0 %v12038_v27, %s16510_s15  ;;  %s11731_s15 = smov 74  }
  0xa3   : > { %915 = vrot.lane.b32.xlu1 %v11975_v11, %s16512_s19 }
  0xa4   : > { %913 = vrot.lane.b32.xlu0 %v11957_v7, %s16512_s19 }
  0xa7   : > { %919 = vrot.lane.b32.xlu1 %v11969_v10, %s16512_s19 }
  0xa8   : > { %917 = vrot.lane.b32.xlu0 %v11945_v3, %s16512_s19 }
  0xab   : > { %923 = vrot.lane.b32.xlu1 %v11993_v17, %s16512_s19 }
  0xac   : > { %921 = vrot.lane.b32.xlu0 %v12005_v20, %s16512_s19 }
  0xaf   : > { %927 = vrot.lane.b32.xlu1 %v12011_v21, %s16512_s19 }
  0xb0   : > { %925 = vrot.lane.b32.xlu0 %v12017_v22, %s16512_s19 }
  0xb3   : > { %931 = vrot.lane.b32.xlu1 %v12032_v26, %s16512_s19 }
  0xb4   : > { %929 = vrot.lane.b32.xlu0 %v12038_v27, %s16512_s19  ;;  %s11732_s19 = smov 75  }
  0xb7   : > { %1042 = vrot.lane.b32.xlu1 %v11975_v11, %s16533_s21 }
  0xb8   : > { %1040 = vrot.lane.b32.xlu0 %v11957_v7, %s16533_s21 }
  0xbb   : > { %1046 = vrot.lane.b32.xlu1 %v11969_v10, %s16533_s21 }
  0xbc   : > { %1044 = vrot.lane.b32.xlu0 %v11945_v3, %s16533_s21 }
  0xbf   : > { %1050 = vrot.lane.b32.xlu1 %v11993_v17, %s16533_s21 }
  0xc0   : > { %1048 = vrot.lane.b32.xlu0 %v12005_v20, %s16533_s21 }
  0xc3   : > { %1054 = vrot.lane.b32.xlu1 %v12011_v21, %s16533_s21 }
  0xc4   : > { %1052 = vrot.lane.b32.xlu0 %v12017_v22, %s16533_s21 }
  0xc5   : > { %v12156_v36 = vpop.permute.xlu1 %408 }
  0xc6   : > { %16577 = vst [vmem:[#allocation15_spill] sm:$0xff] %v12156_v36  ;;  %v12158_v37 = vpop.permute.xlu0 %404 }
  0xc7   : > { %1058 = vrot.lane.b32.xlu1 %v12032_v26, %s16533_s21 }
  0xc8   : > { %1056 = vrot.lane.b32.xlu0 %v12038_v27, %s16533_s21  ;;  %s11736_s21 = smov 93  }
  0xc9   : > { %v12164_v38 = vpop.permute.xlu1 %410 }
  0xca   : > { %16578 = vst [vmem:[#allocation16_spill] sm:$0xff] %v12164_v38  ;;  %v12166_v39 = vpop.permute.xlu0 %406 }
  0xcb   : > { %1169 = vrot.lane.b32.xlu1 %v11975_v11, %s11719_s20 }
  0xcc   : > { %1167 = vrot.lane.b32.xlu0 %v11957_v7, %s11719_s20 }
  0xcd   : > { %v12172_v40 = vpop.permute.xlu1 %414 }
  0xce   : > { %v12174_v41 = vpop.permute.xlu0 %412 }
  0xcf   : > { %16579 = vst [vmem:[#allocation17_spill] sm:$0xff] %v12174_v41  ;;  %1173 = vrot.lane.b32.xlu1 %v11969_v10, %s11719_s20 }
  0xd0   : > { %1171 = vrot.lane.b32.xlu0 %v11945_v3, %s11719_s20 }
  0xd1   : > { %v12180_v42 = vpop.permute.xlu1 %418 }
  0xd2   : > { %16580 = vst [vmem:[#allocation18_spill] sm:$0xff] %v12180_v42  ;;  %v12182_v43 = vpop.permute.xlu0 %416 }
  0xd3   : > { %1177 = vrot.lane.b32.xlu1 %v11993_v17, %s11719_s20 }
  0xd4   : > { %1175 = vrot.lane.b32.xlu0 %v12005_v20, %s11719_s20 }
  0xd5   : > { %v12188_v44 = vpop.permute.xlu1 %422 }
  0xd6   : > { %16581 = vst [vmem:[#allocation19_spill] sm:$0xff] %v12188_v44  ;;  %v12190_v45 = vpop.permute.xlu0 %420 }
  0xd7   : > { %16582 = vst [vmem:[#allocation20_spill] sm:$0xff] %v12190_v45  ;;  %1181 = vrot.lane.b32.xlu1 %v12011_v21, %s11719_s20  ;;  %v430_v45 = vrot.slane %v12182_v43, 4 }
  0xd8   : > { %1179 = vrot.lane.b32.xlu0 %v12017_v22, %s11719_s20 }
  0xd9   : > { %v12196_v46 = vpop.permute.xlu1 %534 }
  0xda   : > { %16583 = vst [vmem:[#allocation21_spill] sm:$0xff] %v12196_v46  ;;  %v12198_v47 = vpop.permute.xlu0 %532 }
  0xdb   : > { %16584 = vst [vmem:[#allocation22_spill] sm:$0xff] %v12198_v47  ;;  %1185 = vrot.lane.b32.xlu1 %v12032_v26, %s11719_s20 }
  0xdc   : > { %1183 = vrot.lane.b32.xlu0 %v12038_v27, %s11719_s20 }
  0xdd   : > { %v12204_v48 = vpop.permute.xlu1 %538 }
  0xde   : > { %16585 = vst [vmem:[#allocation23_spill] sm:$0xff] %v12204_v48  ;;  %v12206_v49 = vpop.permute.xlu0 %536 }
  0xdf   : > { %1296 = vrot.lane.b32.xlu1 %v11975_v11, %s11720_s18 }
  0xe0   : > { %1294 = vrot.lane.b32.xlu0 %v11957_v7, %s11720_s18 }
  0xe1   : > { %v12212_v50 = vpop.permute.xlu1 %542 }
  0xe2   : > { %v12214_v51 = vpop.permute.xlu0 %540 }
  0xe3   : > { %16586 = vst [vmem:[#allocation24_spill] sm:$0xff] %v12214_v51  ;;  %1306 = vrot.lane.b32.xlu1 %v12017_v22, %s11720_s18 }
  0xe4   : > { %1304 = vrot.lane.b32.xlu0 %v11993_v17, %s11720_s18 }
  0xe5   : > { %v12220_v52 = vpop.permute.xlu1 %546 }
  0xe6   : > { %v12222_v53 = vpop.permute.xlu0 %544 }
  0xe7   : > { %1300 = vrot.lane.b32.xlu1 %v11969_v10, %s11720_s18 }
  0xe8   : > { %1298 = vrot.lane.b32.xlu0 %v11945_v3, %s11720_s18 }
  0xe9   : > { %v12228_v54 = vpop.permute.xlu1 %550 }
  0xea   : > { %16587 = vst [vmem:[#allocation25_spill] sm:$0xff] %v12228_v54  ;;  %v12230_v55 = vpop.permute.xlu0 %548 }
  0xeb   : > { %16588 = vst [vmem:[#allocation26_spill] sm:$0xff] %v12230_v55  ;;  %1308 = vrot.lane.b32.xlu1 %v12011_v21, %s11720_s18 }
  0xec   : > { %1302 = vrot.lane.b32.xlu0 %v12005_v20, %s11720_s18 }
  0xed   : > { %v12236_v56 = vpop.permute.xlu1 %661 }
  0xee   : > { %v12238_v57 = vpop.permute.xlu0 %659 }
  0xef   : > { %1312 = vrot.lane.b32.xlu1 %v12032_v26, %s11720_s18 }
  0xf0   : > { %1310 = vrot.lane.b32.xlu0 %v12038_v27, %s11720_s18 }
  0xf1   : > { %v12244_v58 = vpop.permute.xlu1 %665 }
  0xf2   : > { %16589 = vst [vmem:[#allocation27_spill] sm:$0xff] %v12244_v58  ;;  %v12246_v59 = vpop.permute.xlu0 %663 }
  0xf3   : > { %1423 = vrot.lane.b32.xlu1 %v11975_v11, %s16451_s17 }
  0xf4   : > { %1421 = vrot.lane.b32.xlu0 %v11957_v7, %s16451_s17 }
  0xf5   : > { %v12252_v60 = vpop.permute.xlu1 %669 }
  0xf6   : > { %v12254_v61 = vpop.permute.xlu0 %667 }
  0xf7   : > { %16590 = vst [vmem:[#allocation28_spill] sm:$0xff] %v12254_v61  ;;  %1427 = vrot.lane.b32.xlu1 %v11969_v10, %s16451_s17 }
  0xf8   : > { %1425 = vrot.lane.b32.xlu0 %v11945_v3, %s16451_s17  ;;  %v12279_v3 = vld [vmem:[%s16437_s1 + $0x4] ss:$8 sps:$4 sm:$0xff]  }
  0xf9   : > { %v12260_v62 = vpop.permute.xlu1 %673  ;;  %16593 = vst [vmem:[#allocation31_spill] sm:$0xff] %v12279_v3  ;;  %10572 = vmatprep.mubr.msk.bf16.mxu0 %vm1927_vm0, %v12279_v3  ;;  %10573 = vmatprep.mubr.msk.bf16.mxu1 %vm1927_vm0, %v12279_v3 }
  0xfa   : > { %v12262_v63 = vpop.permute.xlu0 %671 }
  0xfb   : > { %1431 = vrot.lane.b32.xlu1 %v11993_v17, %s16451_s17 }
  0xfc   : > { %1429 = vrot.lane.b32.xlu0 %v12005_v20, %s16451_s17 }
  0xfd   : > { %v12268_v2 = vpop.permute.xlu1 %677 }
  0xfe   : > { %16591 = vst [vmem:[#allocation29_spill] sm:$0xff] %v12268_v2  ;;  %v12270_v7 = vpop.permute.xlu0 %675 }
  0xff   : > { %16592 = vst [vmem:[#allocation30_spill] sm:$0xff] %v12270_v7  ;;  %1435 = vrot.lane.b32.xlu1 %v12011_v21, %s16451_s17  ;;  %v2127_v21 = vld [vmem:[%s11926_s10 + $0x48] sm:$0xff]  ;;  %v424_v7 = vrot.slane %v12158_v37, 4 }
 0x100   : > { %1433 = vrot.lane.b32.xlu0 %v12017_v22, %s16451_s17  ;;  %v11257_v0 = vpack.c.bf16 %v2127_v21, %v2127_v21 }
 0x101   : > { %v12281_v10 = vpop.permute.xlu1 %788 }
 0x102   : > { %v12283_v11 = vpop.permute.xlu0 %786 }
 0x103   : > { %1439 = vrot.lane.b32.xlu1 %v12032_v26, %s16451_s17  ;;  %v2246_v26 = vld [vmem:[%s11926_s10 + $0x8] sm:$0xff] }
 0x104   : > { %1437 = vrot.lane.b32.xlu0 %v12038_v27, %s16451_s17  ;;  %v2247_v27 = vld [vmem:[%s11926_s10 + $0x10] sm:$0xff]  ;;  %s16531_s17 = smov 56  }
 0x105   : > { %v12293_v12 = vpop.permute.xlu1 %792  ;;  %v12345_v15 = vpack.c.bf16 %v2247_v27, %v2246_v26  ;;  %v3020_v26 = vld [vmem:[%s11926_s10 + $0x78] sm:$0xff] }
 0x106   : > { %16594 = vst [vmem:[#allocation32_spill] sm:$0xff] %v12293_v12  ;;  %v12295_v17 = vpop.permute.xlu0 %790 }
 0x107   : > { %2185 = vrot.lane.b32.xlu1 %v11254_v28, %s11722_s14 }
 0x108   : > { %2183 = vrot.lane.b32.xlu0 %v11253_v29, %s11722_s14 }
 0x109   : > { %v12303_v20 = vpop.permute.xlu1 %796 }
 0x10a   : > { %v12306_v22 = vpop.permute.xlu0 %794 }
 0x10b   : > { %16595 = vst [vmem:[#allocation33_spill] sm:$0xff] %v12306_v22  ;;  %2189 = vrot.lane.b32.xlu1 %v11256_v30, %s11722_s14  ;;  %v2250_v30 = vld [vmem:[%s11926_s10 + $0x28] sm:$0xff] }
 0x10c   : > { %2187 = vrot.lane.b32.xlu0 %v11255_v31, %s11722_s14  ;;  %v2251_v31 = vld [vmem:[%s11926_s10 + $0x30] sm:$0xff] }
 0x10d   : > { %v12314_v4 = vpop.permute.xlu1 %800  ;;  %v12361_v23 = vpack.c.bf16 %v2251_v31, %v2250_v30 }
 0x10e   : > { %v12316_v8 = vpop.permute.xlu0 %798 }
 0x10f   : > { %2193 = vrot.lane.b32.xlu1 %v11258_v32, %s11722_s14 }
 0x110   : > { %2191 = vrot.lane.b32.xlu0 %v11257_v0, %s11722_s14 }
 0x111   : > { %v12322_v6 = vpop.permute.xlu1 %804 }
 0x112   : > { %16596 = vst [vmem:[#allocation34_spill] sm:$0xff] %v12322_v6  ;;  %v12324_v14 = vpop.permute.xlu0 %802 }
 0x113   : > { %16597 = vst [vmem:[#allocation35_spill] sm:$0xff] %v12324_v14  ;;  %2197 = vrot.lane.b32.xlu1 %v11260_v33, %s11722_s14  ;;  %v12357_v33 = vpack.c.bf16 %v2253_v24, %v2252_v19  ;;  %v12390_v24 = vpack.c.bf16 %v3020_v26, %v3019_v13 }
 0x114   : > { %2195 = vrot.lane.b32.xlu0 %v11259_v34, %s11722_s14  ;;  %v2256_v34 = vld [vmem:[%s11926_s10 + $0x68] sm:$0xff] }
 0x115   : > { %v12334_v18 = vpop.permute.xlu1 %915  ;;  %v12371_v9 = vpack.c.bf16 %v2256_v34, %v2255_v25 }
 0x116   : > { %v12338_v28 = vpop.permute.xlu0 %913 }
 0x117   : > { %2201 = vrot.lane.b32.xlu1 %v11262_v1, %s11722_s14 }
 0x118   : > { %2199 = vrot.lane.b32.xlu0 %v11261_v35, %s11722_s14  ;;  %s11726_s14 = smov 55  }
 0x119   : > { %v12349_v29 = vpop.permute.xlu1 %919 }
 0x11a   : > { %16598 = vst [vmem:[#allocation36_spill] sm:$0xff] %v12349_v29  ;;  %v12353_v32 = vpop.permute.xlu0 %917 }
 0x11b   : > { %2312 = vrot.lane.b32.xlu1 %v12340_v16, %s11723_s16 }
 0x11c   : > { %2310 = vrot.lane.b32.xlu0 %v12345_v15, %s11723_s16 }
 0x11d   : > { %v12365_v35 = vpop.permute.xlu1 %923 }
 0x11e   : > { %v12367_v21 = vpop.permute.xlu0 %921 }
 0x11f   : > { %16599 = vst [vmem:[#allocation37_spill] sm:$0xff] %v12367_v21  ;;  %2316 = vrot.lane.b32.xlu1 %v12357_v33, %s11723_s16 }
 0x120   : > { %2314 = vrot.lane.b32.xlu0 %v12361_v23, %s11723_s16 }
 0x121   : > { %v12375_v1 = vpop.permute.xlu1 %927 }
 0x122   : > { %v12377_v5 = vpop.permute.xlu0 %925 }
 0x123   : > { %2320 = vrot.lane.b32.xlu1 %v12371_v9, %s11723_s16 }
 0x124   : > { %2318 = vrot.lane.b32.xlu0 %v11257_v0, %s11723_s16 }
 0x125   : > { %v12384_v27 = vpop.permute.xlu1 %931 }
 0x126   : > { %16600 = vst [vmem:[#allocation38_spill] sm:$0xff] %v12384_v27  ;;  %v12386_v19 = vpop.permute.xlu0 %929 }
 0x127   : > { %16601 = vst [vmem:[#allocation39_spill] sm:$0xff] %v12386_v19  ;;  %3074 = vrot.lane.b32.xlu1 %v12340_v16, %s11724_s4  ;;  %v16474_v19 = vrot.slane %v12164_v38, 4 }
 0x128   : > { %3072 = vrot.lane.b32.xlu0 %v12345_v15, %s11724_s4 }
 0x129   : > { %v12394_v30 = vpop.permute.xlu1 %1042 }
 0x12a   : > { %v12396_v31 = vpop.permute.xlu0 %1040 }
 0x12b   : > { %3084 = vrot.lane.b32.xlu1 %v12390_v24, %s11724_s4 }
 0x12c   : > { %3082 = vrot.lane.b32.xlu0 %v12371_v9, %s11724_s4 }
 0x12d   : > { %v12402_v0 = vpop.permute.xlu1 %1046 }
 0x12e   : > { %16602 = vst [vmem:[#allocation40_spill] sm:$0xff] %v12402_v0  ;;  %v12404_v25 = vpop.permute.xlu0 %1044 }
 0x12f   : > { %2947 = vrot.lane.b32.xlu1 %v12340_v16, %s11725_s22 }
 0x130   : > { %2945 = vrot.lane.b32.xlu0 %v12345_v15, %s11725_s22 }
 0x131   : > { %v12410_v34 = vpop.permute.xlu1 %1050 }
 0x132   : > { %v12412_v13 = vpop.permute.xlu0 %1048 }
 0x133   : > { %16603 = vst [vmem:[#allocation41_spill] sm:$0xff] %v12412_v13  ;;  %2957 = vrot.lane.b32.xlu1 %v12390_v24, %s11725_s22  ;;  %v425_v13 = vrot.slane %v12166_v39, 4 }
 0x134   : > { %2955 = vrot.lane.b32.xlu0 %v12371_v9, %s11725_s22 }
 0x135   : > { %v12418_v26 = vpop.permute.xlu1 %1054 }
 0x136   : > { %v12420_v44 = vpop.permute.xlu0 %1052 }
 0x137   : > { %2820 = vrot.lane.b32.xlu1 %v12340_v16, %s11726_s14 }
 0x138   : > { %2818 = vrot.lane.b32.xlu0 %v12345_v15, %s11726_s14 }
 0x139   : > { %v12426_v54 = vpop.permute.xlu1 %1058 }
 0x13a   : > { %16604 = vst [vmem:[#allocation42_spill] sm:$0xff] %v12426_v54  ;;  %v12428_v51 = vpop.permute.xlu0 %1056  ;;  %v429_v54 = vrot.slane %v12172_v40, 4 }
 0x13b   : > { %16605 = vst [vmem:[#allocation43_spill] sm:$0xff] %v12428_v51  ;;  %2830 = vrot.lane.b32.xlu1 %v12390_v24, %s11726_s14  ;;  %v16608_v51 = vrot.slane %v12180_v42, 4 }
 0x13c   : > { %2828 = vrot.lane.b32.xlu0 %v12371_v9, %s11726_s14  ;;  %v444_v27 = vsel %vm434_vm1, %v429_v54, %v430_v45 }
 0x13d   : > { %v12434_v61 = vpop.permute.xlu1 %1169  ;;  %v446_v0 = vsel %vm434_vm1, %v430_v45, %v16608_v51  ;;  %v12487_v54 = vsel %vm16518_vm2, %v12172_v40, %v444_v27  ;;  %v3024_v27 = vld [vmem:[%s11926_s10 + $0x98] sm:$0xff] }
 0x13e   : > { %v12436_v2 = vpop.permute.xlu0 %1167  ;;  %16611 = vst [vmem:[#allocation48_spill] sm:$0xff] %v12487_v54  ;;  %v12491_v45 = vsel %vm16518_vm2, %v12182_v43, %v446_v0  ;;  %v12513_v0 = vld [vmem:[%s11926_s10 + $0x80] sm:$0xff] }
 0x13f   : > { %2693 = vrot.lane.b32.xlu1 %v12340_v16, %s16531_s17  ;;  %16612 = vst [vmem:[#allocation49_spill] sm:$0xff] %v12491_v45  ;;  %16616 = vst [vmem:[#allocation53_spill] sm:$0xff] %v12513_v0  ;;  %v1187_v38 = vrot.slane %v12436_v2, 4 }
 0x140   : > { %2691 = vrot.lane.b32.xlu0 %v12345_v15, %s16531_s17 }
 0x141   : > { %v12442_v22 = vpop.permute.xlu1 %1173 }
 0x142   : > { %16606 = vst [vmem:[#allocation44_spill] sm:$0xff] %v12442_v22  ;;  %v12444_v6 = vpop.permute.xlu0 %1171 }
 0x143   : > { %2703 = vrot.lane.b32.xlu1 %v12390_v24, %s16531_s17 }
 0x144   : > { %2701 = vrot.lane.b32.xlu0 %v12371_v9, %s16531_s17 }
 0x145   : > { %v12450_v48 = vpop.permute.xlu1 %1177 }
 0x146   : > { %v12452_v21 = vpop.permute.xlu0 %1175  ;;  %v1192_v54 = vrot.slane %v12450_v48, 4 }
 0x147   : > { %16607 = vst [vmem:[#allocation45_spill] sm:$0xff] %v12452_v21  ;;  %2566 = vrot.lane.b32.xlu1 %v12340_v16, %s11728_s11  ;;  %v426_v21 = vrot.slane %v12156_v36, 4  ;;  %v435_v36 = vsel %vm434_vm1, %v424_v7, %v425_v13 }
 0x148   : > { %2564 = vrot.lane.b32.xlu0 %v12345_v15, %s11728_s11  ;;  %v12503_v40 = vsel %vm16518_vm2, %v12158_v37, %v435_v36 }
 0x149   : > { %v12460_v3 = vpop.permute.xlu1 %1181  ;;  %v438_v22 = vsel %vm434_vm1, %v425_v13, %v426_v21  ;;  %16614 = vst [vmem:[#allocation51_spill] sm:$0xff] %v12503_v40  ;;  %v12508_v43 = vsel %vm434_vm1, %v426_v21, %v16474_v19  ;;  %v3022_v13 = vld [vmem:[%s11926_s10 + $0x88] sm:$0xff]  ;;  %v3023_v19 = vld [vmem:[%s11926_s10 + $0x90] sm:$0xff] }
 0x14a   : > { %v12464_v14 = vpop.permute.xlu0 %1179  ;;  %v12497_v51 = vsel %vm16518_vm2, %v12166_v39, %v438_v22  ;;  %16615 = vst [vmem:[#allocation52_spill] sm:$0xff] %v12508_v43  ;;  %v806_v39 = vrot.slane %v12283_v11, 4  ;;  %v12550_v37 = vpack.c.bf16 %v3024_v27, %v3023_v19  ;;  %v933_v19 = vrot.slane %v12338_v28, 4 }
 0x14b   : > { %2576 = vrot.lane.b32.xlu1 %v12390_v24, %s11728_s11  ;;  %16613 = vst [vmem:[#allocation50_spill] sm:$0xff] %v12497_v51  ;;  %v1060_v51 = vrot.slane %v12396_v31, 4 }
 0x14c   : > { %2574 = vrot.lane.b32.xlu0 %v12371_v9, %s11728_s11 }
 0x14d   : > { %v12477_v29 = vpop.permute.xlu1 %1185 }
 0x14e   : > { %16609 = vst [vmem:[#allocation46_spill] sm:$0xff] %v12477_v29  ;;  %v12480_v12 = vpop.permute.xlu0 %1183  ;;  %v12541_v29 = vpack.c.bf16 %v3022_v13, %v12513_v0  ;;  %v16619_v0 = vrot.slane %v12464_v14, 4 }
 0x14f   : > { %16610 = vst [vmem:[#allocation47_spill] sm:$0xff] %v12480_v12  ;;  %2439 = vrot.lane.b32.xlu1 %v12340_v16, %s11729_s13  ;;  %v16617_v12 = vrot.slane %v12281_v10, 4 }
 0x150   : > { %2437 = vrot.lane.b32.xlu0 %v12345_v15, %s11729_s13 }
 0x151   : > { %v12499_v7 = vpop.permute.xlu1 %1296  ;;  %v12547_v40 = vsel %vm434_vm1, %v806_v39, %v16617_v12  ;;  %v1206_v12 = vsel %vm434_vm1, %v1192_v54, %v16619_v0 }
 0x152   : > { %v1295_v22 = vpop.permute.xlu0 %1294  ;;  %v16618_v13 = vrot.slane %v12499_v7, 4 }
 0x153   : > { %v1314_v21 = vrot.slane %v1295_v22, 4  ;;  %2449 = vrot.lane.b32.xlu1 %v12390_v24, %s11729_s13 }
 0x154   : > { %2447 = vrot.lane.b32.xlu0 %v12371_v9, %s11729_s13 }
 0x155   : > { %v12538_v43 = vpop.permute.xlu1 %1306  ;;  %v1324_v42 = vsel %vm434_vm1, %v1314_v21, %v16618_v13  ;;  %v1065_v21 = vrot.slane %v12410_v34, 4  ;;  %v16620_v13 = vrot.slane %v12434_v61, 4 }
 0x156   : > { %v1320_v36 = vrot.slane %v12538_v43, 4  ;;  %v1305_v45 = vpop.permute.xlu0 %1304  ;;  %v1326_v41 = vsel %vm1325_vm4, %v1295_v22, %v1324_v42  ;;  %v16623_v42 = vrot.slane %v12394_v30, 4  ;;  %v16495_v22 = vrot.slane %v12444_v6, 4 }
 0x157   : > { %v1319_v58 = vrot.slane %v1305_v45, 4  ;;  %3199 = vrot.lane.b32.xlu1 %v12345_v15, %s11730_s23  ;;  %v1197_v54 = vsel %vm434_vm1, %v1187_v38, %v16620_v13  ;;  %v1207_v15 = vsel %vm1198_vm3, %v12450_v48, %v1206_v12 }
 0x158   : > { %2322 = vrot.lane.b32.xlu0 %v12390_v24, %s11723_s16  ;;  %v1199_v48 = vsel %vm1198_vm3, %v12436_v2, %v1197_v54 }
 0x159   : > { %v12572_v0 = vpop.permute.xlu1 %1300  ;;  %v1333_v39 = vsel %vm434_vm1, %v1319_v58, %v1320_v36  ;;  %v16622_v58 = vrot.slane %v12420_v44, 4 }
 0x15a   : > { %16621 = vst [vmem:[#allocation54_spill] sm:$0xff] %v12572_v0  ;;  %v12576_v27 = vpop.permute.xlu0 %1298  ;;  %v1334_v47 = vsel %vm1325_vm4, %v1305_v45, %v1333_v39  ;;  %v811_v0 = vrot.slane %v12303_v20, 4  ;;  %v1070_v45 = vsel %vm434_vm1, %v1060_v51, %v16623_v42  ;;  %v10549_v39 = vcombine.high %v1199_v48, %v1207_v15 }
 0x15b   : > { %v16496_v46 = vrot.slane %v12576_v27, 4  ;;  %3209 = vrot.lane.b32.xlu1 %v12371_v9, %s11730_s23  ;;  %v10557_v38 = vcombine.high %v1326_v41, %v1334_v47  ;;  %v10556_v13 = vcombine.low %v1326_v41, %v1334_v47  ;;  %v1079_v55 = vsel %vm434_vm1, %v1065_v21, %v16622_v58 }
 0x15c   : > { %3201 = vrot.lane.b32.xlu0 %v12340_v16, %s11730_s23  ;;  %v938_v47 = vrot.slane %v12365_v35, 4  ;;  %v16624_v51 = vrot.slane %v12460_v3, 4  ;;  %v16625_v21 = vrot.slane %v12464_v14, 4  ;;  %v1080_v58 = vsel %vm1071_vm5, %v12410_v34, %v1079_v55 }
 0x15d   : > { %1931 = vmatprep.subr.bf16.mxu0 %v10557_v38  ;;  %v12600_v12 = vpop.permute.xlu1 %1308  ;;  %v16626_v38 = vrot.slane %v12499_v7, 4  ;;  %v16627_v41 = vrot.slane %v12334_v18, 4  ;;  %v16628_v55 = vrot.slane %v12377_v5, 4 }
 0x15e   : > { %v1208_v2 = vsel %vm434_vm1, %v16625_v21, %v16624_v51  ;;  %v1321_v54 = vrot.slane %v12600_v12, 4  ;;  %1932 = vmatpush1.bf16.msra.mxu0 %v10556_v13  ;;  %v12608_v16 = vpop.permute.xlu0 %1302  ;;  %v16500_v51 = vrot.slane %v12375_v1, 4  ;;  %v1072_v13 = vsel %vm1071_vm5, %v12396_v31, %v1070_v45 }
 0x15f   : > { %v1327_v42 = vsel %vm434_vm1, %v16626_v38, %v16496_v46  ;;  %v943_v9 = vsel %vm434_vm1, %v933_v19, %v16627_v41  ;;  %1933 = vmatprep.subr.bf16.mxu0 %v10549_v39  ;;  %3076 = vrot.lane.b32.xlu1 %v12361_v23, %s11724_s4  ;;  %v952_v34 = vsel %vm434_vm1, %v938_v47, %v16628_v55  ;;  %v16501_v21 = vrot.slane %v12404_v25, 4 }
 0x160   : > { %3211 = vrot.lane.b32.xlu0 %v12390_v24, %s11730_s23  ;;  %v10548_v38 = vcombine.low %v1199_v48, %v1207_v15  ;;  %v1335_v19 = vsel %vm434_vm1, %v1320_v36, %v1321_v54  ;;  %v16629_v31 = vrot.slane %v12434_v61, 4  ;;  %v1209_v41 = vsel %vm1198_vm3, %v12464_v14, %v1208_v2 }
 0x161   : > { %v12641_v47 = vpop.permute.xlu1 %1312  ;;  %v10541_v39 = vcombine.high %v1072_v13, %v1080_v58  ;;  %v1328_v24 = vsel %vm1325_vm4, %v12499_v7, %v1327_v42  ;;  %v1336_v15 = vsel %vm1325_vm4, %v12538_v43, %v1335_v19  ;;  %v16630_v36 = vrot.slane %v12418_v26, 4 }
 0x162   : > { %v1200_v45 = vsel %vm434_vm1, %v16629_v31, %v16495_v22  ;;  %v16631_v48 = vrot.slane %v12420_v44, 4  ;;  %1934 = vmatpush1.bf16.msra.mxu0 %v10548_v38  ;;  %v12652_v31 = vpop.permute.xlu0 %1310  ;;  %v10559_v22 = vcombine.high %v1328_v24, %v1336_v15  ;;  %v10558_v14 = vcombine.low %v1328_v24, %v1336_v15 }
 0x163   : > { %v953_v2 = vsel %vm944_vm6, %v12365_v35, %v952_v34  ;;  %v684_v46 = vrot.slane %v12252_v60, 4  ;;  %v945_v7 = vsel %vm944_vm6, %v12338_v28, %v943_v9  ;;  %1935 = vmatprep.subr.bf16.mxu0 %v10541_v39  ;;  %3086 = vrot.lane.b32.xlu1 %v12541_v29, %s11724_s4  ;;  %v1201_v43 = vsel %vm1198_vm3, %v12434_v61, %v1200_v45 }
 0x164   : > { %v1081_v55 = vsel %vm434_vm1, %v16631_v48, %v16630_v36  ;;  %v16632_v42 = vrot.slane %v12316_v8, 4  ;;  %v16502_v19 = vrot.slane %v12353_v32, 4  ;;  %3078 = vrot.lane.b32.xlu0 %v12357_v33, %s11724_s4  ;;  %1974 = vmatprep.subr.bf16.mxu1 %v10559_v22  ;;  %v10540_v35 = vcombine.low %v1072_v13, %v1080_v58 }
 0x165   : > { %v10551_v34 = vcombine.high %v1201_v43, %v1209_v41  ;;  %v16633_v28 = vrot.slane %v12394_v30, 4  ;;  %v680_v61 = vrot.slane %v12236_v56, 4  ;;  %v679_v45 = vrot.slane %v12238_v57, 4  ;;  %v12678_v39 = vpop.permute.xlu1 %1423  ;;  %1975 = vmatpush1.bf16.msra.mxu1 %v10558_v14 }
 0x166   : > { %v825_v38 = vsel %vm434_vm1, %v811_v0, %v16632_v42  ;;  %v1082_v0 = vsel %vm1071_vm5, %v12420_v44, %v1081_v55  ;;  %v10533_v22 = vcombine.high %v945_v7, %v953_v2  ;;  %v16497_v58 = vrot.slane %v12314_v4, 4  ;;  %1936 = vmatpush1.bf16.msra.mxu0 %v10540_v35  ;;  %v12686_v15 = vpop.permute.xlu0 %1421 }
 0x167   : > { %v1073_v9 = vsel %vm434_vm1, %v16633_v28, %v16501_v21  ;;  %v16634_v13 = vrot.slane %v12377_v5, 4  ;;  %1976 = vmatprep.subr.bf16.mxu1 %v10551_v34  ;;  %v826_v36 = vsel %vm817_vm7, %v12303_v20, %v825_v38  ;;  %v16635_v44 = vrot.slane %v12262_v63, 4  ;;  %2949 = vrot.lane.b32.xlu1 %v12361_v23, %s11725_s22 }
 0x168   : > { %v558_v55 = vrot.slane %v12222_v53, 4  ;;  %v818_v14 = vsel %vm817_vm7, %v12283_v11, %v12547_v40  ;;  %1937 = vmatprep.subr.bf16.mxu0 %v10533_v22  ;;  %v10550_v42 = vcombine.low %v1201_v43, %v1209_v41  ;;  %v1074_v35 = vsel %vm1071_vm5, %v12394_v30, %v1073_v9  ;;  %3088 = vrot.lane.b32.xlu0 %v12550_v37, %s11724_s4 }
 0x169   : > { %v954_v24 = vsel %vm434_vm1, %v16634_v13, %v16500_v51  ;;  %v698_v48 = vsel %vm434_vm1, %v684_v46, %v16635_v44  ;;  %v808_v20 = vrot.slane %v12295_v17, 4  ;;  %v10532_v46 = vcombine.low %v945_v7, %v953_v2  ;;  %v12715_v43 = vpop.permute.xlu1 %1427 }
 0x16a   : > { %v10543_v38 = vcombine.high %v1074_v35, %v1082_v0  ;;  %v16636_v34 = vrot.slane %v12334_v18, 4  ;;  %v559_v40 = vrot.slane %v12220_v52, 4  ;;  %v689_v41 = vsel %vm434_vm1, %v679_v45, %v680_v61  ;;  %1977 = vmatpush1.bf16.msra.mxu1 %v10550_v42  ;;  %v12724_v13 = vpop.permute.xlu0 %1425 }
 0x16b   : > { %v955_v30 = vsel %vm944_vm6, %v12377_v5, %v954_v24  ;;  %v10525_v2 = vcombine.high %v818_v14, %v826_v36  ;;  %v16498_v7 = vrot.slane %v12206_v49, 4  ;;  %v16499_v28 = vrot.slane %v12260_v62, 4  ;;  %1938 = vmatpush1.bf16.msra.mxu0 %v10532_v46  ;;  %16638 = vst [vmem:[#allocation55_spill] sm:$0xff] %v12724_v13  ;;  %2959 = vrot.lane.b32.xlu1 %v12541_v29, %s11725_s22 }
 0x16c   : > { %v946_v11 = vsel %vm434_vm1, %v16636_v34, %v16502_v19  ;;  %v16637_v9 = vrot.slane %v12316_v8, 4  ;;  %1978 = vmatprep.subr.bf16.mxu1 %v10543_v38  ;;  %v699_v5 = vsel %vm16528_vm8, %v12252_v60, %v698_v48  ;;  %v681_v45 = vrot.slane %v12246_v59, 4  ;;  %2951 = vrot.lane.b32.xlu0 %v12357_v33, %s11725_s22 }
 0x16d   : > { %1939 = vmatprep.subr.bf16.mxu0 %v10525_v2  ;;  %v10542_v24 = vcombine.low %v1074_v35, %v1082_v0  ;;  %v947_v44 = vsel %vm944_vm6, %v12334_v18, %v946_v11  ;;  %v16639_v42 = vrot.slane %v12212_v50, 4  ;;  %v691_v38 = vsel %vm16528_vm8, %v12238_v57, %v689_v41  ;;  %v16641_v35 = vld [vmem:[#allocation21_spill] sm:$0xff]  ;;  %v16643_v11 = vld [vmem:[#allocation22_spill] sm:$0xff] }
 0x16e   : > { %v827_v22 = vsel %vm434_vm1, %v16637_v9, %v16497_v58  ;;  %v10524_v60 = vcombine.low %v818_v14, %v826_v36  ;;  %v10535_v48 = vcombine.high %v947_v44, %v955_v30  ;;  %v16640_v34 = vrot.slane %v12281_v10, 4  ;;  %v1432_v14 = vpop.permute.xlu1 %1431  ;;  %v12760_v58 = vpop.permute.xlu0 %1429 }
 0x16f   : > { %v571_v46 = vsel %vm434_vm1, %v16639_v42, %v558_v55  ;;  %v16642_v18 = vrot.slane %v16641_v35, 4  ;;  %v16644_v2 = vrot.slane %v16643_v11, 4  ;;  %v573_v57 = vsel %vm434_vm1, %v558_v55, %v559_v40  ;;  %1979 = vmatpush1.bf16.msra.mxu1 %v10542_v24  ;;  %16646 = vst [vmem:[#allocation21_spill] sm:$0xff] %v12760_v58  ;;  %2822 = vrot.lane.b32.xlu1 %v12361_v23, %s11726_s14  ;;  %v16652_v24 = vld [vmem:[#allocation54_spill] sm:$0xff] }
 0x170   : > { %v819_v0 = vsel %vm434_vm1, %v16640_v34, %v808_v20  ;;  %v828_v36 = vsel %vm817_vm7, %v12316_v8, %v827_v22  ;;  %v10517_v41 = vcombine.high %v691_v38, %v699_v5  ;;  %v16645_v42 = vrot.slane %v12262_v63, 4  ;;  %1940 = vmatpush1.bf16.msra.mxu0 %v10524_v60  ;;  %1980 = vmatprep.subr.bf16.mxu1 %v10535_v48  ;;  %v16648_v22 = vld [vmem:[#allocation17_spill] sm:$0xff] }
 0x171   : > { %v562_v9 = vsel %vm434_vm1, %v16644_v2, %v16642_v18  ;;  %v572_v18 = vsel %vm16519_vm9, %v12212_v50, %v571_v46  ;;  %v16647_v8 = vrot.slane %v16641_v35, 4  ;;  %v10534_v2 = vcombine.low %v947_v44, %v955_v30  ;;  %2961 = vrot.lane.b32.xlu0 %v12550_v37, %s11725_s22 }
 0x172   : > { %v700_v34 = vsel %vm434_vm1, %v16645_v42, %v16499_v28  ;;  %1941 = vmatprep.subr.bf16.mxu0 %v10517_v41  ;;  %v820_v60 = vsel %vm817_vm7, %v12281_v10, %v819_v0  ;;  %v692_v50 = vsel %vm434_vm1, %v680_v61, %v681_v45  ;;  %v564_v46 = vsel %vm16519_vm9, %v16643_v11, %v562_v9  ;;  %v12791_v61 = vpop.permute.xlu1 %1435  ;;  %v16649_v9 = vld [vmem:[#allocation26_spill] sm:$0xff] }
 0x173   : > { %v565_v55 = vsel %vm434_vm1, %v16647_v8, %v16498_v7  ;;  %v12783_v48 = vsel %vm16519_vm9, %v12222_v53, %v573_v57  ;;  %v10516_v30 = vcombine.low %v691_v38, %v699_v5  ;;  %v10527_v44 = vcombine.high %v820_v60, %v828_v36  ;;  %1981 = vmatpush1.bf16.msra.mxu1 %v10534_v2  ;;  %v12794_v53 = vpop.permute.xlu0 %1433  ;;  %v16650_v2 = vld [vmem:[#allocation27_spill] sm:$0xff]  ;;  %v16658_v7 = vld [vmem:[#allocation48_spill] sm:$0xff] }
 0x174   : > { %v701_v10 = vsel %vm16528_vm8, %v12262_v63, %v700_v34  ;;  %v16503_v0 = vrot.slane %v12678_v39, 4  ;;  %v1441_v41 = vrot.slane %v12686_v15, 4  ;;  %v10509_v11 = vcombine.high %v564_v46, %v572_v18  ;;  %2832 = vrot.lane.b32.xlu1 %v12541_v29, %s11726_s14 }
 0x175   : > { %v16504_v42 = vrot.slane %v16649_v9, 4  ;;  %1942 = vmatpush1.bf16.msra.mxu0 %v10516_v30  ;;  %1982 = vmatprep.subr.bf16.mxu1 %v10527_v44  ;;  %v693_v5 = vsel %vm16528_vm8, %v12236_v56, %v692_v50  ;;  %v12800_v63 = vsel %vm16519_vm9, %v16641_v35, %v565_v55  ;;  %v16506_v38 = vrot.slane %v12652_v31, 4  ;;  %v16651_v50 = vld [vmem:[#allocation32_spill] sm:$0xff] }
 0x176   : > { %v1446_v57 = vrot.slane %v1432_v14, 4  ;;  %v1447_v34 = vrot.slane %v12794_v53, 4  ;;  %1943 = vmatprep.subr.bf16.mxu0 %v10509_v11  ;;  %v10526_v8 = vcombine.low %v820_v60, %v828_v36  ;;  %v16505_v30 = vrot.slane %v16650_v2, 4  ;;  %2824 = vrot.lane.b32.xlu0 %v12357_v33, %s11726_s14  ;;  %v12816_v28 = vpop.permute.xlu1 %1439  ;;  %v12820_v60 = vld [vmem:[%s11926_s10 + $0x28] sm:$0xff] }
 0x177   : > { %v10508_v56 = vcombine.low %v564_v46, %v572_v18  ;;  %v10519_v35 = vcombine.high %v693_v5, %v701_v10  ;;  %v10511_v55 = vcombine.high %v12800_v63, %v12783_v48  ;;  %v16508_v44 = vrot.slane %v16651_v50, 4  ;;  %16653 = vst [vmem:[#allocation22_spill] sm:$0xff] %v12816_v28  ;;  %16654 = vst [vmem:[#allocation17_spill] sm:$0xff] %v12820_v60  ;;  %v2378_v18 = vld [vmem:[%s11926_s10 + $0x30] sm:$0xff]  ;;  %v12824_v51 = vpop.permute.xlu0 %1437  ;;  %v16685_v28 = vld [vmem:[#allocation30_spill] sm:$0xff] }
 0x178   : > { %v1451_v11 = vsel %vm434_vm1, %v1441_v41, %v16503_v0  ;;  %1983 = vmatpush1.bf16.msra.mxu1 %v10526_v8  ;;  %v1460_v36 = vsel %vm434_vm1, %v1446_v57, %v1447_v34  ;;  %v10510_v41 = vcombine.low %v12800_v63, %v12783_v48  ;;  %v12834_v57 = vsel %vm434_vm1, %v559_v40, %v16504_v42  ;;  %v16655_v8 = vld [vmem:[#allocation44_spill] sm:$0xff]  ;;  %v16657_v46 = vld [vmem:[#allocation51_spill] sm:$0xff] }
 0x179   : > { %1944 = vmatpush1.bf16.msra.mxu0 %v10508_v56  ;;  %1984 = vmatprep.subr.bf16.mxu1 %v10519_v35  ;;  %v1461_v21 = vsel %vm16517_vm10, %v1432_v14, %v1460_v36  ;;  %v16656_v56 = vld [vmem:[#allocation47_spill] sm:$0xff]  ;;  %v16659_v35 = vcombine.high %v16657_v46, %v16658_v7  ;;  %v10518_v14 = vcombine.low %v693_v5, %v701_v10  ;;  %v2379_v5 = vld [vmem:[%s11926_s10 + $0x38] sm:$0xff]  ;;  %v1323_v19 = vrot.slane %v12641_v47, 4 }
 0x17a   : > { %2695 = vrot.lane.b32.xlu1 %v12361_v23, %s16531_s17  ;;  %v1337_v48 = vsel %vm434_vm1, %v1321_v54, %v16506_v38  ;;  %v12853_v40 = vsel %vm434_vm1, %v681_v45, %v16505_v30  ;;  %v1453_v63 = vsel %vm16517_vm10, %v12686_v15, %v1451_v11  ;;  %2834 = vrot.lane.b32.xlu0 %v12550_v37, %s11726_s14  ;;  %v2380_v54 = vld [vmem:[%s11926_s10 + $0x40] sm:$0xff]  ;;  %v16661_v15 = vrot.slane %v16652_v24, 4  ;;  %v12878_v38 = vpop.permute.xlu1 %2185  ;;  %v16664_v36 = vld [vmem:[#allocation40_spill] sm:$0xff] }
 0x17b   : > { %1945 = vmatprep.subr.bf16.mxu0 %v16659_v35  ;;  %v12861_v10 = vpack.c.bf16 %v2378_v18, %v12820_v60  ;;  %v12870_v45 = vsel %vm434_vm1, %v808_v20, %v16508_v44  ;;  %v16660_v35 = vld [vmem:[#allocation36_spill] sm:$0xff]  ;;  %v16662_v11 = vrot.slane %v12576_v27, 4  ;;  %16663 = vst [vmem:[#allocation26_spill] sm:$0xff] %v12878_v38  ;;  %v10565_v18 = vcombine.high %v1453_v63, %v1461_v21  ;;  %v12888_v42 = vpop.permute.xlu0 %2183 }
 0x17c   : > { %1985 = vmatpush1.bf16.msra.mxu1 %v10518_v14  ;;  %v16665_v60 = vrot.slane %v12791_v61, 4  ;;  %v16666_v44 = vcombine.low %v16657_v46, %v16658_v7  ;;  %16667 = vst [vmem:[#allocation27_spill] sm:$0xff] %v12888_v42  ;;  %v16668_v14 = vld [vmem:[#allocation43_spill] sm:$0xff]  ;;  %v16669_v0 = vrot.slane %v16655_v8, 4  ;;  %v16670_v47 = vrot.slane %v12444_v6, 4 }
 0x17d   : > { %v1329_v30 = vsel %vm434_vm1, %v16662_v11, %v16661_v15  ;;  %1986 = vmatprep.subr.bf16.mxu1 %v10511_v55  ;;  %v1338_v15 = vsel %vm1325_vm4, %v12600_v12, %v1337_v48  ;;  %v16671_v7 = vrot.slane %v16656_v56, 4  ;;  %v16673_v46 = vrot.slane %v12724_v13, 4  ;;  %v16683_v11 = vld [vmem:[#allocation49_spill] sm:$0xff] }
 0x17e   : > { %v1462_v20 = vsel %vm434_vm1, %v1447_v34, %v16665_v60  ;;  %1946 = vmatpush1.bf16.msra.mxu0 %v16666_v44  ;;  %v1202_v38 = vsel %vm434_vm1, %v16670_v47, %v16669_v0  ;;  %2705 = vrot.lane.b32.xlu1 %v12541_v29, %s16531_s17  ;;  %v16672_v34 = vrot.slane %v12460_v3, 4  ;;  %v12905_v44 = vpack.c.bf16 %v2380_v54, %v2379_v5 }
 0x17f   : > { %1961 = vmatprep.subr.bf16.mxu0 %v10565_v18  ;;  %v1330_v12 = vsel %vm1325_vm4, %v12576_v27, %v1329_v30  ;;  %v1318_v60 = vrot.slane %v12608_v16, 4  ;;  %2697 = vrot.lane.b32.xlu0 %v12357_v33, %s16531_s17  ;;  %v10564_v0 = vcombine.low %v1453_v63, %v1461_v21  ;;  %v16674_v48 = vrot.slane %v12678_v39, 4  ;;  %v16677_v27 = vld [vmem:[#allocation39_spill] sm:$0xff]  ;;  %v12927_v21 = vpop.permute.xlu1 %2189  ;;  %v16682_v30 = vld [vmem:[#allocation50_spill] sm:$0xff] }
 0x180   : > { %v1210_v55 = vsel %vm434_vm1, %v16672_v34, %v16671_v7  ;;  %v16675_v47 = vrot.slane %v16660_v35, 4  ;;  %v16676_v5 = vrot.slane %v12353_v32, 4  ;;  %v1463_v16 = vsel %vm16517_vm10, %v12794_v53, %v1462_v20  ;;  %1987 = vmatpush1.bf16.msra.mxu1 %v10510_v41  ;;  %v12932_v7 = vld [vmem:[%s16437_s1] ss:$8 sps:$4 sm:$0xff]   ;;  %v12943_v41 = vpop.permute.xlu0 %2187 }
 0x181   : > { %v1454_v18 = vsel %vm434_vm1, %v16674_v48, %v16673_v46  ;;  %v10561_v63 = vcombine.high %v1330_v12, %v1338_v15  ;;  %v16678_v34 = vrot.slane %v16664_v36, 4  ;;  %v16679_v46 = vrot.slane %v12404_v25, 4 }
 0x182   : > { %v12922_v54 = vsel %vm434_vm1, %v16676_v5, %v16675_v47  ;;  %v16680_v47 = vld [vmem:[#allocation46_spill] sm:$0xff]  ;;  %v16681_v53 = vrot.slane %v12652_v31, 4  ;;  %1962 = vmatpush2.bf16.msra.mxu0 %v10564_v0  ;;  %v16684_v42 = vcombine.high %v16682_v30, %v16683_v11  ;;  %v1211_v58 = vsel %vm1198_vm3, %v12460_v3, %v1210_v55  ;;  %2568 = vrot.lane.b32.xlu1 %v12361_v23, %s11728_s11 }
 0x183   : > { %v1075_v48 = vsel %vm434_vm1, %v16679_v46, %v16678_v34  ;;  %v1196_v5 = vrot.slane %v16680_v47, 4  ;;  %v1203_v34 = vsel %vm1198_vm3, %v12444_v6, %v1202_v38  ;;  %2017 = vmatprep.subr.bf16.mxu0 %v10561_v63  ;;  %v16686_v0 = vrot.slane %v16668_v14, 4  ;;  %v16688_v47 = vld [vmem:[#allocation45_spill] sm:$0xff]  ;;  %2707 = vrot.lane.b32.xlu0 %v12550_v37, %s16531_s17  ;;  %v16690_v38 = vld [vmem:[#allocation35_spill] sm:$0xff] }
 0x184   : > { %v1339_v20 = vsel %vm434_vm1, %v16681_v53, %v1323_v19  ;;  %1988 = vmatprep.subr.bf16.mxu1 %v16684_v42  ;;  %v1455_v19 = vsel %vm16517_vm10, %v12678_v39, %v1454_v18  ;;  %v16687_v46 = vrot.slane %v12418_v26, 4  ;;  %v1191_v3 = vrot.slane %v16688_v47, 4  ;;  %v12971_v18 = vpop.permute.xlu1 %2193  ;;  %v2192_v63 = vpop.permute.xlu0 %2191 }
 0x185   : > { %v16689_v55 = vrot.slane %v16652_v24, 4  ;;  %v10560_v6 = vcombine.low %v1330_v12, %v1338_v15  ;;  %v10567_v23 = vcombine.high %v1455_v19, %v1463_v16  ;;  %v1340_v39 = vsel %vm1325_vm4, %v12652_v31, %v1339_v20  ;;  %1964 = vmatmul.mubr.bf16.vlgmr.msra.gmra.mxu0 %v12932_v7 }
 0x186   : > { %v1083_v42 = vsel %vm434_vm1, %v16687_v46, %v16686_v0  ;;  %v16691_v0 = vcombine.low %v16682_v30, %v16683_v11  ;;  %v10553_v46 = vcombine.high %v1203_v34, %v1211_v58  ;;  %v16692_v15 = vrot.slane %v16677_v27, 4  ;;  %2578 = vrot.lane.b32.xlu1 %v12541_v29, %s11728_s11 }
 0x187   : > { %v1331_v53 = vsel %vm434_vm1, %v16689_v55, %v1318_v60  ;;  %v16693_v12 = vrot.slane %v12375_v1, 4  ;;  %v1076_v47 = vsel %vm1071_vm5, %v12404_v25, %v1075_v48  ;;  %v16694_v55 = vld [vmem:[#allocation42_spill] sm:$0xff]  ;;  %v16695_v20 = vrot.slane %v16656_v56, 4  ;;  %2018 = vmatpush1.bf16.msra.mxu0 %v10560_v6  ;;  %v16696_v48 = vld [vmem:[#allocation41_spill] sm:$0xff]  ;;  %2570 = vrot.lane.b32.xlu0 %v12357_v33, %s11728_s11 }
 0x188   : > { %1989 = vmatpush1.bf16.msra.mxu1 %v16691_v0  ;;  %v1069_v31 = vrot.slane %v16694_v55, 4  ;;  %v1084_v11 = vsel %vm1071_vm5, %v12418_v26, %v1083_v42  ;;  %v1332_v30 = vsel %vm1325_vm4, %v16652_v24, %v1331_v53  ;;  %v16520_v0 = vrot.slane %v12927_v21, 4  ;;  %2019 = vmatprep.subr.bf16.mxu0 %v10553_v46  ;;  %v16698_v24 = vld [vmem:[#allocation31_spill] sm:$0xff] }
 0x189   : > { %v956_v60 = vsel %vm434_vm1, %v16693_v12, %v16692_v15  ;;  %v1212_v13 = vsel %vm434_vm1, %v16695_v20, %v1196_v5  ;;  %2004 = vmatprep.subr.bf16.mxu1 %v10567_v23  ;;  %v2207_v15 = vrot.slane %v2192_v63, 4  ;;  %v10566_v25 = vcombine.low %v1455_v19, %v1463_v16  ;;  %10574 = vmatprep.mubr.msk.bf16.mxu0 %vm1927_vm0, %v16698_v24  ;;  %v13008_v19 = vpop.permute.xlu1 %2197 }
 0x18a   : > { %v1064_v12 = vrot.slane %v16696_v48, 4  ;;  %v16697_v5 = vrot.slane %v16655_v8, 4  ;;  %v10552_v23 = vcombine.low %v1203_v34, %v1211_v58  ;;  %v10563_v26 = vcombine.high %v1332_v30, %v1340_v39  ;;  %2441 = vrot.lane.b32.xlu1 %v12861_v10, %s11729_s13 }
 0x18b   : > { %v1213_v42 = vsel %vm1198_vm3, %v16656_v56, %v1212_v13  ;;  %v2220_v16 = vsel %vm434_vm1, %v16520_v0, %v2207_v15  ;;  %v10545_v53 = vcombine.high %v1076_v47, %v1084_v11  ;;  %v16699_v58 = vrot.slane %v16690_v38, 4  ;;  %v13019_v56 = vpop.permute.xlu0 %2195  ;;  %v16703_v15 = vld [vmem:[#allocation20_spill] sm:$0xff]  ;;  %2580 = vrot.lane.b32.xlu0 %v12550_v37, %s11728_s11 }
 0x18c   : > { %v1204_v6 = vsel %vm434_vm1, %v16697_v5, %v1191_v3  ;;  %2005 = vmatpush2.bf16.msra.mxu1 %v10566_v25  ;;  %v16700_v34 = vrot.slane %v12314_v4, 4  ;;  %v16701_v3 = vld [vmem:[#allocation38_spill] sm:$0xff]  ;;  %v16702_v46 = vrot.slane %v16668_v14, 4  ;;  %2020 = vmatpush1.bf16.msra.mxu0 %v10552_v23  ;;  %v13023_v55 = vsel %vm2214_vm11, %v12927_v21, %v2220_v16  ;;  %v16704_v23 = vld [vmem:[#allocation37_spill] sm:$0xff] }
 0x18d   : > { %v942_v63 = vrot.slane %v16701_v3, 4  ;;  %2060 = vmatprep.subr.bf16.mxu1 %v10563_v26  ;;  %v957_v20 = vsel %vm944_vm6, %v12375_v1, %v956_v60  ;;  %v432_v25 = vrot.slane %v16703_v15, 4  ;;  %v949_v48 = vsel %vm944_vm6, %v12353_v32, %v12922_v54  ;;  %2021 = vmatprep.subr.bf16.mxu0 %v10545_v53  ;;  %v16706_v54 = vld [vmem:[#allocation23_spill] sm:$0xff] }
 0x18e   : > { %v829_v33 = vsel %vm434_vm1, %v16700_v34, %v16699_v58  ;;  %v1085_v13 = vsel %vm434_vm1, %v16702_v46, %v1069_v31  ;;  %v1205_v31 = vsel %vm1198_vm3, %v16655_v8, %v1204_v6  ;;  %v10562_v5 = vcombine.low %v1332_v30, %v1340_v39  ;;  %v2202_v30 = vpop.permute.xlu1 %2201  ;;  %2451 = vrot.lane.b32.xlu1 %v12541_v29, %s11729_s13 }
 0x18f   : > { %v937_v26 = vrot.slane %v16704_v23, 4  ;;  %v16705_v16 = vrot.slane %v16664_v36, 4  ;;  %v10544_v60 = vcombine.low %v1076_v47, %v1084_v11  ;;  %2007 = vmatmul.mubr.bf16.vlgmr.msra.gmra.mxu1 %v12932_v7  ;;  %v10555_v32 = vcombine.high %v1205_v31, %v1213_v42  ;;  %v16709_v11 = vld [vmem:[#allocation34_spill] sm:$0xff]  ;;  %2443 = vrot.lane.b32.xlu0 %v12905_v44, %s11729_s13 }
 0x190   : > { %v555_v8 = vrot.slane %v16706_v54, 4  ;;  %v1086_v39 = vsel %vm1071_vm5, %v16668_v14, %v1085_v13  ;;  %2061 = vmatpush1.bf16.msra.mxu1 %v10562_v5  ;;  %v10537_v6 = vcombine.high %v949_v48, %v957_v20  ;;  %v16707_v53 = vrot.slane %v16685_v28, 4  ;;  %10575 = vmatprep.mubr.msk.bf16.mxu1 %vm1927_vm0, %v16698_v24  ;;  %v13056_v14 = vpop.permute.xlu0 %2199 }
 0x191   : > { %v1077_v1 = vsel %vm434_vm1, %v16705_v16, %v1064_v12  ;;  %v16708_v58 = vrot.slane %v12260_v62, 4  ;;  %v815_v12 = vrot.slane %v16709_v11, 4  ;;  %v16710_v34 = vrot.slane %v16677_v27, 4  ;;  %2022 = vmatpush1.bf16.msra.mxu0 %v10544_v60  ;;  %2062 = vmatprep.subr.bf16.mxu1 %v10555_v32 }
 0x192   : > { %v2212_v46 = vrot.slane %v2202_v30, 4  ;;  %v830_v13 = vsel %vm817_vm7, %v12314_v4, %v829_v33  ;;  %v822_v5 = vsel %vm817_vm7, %v12295_v17, %v12870_v45  ;;  %v1078_v24 = vsel %vm1071_vm5, %v16664_v36, %v1077_v1  ;;  %2023 = vmatprep.subr.bf16.mxu0 %v10537_v6  ;;  %v16715_v6 = vld [vmem:[#allocation28_spill] sm:$0xff]  ;;  %2324 = vrot.lane.b32.xlu1 %v12541_v29, %s11723_s16 }
 0x193   : > { %v702_v47 = vsel %vm434_vm1, %v16708_v58, %v16707_v53  ;;  %v958_v3 = vsel %vm434_vm1, %v16710_v34, %v942_v63  ;;  %v10554_v23 = vcombine.low %v1205_v31, %v1213_v42  ;;  %v16521_v16 = vrot.slane %v13056_v14, 4  ;;  %v16711_v63 = vld [vmem:[#allocation33_spill] sm:$0xff]  ;;  %v13082_v31 = vpop.permute.xlu1 %2312  ;;  %2453 = vrot.lane.b32.xlu0 %v12550_v37, %s11729_s13 }
 0x194   : > { %v810_v60 = vrot.slane %v16711_v63, 4  ;;  %v16712_v32 = vrot.slane %v16660_v35, 4  ;;  %v10536_v33 = vcombine.low %v949_v48, %v957_v20  ;;  %v10547_v17 = vcombine.high %v1078_v24, %v1086_v39  ;;  %v16713_v20 = vld [vmem:[#allocation29_spill] sm:$0xff] }
 0x195   : > { %v695_v36 = vsel %vm16528_vm8, %v12246_v59, %v12853_v40  ;;  %v959_v45 = vsel %vm944_vm6, %v16677_v27, %v958_v3  ;;  %v2228_v42 = vsel %vm434_vm1, %v16521_v16, %v2212_v46  ;;  %2063 = vmatpush1.bf16.msra.mxu1 %v10554_v23  ;;  %v688_v48 = vrot.slane %v16713_v20, 4  ;;  %v13092_v40 = vpop.permute.xlu0 %2310 }
 0x196   : > { %v950_v4 = vsel %vm434_vm1, %v16712_v32, %v937_v26  ;;  %v10529_v26 = vcombine.high %v822_v5, %v830_v13  ;;  %v16714_v1 = vrot.slane %v16690_v38, 4  ;;  %v13090_v59 = vsel %vm2214_vm11, %v13056_v14, %v2228_v42  ;;  %2024 = vmatpush1.bf16.msra.mxu0 %v10536_v33  ;;  %2064 = vmatprep.subr.bf16.mxu1 %v10547_v17  ;;  %v16720_v32 = vld [vmem:[#allocation24_spill] sm:$0xff]  ;;  %v16721_v33 = vld [vmem:[#allocation25_spill] sm:$0xff] }
 0x197   : > { %v703_v27 = vsel %vm16528_vm8, %v12260_v62, %v702_v47  ;;  %v683_v53 = vrot.slane %v16715_v6, 4  ;;  %v951_v58 = vsel %vm944_vm6, %v16660_v35, %v950_v4  ;;  %v10546_v11 = vcombine.low %v1078_v24, %v1086_v39  ;;  %v13117_v23 = vpop.permute.xlu1 %2316  ;;  %3203 = vrot.lane.b32.xlu1 %v12861_v10, %s11730_s23  ;;  %2326 = vrot.lane.b32.xlu0 %v12550_v37, %s11723_s16 }
 0x198   : > { %v831_v30 = vsel %vm434_vm1, %v16714_v1, %v815_v12  ;;  %2025 = vmatprep.subr.bf16.mxu0 %v10529_v26  ;;  %v16716_v34 = vrot.slane %v16651_v50, 4  ;;  %v10528_v46 = vcombine.low %v822_v5, %v830_v13  ;;  %v10539_v62 = vcombine.high %v951_v58, %v959_v45  ;;  %v16718_v5 = vld [vmem:[#allocation18_spill] sm:$0xff]  ;;  %v16739_v12 = vld [vmem:[#allocation27_spill] sm:$0xff] }
 0x199   : > { %v16717_v39 = vrot.slane %v12206_v49, 4  ;;  %v832_v24 = vsel %vm817_vm7, %v16690_v38, %v831_v30  ;;  %2065 = vmatpush1.bf16.msra.mxu1 %v10546_v11  ;;  %v10521_v13 = vcombine.high %v695_v36, %v703_v27  ;;  %v16719_v63 = vrot.slane %v16718_v5, 4  ;;  %v13129_v38 = vpop.permute.xlu0 %2314 }
 0x19a   : > { %v823_v3 = vsel %vm434_vm1, %v16716_v34, %v810_v60  ;;  %v556_v4 = vrot.slane %v16720_v32, 4  ;;  %v561_v17 = vrot.slane %v16721_v33, 4  ;;  %v16722_v42 = vrot.slane %v16685_v28, 4  ;;  %2026 = vmatpush1.bf16.msra.mxu0 %v10528_v46  ;;  %2066 = vmatprep.subr.bf16.mxu1 %v10539_v62 }
 0x19b   : > { %v567_v47 = vsel %vm434_vm1, %v16717_v39, %v555_v8  ;;  %v448_v60 = vsel %vm434_vm1, %v16719_v63, %v432_v25  ;;  %v576_v20 = vsel %vm16519_vm9, %v12220_v52, %v12834_v57  ;;  %v16723_v1 = vrot.slane %v16650_v2, 4  ;;  %2027 = vmatprep.subr.bf16.mxu0 %v10521_v13  ;;  %3213 = vrot.lane.b32.xlu1 %v12541_v29, %s11730_s23  ;;  %v16728_v63 = vld [vmem:[#allocation16_spill] sm:$0xff] }
 0x19c   : > { %v704_v26 = vsel %vm434_vm1, %v16722_v42, %v688_v48  ;;  %v824_v6 = vsel %vm817_vm7, %v16651_v50, %v823_v3  ;;  %v10538_v11 = vcombine.low %v951_v58, %v959_v45  ;;  %v1449_v34 = vrot.slane %v12824_v51, 4  ;;  %v16724_v48 = vld [vmem:[#allocation19_spill] sm:$0xff]  ;;  %v13153_v58 = vpop.permute.xlu1 %2320  ;;  %3205 = vrot.lane.b32.xlu0 %v12905_v44, %s11730_s23  ;;  %v16730_v29 = vld [vmem:[#allocation52_spill] sm:$0xff] }
 0x19d   : > { %v696_v30 = vsel %vm434_vm1, %v16723_v1, %v683_v53  ;;  %v433_v46 = vrot.slane %v16724_v48, 4  ;;  %v568_v62 = vsel %vm16519_vm9, %v12206_v49, %v567_v47  ;;  %v10520_v52 = vcombine.low %v695_v36, %v703_v27  ;;  %v13148_v53 = vld [vmem:[%s11926_s10 + $0x48] sm:$0xff]  ;;  %v13165_v39 = vpop.permute.xlu0 %2318  ;;  %v4818_v42 = vld [vmem:[%s11926_s10 + $0x10] sm:$0xff]  ;;  %v13203_v48 = vld [vmem:[%s11926_s10 + $0xa0] sm:$0xff] }
 0x19e   : > { %v10531_v57 = vcombine.high %v824_v6, %v832_v24  ;;  %v705_v50 = vsel %vm16528_vm8, %v16685_v28, %v704_v26  ;;  %v1444_v45 = vrot.slane %v12715_v43, 4  ;;  %2067 = vmatpush1.bf16.msra.mxu1 %v10538_v11  ;;  %v10513_v10 = vcombine.high %v568_v62, %v576_v20  ;;  %v4819_v26 = vld [vmem:[%s11926_s10 + $0x18] sm:$0xff] }
 0x19f   : > { %v449_v3 = vsel %vm16518_vm2, %v16718_v5, %v448_v60  ;;  %v569_v49 = vsel %vm434_vm1, %v555_v8, %v556_v4  ;;  %v16725_v36 = vrot.slane %v16649_v9, 4  ;;  %v697_v28 = vsel %vm16528_vm8, %v16650_v2, %v696_v30  ;;  %2028 = vmatpush1.bf16.msra.mxu0 %v10520_v52  ;;  %v16731_v4 = vld [vmem:[#allocation15_spill] sm:$0xff] }
 0x1a0   : > { %2068 = vmatprep.subr.bf16.mxu1 %v10531_v57  ;;  %v10530_v47 = vcombine.low %v824_v6, %v832_v24  ;;  %2029 = vmatprep.subr.bf16.mxu0 %v10513_v10  ;;  %v13171_v8 = vpack.c.bf16 %v13148_v53, %v13148_v53  ;;  %v16726_v13 = vrot.slane %v12791_v61, 4  ;;  %v16727_v5 = vrot.slane %v16648_v22, 4  ;;  %v13200_v6 = vpop.permute.xlu1 %3074 }
 0x1a1   : > { %v577_v27 = vsel %vm434_vm1, %v16725_v36, %v561_v17  ;;  %v16729_v60 = vrot.slane %v16728_v63, 4  ;;  %v10512_v32 = vcombine.low %v568_v62, %v576_v20  ;;  %v441_v33 = vsel %vm16518_vm2, %v16731_v4, %v16730_v29  ;;  %v16732_v20 = vld [vmem:[#allocation55_spill] sm:$0xff]  ;;  %3215 = vrot.lane.b32.xlu0 %v12550_v37, %s11730_s23 }
 0x1a2   : > { %v1464_v2 = vsel %vm434_vm1, %v16726_v13, %v1449_v34  ;;  %v10523_v17 = vcombine.high %v697_v28, %v705_v50  ;;  %v450_v1 = vsel %vm434_vm1, %v432_v25, %v433_v46  ;;  %v578_v22 = vsel %vm16519_vm9, %v16649_v9, %v577_v27  ;;  %2069 = vmatpush1.bf16.msra.mxu1 %v10530_v47  ;;  %v3073_v9 = vpop.permute.xlu0 %3072  ;;  %v16734_v46 = vld [vmem:[#allocation22_spill] sm:$0xff]  ;;  %v4828_v47 = vld [vmem:[%s11926_s10 + $0x70] sm:$0xff] }
 0x1a3   : > { %v442_v24 = vsel %vm434_vm1, %v16729_v60, %v16727_v5  ;;  %v16733_v30 = vrot.slane %v16732_v20, 4  ;;  %v10505_v11 = vcombine.high %v441_v33, %v449_v3  ;;  %v570_v62 = vsel %vm16519_vm9, %v16706_v54, %v569_v49  ;;  %2030 = vmatpush1.bf16.msra.mxu0 %v10512_v32  ;;  %3080 = vrot.lane.b32.xlu1 %v13171_v8, %s11724_s4 }
 0x1a4   : > { %v10522_v52 = vcombine.low %v697_v28, %v705_v50  ;;  %2070 = vmatprep.subr.bf16.mxu1 %v10523_v17  ;;  %v1465_v25 = vsel %vm16517_vm10, %v12791_v61, %v1464_v2  ;;  %v1450_v57 = vrot.slane %v16734_v46, 4  ;;  %v3093_v10 = vrot.slane %v13200_v6, 4  ;;  %v4827_v28 = vld [vmem:[%s11926_s10 + $0x68] sm:$0xff]  ;;  %v16735_v2 = vld [vmem:[#allocation21_spill] sm:$0xff]  ;;  %v13228_v60 = vpop.permute.xlu1 %3084 }
 0x1a5   : > { %v1456_v44 = vsel %vm434_vm1, %v16733_v30, %v1444_v45  ;;  %v3092_v36 = vrot.slane %v3073_v9, 4  ;;  %2031 = vmatprep.subr.bf16.mxu0 %v10505_v11  ;;  %v13213_v54 = vpack.c.bf16 %v4819_v26, %v4818_v42  ;;  %v10504_v49 = vcombine.low %v441_v33, %v449_v3  ;;  %v13231_v3 = vld [vmem:[%s11926_s10 + $0x20] sm:$0xff] }
 0x1a6   : > { %v1457_v50 = vsel %vm16517_vm10, %v16732_v20, %v1456_v44  ;;  %v10515_v61 = vcombine.high %v570_v62, %v578_v22  ;;  %v13221_v27 = vpack.c.bf16 %v13203_v48, %v13203_v48  ;;  %v451_v13 = vsel %vm16518_vm2, %v16703_v15, %v450_v1  ;;  %2071 = vmatpush1.bf16.msra.mxu1 %v10522_v52  ;;  %v3083_v33 = vpop.permute.xlu0 %3082  ;;  %v16736_v1 = vld [vmem:[#allocation17_spill] sm:$0xff]  ;;  %v13261_v44 = vld [vmem:[%s11926_s10 + $0x78] sm:$0xff] }
 0x1a7   : > { %v1445_v5 = vrot.slane %v16735_v2, 4  ;;  %v10569_v32 = vcombine.high %v1457_v50, %v1465_v25  ;;  %v443_v37 = vsel %vm16518_vm2, %v16728_v63, %v442_v24  ;;  %v10514_v29 = vcombine.low %v570_v62, %v578_v22  ;;  %2032 = vmatpush1.bf16.msra.mxu0 %v10504_v49  ;;  %4882 = vrot.lane.b32.xlu1 %v13213_v54, %s11731_s15 }
 0x1a8   : > { %v3098_v4 = vrot.slane %v13228_v60, 4  ;;  %2072 = vmatprep.subr.bf16.mxu1 %v10515_v61  ;;  %v1466_v15 = vsel %vm434_vm1, %v1449_v34, %v1450_v57  ;;  %v3102_v17 = vsel %vm434_vm1, %v3092_v36, %v3093_v10  ;;  %v3097_v42 = vrot.slane %v3083_v33, 4  ;;  %3090 = vrot.lane.b32.xlu0 %v13221_v27, %s11724_s4  ;;  %v13258_v30 = vpop.permute.xlu1 %2947  ;;  %v13279_v61 = vld [vmem:[%s16437_s1 + $0x14] ss:$8 sps:$4 sm:$0xff]   ;;  %s11735_s4 = smov 85  }
 0x1a9   : > { %2047 = vmatprep.subr.bf16.mxu0 %v10569_v32  ;;  %v13244_v63 = vpack.c.bf16 %v4828_v47, %v4827_v28  ;;  %v10568_v24 = vcombine.low %v1457_v50, %v1465_v25  ;;  %v10507_v26 = vcombine.high %v443_v37, %v451_v13  ;;  %v13250_v34 = vpack.c.bf16 %v16736_v1, %v13231_v3 }
 0x1aa   : > { %v1458_v22 = vsel %vm434_vm1, %v1444_v45, %v1445_v5  ;;  %v3111_v20 = vsel %vm434_vm1, %v3097_v42, %v3098_v4  ;;  %2073 = vmatpush1.bf16.msra.mxu1 %v10514_v29  ;;  %v1467_v11 = vsel %vm16517_vm10, %v12824_v51, %v1466_v15  ;;  %v3104_v62 = vsel %vm3103_vm12, %v3073_v9, %v3102_v17  ;;  %v2946_v25 = vpop.permute.xlu0 %2945  ;;  %v16737_v51 = vld [vmem:[#allocation53_spill] sm:$0xff] }
 0x1ab   : > { %v3112_v52 = vsel %vm3103_vm12, %v3083_v33, %v3111_v20  ;;  %2048 = vmatpush2.bf16.msra.mxu0 %v10568_v24  ;;  %2074 = vmatprep.subr.bf16.mxu1 %v10507_v26  ;;  %v2966_v46 = vrot.slane %v13258_v30, 4  ;;  %v2965_v57 = vrot.slane %v2946_v25, 4  ;;  %v10506_v50 = vcombine.low %v443_v37, %v451_v13 }
 0x1ac   : > { %v10726_v45 = vcombine.low %v3104_v62, %v3112_v52  ;;  %4892 = vrot.lane.b32.xlu1 %v13244_v63, %s11731_s15  ;;  %v10727_v36 = vcombine.high %v3104_v62, %v3112_v52  ;;  %v1459_v49 = vsel %vm16517_vm10, %v12715_v43, %v1458_v22  ;;  %4884 = vrot.lane.b32.xlu0 %v13250_v34, %s11731_s15  ;;  %v13281_v28 = vpop.permute.xlu1 %2957  ;;  %vm2595_vm10 = vcmask 465920  }
 0x1ad   : > { %v11419_v9 = vpack.c.bf16 %v16737_v51, %v13261_v44  ;;  %v10571_v47 = vcombine.high %v1459_v49, %v1467_v11  ;;  %v2971_v13 = vrot.slane %v13281_v28, 4  ;;  %v2975_v2 = vsel %vm434_vm1, %v2965_v57, %v2966_v46 }
 0x1ae   : > { %3709 = vmatprep.subr.bf16.mxu0 %v10727_v36  ;;  %2050 = vmatmul.mubr.bf16.vlgmr.msra.gmra.mxu0 %v12932_v7  ;;  %v2956_v43 = vpop.permute.xlu0 %2955  ;;  %v10570_v32 = vcombine.low %v1459_v49, %v1467_v11  ;;  %v2977_v33 = vsel %vm2976_vm13, %v2946_v25, %v2975_v2  ;;  %vm2468_vm2 = vcmask 531456   ;;  %v2203_v35 = vrot.slane %v16739_v12, 4 }
 0x1af   : > { %2075 = vmatpush1.bf16.msra.mxu1 %v10506_v50  ;;  %3710 = vmatpush1.bf16.msra.mxu0 %v10726_v45  ;;  %v2970_v5 = vrot.slane %v2956_v43, 4  ;;  %vm2341_vm9 = vcmask 539648   ;;  %vm3230_vm8 = vcmask 367616  }
 0x1b0   : > { %2090 = vmatprep.subr.bf16.mxu1 %v10571_v47  ;;  %2953 = vrot.lane.b32.xlu1 %v13171_v8, %s11725_s22  ;;  %v13296_v29 = vpop.permute.xlu1 %2820 }
 0x1b1   : > { %4894 = vrot.lane.b32.xlu0 %v11419_v9, %s11731_s15  ;;  %10742 = vmatprep.mubr.msk.bf16.mxu0 %vm1927_vm0, %v13279_v61  ;;  %v2984_v37 = vsel %vm434_vm1, %v2970_v5, %v2971_v13  ;;  %v2839_v24 = vrot.slane %v13296_v29, 4 }
 0x1b2   : > { %v2985_v15 = vsel %vm2976_vm13, %v2956_v43, %v2984_v37  ;;  %v2819_v17 = vpop.permute.xlu0 %2818 }
 0x1b3   : > { %2091 = vmatpush2.bf16.msra.mxu1 %v10570_v32  ;;  %v10718_v42 = vcombine.low %v2977_v33, %v2985_v15  ;;  %v2838_v26 = vrot.slane %v2819_v17, 4  ;;  %v10719_v1 = vcombine.high %v2977_v33, %v2985_v15  ;;  %v4576_v15 = vld [vmem:[%s11926_s10 + $0x80] sm:$0xff] }
 0x1b4   : > { %4755 = vrot.lane.b32.xlu1 %v13213_v54, %s11732_s19  ;;  %v13305_v22 = vpop.permute.xlu1 %2830 }
 0x1b5   : > { %2963 = vrot.lane.b32.xlu0 %v13221_v27, %s11725_s22  ;;  %3711 = vmatprep.subr.bf16.mxu0 %v10719_v1  ;;  %v2844_v20 = vrot.slane %v13305_v22, 4  ;;  %v2848_v62 = vsel %vm434_vm1, %v2838_v26, %v2839_v24  ;;  %s11733_s22 = smov 83  }
 0x1b6   : > { %2093 = vmatmul.mubr.bf16.vlgmr.msra.gmra.mxu1 %v12932_v7  ;;  %3712 = vmatpush1.bf16.msra.mxu0 %v10718_v42  ;;  %v2829_v11 = vpop.permute.xlu0 %2828  ;;  %v2850_v45 = vsel %vm2849_vm14, %v2819_v17, %v2848_v62 }
 0x1b7   : > { %10743 = vmatprep.mubr.msk.bf16.mxu1 %vm1927_vm0, %v13279_v61  ;;  %v2843_v52 = vrot.slane %v2829_v11, 4 }
 0x1b8   : > { %4765 = vrot.lane.b32.xlu1 %v13244_v63, %s11732_s19  ;;  %v13321_v25 = vpop.permute.xlu1 %2693 }
 0x1b9   : > { %4757 = vrot.lane.b32.xlu0 %v13250_v34, %s11732_s19  ;;  %v2857_v7 = vsel %vm434_vm1, %v2843_v52, %v2844_v20  ;;  %v16526_v49 = vrot.slane %v13321_v25, 4 }
 0x1ba   : > { %v2858_v57 = vsel %vm2849_vm14, %v2829_v11, %v2857_v7  ;;  %v2692_v36 = vpop.permute.xlu0 %2691  ;;  %v13353_v7 = vpack.c.bf16 %v4576_v15, %v13261_v44 }
 0x1bb   : > { %v10710_v50 = vcombine.low %v2850_v45, %v2858_v57  ;;  %v2711_v51 = vrot.slane %v2692_v36, 4  ;;  %v10711_v47 = vcombine.high %v2850_v45, %v2858_v57 }
 0x1bc   : > { %2826 = vrot.lane.b32.xlu1 %v13171_v8, %s11726_s14  ;;  %v13329_v43 = vpop.permute.xlu1 %2703 }
 0x1bd   : > { %4767 = vrot.lane.b32.xlu0 %v11419_v9, %s11732_s19  ;;  %3713 = vmatprep.subr.bf16.mxu0 %v10711_v47  ;;  %v16525_v2 = vrot.slane %v13329_v43, 4  ;;  %v2721_v32 = vsel %vm434_vm1, %v2711_v51, %v16526_v49 }
 0x1be   : > { %3714 = vmatpush1.bf16.msra.mxu0 %v10710_v50  ;;  %v2702_v5 = vpop.permute.xlu0 %2701  ;;  %v2723_v17 = vsel %vm16542_vm15, %v2692_v36, %v2721_v32 }
 0x1bf   : > { %v2716_v37 = vrot.slane %v2702_v5, 4 }
 0x1c0   : > { %4628 = vrot.lane.b32.xlu1 %v13213_v54, %s11733_s22  ;;  %v13342_v33 = vpop.permute.xlu1 %2566 }
 0x1c1   : > { %2836 = vrot.lane.b32.xlu0 %v13221_v27, %s11726_s14  ;;  %v2730_v9 = vsel %vm434_vm1, %v2716_v37, %v16525_v2  ;;  %v16524_v11 = vrot.slane %v13342_v33, 4  ;;  %s11734_s14 = smov 84   ;;  %v2335_v2 = vrot.slane %v13153_v58, 4 }
 0x1c2   : > { %v2731_v42 = vsel %vm16542_vm15, %v2702_v5, %v2730_v9  ;;  %v2565_v26 = vpop.permute.xlu0 %2564 }
 0x1c3   : > { %v10702_v1 = vcombine.low %v2723_v17, %v2731_v42  ;;  %v2584_v62 = vrot.slane %v2565_v26, 4  ;;  %v10703_v52 = vcombine.high %v2723_v17, %v2731_v42 }
 0x1c4   : > { %4638 = vrot.lane.b32.xlu1 %v13244_v63, %s11733_s22  ;;  %v13355_v45 = vpop.permute.xlu1 %2576 }
 0x1c5   : > { %4630 = vrot.lane.b32.xlu0 %v13250_v34, %s11733_s22  ;;  %3715 = vmatprep.subr.bf16.mxu0 %v10703_v52  ;;  %v16523_v57 = vrot.slane %v13355_v45, 4  ;;  %v2594_v50 = vsel %vm434_vm1, %v2584_v62, %v16524_v11  ;;  %v2331_v62 = vrot.slane %v13082_v31, 4  ;;  %v2330_v52 = vrot.slane %v13092_v40, 4 }
 0x1c6   : > { %3716 = vmatpush1.bf16.msra.mxu0 %v10702_v1  ;;  %v2575_v36 = vpop.permute.xlu0 %2574  ;;  %v2596_v5 = vsel %vm2595_vm10, %v2565_v26, %v2594_v50  ;;  %v2209_v26 = vrot.slane %v13019_v56, 4 }
 0x1c7   : > { %v2589_v51 = vrot.slane %v2575_v36, 4 }
 0x1c8   : > { %2699 = vrot.lane.b32.xlu1 %v13171_v8, %s16531_s17  ;;  %v13368_v47 = vpop.permute.xlu1 %2439 }
 0x1c9   : > { %4640 = vrot.lane.b32.xlu0 %v13353_v7, %s11733_s22  ;;  %v2603_v44 = vsel %vm434_vm1, %v2589_v51, %v16523_v57  ;;  %v16522_v15 = vrot.slane %v13368_v47, 4 }
 0x1ca   : > { %v2604_v32 = vsel %vm2595_vm10, %v2575_v36, %v2603_v44  ;;  %v2438_v37 = vpop.permute.xlu0 %2437 }
 0x1cb   : > { %v10694_v9 = vcombine.low %v2596_v5, %v2604_v32  ;;  %v2457_v17 = vrot.slane %v2438_v37, 4  ;;  %v10695_v42 = vcombine.high %v2596_v5, %v2604_v32  ;;  %v2208_v5 = vrot.slane %v12971_v18, 4  ;;  %v16738_v32 = vld [vmem:[#allocation26_spill] sm:$0xff] }
 0x1cc   : > { %4501 = vrot.lane.b32.xlu1 %v13213_v54, %s11734_s14  ;;  %v13377_v1 = vpop.permute.xlu1 %2449 }
 0x1cd   : > { %2709 = vrot.lane.b32.xlu0 %v13221_v27, %s16531_s17  ;;  %3717 = vmatprep.subr.bf16.mxu0 %v10695_v42  ;;  %v16527_v36 = vrot.slane %v13377_v1, 4  ;;  %v2467_v51 = vsel %vm434_vm1, %v2457_v17, %v16522_v15  ;;  %v2204_v42 = vrot.slane %v16738_v32, 4  ;;  %v2340_v17 = vsel %vm434_vm1, %v2330_v52, %v2331_v62  ;;  %s11738_s17 = smov 95  }
 0x1ce   : > { %3718 = vmatpush1.bf16.msra.mxu0 %v10694_v9  ;;  %v2448_v50 = vpop.permute.xlu0 %2447  ;;  %v2469_v16 = vsel %vm2468_vm2, %v2438_v37, %v2467_v51  ;;  %v2222_v11 = vsel %vm434_vm1, %v2208_v5, %v2209_v26  ;;  %v2342_v51 = vsel %vm2341_vm9, %v13092_v40, %v2340_v17 }
 0x1cf   : > { %v2462_v44 = vrot.slane %v2448_v50, 4  ;;  %v2213_v37 = vsel %vm434_vm1, %v2203_v35, %v2204_v42 }
 0x1d0   : > { %4511 = vrot.lane.b32.xlu1 %v13244_v63, %s11734_s14  ;;  %v3200_v0 = vpop.permute.xlu1 %3199  ;;  %v2215_v40 = vsel %vm2214_vm11, %v16739_v12, %v2213_v37 }
 0x1d1   : > { %4503 = vrot.lane.b32.xlu0 %v13250_v34, %s11734_s14  ;;  %v2476_v9 = vsel %vm434_vm1, %v2462_v44, %v16527_v36 }
 0x1d2   : > { %v2477_v15 = vsel %vm2468_vm2, %v2448_v50, %v2476_v9  ;;  %v13401_v57 = vpop.permute.xlu0 %2322 }
 0x1d3   : > { %v10686_v49 = vcombine.low %v2469_v16, %v2477_v15  ;;  %v16529_v44 = vrot.slane %v13401_v57, 4  ;;  %v10687_v36 = vcombine.high %v2469_v16, %v2477_v15  ;;  %v2223_v15 = vsel %vm2214_vm11, %v12971_v18, %v2222_v11 }
 0x1d4   : > { %2572 = vrot.lane.b32.xlu1 %v13171_v8, %s11728_s11  ;;  %v3210_v52 = vpop.permute.xlu1 %3209  ;;  %v10671_v9 = vcombine.high %v2215_v40, %v2223_v15  ;;  %v10670_v37 = vcombine.low %v2215_v40, %v2223_v15 }
 0x1d5   : > { %4513 = vrot.lane.b32.xlu0 %v13353_v7, %s11734_s14  ;;  %3719 = vmatprep.subr.bf16.mxu0 %v10687_v36  ;;  %v2349_v50 = vsel %vm434_vm1, %v2335_v2, %v16529_v44  ;;  %v3224_v11 = vrot.slane %v3210_v52, 4 }
 0x1d6   : > { %3720 = vmatpush1.bf16.msra.mxu0 %v10686_v49  ;;  %v13420_v5 = vpop.permute.xlu0 %3201  ;;  %v2350_v16 = vsel %vm2341_vm9, %v13153_v58, %v2349_v50  ;;  %v3219_v49 = vrot.slane %v3200_v0, 4 }
 0x1d7   : > { %v16530_v35 = vrot.slane %v13420_v5, 4  ;;  %v10678_v36 = vcombine.low %v2342_v51, %v2350_v16  ;;  %v10679_v2 = vcombine.high %v2342_v51, %v2350_v16 }
 0x1d8   : > { %4374 = vrot.lane.b32.xlu1 %v13213_v54, %s11735_s4  ;;  %v3077_v58 = vpop.permute.xlu1 %3076 }
 0x1d9   : > { %2582 = vrot.lane.b32.xlu0 %v13221_v27, %s11728_s11  ;;  %3721 = vmatprep.subr.bf16.mxu0 %v10679_v2  ;;  %v3094_v17 = vrot.slane %v3077_v58, 4  ;;  %v3229_v12 = vsel %vm434_vm1, %v3219_v49, %v16530_v35  ;;  %s11746_s11 = smov 90  }
 0x1da   : > { %3722 = vmatpush1.bf16.msra.mxu0 %v10678_v36  ;;  %v13433_v18 = vpop.permute.xlu0 %3211 }
 0x1db   : > { %v3225_v50 = vrot.slane %v13433_v18, 4  ;;  %3723 = vmatprep.subr.bf16.mxu0 %v10671_v9  ;;  %v3231_v9 = vsel %vm3230_vm8, %v3200_v0, %v3229_v12  ;;  %v3105_v15 = vsel %vm434_vm1, %v3093_v10, %v3094_v17  ;;  %v13468_v12 = vld [vmem:[%s16437_s1 + $0x10] ss:$8 sps:$4 sm:$0xff]  }
 0x1dc   : > { %4384 = vrot.lane.b32.xlu1 %v13244_v63, %s11735_s4  ;;  %v3087_v51 = vpop.permute.xlu1 %3086 }
 0x1dd   : > { %4376 = vrot.lane.b32.xlu0 %v13250_v34, %s11735_s4  ;;  %v3238_v16 = vsel %vm434_vm1, %v3224_v11, %v3225_v50  ;;  %v3099_v36 = vrot.slane %v3087_v51, 4  ;;  %v3106_v11 = vsel %vm3103_vm12, %v13200_v6, %v3105_v15 }
 0x1de   : > { %3724 = vmatpush1.bf16.msra.mxu0 %v10670_v37  ;;  %v13446_v2 = vpop.permute.xlu0 %3078  ;;  %v3239_v44 = vsel %vm3230_vm8, %v3210_v52, %v3238_v16 }
 0x1df   : > { %v3095_v40 = vrot.slane %v13446_v2, 4  ;;  %v10734_v49 = vcombine.low %v3231_v9, %v3239_v44  ;;  %v10735_v35 = vcombine.high %v3231_v9, %v3239_v44  ;;  %v3113_v0 = vsel %vm434_vm1, %v3098_v4, %v3099_v36 }
 0x1e0   : > { %2445 = vrot.lane.b32.xlu1 %v13171_v8, %s11729_s13  ;;  %v2950_v52 = vpop.permute.xlu1 %2949  ;;  %v3114_v10 = vsel %vm3103_vm12, %v13228_v60, %v3113_v0 }
 0x1e1   : > { %4386 = vrot.lane.b32.xlu0 %v13353_v7, %s11735_s4  ;;  %3739 = vmatprep.subr.bf16.mxu0 %v10735_v35  ;;  %v2967_v44 = vrot.slane %v2950_v52, 4  ;;  %v10728_v16 = vcombine.low %v3106_v11, %v3114_v10  ;;  %v10729_v9 = vcombine.high %v3106_v11, %v3114_v10  ;;  %v3107_v6 = vsel %vm434_vm1, %v3094_v17, %v3095_v40 }
 0x1e2   : > { %3740 = vmatpush2.bf16.msra.mxu0 %v10734_v49  ;;  %v13470_v37 = vpop.permute.xlu0 %3088  ;;  %v3108_v0 = vsel %vm3103_vm12, %v3077_v58, %v3107_v6 }
 0x1e3   : > { %v16535_v4 = vrot.slane %v13470_v37, 4  ;;  %3752 = vmatprep.subr.bf16.mxu1 %v10729_v9  ;;  %v2978_v17 = vsel %vm434_vm1, %v2966_v46, %v2967_v44 }
 0x1e4   : > { %4247 = vrot.lane.b32.xlu1 %v13213_v54, %s11736_s21  ;;  %v2960_v60 = vpop.permute.xlu1 %2959  ;;  %3753 = vmatpush1.bf16.msra.mxu1 %v10728_v16  ;;  %v2979_v46 = vsel %vm2976_vm13, %v13258_v30, %v2978_v17 }
 0x1e5   : > { %2455 = vrot.lane.b32.xlu0 %v13221_v27, %s11729_s13  ;;  %v3115_v35 = vsel %vm434_vm1, %v3099_v36, %v16535_v4  ;;  %3742 = vmatmul.mubr.bf16.vlgmr.msra.gmra.mxu0 %v13468_v12  ;;  %v2972_v15 = vrot.slane %v2960_v60, 4  ;;  %s11737_s13 = smov 94  }
 0x1e6   : > { %v13484_v49 = vpop.permute.xlu0 %2951  ;;  %v3116_v11 = vsel %vm3103_vm12, %v3087_v51, %v3115_v35  ;;  %10744 = vmatprep.mubr.msk.bf16.mxu0 %vm1927_vm0, %v13279_v61 }
 0x1e7   : > { %v2968_v10 = vrot.slane %v13484_v49, 4  ;;  %v10730_v36 = vcombine.low %v3108_v0, %v3116_v11  ;;  %v10731_v16 = vcombine.high %v3108_v0, %v3116_v11  ;;  %v2986_v58 = vsel %vm434_vm1, %v2971_v13, %v2972_v15 }
 0x1e8   : > { %4257 = vrot.lane.b32.xlu1 %v13244_v63, %s11736_s21  ;;  %v2823_v51 = vpop.permute.xlu1 %2822  ;;  %v2987_v9 = vsel %vm2976_vm13, %v13281_v28, %v2986_v58 }
 0x1e9   : > { %4249 = vrot.lane.b32.xlu0 %v13250_v34, %s11736_s21  ;;  %3795 = vmatprep.subr.bf16.mxu0 %v10731_v16  ;;  %v2840_v6 = vrot.slane %v2823_v51, 4  ;;  %v10720_v0 = vcombine.low %v2979_v46, %v2987_v9  ;;  %v10721_v11 = vcombine.high %v2979_v46, %v2987_v9  ;;  %v2980_v13 = vsel %vm434_vm1, %v2967_v44, %v2968_v10 }
 0x1ea   : > { %3796 = vmatpush1.bf16.msra.mxu0 %v10730_v36  ;;  %v13505_v35 = vpop.permute.xlu0 %2961  ;;  %v2981_v16 = vsel %vm2976_vm13, %v2950_v52, %v2980_v13 }
 0x1eb   : > { %v2973_v4 = vrot.slane %v13505_v35, 4  ;;  %3754 = vmatprep.subr.bf16.mxu1 %v10721_v11  ;;  %v2851_v44 = vsel %vm434_vm1, %v2839_v24, %v2840_v6 }
 0x1ec   : > { %2328 = vrot.lane.b32.xlu1 %v13221_v27, %s11723_s16  ;;  %v2833_v30 = vpop.permute.xlu1 %2832  ;;  %3755 = vmatpush1.bf16.msra.mxu1 %v10720_v0  ;;  %v2852_v24 = vsel %vm2849_vm14, %v13296_v29, %v2851_v44  ;;  %s11745_s16 = smov 100  }
 0x1ed   : > { %4259 = vrot.lane.b32.xlu0 %v13353_v7, %s11736_s21  ;;  %v2988_v28 = vsel %vm434_vm1, %v2972_v15, %v2973_v4  ;;  %v2845_v17 = vrot.slane %v2833_v30, 4 }
 0x1ee   : > { %v13518_v36 = vpop.permute.xlu0 %2824  ;;  %v2989_v58 = vsel %vm2976_vm13, %v2960_v60, %v2988_v28 }
 0x1ef   : > { %v16541_v46 = vrot.slane %v13518_v36, 4  ;;  %v10722_v9 = vcombine.low %v2981_v16, %v2989_v58  ;;  %v10723_v0 = vcombine.high %v2981_v16, %v2989_v58  ;;  %v2859_v52 = vsel %vm434_vm1, %v2844_v20, %v2845_v17 }
 0x1f0   : > { %4122 = vrot.lane.b32.xlu1 %v13250_v34, %s11737_s13  ;;  %v2696_v60 = vpop.permute.xlu1 %2695  ;;  %v2860_v15 = vsel %vm2849_vm14, %v13305_v22, %v2859_v52 }
 0x1f1   : > { %4120 = vrot.lane.b32.xlu0 %v13213_v54, %s11737_s13  ;;  %3797 = vmatprep.subr.bf16.mxu0 %v10723_v0  ;;  %v2713_v11 = vrot.slane %v2696_v60, 4  ;;  %v10712_v28 = vcombine.low %v2852_v24, %v2860_v15  ;;  %v10713_v16 = vcombine.high %v2852_v24, %v2860_v15  ;;  %v2853_v20 = vsel %vm434_vm1, %v2840_v6, %v16541_v46 }
 0x1f2   : > { %3798 = vmatpush1.bf16.msra.mxu0 %v10722_v9  ;;  %v13537_v13 = vpop.permute.xlu0 %2834  ;;  %v2854_v0 = vsel %vm2849_vm14, %v2823_v51, %v2853_v20  ;;  %v16740_v24 = vrot.slane %v13321_v25, 4 }
 0x1f3   : > { %v16536_v58 = vrot.slane %v13537_v13, 4  ;;  %3756 = vmatprep.subr.bf16.mxu1 %v10713_v16 }
 0x1f4   : > { %4132 = vrot.lane.b32.xlu1 %v13353_v7, %s11737_s13  ;;  %v2706_v29 = vpop.permute.xlu1 %2705  ;;  %3757 = vmatpush1.bf16.msra.mxu1 %v10712_v28  ;;  %v2724_v6 = vsel %vm434_vm1, %v16740_v24, %v2713_v11 }
 0x1f5   : > { %4130 = vrot.lane.b32.xlu0 %v13244_v63, %s11737_s13  ;;  %v2861_v22 = vsel %vm434_vm1, %v2845_v17, %v16536_v58  ;;  %v2718_v44 = vrot.slane %v2706_v29, 4  ;;  %v16741_v17 = vrot.slane %v13329_v43, 4  ;;  %v2725_v20 = vsel %vm16542_vm15, %v13321_v25, %v2724_v6  ;;  %v4948_v25 = vld [vmem:[%s11926_s10 + $0x28] sm:$0xff] }
 0x1f6   : > { %v13550_v9 = vpop.permute.xlu0 %2697  ;;  %v2862_v52 = vsel %vm2849_vm14, %v2833_v30, %v2861_v22 }
 0x1f7   : > { %v16537_v15 = vrot.slane %v13550_v9, 4  ;;  %v10714_v28 = vcombine.low %v2854_v0, %v2862_v52  ;;  %v10715_v16 = vcombine.high %v2854_v0, %v2862_v52  ;;  %v2732_v51 = vsel %vm434_vm1, %v16741_v17, %v2718_v44 }
 0x1f8   : > { %3995 = vrot.lane.b32.xlu1 %v13250_v34, %s11738_s17  ;;  %v2569_v30 = vpop.permute.xlu1 %2568  ;;  %v2733_v22 = vsel %vm16542_vm15, %v13329_v43, %v2732_v51 }
 0x1f9   : > { %3993 = vrot.lane.b32.xlu0 %v13213_v54, %s11738_s17  ;;  %3799 = vmatprep.subr.bf16.mxu0 %v10715_v16  ;;  %v2586_v24 = vrot.slane %v2569_v30, 4  ;;  %v10704_v0 = vcombine.low %v2725_v20, %v2733_v22  ;;  %v10705_v52 = vcombine.high %v2725_v20, %v2733_v22  ;;  %v2726_v16 = vsel %vm434_vm1, %v2713_v11, %v16537_v15 }
 0x1fa   : > { %3800 = vmatpush1.bf16.msra.mxu0 %v10714_v28  ;;  %v13569_v34 = vpop.permute.xlu0 %2707  ;;  %v2727_v51 = vsel %vm16542_vm15, %v2696_v60, %v2726_v16  ;;  %v16742_v11 = vrot.slane %v13342_v33, 4  ;;  %v16743_v60 = vrot.slane %v13355_v45, 4  ;;  %v2205_v16 = vrot.slane %v12943_v41, 4 }
 0x1fb   : > { %v16539_v58 = vrot.slane %v13569_v34, 4  ;;  %3758 = vmatprep.subr.bf16.mxu1 %v10705_v52 }
 0x1fc   : > { %4005 = vrot.lane.b32.xlu1 %v13353_v7, %s11738_s17  ;;  %v2579_v43 = vpop.permute.xlu1 %2578  ;;  %3759 = vmatpush1.bf16.msra.mxu1 %v10704_v0  ;;  %v2597_v22 = vsel %vm434_vm1, %v16742_v11, %v2586_v24  ;;  %v4824_v11 = vld [vmem:[%s11926_s10 + $0x40] sm:$0xff] }
 0x1fd   : > { %4003 = vrot.lane.b32.xlu0 %v13244_v63, %s11738_s17  ;;  %v2734_v6 = vsel %vm434_vm1, %v2718_v44, %v16539_v58  ;;  %v2591_v28 = vrot.slane %v2579_v43, 4  ;;  %v11424_v44 = vpack.c.bf16 %v4948_v25, %v13231_v3  ;;  %v11416_v46 = vpack.c.bf16 %v13148_v53, %v4824_v11 }
 0x1fe   : > { %v13583_v17 = vpop.permute.xlu0 %2570  ;;  %v2735_v20 = vsel %vm16542_vm15, %v2706_v29, %v2734_v6 }
 0x1ff   : > { %v16538_v52 = vrot.slane %v13583_v17, 4  ;;  %v10706_v0 = vcombine.low %v2727_v51, %v2735_v20  ;;  %v10707_v15 = vcombine.high %v2727_v51, %v2735_v20  ;;  %v2605_v29 = vsel %vm434_vm1, %v16743_v60, %v2591_v28  ;;  %v4822_v60 = vld [vmem:[%s11926_s10 + $0x30] sm:$0xff] }
 0x200   : > { %3217 = vrot.lane.b32.xlu1 %v13221_v27, %s11730_s23  ;;  %v13600_v6 = vpop.permute.xlu1 %2441  ;;  %v2598_v27 = vsel %vm2595_vm10, %v13342_v33, %v2597_v22  ;;  %v2606_v51 = vsel %vm2595_vm10, %v13355_v45, %v2605_v29  ;;  %v2210_v45 = vrot.slane %v13008_v19, 4  ;;  %v2216_v22 = vsel %vm434_vm1, %v2204_v42, %v2205_v16  ;;  %v4823_v29 = vld [vmem:[%s11926_s10 + $0x38] sm:$0xff] }
 0x201   : > { %3207 = vrot.lane.b32.xlu0 %v13171_v8, %s11730_s23  ;;  %3801 = vmatprep.subr.bf16.mxu0 %v10707_v15  ;;  %v2459_v3 = vrot.slane %v13600_v6, 4  ;;  %v10696_v25 = vcombine.low %v2598_v27, %v2606_v51  ;;  %v10697_v20 = vcombine.high %v2598_v27, %v2606_v51  ;;  %s11739_s23 = smov 73   ;;  %v2599_v33 = vsel %vm434_vm1, %v2586_v24, %v16538_v52 }
 0x202   : > { %3802 = vmatpush1.bf16.msra.mxu0 %v10706_v0  ;;  %v13607_v8 = vpop.permute.xlu0 %2580  ;;  %v2332_v0 = vrot.slane %v13129_v38, 4  ;;  %v2600_v51 = vsel %vm2595_vm10, %v2569_v30, %v2599_v33  ;;  %v16744_v42 = vrot.slane %v13368_v47, 4  ;;  %v13645_v30 = vsel %vm2214_vm11, %v16738_v32, %v2216_v22 }
 0x203   : > { %v16540_v15 = vrot.slane %v13607_v8, 4  ;;  %3760 = vmatprep.subr.bf16.mxu1 %v10697_v20  ;;  %v13652_v33 = vpack.c.bf16 %v4823_v29, %v4822_v60  ;;  %v4698_v60 = vld [vmem:[%s11926_s10 + $0x48] sm:$0xff] }
 0x204   : > { %5011 = vrot.lane.b32.xlu1 %v11424_v44, %s11739_s23  ;;  %v2452_v44 = vpop.permute.xlu1 %2451  ;;  %3761 = vmatpush1.bf16.msra.mxu1 %v10696_v25  ;;  %v2470_v52 = vsel %vm434_vm1, %v16744_v42, %v2459_v3  ;;  %v13637_v25 = vld [vmem:[%s11926_s10 + $0x98] sm:$0xff] }
 0x205   : > { %5009 = vrot.lane.b32.xlu0 %v13213_v54, %s11739_s23  ;;  %v2607_v24 = vsel %vm434_vm1, %v2591_v28, %v16540_v15  ;;  %v2464_v27 = vrot.slane %v2452_v44, 4  ;;  %v2471_v32 = vsel %vm2468_vm2, %v13368_v47, %v2470_v52 }
 0x206   : > { %v13629_v54 = vpop.permute.xlu0 %2443  ;;  %v2608_v20 = vsel %vm2595_vm10, %v2579_v43, %v2607_v24  ;;  %v2224_v43 = vsel %vm434_vm1, %v2209_v26, %v2210_v45  ;;  %v11421_v26 = vpack.c.bf16 %v13203_v48, %v13637_v25  ;;  %v2333_v48 = vrot.slane %v13117_v23, 4 }
 0x207   : > { %v2460_v58 = vrot.slane %v13629_v54, 4  ;;  %v10698_v28 = vcombine.low %v2600_v51, %v2608_v20  ;;  %v10699_v15 = vcombine.high %v2600_v51, %v2608_v20  ;;  %v4831_v51 = vld [vmem:[%s11926_s10 + $0x88] sm:$0xff]  ;;  %v4832_v20 = vld [vmem:[%s11926_s10 + $0x90] sm:$0xff] }
 0x208   : > { %5021 = vrot.lane.b32.xlu1 %v13353_v7, %s11739_s23  ;;  %v16745_v7 = vrot.slane %v13377_v1, 4  ;;  %v2325_v53 = vpop.permute.xlu1 %2324 }
 0x209   : > { %5019 = vrot.lane.b32.xlu0 %v13244_v63, %s11739_s23  ;;  %3803 = vmatprep.subr.bf16.mxu0 %v10699_v15  ;;  %v2343_v63 = vsel %vm434_vm1, %v2331_v62, %v2332_v0  ;;  %v2337_v29 = vrot.slane %v2325_v53, 4  ;;  %v2472_v47 = vsel %vm434_vm1, %v2459_v3, %v2460_v58  ;;  %v13679_v62 = vpack.c.bf16 %v4832_v20, %v4831_v51 }
 0x20a   : > { %v2478_v24 = vsel %vm434_vm1, %v16745_v7, %v2464_v27  ;;  %3804 = vmatpush1.bf16.msra.mxu0 %v10698_v28  ;;  %v13669_v42 = vpop.permute.xlu0 %2453  ;;  %v16746_v28 = vrot.slane %v13401_v57, 4  ;;  %v13686_v3 = vpack.c.bf16 %v4698_v60, %v4824_v11  ;;  %v2473_v20 = vsel %vm2468_vm2, %v13600_v6, %v2472_v47  ;;  %v4707_v47 = vld [vmem:[%s11926_s10 + $0xa0] sm:$0xff] }
 0x20b   : > { %v2479_v22 = vsel %vm2468_vm2, %v13377_v1, %v2478_v24  ;;  %v2225_v1 = vsel %vm2214_vm11, %v13019_v56, %v2224_v43  ;;  %v2465_v52 = vrot.slane %v13669_v42, 4  ;;  %v16747_v56 = vrot.slane %v13056_v14, 4 }
 0x20c   : > { %v10688_v15 = vcombine.low %v2471_v32, %v2479_v22  ;;  %v10689_v7 = vcombine.high %v2471_v32, %v2479_v22  ;;  %4888 = vrot.lane.b32.xlu1 %v11416_v46, %s11731_s15  ;;  %v2351_v24 = vsel %vm434_vm1, %v16746_v28, %v2337_v29  ;;  %v13691_v32 = vpop.permute.xlu1 %3203  ;;  %v2344_v46 = vsel %vm2341_vm9, %v13082_v31, %v2343_v63 }
 0x20d   : > { %4886 = vrot.lane.b32.xlu0 %v13652_v33, %s11731_s15  ;;  %v2226_v43 = vsel %vm434_vm1, %v2210_v45, %v16747_v56  ;;  %v2352_v51 = vsel %vm2341_vm9, %v13401_v57, %v2351_v24  ;;  %v2480_v11 = vsel %vm434_vm1, %v2464_v27, %v2465_v52  ;;  %v3221_v14 = vrot.slane %v13691_v32, 4 }
 0x20e   : > { %3762 = vmatprep.subr.bf16.mxu1 %v10689_v7  ;;  %v13703_v45 = vpop.permute.xlu0 %2326  ;;  %v10680_v22 = vcombine.low %v2344_v46, %v2352_v51  ;;  %v10681_v60 = vcombine.high %v2344_v46, %v2352_v51  ;;  %v2345_v31 = vsel %vm434_vm1, %v2332_v0, %v2333_v48  ;;  %v16748_v27 = vrot.slane %v12927_v21, 4 }
 0x20f   : > { %3763 = vmatpush1.bf16.msra.mxu1 %v10688_v15  ;;  %v2481_v15 = vsel %vm2468_vm2, %v2452_v44, %v2480_v11  ;;  %v2338_v57 = vrot.slane %v13703_v45, 4  ;;  %v10673_v44 = vcombine.high %v13645_v30, %v2225_v1  ;;  %v10672_v0 = vcombine.low %v13645_v30, %v2225_v1 }
 0x210   : > { %4898 = vrot.lane.b32.xlu1 %v11421_v26, %s11731_s15  ;;  %v10690_v6 = vcombine.low %v2473_v20, %v2481_v15  ;;  %v10691_v63 = vcombine.high %v2473_v20, %v2481_v15  ;;  %v2218_v7 = vsel %vm434_vm1, %v2205_v16, %v16748_v27  ;;  %3764 = vmatprep.subr.bf16.mxu1 %v10681_v60  ;;  %v3214_v28 = vpop.permute.xlu1 %3213  ;;  %v16749_v1 = vrot.slane %v13420_v5, 4 }
 0x211   : > { %4896 = vrot.lane.b32.xlu0 %v13679_v62, %s11731_s15  ;;  %v2353_v21 = vsel %vm434_vm1, %v2337_v29, %v2338_v57  ;;  %v2227_v26 = vsel %vm2214_vm11, %v13008_v19, %v2226_v43  ;;  %v2346_v16 = vsel %vm2341_vm9, %v13129_v38, %v2345_v31  ;;  %v3226_v24 = vrot.slane %v3214_v28, 4 }
 0x212   : > { %3805 = vmatprep.subr.bf16.mxu0 %v10691_v63  ;;  %v13728_v56 = vpop.permute.xlu0 %3205  ;;  %v2354_v30 = vsel %vm2341_vm9, %v2325_v53, %v2353_v21  ;;  %v3232_v46 = vsel %vm434_vm1, %v16749_v1, %v3221_v14  ;;  %v13738_v38 = vpack.c.bf16 %v4707_v47, %v13637_v25  ;;  %v2219_v43 = vsel %vm2214_vm11, %v12943_v41, %v2218_v7 }
 0x213   : > { %3765 = vmatpush1.bf16.msra.mxu1 %v10680_v22  ;;  %3806 = vmatpush1.bf16.msra.mxu0 %v10690_v6  ;;  %v3222_v51 = vrot.slane %v13728_v56, 4  ;;  %v10682_v19 = vcombine.low %v2346_v16, %v2354_v30  ;;  %v10683_v29 = vcombine.high %v2346_v16, %v2354_v30  ;;  %v3240_v53 = vsel %vm434_vm1, %v3225_v50, %v3226_v24  ;;  %v13789_v30 = vld [vmem:[%s16437_s1 + $0x24] ss:$8 sps:$4 sm:$0xff]  }
 0x214   : > { %3766 = vmatprep.subr.bf16.mxu1 %v10673_v44  ;;  %4761 = vrot.lane.b32.xlu1 %v13686_v3, %s11732_s19  ;;  %v10675_v11 = vcombine.high %v2219_v43, %v2227_v26  ;;  %v3233_v22 = vsel %vm3230_vm8, %v13420_v5, %v3232_v46  ;;  %v3241_v25 = vsel %vm3230_vm8, %v13433_v18, %v3240_v53  ;;  %vm4913_vm11 = vcmask 605184  }
 0x215   : > { %4759 = vrot.lane.b32.xlu0 %v13652_v33, %s11732_s19  ;;  %3807 = vmatprep.subr.bf16.mxu0 %v10683_v29  ;;  %v3081_v20 = vpop.permute.xlu1 %3080  ;;  %v10736_v41 = vcombine.low %v3233_v22, %v3241_v25  ;;  %v10737_v15 = vcombine.high %v3233_v22, %v3241_v25  ;;  %v3234_v50 = vsel %vm434_vm1, %v3221_v14, %v3222_v51 }
 0x216   : > { %v13751_v60 = vpop.permute.xlu0 %3215  ;;  %v3096_v31 = vrot.slane %v3081_v20, 4  ;;  %v10674_v5 = vcombine.low %v2219_v43, %v2227_v26  ;;  %v3235_v7 = vsel %vm3230_vm8, %v13691_v32, %v3234_v50  ;;  %v16750_v26 = vrot.slane %v13470_v37, 4 }
 0x217   : > { %3767 = vmatpush1.bf16.msra.mxu1 %v10672_v0  ;;  %3808 = vmatpush1.bf16.msra.mxu0 %v10682_v19  ;;  %v3227_v6 = vrot.slane %v13751_v60, 4 }
 0x218   : > { %3809 = vmatprep.subr.bf16.mxu0 %v10675_v11  ;;  %4771 = vrot.lane.b32.xlu1 %v13738_v38, %s11732_s19  ;;  %v3109_v14 = vsel %vm434_vm1, %v3095_v40, %v3096_v31 }
 0x219   : > { %4769 = vrot.lane.b32.xlu0 %v13679_v62, %s11732_s19  ;;  %3782 = vmatprep.subr.bf16.mxu1 %v10737_v15  ;;  %v4883_v18 = vpop.permute.xlu1 %4882  ;;  %v3242_v63 = vsel %vm434_vm1, %v3226_v24, %v3227_v6  ;;  %v3110_v16 = vsel %vm3103_vm12, %v13446_v2, %v3109_v14 }
 0x21a   : > { %v3091_v27 = vpop.permute.xlu0 %3090  ;;  %v3243_v44 = vsel %vm3230_vm8, %v3214_v28, %v3242_v63  ;;  %v4902_v19 = vrot.slane %v4883_v18, 4 }
 0x21b   : > { %3783 = vmatpush2.bf16.msra.mxu1 %v10736_v41  ;;  %3810 = vmatpush1.bf16.msra.mxu0 %v10674_v5  ;;  %v3101_v47 = vrot.slane %v3091_v27, 4  ;;  %v10738_v0 = vcombine.low %v3235_v7, %v3243_v44  ;;  %v10739_v21 = vcombine.high %v3235_v7, %v3243_v44 }
 0x21c   : > { %4634 = vrot.lane.b32.xlu1 %v13686_v3, %s11733_s22 }
 0x21d   : > { %4632 = vrot.lane.b32.xlu0 %v13652_v33, %s11733_s22  ;;  %v3117_v32 = vsel %vm434_vm1, %v16750_v26, %v3101_v47  ;;  %3825 = vmatprep.subr.bf16.mxu0 %v10739_v21 }
 0x21e   : > { %3785 = vmatmul.mubr.bf16.vlgmr.msra.gmra.mxu1 %v13468_v12  ;;  %v4893_v28 = vpop.permute.xlu1 %4892  ;;  %v13780_v40 = vpop.permute.xlu0 %4884  ;;  %v3118_v24 = vsel %vm3103_vm12, %v13470_v37, %v3117_v32  ;;  %vm4786_vm12 = vcmask 613376  }
 0x21f   : > { %10745 = vmatprep.mubr.msk.bf16.mxu1 %vm1927_vm0, %v13279_v61  ;;  %3826 = vmatpush2.bf16.msra.mxu0 %v10738_v0  ;;  %v4903_v1 = vrot.slane %v13780_v40, 4  ;;  %v10732_v61 = vcombine.low %v3110_v16, %v3118_v24  ;;  %v10733_v46 = vcombine.high %v3110_v16, %v3118_v24  ;;  %v4907_v29 = vrot.slane %v4893_v28, 4 }
 0x220   : > { %4644 = vrot.lane.b32.xlu1 %v13738_v38, %s11733_s22 }
 0x221   : > { %4642 = vrot.lane.b32.xlu0 %v13679_v62, %s11733_s22  ;;  %3838 = vmatprep.subr.bf16.mxu1 %v10733_v46  ;;  %v4912_v20 = vsel %vm434_vm1, %v4902_v19, %v4903_v1  ;;  %v16751_v19 = vrot.slane %v13518_v36, 4 }
 0x222   : > { %v2954_v2 = vpop.permute.xlu1 %2953  ;;  %3828 = vmatmul.mubr.bf16.vlgmr.msra.gmra.mxu0 %v13468_v12  ;;  %3839 = vmatpush1.bf16.msra.mxu1 %v10732_v61  ;;  %v4914_v25 = vsel %vm4913_vm11, %v4883_v18, %v4912_v20 }
 0x223   : > { %v13797_v37 = vpop.permute.xlu0 %4894  ;;  %10912 = vmatprep.mubr.msk.bf16.mxu0 %vm1927_vm0, %v13789_v30  ;;  %v2969_v43 = vrot.slane %v2954_v2, 4 }
 0x224   : > { %v4908_v53 = vrot.slane %v13797_v37, 4  ;;  %4507 = vrot.lane.b32.xlu1 %v13686_v3, %s11734_s14 }
 0x225   : > { %4505 = vrot.lane.b32.xlu0 %v13652_v33, %s11734_s14  ;;  %v2982_v15 = vsel %vm434_vm1, %v2968_v10, %v2969_v43 }
 0x226   : > { %v4756_v12 = vpop.permute.xlu1 %4755  ;;  %v4921_v11 = vsel %vm434_vm1, %v4907_v29, %v4908_v53  ;;  %v2983_v10 = vsel %vm2976_vm13, %v13484_v49, %v2982_v15 }
 0x227   : > { %v2964_v22 = vpop.permute.xlu0 %2963  ;;  %v4922_v41 = vsel %vm4913_vm11, %v4893_v28, %v4921_v11  ;;  %v16752_v11 = vrot.slane %v13537_v13, 4 }
 0x228   : > { %v2974_v31 = vrot.slane %v2964_v22, 4  ;;  %4517 = vrot.lane.b32.xlu1 %v13738_v38, %s11734_s14  ;;  %v10896_v50 = vcombine.low %v4914_v25, %v4922_v41  ;;  %v10897_v5 = vcombine.high %v4914_v25, %v4922_v41 }
 0x229   : > { %4515 = vrot.lane.b32.xlu0 %v13679_v62, %s11734_s14 }
 0x22a   : > { %v2990_v63 = vsel %vm434_vm1, %v2973_v4, %v2974_v31  ;;  %5519 = vmatprep.subr.bf16.mxu0 %v10897_v5  ;;  %v4766_v18 = vpop.permute.xlu1 %4765  ;;  %v4775_v4 = vrot.slane %v4756_v12, 4 }
 0x22b   : > { %5520 = vmatpush1.bf16.msra.mxu0 %v10896_v50  ;;  %v13824_v27 = vpop.permute.xlu0 %4757  ;;  %v2991_v7 = vsel %vm2976_vm13, %v13505_v35, %v2990_v63  ;;  %v4780_v49 = vrot.slane %v4766_v18, 4  ;;  %vm4659_vm13 = vcmask 678912  }
 0x22c   : > { %v4776_v44 = vrot.slane %v13824_v27, 4  ;;  %4380 = vrot.lane.b32.xlu1 %v13686_v3, %s11735_s4  ;;  %v10724_v14 = vcombine.low %v2983_v10, %v2991_v7  ;;  %v10725_v47 = vcombine.high %v2983_v10, %v2991_v7 }
 0x22d   : > { %4378 = vrot.lane.b32.xlu0 %v13652_v33, %s11735_s4 }
 0x22e   : > { %3840 = vmatprep.subr.bf16.mxu1 %v10725_v47  ;;  %v2827_v0 = vpop.permute.xlu1 %2826  ;;  %v4785_v32 = vsel %vm434_vm1, %v4775_v4, %v4776_v44 }
 0x22f   : > { %3841 = vmatpush1.bf16.msra.mxu1 %v10724_v14  ;;  %v13835_v21 = vpop.permute.xlu0 %4767  ;;  %v2842_v26 = vrot.slane %v2827_v0, 4  ;;  %v4787_v61 = vsel %vm4786_vm12, %v4756_v12, %v4785_v32  ;;  %v16753_v32 = vrot.slane %v13550_v9, 4 }
 0x230   : > { %v4781_v35 = vrot.slane %v13835_v21, 4  ;;  %4390 = vrot.lane.b32.xlu1 %v13738_v38, %s11735_s4 }
 0x231   : > { %4388 = vrot.lane.b32.xlu0 %v13679_v62, %s11735_s4  ;;  %v2855_v2 = vsel %vm434_vm1, %v16751_v19, %v2842_v26  ;;  %v16754_v19 = vrot.slane %v13569_v34, 4 }
 0x232   : > { %v4629_v28 = vpop.permute.xlu1 %4628  ;;  %v4794_v16 = vsel %vm434_vm1, %v4780_v49, %v4781_v35  ;;  %v2856_v41 = vsel %vm2849_vm14, %v13518_v36, %v2855_v2 }
 0x233   : > { %v2837_v24 = vpop.permute.xlu0 %2836  ;;  %v4795_v46 = vsel %vm4786_vm12, %v4766_v18, %v4794_v16  ;;  %v4648_v63 = vrot.slane %v4629_v28, 4 }
 0x234   : > { %v2847_v29 = vrot.slane %v2837_v24, 4  ;;  %4253 = vrot.lane.b32.xlu1 %v13686_v3, %s11736_s21  ;;  %v10888_v43 = vcombine.low %v4787_v61, %v4795_v46  ;;  %v10889_v20 = vcombine.high %v4787_v61, %v4795_v46 }
 0x235   : > { %4251 = vrot.lane.b32.xlu0 %v13652_v33, %s11736_s21 }
 0x236   : > { %v2863_v22 = vsel %vm434_vm1, %v16752_v11, %v2847_v29  ;;  %5521 = vmatprep.subr.bf16.mxu0 %v10889_v20  ;;  %v4639_v12 = vpop.permute.xlu1 %4638 }
 0x237   : > { %5522 = vmatpush1.bf16.msra.mxu0 %v10888_v43  ;;  %v13860_v25 = vpop.permute.xlu0 %4630  ;;  %v2864_v15 = vsel %vm2849_vm14, %v13537_v13, %v2863_v22  ;;  %v4653_v36 = vrot.slane %v4639_v12, 4  ;;  %vm4532_vm14 = vcmask 687104  }
 0x238   : > { %v4649_v31 = vrot.slane %v13860_v25, 4  ;;  %4263 = vrot.lane.b32.xlu1 %v13738_v38, %s11736_s21  ;;  %v10716_v50 = vcombine.low %v2856_v41, %v2864_v15  ;;  %v10717_v5 = vcombine.high %v2856_v41, %v2864_v15 }
 0x239   : > { %4261 = vrot.lane.b32.xlu0 %v13679_v62, %s11736_s21 }
 0x23a   : > { %3842 = vmatprep.subr.bf16.mxu1 %v10717_v5  ;;  %v2700_v18 = vpop.permute.xlu1 %2699  ;;  %v4658_v14 = vsel %vm434_vm1, %v4648_v63, %v4649_v31 }
 0x23b   : > { %3843 = vmatpush1.bf16.msra.mxu1 %v10716_v50  ;;  %v13871_v10 = vpop.permute.xlu0 %4640  ;;  %v2715_v7 = vrot.slane %v2700_v18, 4  ;;  %v4660_v49 = vsel %vm4659_vm13, %v4629_v28, %v4658_v14 }
 0x23c   : > { %v4654_v13 = vrot.slane %v13871_v10, 4  ;;  %4126 = vrot.lane.b32.xlu1 %v13686_v3, %s11737_s13 }
 0x23d   : > { %4124 = vrot.lane.b32.xlu0 %v13652_v33, %s11737_s13  ;;  %v2728_v16 = vsel %vm434_vm1, %v16753_v32, %v2715_v7 }
 0x23e   : > { %v4502_v47 = vpop.permute.xlu1 %4501  ;;  %v4667_v4 = vsel %vm434_vm1, %v4653_v36, %v4654_v13  ;;  %v2729_v43 = vsel %vm16542_vm15, %v13550_v9, %v2728_v16 }
 0x23f   : > { %v2710_v0 = vpop.permute.xlu0 %2709  ;;  %v4668_v26 = vsel %vm4659_vm13, %v4639_v12, %v4667_v4  ;;  %v4521_v41 = vrot.slane %v4502_v47, 4 }
 0x240   : > { %v2720_v24 = vrot.slane %v2710_v0, 4  ;;  %4136 = vrot.lane.b32.xlu1 %v13738_v38, %s11737_s13  ;;  %v10880_v61 = vcombine.low %v4660_v49, %v4668_v26  ;;  %v10881_v46 = vcombine.high %v4660_v49, %v4668_v26  ;;  %v11740_v0 = vmov 0  }
 0x241   : > { %4134 = vrot.lane.b32.xlu0 %v13679_v62, %s11737_s13  ;;  %11554 = vset.pattern.permute.xlu1 %v11740_v0  ;;  %5885 = vst [vmem:[#allocation3] sm:$0xf] %v11740_v0  ;;  %5886 = vst [vmem:[#allocation3 + $0x28] sm:$0xf] %v11740_v0  ;;  %v16755_v49 = vrot.slane %v13583_v17, 4 }
 0x242   : > { %v2736_v2 = vsel %vm434_vm1, %v16754_v19, %v2720_v24  ;;  %5523 = vmatprep.subr.bf16.mxu0 %v10881_v46  ;;  %v4512_v28 = vpop.permute.xlu1 %4511  ;;  %5887 = vst [vmem:[#allocation3 + $0x24] sm:$0xf] %v11740_v0  ;;  %5888 = vst [vmem:[#allocation3 + $0x4c] sm:$0xf] %v11740_v0  ;;  %11553 = vset.pattern.permute.xlu0 %v11740_v0  ;;  %v4835_v24 = vld [vmem:[%s11926_s10 + $0xa8] sm:$0xff] }
 0x243   : > { %5524 = vmatpush1.bf16.msra.mxu0 %v10880_v61  ;;  %v13896_v29 = vpop.permute.xlu0 %4503  ;;  %v2737_v20 = vsel %vm16542_vm15, %v13569_v34, %v2736_v2  ;;  %v4526_v9 = vrot.slane %v4512_v28, 4  ;;  %v16756_v61 = vrot.slane %v13607_v8, 4  ;;  %v4826_v2 = vld [vmem:[%s11926_s10 + $0x50] sm:$0xff]  ;;  %vm4024_vm15 = vcmask 777216  }
 0x244   : > { %v4522_v11 = vrot.slane %v13896_v29, 4  ;;  %3999 = vrot.lane.b32.xlu1 %v13686_v3, %s11738_s17  ;;  %v10708_v22 = vcombine.low %v2729_v43, %v2737_v20  ;;  %v10709_v12 = vcombine.high %v2729_v43, %v2737_v20 }
 0x245   : > { %3997 = vrot.lane.b32.xlu0 %v13652_v33, %s11738_s17 }
 0x246   : > { %3844 = vmatprep.subr.bf16.mxu1 %v10709_v12  ;;  %v2573_v15 = vpop.permute.xlu1 %2572  ;;  %v4531_v63 = vsel %vm434_vm1, %v4521_v41, %v4522_v11  ;;  %v13943_v12 = vpack.c.bf16 %v4835_v24, %v4835_v24  ;;  %v13947_v41 = vpack.c.bf16 %v4826_v2, %v4826_v2 }
 0x247   : > { %3845 = vmatpush1.bf16.msra.mxu1 %v10708_v22  ;;  %v13907_v50 = vpop.permute.xlu0 %4513  ;;  %v2588_v5 = vrot.slane %v2573_v15, 4  ;;  %v4533_v14 = vsel %vm4532_vm14, %v4502_v47, %v4531_v63 }
 0x248   : > { %v4527_v34 = vrot.slane %v13907_v50, 4  ;;  %4009 = vrot.lane.b32.xlu1 %v13738_v38, %s11738_s17 }
 0x249   : > { %4007 = vrot.lane.b32.xlu0 %v13679_v62, %s11738_s17  ;;  %v2601_v26 = vsel %vm434_vm1, %v16755_v49, %v2588_v5 }
 0x24a   : > { %v4375_v18 = vpop.permute.xlu1 %4374  ;;  %v4540_v36 = vsel %vm434_vm1, %v4526_v9, %v4527_v34  ;;  %v2602_v43 = vsel %vm2595_vm10, %v13583_v17, %v2601_v26 }
 0x24b   : > { %v2583_v7 = vpop.permute.xlu0 %2582  ;;  %v4541_v4 = vsel %vm4532_vm14, %v4512_v28, %v4540_v36  ;;  %v4394_v15 = vrot.slane %v4375_v18, 4 }
 0x24c   : > { %v2593_v32 = vrot.slane %v2583_v7, 4  ;;  %5015 = vrot.lane.b32.xlu1 %v13686_v3, %s11739_s23  ;;  %v10872_v16 = vcombine.low %v4533_v14, %v4541_v4  ;;  %v10873_v47 = vcombine.high %v4533_v14, %v4541_v4 }
 0x24d   : > { %5013 = vrot.lane.b32.xlu0 %v13652_v33, %s11739_s23 }
 0x24e   : > { %v2609_v46 = vsel %vm434_vm1, %v16756_v61, %v2593_v32  ;;  %5525 = vmatprep.subr.bf16.mxu0 %v10873_v47  ;;  %v4385_v19 = vpop.permute.xlu1 %4384  ;;  %v2334_v47 = vrot.slane %v13165_v39, 4 }
 0x24f   : > { %5526 = vmatpush1.bf16.msra.mxu0 %v10872_v16  ;;  %v13934_v28 = vpop.permute.xlu0 %4376  ;;  %v2610_v3 = vsel %vm2595_vm10, %v13607_v8, %v2609_v46  ;;  %vm4405_vm10 = vcmask 695296   ;;  %v4399_v8 = vrot.slane %v4385_v19, 4 }
 0x250   : > { %v4395_v20 = vrot.slane %v13934_v28, 4  ;;  %5025 = vrot.lane.b32.xlu1 %v13738_v38, %s11739_s23  ;;  %v10700_v33 = vcombine.low %v2602_v43, %v2610_v3  ;;  %v10701_v22 = vcombine.high %v2602_v43, %v2610_v3 }
 0x251   : > { %5023 = vrot.lane.b32.xlu0 %v13679_v62, %s11739_s23 }
 0x252   : > { %3846 = vmatprep.subr.bf16.mxu1 %v10701_v22  ;;  %v2446_v17 = vpop.permute.xlu1 %2445  ;;  %v4404_v62 = vsel %vm434_vm1, %v4394_v15, %v4395_v20 }
 0x253   : > { %3847 = vmatpush1.bf16.msra.mxu1 %v10700_v33  ;;  %v13949_v9 = vpop.permute.xlu0 %4386  ;;  %v2461_v5 = vrot.slane %v2446_v17, 4  ;;  %v4406_v14 = vsel %vm4405_vm10, %v4375_v18, %v4404_v62 }
 0x254   : > { %v4400_v38 = vrot.slane %v13949_v9, 4  ;;  %4900 = vrot.lane.b32.xlu1 %v13943_v12, %s11731_s15 }
 0x255   : > { %4890 = vrot.lane.b32.xlu0 %v13947_v41, %s11731_s15  ;;  %v2474_v0 = vsel %vm434_vm1, %v2460_v58, %v2461_v5  ;;  %s11748_s15 = smov 99  }
 0x256   : > { %v4248_v63 = vpop.permute.xlu1 %4247  ;;  %v4413_v36 = vsel %vm434_vm1, %v4399_v8, %v4400_v38  ;;  %v2475_v58 = vsel %vm2468_vm2, %v13629_v54, %v2474_v0  ;;  %v2347_v54 = vsel %vm434_vm1, %v2333_v48, %v2334_v47 }
 0x257   : > { %v2456_v7 = vpop.permute.xlu0 %2455  ;;  %v4414_v4 = vsel %vm4405_vm10, %v4385_v19, %v4413_v36  ;;  %v4267_v39 = vrot.slane %v4248_v63, 4  ;;  %v2348_v17 = vsel %vm2341_vm9, %v13117_v23, %v2347_v54 }
 0x258   : > { %v2466_v49 = vrot.slane %v2456_v7, 4  ;;  %4773 = vrot.lane.b32.xlu1 %v13943_v12, %s11732_s19  ;;  %v10864_v26 = vcombine.low %v4406_v14, %v4414_v4  ;;  %v10865_v32 = vcombine.high %v4406_v14, %v4414_v4 }
 0x259   : > { %4763 = vrot.lane.b32.xlu0 %v13947_v41, %s11732_s19  ;;  %s11749_s19 = smov 89  }
 0x25a   : > { %v2482_v16 = vsel %vm434_vm1, %v2465_v52, %v2466_v49  ;;  %5527 = vmatprep.subr.bf16.mxu0 %v10865_v32  ;;  %v4258_v18 = vpop.permute.xlu1 %4257  ;;  %v16757_v32 = vcombine.high %v13023_v55, %v13090_v59 }
 0x25b   : > { %5528 = vmatpush1.bf16.msra.mxu0 %v10864_v26  ;;  %v13975_v24 = vpop.permute.xlu0 %4249  ;;  %v2483_v61 = vsel %vm2468_vm2, %v13669_v42, %v2482_v16  ;;  %v4272_v3 = vrot.slane %v4258_v18, 4  ;;  %vm4278_vm2 = vcmask 760832  }
 0x25c   : > { %v4268_v46 = vrot.slane %v13975_v24, 4  ;;  %4646 = vrot.lane.b32.xlu1 %v13943_v12, %s11733_s22  ;;  %v10692_v19 = vcombine.low %v2475_v58, %v2483_v61  ;;  %v10693_v52 = vcombine.high %v2475_v58, %v2483_v61  ;;  %v16758_v61 = vcombine.low %v13023_v55, %v13090_v59 }
 0x25d   : > { %4636 = vrot.lane.b32.xlu0 %v13947_v41, %s11733_s22  ;;  %s11750_s22 = smov 118  }
 0x25e   : > { %3848 = vmatprep.subr.bf16.mxu1 %v10693_v52  ;;  %v2329_v2 = vpop.permute.xlu1 %2328  ;;  %v4277_v22 = vsel %vm434_vm1, %v4267_v39, %v4268_v46 }
 0x25f   : > { %v2339_v43 = vrot.slane %v2329_v2, 4  ;;  %3849 = vmatpush1.bf16.msra.mxu1 %v10692_v19  ;;  %v13989_v42 = vpop.permute.xlu0 %4259 }
 0x260   : > { %v4273_v33 = vrot.slane %v13989_v42, 4  ;;  %4519 = vrot.lane.b32.xlu1 %v13943_v12, %s11734_s14 }
 0x261   : > { %v2355_v15 = vsel %vm434_vm1, %v2338_v57, %v2339_v43  ;;  %4509 = vrot.lane.b32.xlu0 %v13947_v41, %s11734_s14  ;;  %v4279_v57 = vsel %vm4278_vm2, %v4248_v63, %v4277_v22  ;;  %s11751_s14 = smov 119  }
 0x262   : > { %v14002_v48 = vpop.permute.xlu1 %4122  ;;  %v2356_v8 = vsel %vm2341_vm9, %v13703_v45, %v2355_v15  ;;  %v4286_v5 = vsel %vm434_vm1, %v4272_v3, %v4273_v33  ;;  %vm4151_vm9 = vcmask 769024  }
 0x263   : > { %v4121_v62 = vpop.permute.xlu0 %4120  ;;  %v10684_v36 = vcombine.low %v2348_v17, %v2356_v8  ;;  %v10685_v7 = vcombine.high %v2348_v17, %v2356_v8  ;;  %v4287_v14 = vsel %vm4278_vm2, %v4258_v18, %v4286_v5  ;;  %v4141_v4 = vrot.slane %v14002_v48, 4 }
 0x264   : > { %v4140_v0 = vrot.slane %v4121_v62, 4  ;;  %4392 = vrot.lane.b32.xlu1 %v13943_v12, %s11735_s4  ;;  %v10856_v23 = vcombine.low %v4279_v57, %v4287_v14  ;;  %v10857_v49 = vcombine.high %v4279_v57, %v4287_v14 }
 0x265   : > { %4382 = vrot.lane.b32.xlu0 %v13947_v41, %s11735_s4  ;;  %3850 = vmatprep.subr.bf16.mxu1 %v10685_v7  ;;  %s11741_s4 = smov 111  }
 0x266   : > { %5529 = vmatprep.subr.bf16.mxu0 %v10857_v49  ;;  %v14018_v45 = vpop.permute.xlu1 %4132  ;;  %3851 = vmatpush1.bf16.msra.mxu1 %v10684_v36  ;;  %v4150_v16 = vsel %vm434_vm1, %v4140_v0, %v4141_v4 }
 0x267   : > { %v4146_v63 = vrot.slane %v14018_v45, 4  ;;  %5530 = vmatpush1.bf16.msra.mxu0 %v10856_v23  ;;  %v4131_v26 = vpop.permute.xlu0 %4130  ;;  %3852 = vmatprep.subr.bf16.mxu1 %v16757_v32  ;;  %v4152_v19 = vsel %vm4151_vm9, %v4121_v62, %v4150_v16 }
 0x268   : > { %v4145_v18 = vrot.slane %v4131_v26, 4  ;;  %4265 = vrot.lane.b32.xlu1 %v13943_v12, %s11736_s21 }
 0x269   : > { %4255 = vrot.lane.b32.xlu0 %v13947_v41, %s11736_s21  ;;  %s11747_s21 = smov 91  }
 0x26a   : > { %v4159_v47 = vsel %vm434_vm1, %v4145_v18, %v4146_v63  ;;  %v14034_v58 = vpop.permute.xlu1 %3995  ;;  %3853 = vmatpush1.bf16.msra.mxu1 %v16758_v61 }
 0x26b   : > { %v4160_v52 = vsel %vm4151_vm9, %v4131_v26, %v4159_v47  ;;  %v3994_v39 = vpop.permute.xlu0 %3993  ;;  %v4014_v54 = vrot.slane %v14034_v58, 4  ;;  %v5756_v26 = vld [vmem:[%s16438_s2 + $0x8] sm:$0xff] }
 0x26c   : > { %v10848_v2 = vcombine.low %v4152_v19, %v4160_v52  ;;  %v4013_v43 = vrot.slane %v3994_v39, 4  ;;  %4138 = vrot.lane.b32.xlu1 %v13943_v12, %s11737_s13  ;;  %v10849_v3 = vcombine.high %v4152_v19, %v4160_v52 }
 0x26d   : > { %4128 = vrot.lane.b32.xlu0 %v13947_v41, %s11737_s13  ;;  %s11742_s13 = smov 110  }
 0x26e   : > { %5531 = vmatprep.subr.bf16.mxu0 %v10849_v3  ;;  %v14046_v22 = vpop.permute.xlu1 %4005  ;;  %v4023_v15 = vsel %vm434_vm1, %v4013_v43, %v4014_v54 }
 0x26f   : > { %v4019_v55 = vrot.slane %v14046_v22, 4  ;;  %5532 = vmatpush1.bf16.msra.mxu0 %v10848_v2  ;;  %v4004_v59 = vpop.permute.xlu0 %4003  ;;  %v4025_v62 = vsel %vm4024_vm15, %v3994_v39, %v4023_v15  ;;  %v5784_v39 = vld [vmem:[%s16439_s3 + $0x8] sm:$0xff]  ;;  %v11581_v15 = vld [vmem:[%s16437_s1 + $0x10] ss:$8 sps:$4 sm:$0xff]  }
 0x270   : > { %v4018_v17 = vrot.slane %v4004_v59, 4  ;;  %4011 = vrot.lane.b32.xlu1 %v13943_v12, %s11738_s17 }
 0x271   : > { %4001 = vrot.lane.b32.xlu0 %v13947_v41, %s11738_s17  ;;  %s11743_s17 = smov 109  }
 0x272   : > { %v4032_v8 = vsel %vm434_vm1, %v4018_v17, %v4019_v55  ;;  %v3218_v5 = vpop.permute.xlu1 %3217 }
 0x273   : > { %v4033_v36 = vsel %vm4024_vm15, %v4004_v59, %v4032_v8  ;;  %v3228_v7 = vrot.slane %v3218_v5, 4  ;;  %v3208_v57 = vpop.permute.xlu0 %3207 }
 0x274   : > { %v10840_v14 = vcombine.low %v4025_v62, %v4033_v36  ;;  %v3223_v0 = vrot.slane %v3208_v57, 4  ;;  %5027 = vrot.lane.b32.xlu1 %v13943_v12, %s11739_s23  ;;  %v10841_v23 = vcombine.high %v4025_v62, %v4033_v36 }
 0x275   : > { %v3244_v49 = vsel %vm434_vm1, %v3227_v6, %v3228_v7  ;;  %5017 = vrot.lane.b32.xlu0 %v13947_v41, %s11739_s23  ;;  %v5755_v6 = vld [vmem:[%s16438_s2] sm:$0xff]  ;;  %s11744_s23 = smov 101  }
 0x276   : > { %v3236_v32 = vsel %vm434_vm1, %v3222_v51, %v3223_v0  ;;  %5533 = vmatprep.subr.bf16.mxu0 %v10841_v23  ;;  %v14074_v16 = vpop.permute.xlu1 %5011  ;;  %v3245_v12 = vsel %vm3230_vm8, %v13751_v60, %v3244_v49  ;;  %v5783_v60 = vld [vmem:[%s16439_s3] sm:$0xff] }
 0x277   : > { %5534 = vmatpush1.bf16.msra.mxu0 %v10840_v14  ;;  %v5010_v41 = vpop.permute.xlu0 %5009  ;;  %v3237_v18 = vsel %vm3230_vm8, %v13728_v56, %v3236_v32  ;;  %v5030_v47 = vrot.slane %v14074_v16, 4  ;;  %vm5040_vm8 = vcmask 596992   ;;  %v14114_v23 = vld [vmem:[%s16437_s1 + $0x20] ss:$8 sps:$4 sm:$0xff]  }
 0x278   : > { %v5029_v61 = vrot.slane %v5010_v41, 4  ;;  %v10740_v19 = vcombine.low %v3237_v18, %v3245_v12  ;;  %v10741_v51 = vcombine.high %v3237_v18, %v3245_v12  ;;  %5764 = vperm.xlu1 %11554, %v5756_v26  }
 0x279   : > { %5759 = vperm.xlu0 %11553, %v5755_v6  }
 0x27a   : > { %3868 = vmatprep.subr.bf16.mxu1 %v10741_v51  ;;  %v14087_v52 = vpop.permute.xlu1 %5021  ;;  %v5039_v43 = vsel %vm434_vm1, %v5029_v61, %v5030_v47 }
 0x27b   : > { %v5035_v56 = vrot.slane %v14087_v52, 4  ;;  %3869 = vmatpush2.bf16.msra.mxu1 %v10740_v19  ;;  %v5020_v2 = vpop.permute.xlu0 %5019  ;;  %v5041_v8 = vsel %vm5040_vm8, %v5010_v41, %v5039_v43 }
 0x27c   : > { %v5034_v3 = vrot.slane %v5020_v2, 4  ;;  %5787 = vperm.xlu1 %11554, %v5783_v60  }
 0x27d   : > { %5792 = vperm.xlu0 %11553, %v5784_v39  }
 0x27e   : > { %v5048_v59 = vsel %vm434_vm1, %v5034_v3, %v5035_v56  ;;  %3871 = vmatmul.mubr.bf16.vlgmr.msra.gmra.mxu1 %v11581_v15  ;;  %v14102_v17 = vpop.permute.xlu1 %4888 }
 0x27f   : > { %v5049_v5 = vsel %vm5040_vm8, %v5020_v2, %v5048_v59  ;;  %v4905_v62 = vrot.slane %v14102_v17, 4  ;;  %v4887_v36 = vpop.permute.xlu0 %4886  ;;  %10913 = vmatprep.mubr.msk.bf16.mxu1 %vm1927_vm0, %v13789_v30 }
 0x280   : > { %v10904_v7 = vcombine.low %v5041_v8, %v5049_v5  ;;  %v4904_v57 = vrot.slane %v4887_v36, 4  ;;  %v10905_v14 = vcombine.high %v5041_v8, %v5049_v5 }
 0x282   : > { %5549 = vmatprep.subr.bf16.mxu0 %v10905_v14  ;;  %v14109_v0 = vpop.permute.xlu1 %4898  ;;  %v4917_v49 = vsel %vm434_vm1, %v4904_v57, %v4905_v62  ;;  %v4915_v6 = vsel %vm434_vm1, %v4903_v1, %v4904_v57 }
 0x283   : > { %v4910_v26 = vrot.slane %v14109_v0, 4  ;;  %5550 = vmatpush2.bf16.msra.mxu0 %v10904_v7  ;;  %v4897_v32 = vpop.permute.xlu0 %4896  ;;  %v4918_v41 = vsel %vm4913_vm11, %v4887_v36, %v4917_v49  ;;  %v4916_v1 = vsel %vm4913_vm11, %v13780_v40, %v4915_v6 }
 0x284   : > { %v4909_v12 = vrot.slane %v4897_v32, 4 }
 0x286   : > { %v4925_v18 = vsel %vm434_vm1, %v4909_v12, %v4910_v26  ;;  %5552 = vmatmul.mubr.bf16.vlgmr.msra.gmra.mxu0 %v14114_v23  ;;  %v14128_v61 = vpop.permute.xlu1 %4761  ;;  %v4923_v19 = vsel %vm434_vm1, %v4908_v53, %v4909_v12 }
 0x287   : > { %v4926_v51 = vsel %vm4913_vm11, %v4897_v32, %v4925_v18  ;;  %v4778_v60 = vrot.slane %v14128_v61, 4  ;;  %v4760_v39 = vpop.permute.xlu0 %4759  ;;  %v4924_v2 = vsel %vm4913_vm11, %v13797_v37, %v4923_v19  ;;  %10914 = vmatprep.mubr.msk.bf16.mxu0 %vm1927_vm0, %v13789_v30 }
 0x288   : > { %v10900_v43 = vcombine.low %v4918_v41, %v4926_v51  ;;  %v4777_v3 = vrot.slane %v4760_v39, 4  ;;  %v10898_v59 = vcombine.low %v4916_v1, %v4924_v2  ;;  %v10899_v15 = vcombine.high %v4916_v1, %v4924_v2 }
 0x289   : > { %v10901_v8 = vcombine.high %v4918_v41, %v4926_v51 }
 0x28a   : > { %5562 = vmatprep.subr.bf16.mxu1 %v10899_v15  ;;  %v14141_v53 = vpop.permute.xlu1 %4771  ;;  %v4790_v5 = vsel %vm434_vm1, %v4777_v3, %v4778_v60  ;;  %v4788_v30 = vsel %vm434_vm1, %v4776_v44, %v4777_v3 }
 0x28b   : > { %5605 = vmatprep.subr.bf16.mxu0 %v10901_v8  ;;  %v4783_v40 = vrot.slane %v14141_v53, 4  ;;  %5563 = vmatpush1.bf16.msra.mxu1 %v10898_v59  ;;  %v4770_v37 = vpop.permute.xlu0 %4769  ;;  %v4791_v7 = vsel %vm4786_vm12, %v4760_v39, %v4790_v5  ;;  %v4789_v44 = vsel %vm4786_vm12, %v13824_v27, %v4788_v30 }
 0x28c   : > { %5606 = vmatpush1.bf16.msra.mxu0 %v10900_v43  ;;  %v4782_v36 = vrot.slane %v4770_v37, 4 }
 0x28e   : > { %v4798_v57 = vsel %vm434_vm1, %v4782_v36, %v4783_v40  ;;  %v14154_v14 = vpop.permute.xlu1 %4634  ;;  %v4796_v49 = vsel %vm434_vm1, %v4781_v35, %v4782_v36 }
 0x28f   : > { %v4799_v32 = vsel %vm4786_vm12, %v4770_v37, %v4798_v57  ;;  %v4651_v12 = vrot.slane %v14154_v14, 4  ;;  %v4633_v6 = vpop.permute.xlu0 %4632  ;;  %v4797_v41 = vsel %vm4786_vm12, %v13835_v21, %v4796_v49 }
 0x290   : > { %v10892_v18 = vcombine.low %v4791_v7, %v4799_v32  ;;  %v4650_v19 = vrot.slane %v4633_v6, 4  ;;  %v10890_v51 = vcombine.low %v4789_v44, %v4797_v41  ;;  %v10891_v39 = vcombine.high %v4789_v44, %v4797_v41 }
 0x291   : > { %v10893_v1 = vcombine.high %v4791_v7, %v4799_v32 }
 0x292   : > { %5564 = vmatprep.subr.bf16.mxu1 %v10891_v39  ;;  %v14165_v2 = vpop.permute.xlu1 %4644  ;;  %v4663_v35 = vsel %vm434_vm1, %v4650_v19, %v4651_v12  ;;  %v4661_v21 = vsel %vm434_vm1, %v4649_v31, %v4650_v19 }
 0x293   : > { %5607 = vmatprep.subr.bf16.mxu0 %v10893_v1  ;;  %v4656_v43 = vrot.slane %v14165_v2, 4  ;;  %5565 = vmatpush1.bf16.msra.mxu1 %v10890_v51  ;;  %v4643_v27 = vpop.permute.xlu0 %4642  ;;  %v4664_v59 = vsel %vm4659_vm13, %v4633_v6, %v4663_v35  ;;  %v4662_v31 = vsel %vm4659_vm13, %v13860_v25, %v4661_v21 }
 0x294   : > { %5608 = vmatpush1.bf16.msra.mxu0 %v10892_v18  ;;  %v4655_v3 = vrot.slane %v4643_v27, 4 }
 0x296   : > { %v4671_v15 = vsel %vm434_vm1, %v4655_v3, %v4656_v43  ;;  %v14178_v8 = vpop.permute.xlu1 %4507  ;;  %v4669_v5 = vsel %vm434_vm1, %v4654_v13, %v4655_v3 }
 0x297   : > { %v4672_v37 = vsel %vm4659_vm13, %v4643_v27, %v4671_v15  ;;  %v4524_v36 = vrot.slane %v14178_v8, 4  ;;  %v4506_v30 = vpop.permute.xlu0 %4505  ;;  %v4670_v7 = vsel %vm4659_vm13, %v13871_v10, %v4669_v5 }
 0x298   : > { %v10884_v57 = vcombine.low %v4664_v59, %v4672_v37  ;;  %v4523_v49 = vrot.slane %v4506_v30, 4  ;;  %v10882_v32 = vcombine.low %v4662_v31, %v4670_v7  ;;  %v10883_v6 = vcombine.high %v4662_v31, %v4670_v7 }
 0x299   : > { %v10885_v44 = vcombine.high %v4664_v59, %v4672_v37 }
 0x29a   : > { %5566 = vmatprep.subr.bf16.mxu1 %v10883_v6  ;;  %v14189_v41 = vpop.permute.xlu1 %4517  ;;  %v4536_v13 = vsel %vm434_vm1, %v4523_v49, %v4524_v36  ;;  %v4534_v10 = vsel %vm434_vm1, %v4522_v11, %v4523_v49 }
 0x29b   : > { %5609 = vmatprep.subr.bf16.mxu0 %v10885_v44  ;;  %v4529_v18 = vrot.slane %v14189_v41, 4  ;;  %5567 = vmatpush1.bf16.msra.mxu1 %v10882_v32  ;;  %v4516_v25 = vpop.permute.xlu0 %4515  ;;  %v4537_v51 = vsel %vm4532_vm14, %v4506_v30, %v4536_v13  ;;  %v4535_v11 = vsel %vm4532_vm14, %v13896_v29, %v4534_v10 }
 0x29c   : > { %5610 = vmatpush1.bf16.msra.mxu0 %v10884_v57  ;;  %v4528_v19 = vrot.slane %v4516_v25, 4 }
 0x29e   : > { %v4544_v39 = vsel %vm434_vm1, %v4528_v19, %v4529_v18  ;;  %v14202_v1 = vpop.permute.xlu1 %4380  ;;  %v4542_v35 = vsel %vm434_vm1, %v4527_v34, %v4528_v19 }
 0x29f   : > { %v4545_v27 = vsel %vm4532_vm14, %v4516_v25, %v4544_v39  ;;  %v4397_v3 = vrot.slane %v14202_v1, 4  ;;  %v4379_v21 = vpop.permute.xlu0 %4378  ;;  %v4543_v59 = vsel %vm4532_vm14, %v13907_v50, %v4542_v35 }
 0x2a0   : > { %v10876_v15 = vcombine.low %v4537_v51, %v4545_v27  ;;  %v4396_v5 = vrot.slane %v4379_v21, 4  ;;  %v10874_v37 = vcombine.low %v4535_v11, %v4543_v59  ;;  %v10875_v30 = vcombine.high %v4535_v11, %v4543_v59 }
 0x2a1   : > { %v10877_v31 = vcombine.high %v4537_v51, %v4545_v27 }
 0x2a2   : > { %5568 = vmatprep.subr.bf16.mxu1 %v10875_v30  ;;  %v14213_v7 = vpop.permute.xlu1 %4390  ;;  %v4409_v34 = vsel %vm434_vm1, %v4396_v5, %v4397_v3  ;;  %v4407_v50 = vsel %vm434_vm1, %v4395_v20, %v4396_v5 }
 0x2a3   : > { %5611 = vmatprep.subr.bf16.mxu0 %v10877_v31  ;;  %v4402_v57 = vrot.slane %v14213_v7, 4  ;;  %5569 = vmatpush1.bf16.msra.mxu1 %v10874_v37  ;;  %v4389_v29 = vpop.permute.xlu0 %4388  ;;  %v4410_v32 = vsel %vm4405_vm10, %v4379_v21, %v4409_v34  ;;  %v4408_v20 = vsel %vm4405_vm10, %v13934_v28, %v4407_v50 }
 0x2a4   : > { %5612 = vmatpush1.bf16.msra.mxu0 %v10876_v15  ;;  %v4401_v49 = vrot.slane %v4389_v29, 4 }
 0x2a6   : > { %v4417_v6 = vsel %vm434_vm1, %v4401_v49, %v4402_v57  ;;  %v14226_v44 = vpop.permute.xlu1 %4253  ;;  %v4415_v13 = vsel %vm434_vm1, %v4400_v38, %v4401_v49 }
 0x2a7   : > { %v4418_v25 = vsel %vm4405_vm10, %v4389_v29, %v4417_v6  ;;  %v4270_v19 = vrot.slane %v14226_v44, 4  ;;  %v4252_v10 = vpop.permute.xlu0 %4251  ;;  %v4416_v51 = vsel %vm4405_vm10, %v13949_v9, %v4415_v13 }
 0x2a8   : > { %v10868_v39 = vcombine.low %v4410_v32, %v4418_v25  ;;  %v4269_v35 = vrot.slane %v4252_v10, 4  ;;  %v10866_v27 = vcombine.low %v4408_v20, %v4416_v51  ;;  %v10867_v21 = vcombine.high %v4408_v20, %v4416_v51 }
 0x2a9   : > { %v10869_v11 = vcombine.high %v4410_v32, %v4418_v25 }
 0x2aa   : > { %5570 = vmatprep.subr.bf16.mxu1 %v10867_v21  ;;  %v14237_v59 = vpop.permute.xlu1 %4263  ;;  %v4282_v38 = vsel %vm434_vm1, %v4269_v35, %v4270_v19  ;;  %v4280_v9 = vsel %vm434_vm1, %v4268_v46, %v4269_v35 }
 0x2ab   : > { %5613 = vmatprep.subr.bf16.mxu0 %v10869_v11  ;;  %v4275_v15 = vrot.slane %v14237_v59, 4  ;;  %5571 = vmatpush1.bf16.msra.mxu1 %v10866_v27  ;;  %v4262_v28 = vpop.permute.xlu0 %4261  ;;  %v4283_v37 = vsel %vm4278_vm2, %v4252_v10, %v4282_v38  ;;  %v4281_v46 = vsel %vm4278_vm2, %v13975_v24, %v4280_v9 }
 0x2ac   : > { %5614 = vmatpush1.bf16.msra.mxu0 %v10868_v39  ;;  %v4274_v5 = vrot.slane %v4262_v28, 4 }
 0x2ae   : > { %v4290_v30 = vsel %vm434_vm1, %v4274_v5, %v4275_v15  ;;  %v14250_v31 = vpop.permute.xlu1 %4126  ;;  %v4288_v34 = vsel %vm434_vm1, %v4273_v33, %v4274_v5 }
 0x2af   : > { %v4291_v29 = vsel %vm4278_vm2, %v4262_v28, %v4290_v30  ;;  %v4143_v49 = vrot.slane %v14250_v31, 4  ;;  %v4125_v50 = vpop.permute.xlu0 %4124  ;;  %v4289_v32 = vsel %vm4278_vm2, %v13989_v42, %v4288_v34 }
 0x2b0   : > { %v10860_v6 = vcombine.low %v4283_v37, %v4291_v29  ;;  %v4142_v13 = vrot.slane %v4125_v50, 4  ;;  %v10858_v25 = vcombine.low %v4281_v46, %v4289_v32  ;;  %v10859_v10 = vcombine.high %v4281_v46, %v4289_v32 }
 0x2b1   : > { %v10861_v20 = vcombine.high %v4283_v37, %v4291_v29 }
 0x2b2   : > { %5572 = vmatprep.subr.bf16.mxu1 %v10859_v10  ;;  %v14261_v51 = vpop.permute.xlu1 %4136  ;;  %v4155_v33 = vsel %vm434_vm1, %v4142_v13, %v4143_v49  ;;  %v4153_v42 = vsel %vm434_vm1, %v4141_v4, %v4142_v13 }
 0x2b3   : > { %5615 = vmatprep.subr.bf16.mxu0 %v10861_v20  ;;  %v4148_v39 = vrot.slane %v14261_v51, 4  ;;  %5573 = vmatpush1.bf16.msra.mxu1 %v10858_v25  ;;  %v4135_v24 = vpop.permute.xlu0 %4134  ;;  %v4156_v27 = vsel %vm4151_vm9, %v4125_v50, %v4155_v33  ;;  %v4154_v4 = vsel %vm4151_vm9, %v14002_v48, %v4153_v42 }
 0x2b4   : > { %5616 = vmatpush1.bf16.msra.mxu0 %v10860_v6  ;;  %v4147_v35 = vrot.slane %v4135_v24, 4 }
 0x2b6   : > { %v4163_v21 = vsel %vm434_vm1, %v4147_v35, %v4148_v39  ;;  %v14274_v11 = vpop.permute.xlu1 %3999  ;;  %v4161_v38 = vsel %vm434_vm1, %v4146_v63, %v4147_v35 }
 0x2b7   : > { %v4164_v28 = vsel %vm4151_vm9, %v4135_v24, %v4163_v21  ;;  %v4016_v5 = vrot.slane %v14274_v11, 4  ;;  %v3998_v9 = vpop.permute.xlu0 %3997  ;;  %v4162_v37 = vsel %vm4151_vm9, %v14018_v45, %v4161_v38 }
 0x2b8   : > { %v10852_v30 = vcombine.low %v4156_v27, %v4164_v28  ;;  %v4015_v34 = vrot.slane %v3998_v9, 4  ;;  %v10850_v29 = vcombine.low %v4154_v4, %v4162_v37  ;;  %v10851_v50 = vcombine.high %v4154_v4, %v4162_v37 }
 0x2b9   : > { %v10853_v46 = vcombine.high %v4156_v27, %v4164_v28 }
 0x2ba   : > { %5574 = vmatprep.subr.bf16.mxu1 %v10851_v50  ;;  %v14285_v32 = vpop.permute.xlu1 %4009  ;;  %v4028_v63 = vsel %vm434_vm1, %v4015_v34, %v4016_v5  ;;  %v4026_v45 = vsel %vm434_vm1, %v4014_v54, %v4015_v34 }
 0x2bb   : > { %5617 = vmatprep.subr.bf16.mxu0 %v10853_v46  ;;  %v4021_v6 = vrot.slane %v14285_v32, 4  ;;  %5575 = vmatpush1.bf16.msra.mxu1 %v10850_v29  ;;  %v4008_v48 = vpop.permute.xlu0 %4007  ;;  %v4029_v25 = vsel %vm4024_vm15, %v3998_v9, %v4028_v63  ;;  %v4027_v54 = vsel %vm4024_vm15, %v14034_v58, %v4026_v45 }
 0x2bc   : > { %5618 = vmatpush1.bf16.msra.mxu0 %v10852_v30  ;;  %v4020_v13 = vrot.slane %v4008_v48, 4 }
 0x2be   : > { %v4036_v10 = vsel %vm434_vm1, %v4020_v13, %v4021_v6  ;;  %v14298_v20 = vpop.permute.xlu1 %5015  ;;  %v4034_v33 = vsel %vm434_vm1, %v4019_v55, %v4020_v13 }
 0x2bf   : > { %v4037_v24 = vsel %vm4024_vm15, %v4008_v48, %v4036_v10  ;;  %v5032_v35 = vrot.slane %v14298_v20, 4  ;;  %v5014_v42 = vpop.permute.xlu0 %5013  ;;  %v4035_v27 = vsel %vm4024_vm15, %v14046_v22, %v4034_v33 }
 0x2c0   : > { %v10844_v21 = vcombine.low %v4029_v25, %v4037_v24  ;;  %v5031_v38 = vrot.slane %v5014_v42, 4  ;;  %v10842_v28 = vcombine.low %v4027_v54, %v4035_v27  ;;  %v10843_v9 = vcombine.high %v4027_v54, %v4035_v27 }
 0x2c1   : > { %v10845_v4 = vcombine.high %v4029_v25, %v4037_v24 }
 0x2c2   : > { %5576 = vmatprep.subr.bf16.mxu1 %v10843_v9  ;;  %v14309_v37 = vpop.permute.xlu1 %5025  ;;  %v5044_v55 = vsel %vm434_vm1, %v5031_v38, %v5032_v35  ;;  %v5042_v22 = vsel %vm434_vm1, %v5030_v47, %v5031_v38 }
 0x2c3   : > { %5619 = vmatprep.subr.bf16.mxu0 %v10845_v4  ;;  %v5037_v30 = vrot.slane %v14309_v37, 4  ;;  %5577 = vmatpush1.bf16.msra.mxu1 %v10842_v28  ;;  %v5024_v58 = vpop.permute.xlu0 %5023  ;;  %v5045_v29 = vsel %vm5040_vm8, %v5014_v42, %v5044_v55  ;;  %v5043_v25 = vsel %vm5040_vm8, %v14074_v16, %v5042_v22 }
 0x2c4   : > { %5620 = vmatpush1.bf16.msra.mxu0 %v10844_v21  ;;  %v5036_v34 = vrot.slane %v5024_v58, 4 }
 0x2c6   : > { %v5052_v50 = vsel %vm434_vm1, %v5036_v34, %v5037_v30  ;;  %v4901_v46 = vpop.permute.xlu1 %4900  ;;  %v5050_v63 = vsel %vm434_vm1, %v5035_v56, %v5036_v34 }
 0x2c7   : > { %v5053_v48 = vsel %vm5040_vm8, %v5024_v58, %v5052_v50  ;;  %v4911_v13 = vrot.slane %v4901_v46, 4  ;;  %v4891_v45 = vpop.permute.xlu0 %4890  ;;  %v5051_v47 = vsel %vm5040_vm8, %v14087_v52, %v5050_v63 }
 0x2c8   : > { %v10908_v10 = vcombine.low %v5045_v29, %v5053_v48  ;;  %v4906_v33 = vrot.slane %v4891_v45, 4  ;;  %v10906_v24 = vcombine.low %v5043_v25, %v5051_v47  ;;  %v10907_v42 = vcombine.high %v5043_v25, %v5051_v47 }
 0x2c9   : > { %v4927_v54 = vsel %vm434_vm1, %v4910_v26, %v4911_v13  ;;  %v10909_v27 = vcombine.high %v5045_v29, %v5053_v48 }
 0x2ca   : > { %v4919_v56 = vsel %vm434_vm1, %v4905_v62, %v4906_v33  ;;  %5592 = vmatprep.subr.bf16.mxu1 %v10907_v42  ;;  %v4774_v21 = vpop.permute.xlu1 %4773  ;;  %v4928_v16 = vsel %vm4913_vm11, %v14109_v0, %v4927_v54 }
 0x2cb   : > { %5635 = vmatprep.subr.bf16.mxu0 %v10909_v27  ;;  %v4784_v52 = vrot.slane %v4774_v21, 4  ;;  %5593 = vmatpush2.bf16.msra.mxu1 %v10906_v24  ;;  %v4764_v38 = vpop.permute.xlu0 %4763  ;;  %v4920_v28 = vsel %vm4913_vm11, %v14102_v17, %v4919_v56  ;;  %vm6494_vm11 = vcmask 744448  }
 0x2cc   : > { %5636 = vmatpush2.bf16.msra.mxu0 %v10908_v10  ;;  %v4779_v9 = vrot.slane %v4764_v38, 4  ;;  %v10902_v26 = vcombine.low %v4920_v28, %v4928_v16  ;;  %v10903_v4 = vcombine.high %v4920_v28, %v4928_v16 }
 0x2cd   : > { %v4800_v62 = vsel %vm434_vm1, %v4783_v40, %v4784_v52 }
 0x2ce   : > { %v4792_v55 = vsel %vm434_vm1, %v4778_v60, %v4779_v9  ;;  %5595 = vmatmul.mubr.bf16.vlgmr.msra.gmra.mxu1 %v14114_v23  ;;  %5648 = vmatprep.subr.bf16.mxu1 %v10903_v4  ;;  %v4647_v0 = vpop.permute.xlu1 %4646  ;;  %v4801_v58 = vsel %vm4786_vm12, %v14141_v53, %v4800_v62  ;;  %v11582_v60 = vld [vmem:[%s16437_s1 + $0x24] ss:$8 sps:$4 sm:$0xff]  }
 0x2cf   : > { %5638 = vmatmul.mubr.bf16.vlgmr.msra.gmra.mxu0 %v14114_v23  ;;  %v4657_v17 = vrot.slane %v4647_v0, 4  ;;  %5649 = vmatpush1.bf16.msra.mxu1 %v10902_v26  ;;  %v4637_v34 = vpop.permute.xlu0 %4636  ;;  %v4793_v22 = vsel %vm4786_vm12, %v14128_v61, %v4792_v55  ;;  %vm5996_vm12 = vcmask 908288  }
 0x2d0   : > { %v4652_v40 = vrot.slane %v4637_v34, 4  ;;  %v10894_v29 = vcombine.low %v4793_v22, %v4801_v58  ;;  %v10895_v50 = vcombine.high %v4793_v22, %v4801_v58  ;;  %10915 = vmatprep.mubr.msk.bf16.mxu1 %vm1927_vm0, %v11582_v60 }
 0x2d1   : > { %v4673_v53 = vsel %vm434_vm1, %v4656_v43, %v4657_v17 }
 0x2d2   : > { %v4665_v46 = vsel %vm434_vm1, %v4651_v12, %v4652_v40  ;;  %5650 = vmatprep.subr.bf16.mxu1 %v10895_v50  ;;  %v4520_v63 = vpop.permute.xlu1 %4519  ;;  %v4674_v61 = vsel %vm4659_vm13, %v14165_v2, %v4673_v53 }
 0x2d3   : > { %v4530_v48 = vrot.slane %v4520_v63, 4  ;;  %5651 = vmatpush1.bf16.msra.mxu1 %v10894_v29  ;;  %v4510_v13 = vpop.permute.xlu0 %4509  ;;  %v4666_v45 = vsel %vm4659_vm13, %v14154_v14, %v4665_v46  ;;  %vm6411_vm13 = vcmask 809984  }
 0x2d4   : > { %v4525_v25 = vrot.slane %v4510_v13, 4  ;;  %v10886_v47 = vcombine.low %v4666_v45, %v4674_v61  ;;  %v10887_v10 = vcombine.high %v4666_v45, %v4674_v61 }
 0x2d5   : > { %v4546_v43 = vsel %vm434_vm1, %v4529_v18, %v4530_v48 }
 0x2d6   : > { %v4538_v12 = vsel %vm434_vm1, %v4524_v36, %v4525_v25  ;;  %5652 = vmatprep.subr.bf16.mxu1 %v10887_v10  ;;  %v4393_v33 = vpop.permute.xlu1 %4392  ;;  %v4547_v2 = vsel %vm4532_vm14, %v14189_v41, %v4546_v43  ;;  %v1965_v25 = vpop.f32.mrf.mxu0 }
 0x2d7   : > { %v4403_v24 = vrot.slane %v4393_v33, 4  ;;  %5653 = vmatpush1.bf16.msra.mxu1 %v10886_v47  ;;  %v4383_v42 = vpop.permute.xlu0 %4382  ;;  %v4539_v14 = vsel %vm4532_vm14, %v14178_v8, %v4538_v12  ;;  %vm6328_vm14 = vcmask 818176  }
 0x2d8   : > { %v4398_v54 = vrot.slane %v4383_v42, 4  ;;  %v10878_v27 = vcombine.low %v4539_v14, %v4547_v2  ;;  %v10879_v56 = vcombine.high %v4539_v14, %v4547_v2 }
 0x2d9   : > { %v4419_v18 = vsel %vm434_vm1, %v4402_v57, %v4403_v24 }
 0x2da   : > { %v4411_v36 = vsel %vm434_vm1, %v4397_v3, %v4398_v54  ;;  %5654 = vmatprep.subr.bf16.mxu1 %v10879_v56  ;;  %v4266_v21 = vpop.permute.xlu1 %4265  ;;  %v4420_v41 = vsel %vm4405_vm10, %v14213_v7, %v4419_v18  ;;  %v5829_v54 = vlaneseq }
 0x2db   : > { %v4276_v16 = vrot.slane %v4266_v21, 4  ;;  %5655 = vmatpush1.bf16.msra.mxu1 %v10878_v27  ;;  %v4256_v52 = vpop.permute.xlu0 %4255  ;;  %v4412_v8 = vsel %vm4405_vm10, %v14202_v1, %v4411_v36  ;;  %vm6245_vm10 = vcmask 826368  }
 0x2dc   : > { %v4271_v38 = vrot.slane %v4256_v52, 4  ;;  %v10870_v28 = vcombine.low %v4412_v8, %v4420_v41  ;;  %v10871_v9 = vcombine.high %v4412_v8, %v4420_v41  ;;  %v14445_v18 = vshrl.u32 %v5829_v54, 7 }
 0x2dd   : > { %v4292_v57 = vsel %vm434_vm1, %v4275_v15, %v4276_v16 }
 0x2de   : > { %v4284_v3 = vsel %vm434_vm1, %v4270_v19, %v4271_v38  ;;  %5656 = vmatprep.subr.bf16.mxu1 %v10871_v9  ;;  %v4139_v26 = vpop.permute.xlu1 %4138  ;;  %v4293_v7 = vsel %vm4278_vm2, %v14237_v59, %v4292_v57  ;;  %v5831_v38 = vsub.s32 0, %v14445_v18 }
 0x2df   : > { %v4149_v4 = vrot.slane %v4139_v26, 4  ;;  %5657 = vmatpush1.bf16.msra.mxu1 %v10870_v28  ;;  %v4129_v62 = vpop.permute.xlu0 %4128  ;;  %v4285_v1 = vsel %vm4278_vm2, %v14226_v44, %v4284_v3  ;;  %v5835_v28 = vsub.s32 1, %v14445_v18  ;;  %vm6162_vm2 = vcmask 891904  }
 0x2e0   : > { %v4144_v55 = vrot.slane %v4129_v62, 4  ;;  %v10862_v0 = vcombine.low %v4285_v1, %v4293_v7  ;;  %v10863_v58 = vcombine.high %v4285_v1, %v4293_v7  ;;  %v14457_v7 = vld [vmem:[%s16443_s7] sm:$0xff] }
 0x2e1   : > { %v4165_v15 = vsel %vm434_vm1, %v4148_v39, %v4149_v4 }
 0x2e2   : > { %v4157_v19 = vsel %vm434_vm1, %v4143_v49, %v4144_v55  ;;  %5658 = vmatprep.subr.bf16.mxu1 %v10863_v58  ;;  %v4012_v17 = vpop.permute.xlu1 %4011  ;;  %v4166_v59 = vsel %vm4151_vm9, %v14261_v51, %v4165_v15  ;;  %v5832_v58 = vrot.slane %v14457_v7, %v5831_v38  ;;  %v5836_v15 = vrot.slane %v14457_v7, %v5835_v28 }
 0x2e3   : > { %v4022_v34 = vrot.slane %v4012_v17, 4  ;;  %5659 = vmatpush1.bf16.msra.mxu1 %v10862_v0  ;;  %v4002_v22 = vpop.permute.xlu0 %4001  ;;  %v4158_v44 = vsel %vm4151_vm9, %v14250_v31, %v4157_v19  ;;  %v5847_v38 = vsub.s32 4, %v14445_v18  ;;  %vm6079_vm9 = vcmask 900096  }
 0x2e4   : > { %v4017_v40 = vrot.slane %v4002_v22, 4  ;;  %v10854_v29 = vcombine.low %v4158_v44, %v4166_v59  ;;  %v10855_v50 = vcombine.high %v4158_v44, %v4166_v59 }
 0x2e5   : > { %v4038_v39 = vsel %vm434_vm1, %v4021_v6, %v4022_v34 }
 0x2e6   : > { %v4030_v49 = vsel %vm434_vm1, %v4016_v5, %v4017_v40  ;;  %5660 = vmatprep.subr.bf16.mxu1 %v10855_v50  ;;  %v5028_v60 = vpop.permute.xlu1 %5027  ;;  %v4039_v51 = vsel %vm4024_vm15, %v14285_v32, %v4038_v39 }
 0x2e7   : > { %v5038_v53 = vrot.slane %v5028_v60, 4  ;;  %5661 = vmatpush1.bf16.msra.mxu1 %v10854_v29  ;;  %v5018_v46 = vpop.permute.xlu0 %5017  ;;  %v4031_v31 = vsel %vm4024_vm15, %v14274_v11, %v4030_v49  ;;  %vm6577_vm15 = vcmask 736256  }
 0x2e8   : > { %v5033_v63 = vrot.slane %v5018_v46, 4  ;;  %v10846_v61 = vcombine.low %v4031_v31, %v4039_v51  ;;  %v10847_v48 = vcombine.high %v4031_v31, %v4039_v51 }
 0x2e9   : > { %v5054_v6 = vsel %vm434_vm1, %v5037_v30, %v5038_v53  ;;  %v1967_v30 = vpop.f32.mrf.mxu0  ;;  %v2008_v53 = vpop.f32.mrf.mxu1 }
 0x2ea   : > { %v5046_v5 = vsel %vm434_vm1, %v5032_v35, %v5033_v63  ;;  %5662 = vmatprep.subr.bf16.mxu1 %v10847_v48  ;;  %v5055_v32 = vsel %vm5040_vm8, %v14309_v37, %v5054_v6 }
 0x2eb   : > { %5663 = vmatpush1.bf16.msra.mxu1 %v10846_v61  ;;  %v5047_v13 = vsel %vm5040_vm8, %v14298_v20, %v5046_v5  ;;  %v1969_v47 = vpop.f32.mrf.mxu0  ;;  %v2010_v48 = vpop.f32.mrf.mxu1  ;;  %vm6660_vm8 = vcmask 728064  }
 0x2ec   : > { %v10910_v11 = vcombine.low %v5047_v13, %v5055_v32  ;;  %v10911_v45 = vcombine.high %v5047_v13, %v5055_v32 }
 0x2ed   : > { %v1971_v10 = vpop.f32.mrf.mxu0  ;;  %v2012_v5 = vpop.f32.mrf.mxu1 }
 0x2ee   : > { %5678 = vmatprep.subr.bf16.mxu1 %v10911_v45 }
 0x2ef   : > { %5679 = vmatpush2.bf16.msra.mxu1 %v10910_v11  ;;  %v14427_v43 = vpop.f32.mrf.mxu0  ;;  %v2014_v13 = vpop.f32.mrf.mxu1 }
 0x2f1   : > { %v14429_v35 = vpop.f32.mrf.mxu0  ;;  %v14480_v11 = vpop.f32.mrf.mxu1 }
 0x2f2   : > { %5681 = vmatmul.mubr.bf16.vlgmr.msra.gmra.mxu1 %v14114_v23 }
 0x2f3   : > { %v14431_v12 = vpop.f32.mrf.mxu0  ;;  %v14441_v27 = vpop.permute.xlu1 %5764 }
 0x2f4   : > { %v14447_v41 = vpop.permute.xlu0 %5759  ;;  %v14482_v45 = vpop.f32.mrf.mxu1 }
 0x2f5   : > { %v14433_v37 = vpop.f32.mrf.mxu0 }
 0x2f7   : > { %v3743_v33 = vpop.f32.mrf.mxu0  ;;  %v14451_v9 = vpop.permute.xlu1 %5787 }
 0x2f8   : > { %v3897_v36 = vadd.f32 %v3743_v33, %v1965_v25  ;;  %v14463_v17 = vpop.permute.xlu0 %5792  ;;  %v14484_v25 = vpop.f32.mrf.mxu1 }
 0x2f9   : > { %v3745_v20 = vpop.f32.mrf.mxu0 }
 0x2fa   : > { %v3898_v16 = vadd.f32 %v3745_v20, %v1967_v30  ;;  %v14486_v30 = vpop.f32.mrf.mxu1 }
 0x2fb   : > { %v3747_v2 = vpop.f32.mrf.mxu0 }
 0x2fc   : > { %v3905_v57 = vadd.f32 %v3747_v2, %v1969_v47  ;;  %v3786_v47 = vpop.f32.mrf.mxu1 }
 0x2fd   : > { %v3749_v24 = vpop.f32.mrf.mxu0 }
 0x2fe   : > { %v3906_v62 = vadd.f32 %v3749_v24, %v1971_v10  ;;  %v3788_v10 = vpop.f32.mrf.mxu1 }
 0x2ff   : > { %v14435_v42 = vpop.f32.mrf.mxu0  ;;  %v3900_v28 = vadd.f32 %v3788_v10, %v2010_v48 }
 0x300   : > { %v3790_v33 = vpop.f32.mrf.mxu1 }
 0x301   : > { %v14437_v14 = vpop.f32.mrf.mxu0 }
 0x302   : > { %v3792_v20 = vpop.f32.mrf.mxu1 }
 0x303   : > { %v14439_v23 = vpop.f32.mrf.mxu0 }
 0x305   : > { %v14443_v56 = vpop.f32.mrf.mxu0 }
 0x33e   : > { %v14488_v2 = vpop.f32.mrf.mxu1 }
 0x340   : > { %v14490_v24 = vpop.f32.mrf.mxu1 }
 0x342   : > { %v14492_v54 = vpop.f32.mrf.mxu1 }
 0x346   : > { %v5553_v21 = vpop.f32.mrf.mxu0 }
 0x347   : > { %v5707_v52 = vadd.f32 %v5553_v21, %v3897_v36  ;;  %v14494_v36 = vpop.f32.mrf.mxu1  ;;  %v3899_v21 = vadd.f32 %v3786_v47, %v2008_v53 }
 0x348   : > { %v5555_v8 = vpop.f32.mrf.mxu0 }
 0x349   : > { %v5708_v3 = vadd.f32 %v5555_v8, %v3898_v16  ;;  %v5767_v26 = vmul.f32 %v14447_v41, %v5707_v52  ;;  %v3901_v16 = vadd.f32 %v14435_v42, %v14427_v43  ;;  %v5839_v8 = vsub.s32 2, %v14445_v18 }
 0x34a   : > { %v5557_v4 = vpop.f32.mrf.mxu0  ;;  %v3909_v43 = vadd.f32 %v14439_v23, %v14431_v12  ;;  %v3910_v42 = vadd.f32 %v14443_v56, %v14433_v37 }
 0x34b   : > { %v5768_v1 = vmul.f32 %v14447_v41, %v5708_v3  ;;  %v5795_v55 = vadd.f32 %v14451_v9, %v5767_v26  ;;  %v5715_v0 = vadd.f32 %v5557_v4, %v3905_v57  ;;  %v3907_v57 = vadd.f32 %v3790_v33, %v2012_v5 }
 0x34c   : > { %v5559_v19 = vpop.f32.mrf.mxu0  ;;  %v5843_v4 = vsub.s32 3, %v14445_v18 }
 0x34d   : > { %v5796_v59 = vadd.f32 %v14451_v9, %v5768_v1  ;;  %v5811_v34 = vmax.f32 %v5795_v55, 0.0  ;;  %v5775_v22 = vmul.f32 %v14441_v27, %v5715_v0  ;;  %v5716_v44 = vadd.f32 %v5559_v19, %v3906_v62 }
 0x34e   : > { %v3908_v62 = vadd.f32 %v3792_v20, %v2014_v13  ;;  %v3902_v1 = vadd.f32 %v14437_v14, %v14429_v35  ;;  %v5848_v35 = vrot.slane %v14457_v7, %v5847_v38  ;;  %v5844_v12 = vrot.slane %v14457_v7, %v5843_v4 }
 0x34f   : > { %v5812_v40 = vmax.f32 %v5796_v59, 0.0  ;;  %v5776_v29 = vmul.f32 %v14441_v27, %v5716_v44  ;;  %v5803_v50 = vadd.f32 %v14463_v17, %v5775_v22  ;;  %v5869_v39 = vmul.f32 %v5832_v58, %v5811_v34 }
 0x350   : > { %v5840_v34 = vrot.slane %v14457_v7, %v5839_v8 }
 0x351   : > { %v5870_v49 = vmul.f32 %v5836_v15, %v5812_v40  ;;  %v5804_v60 = vadd.f32 %v14463_v17, %v5776_v29  ;;  %v5819_v51 = vmax.f32 %v5803_v50, 0.0 }
 0x353   : > { %v14470_v46 = vpack.c.bf16 %v5870_v49, %v5869_v39  ;;  %v5820_v31 = vmax.f32 %v5804_v60, 0.0  ;;  %v5877_v63 = vmul.f32 %v5832_v58, %v5819_v51  ;;  %v5851_v58 = vsub.s32 5, %v14445_v18 }
 0x355   : > { %5937 = vst [vmem:[#allocation3 + $0x4] sm:$0xff] %v14470_v46  ;;  %v5878_v61 = vmul.f32 %v5836_v15, %v5820_v31  ;;  %v5852_v39 = vrot.slane %v14457_v7, %v5851_v58 }
 0x357   : > { %v14473_v6 = vpack.c.bf16 %v5878_v61, %v5877_v63 }
 0x359   : > { %5941 = vst [vmem:[#allocation3 + $0x2c] sm:$0xff] %v14473_v6 }
 0x35c   : > { %v14476_v32 = vld [vmem:[#allocation3] sm:$0xff] }
 0x35d   : > { %5965 = vrot.lane.b32.xlu1 %v14476_v32, %s11741_s4 }
 0x38e   : > { %v5596_v52 = vpop.f32.mrf.mxu1 }
 0x38f   : > { %v5709_v3 = vadd.f32 %v5596_v52, %v3899_v21  ;;  %v5639_v26 = vpop.f32.mrf.mxu0 }
 0x390   : > { %v5711_v55 = vadd.f32 %v5639_v26, %v3901_v16  ;;  %v5598_v0 = vpop.f32.mrf.mxu1 }
 0x391   : > { %v5769_v15 = vmul.f32 %v14447_v41, %v5709_v3  ;;  %v5710_v19 = vadd.f32 %v5598_v0, %v3900_v28  ;;  %v5641_v59 = vpop.f32.mrf.mxu0 }
 0x392   : > { %v5771_v22 = vmul.f32 %v14447_v41, %v5711_v55  ;;  %v5712_v14 = vadd.f32 %v5641_v59, %v3902_v1  ;;  %v5600_v44 = vpop.f32.mrf.mxu1 }
 0x393   : > { %v5797_v40 = vadd.f32 %v14451_v9, %v5769_v15  ;;  %v5770_v29 = vmul.f32 %v14447_v41, %v5710_v19  ;;  %v5717_v23 = vadd.f32 %v5600_v44, %v3907_v57  ;;  %v5643_v37 = vpop.f32.mrf.mxu0 }
 0x394   : > { %v5799_v56 = vadd.f32 %v14451_v9, %v5771_v22  ;;  %v5772_v50 = vmul.f32 %v14447_v41, %v5712_v14  ;;  %v5719_v49 = vadd.f32 %v5643_v37, %v3909_v43  ;;  %v5602_v60 = vpop.f32.mrf.mxu1  ;;  %v5855_v37 = vsub.s32 6, %v14445_v18 }
 0x395   : > { %v5813_v51 = vmax.f32 %v5797_v40, 0.0  ;;  %v5798_v53 = vadd.f32 %v14451_v9, %v5770_v29  ;;  %v5777_v31 = vmul.f32 %v14441_v27, %v5717_v23  ;;  %v5718_v63 = vadd.f32 %v5602_v60, %v3908_v62  ;;  %v5645_v61 = vpop.f32.mrf.mxu0 }
 0x396   : > { %v5815_v48 = vmax.f32 %v5799_v56, 0.0  ;;  %v5800_v5 = vadd.f32 %v14451_v9, %v5772_v50  ;;  %v5779_v13 = vmul.f32 %v14441_v27, %v5719_v49  ;;  %v5720_v47 = vadd.f32 %v5645_v61, %v3910_v42 }
 0x397   : > { %v5814_v10 = vmax.f32 %v5798_v53, 0.0  ;;  %v5805_v33 = vadd.f32 %v14463_v17, %v5777_v31  ;;  %v5778_v20 = vmul.f32 %v14441_v27, %v5718_v63  ;;  %v5871_v8 = vmul.f32 %v5840_v34, %v5813_v51 }
 0x398   : > { %v5816_v21 = vmax.f32 %v5800_v5, 0.0  ;;  %v5807_v16 = vadd.f32 %v14463_v17, %v5779_v13  ;;  %v5780_v52 = vmul.f32 %v14441_v27, %v5720_v47  ;;  %v5873_v3 = vmul.f32 %v5848_v35, %v5815_v48 }
 0x399   : > { %v5872_v38 = vmul.f32 %v5844_v12, %v5814_v10  ;;  %v5821_v28 = vmax.f32 %v5805_v33, 0.0  ;;  %v5806_v57 = vadd.f32 %v14463_v17, %v5778_v20  ;;  %v3903_v40 = vadd.f32 %v14488_v2, %v14480_v11 }
 0x39a   : > { %v5874_v26 = vmul.f32 %v5852_v39, %v5816_v21  ;;  %v5823_v4 = vmax.f32 %v5807_v16, 0.0  ;;  %v5808_v62 = vadd.f32 %v14463_v17, %v5780_v52  ;;  %v5859_v50 = vsub.s32 7, %v14445_v18 }
 0x39b   : > { %v14528_v1 = vpack.c.bf16 %v5872_v38, %v5871_v8  ;;  %v5822_v55 = vmax.f32 %v5806_v57, 0.0  ;;  %v5879_v43 = vmul.f32 %v5840_v34, %v5821_v28  ;;  %v14546_v34 = vld [vmem:[#allocation3 + $0x28] sm:$0xff]  ;;  %v3912_v11 = vadd.f32 %v14494_v36, %v14486_v30 }
 0x39c   : > { %v14530_v0 = vpack.c.bf16 %v5874_v26, %v5873_v3  ;;  %v5824_v58 = vmax.f32 %v5808_v62, 0.0  ;;  %v5881_v15 = vmul.f32 %v5848_v35, %v5823_v4  ;;  %v5856_v53 = vrot.slane %v14457_v7, %v5855_v37 }
 0x39d   : > { %5938 = vst [vmem:[#allocation3 + $0xc] sm:$0xff] %v14528_v1  ;;  %v5880_v42 = vmul.f32 %v5844_v12, %v5822_v55  ;;  %v3904_v12 = vadd.f32 %v14490_v24, %v14482_v45  ;;  %v5860_v31 = vrot.slane %v14457_v7, %v5859_v50 }
 0x39e   : > { %5939 = vst [vmem:[#allocation3 + $0x14] sm:$0xff] %v14530_v0  ;;  %v5882_v19 = vmul.f32 %v5852_v39, %v5824_v58  ;;  %v3911_v39 = vadd.f32 %v14492_v54, %v14484_v25 }
 0x39f   : > { %v14534_v59 = vpack.c.bf16 %v5880_v42, %v5879_v43 }
 0x3a0   : > { %v14536_v22 = vpack.c.bf16 %v5882_v19, %v5881_v15 }
 0x3a1   : > { %5942 = vst [vmem:[#allocation3 + $0x34] sm:$0xff] %v14534_v59 }
 0x3a2   : > { %5943 = vst [vmem:[#allocation3 + $0x3c] sm:$0xff] %v14536_v22 }
 0x3a4   : > { %v14540_v14 = vld [vmem:[#allocation3 + $0x8] sm:$0xff] }
 0x3a5   : > { %5967 = vrot.lane.b32.xlu0 %v14540_v14, %s11741_s4  ;;  %v14552_v35 = vld [vmem:[#allocation3 + $0x10] sm:$0xff] }
 0x3a8   : > { %v14544_v44 = vld [vmem:[#allocation3 + $0x30] sm:$0xff] }
 0x3a9   : > { %5977 = vrot.lane.b32.xlu1 %v14544_v44, %s11741_s4  ;;  %5975 = vrot.lane.b32.xlu0 %v14546_v34, %s11741_s4  ;;  %v14583_v52 = vld [vmem:[#allocation3 + $0x38] sm:$0xff] }
 0x3ad   : > { %5969 = vrot.lane.b32.xlu1 %v14552_v35, %s11741_s4 }
 0x3b2   : > { %v5682_v29 = vpop.f32.mrf.mxu1 }
 0x3b3   : > { %v5713_v23 = vadd.f32 %v5682_v29, %v3903_v40 }
 0x3b4   : > { %v5684_v56 = vpop.f32.mrf.mxu1 }
 0x3b5   : > { %v5773_v49 = vmul.f32 %v14447_v41, %v5713_v23  ;;  %v5714_v60 = vadd.f32 %v5684_v56, %v3904_v12  ;;  %v14702_v56 = vld [vmem:[#allocation8 + $0x4] ss:$8 sps:$4 sm:$0xff]  }
 0x3b6   : > { %v5686_v51 = vpop.f32.mrf.mxu1  ;;  %10998 = vmatprep.mubr.msk.bf16.mxu0 %vm1927_vm0, %v14702_v56  ;;  %10999 = vmatprep.mubr.msk.bf16.mxu1 %vm1927_vm0, %v14702_v56 }
 0x3b7   : > { %v5801_v2 = vadd.f32 %v14451_v9, %v5773_v49  ;;  %v5774_v45 = vmul.f32 %v14447_v41, %v5714_v60  ;;  %v5721_v24 = vadd.f32 %v5686_v51, %v3911_v39 }
 0x3b8   : > { %v5688_v18 = vpop.f32.mrf.mxu1 }
 0x3b9   : > { %v5817_v63 = vmax.f32 %v5801_v2, 0.0  ;;  %v5802_v25 = vadd.f32 %v14451_v9, %v5774_v45  ;;  %v5781_v54 = vmul.f32 %v14441_v27, %v5721_v24  ;;  %v5722_v61 = vadd.f32 %v5688_v18, %v3912_v11 }
 0x3bb   : > { %v5818_v48 = vmax.f32 %v5802_v25, 0.0  ;;  %v5809_v5 = vadd.f32 %v14463_v17, %v5781_v54  ;;  %v5782_v30 = vmul.f32 %v14441_v27, %v5722_v61  ;;  %v5875_v36 = vmul.f32 %v5856_v53, %v5817_v63 }
 0x3bd   : > { %v5876_v13 = vmul.f32 %v5860_v31, %v5818_v48  ;;  %v5825_v41 = vmax.f32 %v5809_v5, 0.0  ;;  %v5810_v47 = vadd.f32 %v14463_v17, %v5782_v30 }
 0x3bf   : > { %v11436_v10 = vpack.c.bf16 %v5876_v13, %v5875_v36  ;;  %v5826_v33 = vmax.f32 %v5810_v47, 0.0  ;;  %v5883_v7 = vmul.f32 %v5856_v53, %v5825_v41 }
 0x3c1   : > { %5940 = vst [vmem:[#allocation3 + $0x1c] sm:$0xff] %v11436_v10  ;;  %v5884_v20 = vmul.f32 %v5860_v31, %v5826_v33 }
 0x3c3   : > { %v11440_v21 = vpack.c.bf16 %v5884_v20, %v5883_v7 }
 0x3c5   : > { %5944 = vst [vmem:[#allocation3 + $0x44] sm:$0xff] %v11440_v21 }
 0x3c8   : > { %v5949_v9 = vld [vmem:[#allocation3 + $0x20] sm:$0xf]  ;;  %v14576_v16 = vld [vmem:[#allocation3 + $0x18] sm:$0xff] }
 0x3c9   : > { %5973 = vrot.lane.b32.xlu1 %v5949_v9, %s11741_s4  ;;  %5971 = vrot.lane.b32.xlu0 %v14576_v16, %s11741_s4  ;;  %v6032_v8 = vld [vmem:[#allocation3 + $0x20] sm:$0xf] }
 0x3ca   : > { %v6115_v28 = vld [vmem:[#allocation3 + $0x20] sm:$0xf] }
 0x3cb   : > { %v6198_v3 = vld [vmem:[#allocation3 + $0x20] sm:$0xf] }
 0x3cc   : > { %v14581_v27 = vld [vmem:[#allocation3 + $0x40] sm:$0xff]  ;;  %v5954_v17 = vld [vmem:[#allocation3 + $0x48] sm:$0xf] }
 0x3cd   : > { %5981 = vrot.lane.b32.xlu1 %v14581_v27, %s11741_s4  ;;  %5979 = vrot.lane.b32.xlu0 %v14583_v52, %s11741_s4  ;;  %v6037_v38 = vld [vmem:[#allocation3 + $0x48] sm:$0xf]  ;;  %v6530_v49 = vld [vmem:[#allocation3 + $0x20] sm:$0xf] }
 0x3ce   : > { %v6120_v57 = vld [vmem:[#allocation3 + $0x48] sm:$0xf]  ;;  %v6447_v24 = vld [vmem:[#allocation3 + $0x20] sm:$0xf] }
 0x3cf   : > { %v6203_v26 = vld [vmem:[#allocation3 + $0x48] sm:$0xf]  ;;  %v14644_v4 = vpop.permute.xlu1 %5965  ;;  %v6364_v54 = vld [vmem:[#allocation3 + $0x20] sm:$0xf] }
 0x3d0   : > { %v6535_v11 = vld [vmem:[#allocation3 + $0x48] sm:$0xf]  ;;  %v6281_v13 = vld [vmem:[#allocation3 + $0x20] sm:$0xf] }
 0x3d1   : > { %6048 = vrot.lane.b32.xlu1 %v14476_v32, %s11742_s13  ;;  %5983 = vrot.lane.b32.xlu0 %v5954_v17, %s11741_s4  ;;  %v6452_v18 = vld [vmem:[#allocation3 + $0x48] sm:$0xf]  ;;  %v6613_v20 = vld [vmem:[#allocation3 + $0x20] sm:$0xf]  ;;  %s11752_s4 = smov 127  }
 0x3d2   : > { %v6369_v5 = vld [vmem:[#allocation3 + $0x48] sm:$0xf] }
 0x3d3   : > { %v6286_v10 = vld [vmem:[#allocation3 + $0x48] sm:$0xf] }
 0x3d4   : > { %v6618_v17 = vld [vmem:[#allocation3 + $0x48] sm:$0xf] }
 0x3d5   : > { %6052 = vrot.lane.b32.xlu1 %v14552_v35, %s11742_s13  ;;  %6050 = vrot.lane.b32.xlu0 %v14540_v14, %s11742_s13 }
 0x3d9   : > { %6056 = vrot.lane.b32.xlu1 %v6032_v8, %s11742_s13  ;;  %6054 = vrot.lane.b32.xlu0 %v14576_v16, %s11742_s13 }
 0x3dd   : > { %6060 = vrot.lane.b32.xlu1 %v14544_v44, %s11742_s13  ;;  %6058 = vrot.lane.b32.xlu0 %v14546_v34, %s11742_s13 }
 0x3e1   : > { %6064 = vrot.lane.b32.xlu1 %v14581_v27, %s11742_s13  ;;  %6062 = vrot.lane.b32.xlu0 %v14583_v52, %s11742_s13 }
 0x3e5   : > { %6131 = vrot.lane.b32.xlu1 %v14476_v32, %s11743_s17  ;;  %6066 = vrot.lane.b32.xlu0 %v6037_v38, %s11742_s13  ;;  %s11753_s13 = smov 1  }
 0x3e9   : > { %6135 = vrot.lane.b32.xlu1 %v14552_v35, %s11743_s17  ;;  %6133 = vrot.lane.b32.xlu0 %v14540_v14, %s11743_s17 }
 0x3ed   : > { %6139 = vrot.lane.b32.xlu1 %v6115_v28, %s11743_s17  ;;  %6137 = vrot.lane.b32.xlu0 %v14576_v16, %s11743_s17 }
 0x3f1   : > { %6143 = vrot.lane.b32.xlu1 %v14544_v44, %s11743_s17  ;;  %6141 = vrot.lane.b32.xlu0 %v14546_v34, %s11743_s17 }
 0x3f5   : > { %6147 = vrot.lane.b32.xlu1 %v14581_v27, %s11743_s17  ;;  %6145 = vrot.lane.b32.xlu0 %v14583_v52, %s11743_s17 }
 0x3f9   : > { %6214 = vrot.lane.b32.xlu1 %v14476_v32, %s11744_s23  ;;  %6149 = vrot.lane.b32.xlu0 %v6120_v57, %s11743_s17  ;;  %s11754_s17 = smov 9  }
 0x3fd   : > { %6218 = vrot.lane.b32.xlu1 %v14552_v35, %s11744_s23  ;;  %6216 = vrot.lane.b32.xlu0 %v14540_v14, %s11744_s23 }
 0x401   : > { %6222 = vrot.lane.b32.xlu1 %v6198_v3, %s11744_s23  ;;  %6220 = vrot.lane.b32.xlu0 %v14576_v16, %s11744_s23 }
 0x405   : > { %6226 = vrot.lane.b32.xlu1 %v14544_v44, %s11744_s23  ;;  %6224 = vrot.lane.b32.xlu0 %v14546_v34, %s11744_s23 }
 0x409   : > { %6230 = vrot.lane.b32.xlu1 %v14581_v27, %s11744_s23  ;;  %6228 = vrot.lane.b32.xlu0 %v14583_v52, %s11744_s23 }
 0x40d   : > { %6297 = vrot.lane.b32.xlu1 %v14476_v32, %s11745_s16  ;;  %6232 = vrot.lane.b32.xlu0 %v6203_v26, %s11744_s23  ;;  %s11755_s23 = smov 10  }
 0x411   : > { %6548 = vrot.lane.b32.xlu1 %v14540_v14, %s11746_s11  ;;  %6546 = vrot.lane.b32.xlu0 %v14476_v32, %s11746_s11 }
 0x415   : > { %6556 = vrot.lane.b32.xlu1 %v14546_v34, %s11746_s11  ;;  %6550 = vrot.lane.b32.xlu0 %v14552_v35, %s11746_s11 }
 0x417   : > { %v14650_v62 = vpop.permute.xlu0 %5967 }
 0x419   : > { %6560 = vrot.lane.b32.xlu1 %v14583_v52, %s11746_s11  ;;  %6558 = vrot.lane.b32.xlu0 %v14544_v44, %s11746_s11 }
 0x41b   : > { %v14652_v55 = vpop.permute.xlu1 %5977  ;;  %v14662_v58 = vpop.permute.xlu0 %5975 }
 0x41d   : > { %6465 = vrot.lane.b32.xlu1 %v14540_v14, %s11747_s21  ;;  %6463 = vrot.lane.b32.xlu0 %v14476_v32, %s11747_s21 }
 0x41f   : > { %v14664_v43 = vpop.permute.xlu1 %5969 }
 0x421   : > { %6473 = vrot.lane.b32.xlu1 %v14546_v34, %s11747_s21  ;;  %6467 = vrot.lane.b32.xlu0 %v14552_v35, %s11747_s21 }
 0x425   : > { %6477 = vrot.lane.b32.xlu1 %v14583_v52, %s11747_s21  ;;  %6475 = vrot.lane.b32.xlu0 %v14544_v44, %s11747_s21 }
 0x429   : > { %6382 = vrot.lane.b32.xlu1 %v14540_v14, %s11748_s15  ;;  %6380 = vrot.lane.b32.xlu0 %v14476_v32, %s11748_s15 }
 0x42d   : > { %6390 = vrot.lane.b32.xlu1 %v14546_v34, %s11748_s15  ;;  %6384 = vrot.lane.b32.xlu0 %v14552_v35, %s11748_s15 }
 0x431   : > { %6394 = vrot.lane.b32.xlu1 %v14583_v52, %s11748_s15  ;;  %6392 = vrot.lane.b32.xlu0 %v14544_v44, %s11748_s15 }
 0x435   : > { %6301 = vrot.lane.b32.xlu1 %v14552_v35, %s11745_s16  ;;  %6299 = vrot.lane.b32.xlu0 %v14540_v14, %s11745_s16 }
 0x439   : > { %6309 = vrot.lane.b32.xlu1 %v14544_v44, %s11745_s16  ;;  %6307 = vrot.lane.b32.xlu0 %v14546_v34, %s11745_s16 }
 0x43b   : > { %v14670_v42 = vpop.permute.xlu1 %5973  ;;  %v14672_v15 = vpop.permute.xlu0 %5971 }
 0x43d   : > { %6629 = vrot.lane.b32.xlu1 %v14476_v32, %s11749_s19  ;;  %6311 = vrot.lane.b32.xlu0 %v14583_v52, %s11745_s16 }
 0x43f   : > { %v14678_v19 = vpop.permute.xlu1 %5981  ;;  %v14680_v40 = vpop.permute.xlu0 %5979 }
 0x441   : > { %6633 = vrot.lane.b32.xlu1 %v14552_v35, %s11749_s19  ;;  %6631 = vrot.lane.b32.xlu0 %v14540_v14, %s11749_s19 }
 0x443   : > { %v14686_v29 = vpop.permute.xlu1 %6048  ;;  %v14688_v12 = vpop.permute.xlu0 %5983 }
 0x444   : > { %16759 = vst [vmem:[#allocation32_spill] sm:$0xff] %v14688_v12 }
 0x445   : > { %6641 = vrot.lane.b32.xlu1 %v14544_v44, %s11749_s19  ;;  %6639 = vrot.lane.b32.xlu0 %v14546_v34, %s11749_s19 }
 0x447   : > { %v14694_v23 = vpop.permute.xlu1 %6052  ;;  %v14696_v37 = vpop.permute.xlu0 %6050 }
 0x449   : > { %6552 = vrot.lane.b32.xlu1 %v14576_v16, %s11746_s11  ;;  %6643 = vrot.lane.b32.xlu0 %v14583_v52, %s11749_s19 }
 0x44b   : > { %v14704_v50 = vpop.permute.xlu1 %6056  ;;  %v14706_v39 = vpop.permute.xlu0 %6054 }
 0x44c   : > { %16760 = vst [vmem:[#allocation54_spill] sm:$0xff] %v14704_v50  ;;  %16761 = vst [vmem:[#allocation44_spill] sm:$0xff] %v14706_v39 }
 0x44d   : > { %6562 = vrot.lane.b32.xlu1 %v14581_v27, %s11746_s11  ;;  %6554 = vrot.lane.b32.xlu0 %v6530_v49, %s11746_s11 }
 0x44f   : > { %v14715_v60 = vpop.permute.xlu1 %6060  ;;  %v14717_v51 = vpop.permute.xlu0 %6058 }
 0x451   : > { %6469 = vrot.lane.b32.xlu1 %v14576_v16, %s11747_s21  ;;  %6564 = vrot.lane.b32.xlu0 %v6535_v11, %s11746_s11  ;;  %s11757_s11 = smov 117  }
 0x453   : > { %v14722_v2 = vpop.permute.xlu1 %6064  ;;  %v14724_v45 = vpop.permute.xlu0 %6062 }
 0x454   : > { %16762 = vst [vmem:[#allocation47_spill] sm:$0xff] %v14722_v2 }
 0x455   : > { %6479 = vrot.lane.b32.xlu1 %v14581_v27, %s11747_s21  ;;  %6471 = vrot.lane.b32.xlu0 %v6447_v24, %s11747_s21 }
 0x457   : > { %v14729_v53 = vpop.permute.xlu1 %6131  ;;  %v14731_v31 = vpop.permute.xlu0 %6066 }
 0x458   : > { %16763 = vst [vmem:[#allocation51_spill] sm:$0xff] %v14731_v31 }
 0x459   : > { %6386 = vrot.lane.b32.xlu1 %v14576_v16, %s11748_s15  ;;  %6481 = vrot.lane.b32.xlu0 %v6452_v18, %s11747_s21  ;;  %s16816_s21 = smov 27  }
 0x45b   : > { %v14736_v63 = vpop.permute.xlu1 %6135  ;;  %v14738_v25 = vpop.permute.xlu0 %6133 }
 0x45d   : > { %6396 = vrot.lane.b32.xlu1 %v14581_v27, %s11748_s15  ;;  %6388 = vrot.lane.b32.xlu0 %v6364_v54, %s11748_s15 }
 0x45f   : > { %v14743_v61 = vpop.permute.xlu1 %6139  ;;  %v14745_v48 = vpop.permute.xlu0 %6137 }
 0x460   : > { %16764 = vst [vmem:[#allocation48_spill] sm:$0xff] %v14743_v61  ;;  %16765 = vst [vmem:[#allocation36_spill] sm:$0xff] %v14745_v48 }
 0x461   : > { %6303 = vrot.lane.b32.xlu1 %v14576_v16, %s11745_s16  ;;  %6398 = vrot.lane.b32.xlu0 %v6369_v5, %s11748_s15  ;;  %s16817_s15 = smov 28  }
 0x463   : > { %v14750_v30 = vpop.permute.xlu1 %6143  ;;  %v14752_v36 = vpop.permute.xlu0 %6141 }
 0x465   : > { %6313 = vrot.lane.b32.xlu1 %v14581_v27, %s11745_s16  ;;  %6305 = vrot.lane.b32.xlu0 %v6281_v13, %s11745_s16 }
 0x467   : > { %v14757_v41 = vpop.permute.xlu1 %6147  ;;  %v14759_v47 = vpop.permute.xlu0 %6145 }
 0x468   : > { %16766 = vst [vmem:[#allocation40_spill] sm:$0xff] %v14757_v41 }
 0x469   : > { %6635 = vrot.lane.b32.xlu1 %v14576_v16, %s11749_s19  ;;  %6315 = vrot.lane.b32.xlu0 %v6286_v10, %s11745_s16  ;;  %s11756_s16 = smov 11  }
 0x46b   : > { %v14764_v33 = vpop.permute.xlu1 %6214  ;;  %v14766_v7 = vpop.permute.xlu0 %6149 }
 0x46c   : > { %16767 = vst [vmem:[#allocation43_spill] sm:$0xff] %v14766_v7 }
 0x46d   : > { %6645 = vrot.lane.b32.xlu1 %v14581_v27, %s11749_s19  ;;  %6637 = vrot.lane.b32.xlu0 %v6613_v20, %s11749_s19 }
 0x46f   : > { %v14771_v21 = vpop.permute.xlu1 %6218  ;;  %v14773_v9 = vpop.permute.xlu0 %6216 }
 0x471   : > { %7860 = vrot.lane.b32.xlu1 %v14470_v46, %s11750_s22  ;;  %6647 = vrot.lane.b32.xlu0 %v6618_v17, %s11749_s19  ;;  %s16818_s19 = smov 29  }
 0x473   : > { %v14778_v16 = vpop.permute.xlu1 %6222  ;;  %v14780_v8 = vpop.permute.xlu0 %6220 }
 0x474   : > { %16768 = vst [vmem:[#allocation39_spill] sm:$0xff] %v14778_v16  ;;  %16769 = vst [vmem:[#allocation46_spill] sm:$0xff] %v14780_v8 }
 0x475   : > { %7864 = vrot.lane.b32.xlu1 %v14530_v0, %s11750_s22  ;;  %7862 = vrot.lane.b32.xlu0 %v14528_v1, %s11750_s22 }
 0x477   : > { %v14786_v27 = vpop.permute.xlu1 %6226  ;;  %v14788_v38 = vpop.permute.xlu0 %6224 }
 0x479   : > { %7872 = vrot.lane.b32.xlu1 %v14534_v59, %s11750_s22  ;;  %7870 = vrot.lane.b32.xlu0 %v14473_v6, %s11750_s22 }
 0x47b   : > { %v14794_v28 = vpop.permute.xlu1 %6230  ;;  %v14796_v57 = vpop.permute.xlu0 %6228 }
 0x47c   : > { %16770 = vst [vmem:[#allocation50_spill] sm:$0xff] %v14796_v57 }
 0x47d   : > { %7777 = vrot.lane.b32.xlu1 %v14470_v46, %s11751_s14  ;;  %7874 = vrot.lane.b32.xlu0 %v14536_v22, %s11750_s22 }
 0x47f   : > { %v14802_v3 = vpop.permute.xlu1 %6297  ;;  %v14804_v26 = vpop.permute.xlu0 %6232 }
 0x480   : > { %16771 = vst [vmem:[#allocation49_spill] sm:$0xff] %v14804_v26 }
 0x481   : > { %7781 = vrot.lane.b32.xlu1 %v14530_v0, %s11751_s14  ;;  %7779 = vrot.lane.b32.xlu0 %v14528_v1, %s11751_s14 }
 0x483   : > { %v6549_v49 = vpop.permute.xlu1 %6548  ;;  %v6547_v11 = vpop.permute.xlu0 %6546 }
 0x484   : > { %v6567_v24 = vrot.slane %v6549_v49, 4  ;;  %v6566_v18 = vrot.slane %v6547_v11, 4 }
 0x485   : > { %7789 = vrot.lane.b32.xlu1 %v14534_v59, %s11751_s14  ;;  %7787 = vrot.lane.b32.xlu0 %v14473_v6, %s11751_s14 }
 0x486   : > { %v6576_v10 = vsel %vm434_vm1, %v6566_v18, %v6567_v24 }
 0x487   : > { %v6557_v54 = vpop.permute.xlu1 %6556  ;;  %v14814_v5 = vpop.permute.xlu0 %6550  ;;  %v6578_v7 = vsel %vm6577_vm15, %v6547_v11, %v6576_v10 }
 0x488   : > { %v16545_v13 = vrot.slane %v14814_v5, 4  ;;  %v6571_v50 = vrot.slane %v6557_v54, 4 }
 0x489   : > { %7694 = vrot.lane.b32.xlu1 %v14470_v46, %s11752_s4  ;;  %7791 = vrot.lane.b32.xlu0 %v14536_v22, %s11751_s14 }
 0x48a   : > { %v6579_v61 = vsel %vm434_vm1, %v6567_v24, %v16545_v13 }
 0x48b   : > { %v14822_v20 = vpop.permute.xlu1 %6560  ;;  %v6559_v17 = vpop.permute.xlu0 %6558  ;;  %v6580_v48 = vsel %vm6577_vm15, %v6549_v49, %v6579_v61 }
 0x48c   : > { %v16550_v31 = vrot.slane %v14822_v20, 4  ;;  %v6572_v16 = vrot.slane %v6559_v17, 4 }
 0x48d   : > { %7698 = vrot.lane.b32.xlu1 %v14530_v0, %s11752_s4  ;;  %7696 = vrot.lane.b32.xlu0 %v14528_v1, %s11752_s4 }
 0x48e   : > { %v6587_v46 = vsel %vm434_vm1, %v6572_v16, %v16550_v31  ;;  %v6585_v18 = vsel %vm434_vm1, %v6571_v50, %v6572_v16 }
 0x48f   : > { %v6588_v2 = vsel %vm6577_vm15, %v6559_v17, %v6587_v46  ;;  %v6466_v24 = vpop.permute.xlu1 %6465  ;;  %v6464_v13 = vpop.permute.xlu0 %6463  ;;  %v6586_v39 = vsel %vm6577_vm15, %v6557_v54, %v6585_v18 }
 0x490   : > { %v10984_v0 = vcombine.low %v6580_v48, %v6588_v2  ;;  %v10982_v26 = vcombine.low %v6578_v7, %v6586_v39  ;;  %v10983_v1 = vcombine.high %v6578_v7, %v6586_v39  ;;  %v10985_v50 = vcombine.high %v6580_v48, %v6588_v2 }
 0x491   : > { %7706 = vrot.lane.b32.xlu1 %v14534_v59, %s11752_s4  ;;  %7704 = vrot.lane.b32.xlu0 %v14473_v6, %s11752_s4  ;;  %v6484_v16 = vrot.slane %v6466_v24, 4  ;;  %v6483_v11 = vrot.slane %v6464_v13, 4 }
 0x492   : > { %7138 = vmatprep.subr.bf16.mxu0 %v10983_v1  ;;  %7181 = vmatprep.subr.bf16.mxu1 %v10985_v50 }
 0x493   : > { %v6474_v61 = vpop.permute.xlu1 %6473  ;;  %v14844_v49 = vpop.permute.xlu0 %6467  ;;  %7139 = vmatpush1.bf16.msra.mxu0 %v10982_v26  ;;  %7182 = vmatpush1.bf16.msra.mxu1 %v10984_v0  ;;  %v6493_v6 = vsel %vm434_vm1, %v6483_v11, %v6484_v16 }
 0x494   : > { %v16548_v54 = vrot.slane %v14844_v49, 4  ;;  %v6488_v2 = vrot.slane %v6474_v61, 4  ;;  %v6495_v10 = vsel %vm6494_vm11, %v6464_v13, %v6493_v6  ;;  %v16551_v13 = vrot.slane %v14650_v62, 4 }
 0x495   : > { %7595 = vrot.lane.b32.xlu1 %v14476_v32, %s11753_s13  ;;  %7708 = vrot.lane.b32.xlu0 %v14536_v22, %s11752_s4  ;;  %v5990_v6 = vrot.slane %v14662_v58, 4 }
 0x496   : > { %v6496_v7 = vsel %vm434_vm1, %v6484_v16, %v16548_v54 }
 0x497   : > { %v14852_v59 = vpop.permute.xlu1 %6477  ;;  %v6476_v39 = vpop.permute.xlu0 %6475  ;;  %v6497_v17 = vsel %vm6494_vm11, %v6466_v24, %v6496_v7  ;;  %v16552_v24 = vrot.slane %v14652_v55, 4 }
 0x498   : > { %v16547_v48 = vrot.slane %v14852_v59, 4  ;;  %v6489_v26 = vrot.slane %v6476_v39, 4 }
 0x499   : > { %7599 = vrot.lane.b32.xlu1 %v14552_v35, %s11753_s13  ;;  %7597 = vrot.lane.b32.xlu0 %v14540_v14, %s11753_s13 }
 0x49a   : > { %v6504_v32 = vsel %vm434_vm1, %v6489_v26, %v16547_v48  ;;  %v6502_v22 = vsel %vm434_vm1, %v6488_v2, %v6489_v26 }
 0x49b   : > { %v6505_v46 = vsel %vm6494_vm11, %v6476_v39, %v6504_v32  ;;  %v6383_v18 = vpop.permute.xlu1 %6382  ;;  %v6381_v0 = vpop.permute.xlu0 %6380  ;;  %v6503_v1 = vsel %vm6494_vm11, %v6474_v61, %v6502_v22  ;;  %v5985_v32 = vrot.slane %v14644_v4, 4 }
 0x49c   : > { %v10976_v50 = vcombine.low %v6497_v17, %v6505_v46  ;;  %v10974_v16 = vcombine.low %v6495_v10, %v6503_v1  ;;  %v10975_v11 = vcombine.high %v6495_v10, %v6503_v1  ;;  %v10977_v2 = vcombine.high %v6497_v17, %v6505_v46  ;;  %v14881_v10 = vld [vmem:[#allocation3] sm:$0xff] }
 0x49d   : > { %7607 = vrot.lane.b32.xlu1 %v14544_v44, %s11753_s13  ;;  %7605 = vrot.lane.b32.xlu0 %v14546_v34, %s11753_s13  ;;  %v6401_v39 = vrot.slane %v6383_v18, 4  ;;  %v6400_v7 = vrot.slane %v6381_v0, 4  ;;  %v5995_v17 = vsel %vm434_vm1, %v5985_v32, %v16551_v13  ;;  %v6004_v46 = vsel %vm434_vm1, %v5990_v6, %v16552_v24 }
 0x49e   : > { %7140 = vmatprep.subr.bf16.mxu0 %v10975_v11  ;;  %7183 = vmatprep.subr.bf16.mxu1 %v10977_v2  ;;  %v14902_v32 = vsel %vm5996_vm12, %v14644_v4, %v5995_v17  ;;  %v14906_v6 = vsel %vm5996_vm12, %v14662_v58, %v6004_v46  ;;  %v16772_v13 = vrot.slane %v14750_v30, 4 }
 0x49f   : > { %v6391_v61 = vpop.permute.xlu1 %6390  ;;  %v14877_v26 = vpop.permute.xlu0 %6384  ;;  %7141 = vmatpush1.bf16.msra.mxu0 %v10974_v16  ;;  %7184 = vmatpush1.bf16.msra.mxu1 %v10976_v50  ;;  %v6410_v1 = vsel %vm434_vm1, %v6400_v7, %v6401_v39  ;;  %v6240_v7 = vrot.slane %v14786_v27, 4 }
 0x4a0   : > { %v16549_v22 = vrot.slane %v14877_v26, 4  ;;  %v6405_v11 = vrot.slane %v6391_v61, 4  ;;  %v6412_v58 = vsel %vm6411_vm13, %v6381_v0, %v6410_v1  ;;  %v6156_v0 = vrot.slane %v14752_v36, 4 }
 0x4a1   : > { %7512 = vrot.lane.b32.xlu1 %v14881_v10, %s11754_s17  ;;  %7609 = vrot.lane.b32.xlu0 %v14583_v52, %s11753_s13 }
 0x4a2   : > { %v6413_v48 = vsel %vm434_vm1, %v6401_v39, %v16549_v22  ;;  %v6239_v39 = vrot.slane %v14788_v38, 4 }
 0x4a3   : > { %v14894_v50 = vpop.permute.xlu1 %6394  ;;  %v6393_v16 = vpop.permute.xlu0 %6392  ;;  %v6414_v46 = vsel %vm6411_vm13, %v6383_v18, %v6413_v48 }
 0x4a4   : > { %v16554_v2 = vrot.slane %v14894_v50, 4  ;;  %v6406_v54 = vrot.slane %v6393_v16, 4 }
 0x4a5   : > { %7516 = vrot.lane.b32.xlu1 %v14552_v35, %s11754_s17  ;;  %7514 = vrot.lane.b32.xlu0 %v14540_v14, %s11754_s17 }
 0x4a6   : > { %v6421_v4 = vsel %vm434_vm1, %v6406_v54, %v16554_v2  ;;  %v6419_v17 = vsel %vm434_vm1, %v6405_v11, %v6406_v54  ;;  %v6317_v11 = vrot.slane %v14802_v3, 4  ;;  %v6151_v54 = vrot.slane %v14729_v53, 4 }
 0x4a7   : > { %v6422_v35 = vsel %vm6411_vm13, %v6393_v16, %v6421_v4  ;;  %v14921_v22 = vpop.permute.xlu1 %6301  ;;  %v14923_v14 = vpop.permute.xlu0 %6299  ;;  %v6420_v31 = vsel %vm6411_vm13, %v6391_v61, %v6419_v17  ;;  %v6068_v61 = vrot.slane %v14686_v29, 4  ;;  %v6235_v16 = vrot.slane %v14773_v9, 4 }
 0x4a8   : > { %v10968_v24 = vcombine.low %v6414_v46, %v6422_v35  ;;  %v6318_v8 = vrot.slane %v14923_v14, 4  ;;  %v10966_v2 = vcombine.low %v6412_v58, %v6420_v31  ;;  %v10967_v48 = vcombine.high %v6412_v58, %v6420_v31 }
 0x4a9   : > { %7524 = vrot.lane.b32.xlu1 %v14544_v44, %s11754_s17  ;;  %7522 = vrot.lane.b32.xlu0 %v14546_v34, %s11754_s17  ;;  %v10969_v18 = vcombine.high %v6414_v46, %v6422_v35  ;;  %v6234_v17 = vrot.slane %v14764_v33, 4  ;;  %v6253_v44 = vsel %vm434_vm1, %v6239_v39, %v6240_v7  ;;  %v6073_v4 = vrot.slane %v14717_v51, 4 }
 0x4aa   : > { %7142 = vmatprep.subr.bf16.mxu0 %v10967_v48  ;;  %v6327_v35 = vsel %vm434_vm1, %v6317_v11, %v6318_v8  ;;  %v6152_v39 = vrot.slane %v14738_v25, 4  ;;  %v6170_v48 = vsel %vm434_vm1, %v6156_v0, %v16772_v13  ;;  %v6254_v58 = vsel %vm6245_vm10, %v14788_v38, %v6253_v44  ;;  %v14974_v44 = vld [vmem:[#allocation3 + $0x10] sm:$0xff] }
 0x4ab   : > { %7185 = vmatprep.subr.bf16.mxu1 %v10969_v18  ;;  %v6310_v34 = vpop.permute.xlu1 %6309  ;;  %v6308_v31 = vpop.permute.xlu0 %6307  ;;  %7143 = vmatpush1.bf16.msra.mxu0 %v10966_v2  ;;  %v6244_v18 = vsel %vm434_vm1, %v6234_v17, %v6235_v16  ;;  %v6329_v13 = vsel %vm6328_vm14, %v14802_v3, %v6327_v35  ;;  %v16774_v17 = vrot.slane %v14921_v22, 4  ;;  %v14976_v3 = vld [vmem:[#allocation3 + $0x8] sm:$0xff]  ;;  %v16775_v35 = vrot.slane %v14696_v37, 4 }
 0x4ac   : > { %v6323_v46 = vrot.slane %v6310_v34, 4  ;;  %7186 = vmatpush1.bf16.msra.mxu1 %v10968_v24  ;;  %v6322_v1 = vrot.slane %v6308_v31, 4 }
 0x4ad   : > { %7429 = vrot.lane.b32.xlu1 %v14881_v10, %s11755_s23  ;;  %7526 = vrot.lane.b32.xlu0 %v14583_v52, %s11754_s17  ;;  %v16773_v52 = vrot.slane %v14796_v57, 4  ;;  %v16776_v57 = vrot.slane %v14715_v60, 4 }
 0x4ae   : > { %v6336_v11 = vsel %vm434_vm1, %v6322_v1, %v6323_v46  ;;  %v6330_v1 = vsel %vm434_vm1, %v6318_v8, %v16774_v17  ;;  %v6246_v8 = vsel %vm6245_vm10, %v14764_v33, %v6244_v18  ;;  %v6171_v33 = vsel %vm6162_vm2, %v14752_v36, %v6170_v48 }
 0x4af   : > { %v6337_v0 = vsel %vm6328_vm14, %v6308_v31, %v6336_v11  ;;  %v14963_v12 = vpop.permute.xlu1 %6629  ;;  %v14965_v41 = vpop.permute.xlu0 %6311  ;;  %v6255_v24 = vsel %vm434_vm1, %v6240_v7, %v16773_v52  ;;  %v6078_v11 = vsel %vm434_vm1, %v6068_v61, %v16775_v35  ;;  %v6087_v7 = vsel %vm434_vm1, %v6073_v4, %v16776_v57 }
 0x4b0   : > { %v10958_v2 = vcombine.low %v6329_v13, %v6337_v0  ;;  %v6324_v38 = vrot.slane %v14965_v41, 4  ;;  %v10959_v31 = vcombine.high %v6329_v13, %v6337_v0  ;;  %v16559_v52 = vrot.slane %v14736_v63, 4 }
 0x4b1   : > { %7433 = vrot.lane.b32.xlu1 %v14974_v44, %s11755_s23  ;;  %7431 = vrot.lane.b32.xlu0 %v14976_v3, %s11755_s23  ;;  %v6161_v13 = vsel %vm434_vm1, %v6151_v54, %v6152_v39  ;;  %v16777_v0 = vrot.slane %v14771_v21, 4  ;;  %v10951_v17 = vcombine.high %v6246_v8, %v6254_v58  ;;  %v6331_v4 = vsel %vm6328_vm14, %v14923_v14, %v6330_v1 }
 0x4b2   : > { %7144 = vmatprep.subr.bf16.mxu0 %v10959_v31  ;;  %v6338_v57 = vsel %vm434_vm1, %v6323_v46, %v6324_v38  ;;  %v6075_v31 = vrot.slane %v14724_v45, 4  ;;  %v15010_v46 = vld [vmem:[#allocation3 + $0x30] sm:$0xff]  ;;  %v16778_v14 = vrot.slane %v14759_v47, 4 }
 0x4b3   : > { %v6247_v61 = vsel %vm434_vm1, %v6235_v16, %v16777_v0  ;;  %v15002_v18 = vpop.permute.xlu1 %6633  ;;  %7145 = vmatpush1.bf16.msra.mxu0 %v10958_v2  ;;  %v15004_v54 = vpop.permute.xlu0 %6631  ;;  %v6339_v35 = vsel %vm6328_vm14, %v6310_v34, %v6338_v57  ;;  %v6256_v16 = vsel %vm6245_vm10, %v14786_v27, %v6255_v24  ;;  %v15012_v0 = vld [vmem:[#allocation3 + $0x28] sm:$0xff]  ;;  %v16779_v2 = vrot.slane %v14750_v30, 4 }
 0x4b4   : > { %7146 = vmatprep.subr.bf16.mxu0 %v10951_v17  ;;  %v10960_v36 = vcombine.low %v6331_v4, %v6339_v35  ;;  %v10961_v48 = vcombine.high %v6331_v4, %v6339_v35  ;;  %v6163_v34 = vsel %vm6162_vm2, %v14729_v53, %v6161_v13  ;;  %v6248_v27 = vsel %vm6245_vm10, %v14773_v9, %v6247_v61 }
 0x4b5   : > { %v6172_v1 = vsel %vm434_vm1, %v16779_v2, %v16778_v14  ;;  %v10950_v24 = vcombine.low %v6246_v8, %v6254_v58  ;;  %7441 = vrot.lane.b32.xlu1 %v15010_v46, %s11755_s23  ;;  %7439 = vrot.lane.b32.xlu0 %v15012_v0, %s11755_s23  ;;  %v6070_v17 = vrot.slane %v14694_v23, 4  ;;  %v6164_v57 = vsel %vm434_vm1, %v6152_v39, %v16559_v52 }
 0x4b6   : > { %7187 = vmatprep.subr.bf16.mxu1 %v10961_v48  ;;  %v10943_v4 = vcombine.high %v6163_v34, %v6171_v33  ;;  %v10953_v35 = vcombine.high %v6248_v27, %v6256_v16  ;;  %v5987_v53 = vrot.slane %v14664_v43, 4  ;;  %v6088_v9 = vsel %vm6079_vm9, %v14717_v51, %v6087_v7  ;;  %v15046_v7 = vld [vmem:[#allocation3 + $0x38] sm:$0xff] }
 0x4b7   : > { %v15034_v58 = vpop.permute.xlu1 %6641  ;;  %7147 = vmatpush1.bf16.msra.mxu0 %v10950_v24  ;;  %7188 = vmatpush1.bf16.msra.mxu1 %v10960_v36  ;;  %v6640_v8 = vpop.permute.xlu0 %6639  ;;  %v6173_v13 = vsel %vm6162_vm2, %v14750_v30, %v6172_v1  ;;  %v16780_v61 = vrot.slane %v14680_v40, 4  ;;  %v16781_v39 = vrot.slane %v14652_v55, 4  ;;  %v6080_v14 = vsel %vm6079_vm9, %v14686_v29, %v6078_v11 }
 0x4b8   : > { %v6655_v2 = vrot.slane %v15034_v58, 4  ;;  %v6654_v51 = vrot.slane %v6640_v8, 4  ;;  %7148 = vmatprep.subr.bf16.mxu0 %v10943_v4  ;;  %7189 = vmatprep.subr.bf16.mxu1 %v10953_v35  ;;  %v16782_v30 = vrot.slane %v14715_v60, 4  ;;  %v6165_v1 = vsel %vm6162_vm2, %v14738_v25, %v6164_v57 }
 0x4b9   : > { %v6006_v48 = vsel %vm434_vm1, %v16781_v39, %v16780_v61  ;;  %v10942_v24 = vcombine.low %v6163_v34, %v6171_v33  ;;  %v10952_v61 = vcombine.low %v6248_v27, %v6256_v16  ;;  %7346 = vrot.lane.b32.xlu1 %v14881_v10, %s11756_s16  ;;  %7443 = vrot.lane.b32.xlu0 %v15046_v7, %s11755_s23  ;;  %v16783_v29 = vrot.slane %v14696_v37, 4 }
 0x4ba   : > { %v6089_v36 = vsel %vm434_vm1, %v16782_v30, %v6075_v31  ;;  %v6650_v4 = vrot.slane %v15004_v54, 4  ;;  %v10935_v35 = vcombine.high %v6080_v14, %v6088_v9  ;;  %v10945_v39 = vcombine.high %v6165_v1, %v6173_v13 }
 0x4bb   : > { %v6081_v11 = vsel %vm434_vm1, %v16783_v29, %v6070_v17  ;;  %v15065_v25 = vpop.permute.xlu1 %6552  ;;  %7149 = vmatpush1.bf16.msra.mxu0 %v10942_v24  ;;  %7190 = vmatpush1.bf16.msra.mxu1 %v10952_v61  ;;  %v15067_v33 = vpop.permute.xlu0 %6643  ;;  %v10927_v10 = vcombine.high %v14902_v32, %v14906_v6  ;;  %v6090_v16 = vsel %vm6079_vm9, %v14715_v60, %v6089_v36  ;;  %v16784_v34 = vrot.slane %v14650_v62, 4 }
 0x4bc   : > { %v6649_v57 = vrot.slane %v14963_v12, 4  ;;  %v6668_v30 = vsel %vm434_vm1, %v6654_v51, %v6655_v2  ;;  %v16561_v24 = vrot.slane %v15067_v33, 4  ;;  %7150 = vmatprep.subr.bf16.mxu0 %v10935_v35  ;;  %7191 = vmatprep.subr.bf16.mxu1 %v10945_v39  ;;  %v6007_v61 = vsel %vm5996_vm12, %v14652_v55, %v6006_v48 }
 0x4bd   : > { %v5998_v27 = vsel %vm434_vm1, %v16784_v34, %v5987_v53  ;;  %v6082_v60 = vsel %vm6079_vm9, %v14696_v37, %v6081_v11  ;;  %v10934_v36 = vcombine.low %v6080_v14, %v6088_v9  ;;  %v16560_v29 = vrot.slane %v15002_v18, 4  ;;  %7350 = vrot.lane.b32.xlu1 %v14974_v44, %s11756_s16  ;;  %7348 = vrot.lane.b32.xlu0 %v14976_v3, %s11756_s16 }
 0x4be   : > { %v10944_v52 = vcombine.low %v6165_v1, %v6173_v13  ;;  %v6659_v51 = vsel %vm434_vm1, %v6649_v57, %v6650_v4  ;;  %v6569_v35 = vrot.slane %v15065_v25, 4  ;;  %v10937_v39 = vcombine.high %v6082_v60, %v6090_v16  ;;  %v15122_v57 = vld [vmem:[#allocation3 + $0x4] sm:$0xff] }
 0x4bf   : > { %v6669_v55 = vsel %vm6660_vm8, %v6640_v8, %v6668_v30  ;;  %v6563_v48 = vpop.permute.xlu1 %6562  ;;  %7151 = vmatpush1.bf16.msra.mxu0 %v10934_v36  ;;  %v6555_v37 = vpop.permute.xlu0 %6554  ;;  %v5999_v9 = vsel %vm5996_vm12, %v14650_v62, %v5998_v27  ;;  %v10926_v44 = vcombine.low %v14902_v32, %v14906_v6  ;;  %v6670_v14 = vsel %vm434_vm1, %v6655_v2, %v16561_v24 }
 0x4c0   : > { %7192 = vmatpush1.bf16.msra.mxu1 %v10944_v52  ;;  %v6574_v13 = vrot.slane %v6563_v48, 4  ;;  %7152 = vmatprep.subr.bf16.mxu0 %v10927_v10  ;;  %v10929_v3 = vcombine.high %v5999_v9, %v6007_v61  ;;  %v6662_v8 = vsel %vm434_vm1, %v6650_v4, %v16560_v29  ;;  %v6661_v52 = vsel %vm6660_vm8, %v14963_v12, %v6659_v51  ;;  %v7761_v29 = vld [vmem:[#allocation3 + $0x24] sm:$0xf] }
 0x4c1   : > { %7193 = vmatprep.subr.bf16.mxu1 %v10937_v39  ;;  %v10936_v1 = vcombine.low %v6082_v60, %v6090_v16  ;;  %7358 = vrot.lane.b32.xlu1 %v15010_v46, %s11756_s16  ;;  %v6570_v62 = vrot.slane %v6555_v37, 4  ;;  %v10991_v32 = vcombine.high %v6661_v52, %v6669_v55  ;;  %v16785_v6 = vrot.slane %v14814_v5, 4  ;;  %v15134_v39 = vld [vmem:[#allocation8] ss:$8 sps:$4 sm:$0xff]  }
 0x4c2   : > { %7356 = vrot.lane.b32.xlu0 %v15012_v0, %s11756_s16  ;;  %v16786_v11 = vrot.slane %v14822_v20, 4  ;;  %v6671_v46 = vsel %vm6660_vm8, %v15034_v58, %v6670_v14  ;;  %v10928_v27 = vcombine.low %v5999_v9, %v6007_v61  ;;  %v6663_v30 = vsel %vm6660_vm8, %v15004_v54, %v6662_v8 }
 0x4c3   : > { %v6581_v2 = vsel %vm434_vm1, %v16785_v6, %v6569_v35  ;;  %v15115_v10 = vpop.permute.xlu1 %6469  ;;  %7153 = vmatpush1.bf16.msra.mxu0 %v10926_v44  ;;  %v6565_v12 = vpop.permute.xlu0 %6564  ;;  %v10990_v60 = vcombine.low %v6661_v52, %v6669_v55  ;;  %v6583_v58 = vsel %vm434_vm1, %v6569_v35, %v6570_v62  ;;  %v10993_v36 = vcombine.high %v6663_v30, %v6671_v46 }
 0x4c4   : > { %v6589_v4 = vsel %vm434_vm1, %v16786_v11, %v6574_v13  ;;  %7194 = vmatpush1.bf16.msra.mxu1 %v10936_v1  ;;  %v6486_v16 = vrot.slane %v15115_v10, 4  ;;  %v6575_v34 = vrot.slane %v6565_v12, 4  ;;  %7168 = vmatprep.subr.bf16.mxu0 %v10991_v32  ;;  %v16787_v35 = vrot.slane %v14844_v49, 4  ;;  %v15162_v12 = vld [vmem:[#allocation3 + $0x34] sm:$0xff] }
 0x4c5   : > { %v6590_v0 = vsel %vm6577_vm15, %v14822_v20, %v6589_v4  ;;  %7195 = vmatprep.subr.bf16.mxu1 %v10929_v3  ;;  %7943 = vrot.lane.b32.xlu1 %v15122_v57, %s11757_s11  ;;  %v6582_v20 = vsel %vm6577_vm15, %v14814_v5, %v6581_v2  ;;  %v15139_v5 = vld [vmem:[#allocation3 + $0xc] sm:$0xff]  ;;  %v10992_v3 = vcombine.low %v6663_v30, %v6671_v46  ;;  %v16788_v52 = vrot.slane %v14852_v59, 4 }
 0x4c6   : > { %7360 = vrot.lane.b32.xlu0 %v15046_v7, %s11756_s16  ;;  %v6591_v61 = vsel %vm434_vm1, %v6574_v13, %v6575_v34  ;;  %v10987_v51 = vcombine.high %v6582_v20, %v6590_v0  ;;  %v15137_v7 = vld [vmem:[#allocation3 + $0x14] sm:$0xff]  ;;  %v6498_v13 = vsel %vm434_vm1, %v16787_v35, %v6486_v16  ;;  %v10986_v14 = vcombine.low %v6582_v20, %v6590_v0  ;;  %v15164_v46 = vld [vmem:[#allocation3 + $0x2c] sm:$0xff]  ;;  %v7844_v35 = vld [vmem:[#allocation3 + $0x24] sm:$0xf] }
 0x4c7   : > { %v6480_v54 = vpop.permute.xlu1 %6479  ;;  %7169 = vmatpush2.bf16.msra.mxu0 %v10990_v60  ;;  %v6472_v55 = vpop.permute.xlu0 %6471  ;;  %v6592_v37 = vsel %vm6577_vm15, %v6563_v48, %v6591_v61  ;;  %v6584_v48 = vsel %vm6577_vm15, %v15065_v25, %v6583_v58  ;;  %v6499_v2 = vsel %vm6494_vm11, %v14844_v49, %v6498_v13  ;;  %v16789_v20 = vrot.slane %v14877_v26, 4 }
 0x4c8   : > { %7196 = vmatpush1.bf16.msra.mxu1 %v10928_v27  ;;  %v6491_v9 = vrot.slane %v6480_v54, 4  ;;  %v6487_v44 = vrot.slane %v6472_v55, 4  ;;  %7224 = vmatprep.subr.bf16.mxu0 %v10987_v51  ;;  %v10989_v8 = vcombine.high %v6584_v48, %v6592_v37  ;;  %v10988_v34 = vcombine.low %v6584_v48, %v6592_v37  ;;  %v15180_v51 = vld [vmem:[#allocation3 + $0x1c] sm:$0xff] }
 0x4c9   : > { %7211 = vmatprep.subr.bf16.mxu1 %v10993_v36  ;;  %7947 = vrot.lane.b32.xlu1 %v15137_v7, %s11757_s11  ;;  %v15182_v55 = vld [vmem:[#allocation3 + $0x3c] sm:$0xff]  ;;  %v16790_v13 = vrot.slane %v14894_v50, 4  ;;  %vm7891_vm15 = vcmask 965632  }
 0x4ca   : > { %7945 = vrot.lane.b32.xlu0 %v15139_v5, %s11757_s11  ;;  %7171 = vmatmul.mubr.bf16.vlgmr.msra.gmra.mxu0 %v15134_v39  ;;  %v6506_v1 = vsel %vm434_vm1, %v16788_v52, %v6491_v9  ;;  %v6500_v62 = vsel %vm434_vm1, %v6486_v16, %v6487_v44  ;;  %v5989_v44 = vrot.slane %v14670_v42, 4 }
 0x4cb   : > { %v15155_v32 = vpop.permute.xlu1 %6386  ;;  %7225 = vmatpush1.bf16.msra.mxu0 %v10986_v14  ;;  %v6482_v6 = vpop.permute.xlu0 %6481  ;;  %v6507_v25 = vsel %vm6494_vm11, %v14852_v59, %v6506_v1  ;;  %11000 = vmatprep.mubr.msk.bf16.mxu0 %vm1927_vm0, %v14702_v56  ;;  %v6501_v30 = vsel %vm6494_vm11, %v15115_v10, %v6500_v62  ;;  %v5988_v10 = vrot.slane %v14672_v15, 4  ;;  %v15204_v62 = vld [vmem:[#allocation3 + $0x44] sm:$0xff] }
 0x4cc   : > { %7212 = vmatpush2.bf16.msra.mxu1 %v10992_v3  ;;  %v6403_v11 = vrot.slane %v15155_v32, 4  ;;  %v6492_v4 = vrot.slane %v6482_v6, 4  ;;  %v10978_v0 = vcombine.low %v6499_v2, %v6507_v25  ;;  %v10979_v16 = vcombine.high %v6499_v2, %v6507_v25 }
 0x4cd   : > { %7267 = vmatprep.subr.bf16.mxu1 %v10989_v8  ;;  %7955 = vrot.lane.b32.xlu1 %v15162_v12, %s11757_s11  ;;  %v15207_v25 = vsel %vm434_vm1, %v5988_v10, %v5989_v44 }
 0x4ce   : > { %7953 = vrot.lane.b32.xlu0 %v15164_v46, %s11757_s11  ;;  %v6508_v49 = vsel %vm434_vm1, %v6491_v9, %v6492_v4  ;;  %7226 = vmatprep.subr.bf16.mxu0 %v10979_v16  ;;  %v6415_v58 = vsel %vm434_vm1, %v16789_v20, %v6403_v11  ;;  %v15213_v4 = vsel %vm434_vm1, %v5987_v53, %v5988_v10  ;;  %v7849_v53 = vld [vmem:[#allocation3 + $0x4c] sm:$0xf] }
 0x4cf   : > { %7214 = vmatmul.mubr.bf16.vlgmr.msra.gmra.mxu1 %v15134_v39  ;;  %v6397_v59 = vpop.permute.xlu1 %6396  ;;  %7227 = vmatpush1.bf16.msra.mxu0 %v10978_v0  ;;  %v6389_v27 = vpop.permute.xlu0 %6388  ;;  %v6509_v60 = vsel %vm6494_vm11, %v6480_v54, %v6508_v49  ;;  %v6242_v54 = vrot.slane %v14794_v28, 4  ;;  %v6416_v48 = vsel %vm6411_vm13, %v14877_v26, %v6415_v58  ;;  %v16791_v26 = vld [vmem:[#allocation40_spill] sm:$0xff]  ;;  %v16796_v58 = vld [vmem:[#allocation49_spill] sm:$0xff]  ;;  %vm7808_vm11 = vcmask 973824  }
 0x4d0   : > { %7268 = vmatpush1.bf16.msra.mxu1 %v10988_v34  ;;  %v6408_v61 = vrot.slane %v6397_v59, 4  ;;  %v6404_v36 = vrot.slane %v6389_v27, 4  ;;  %v10980_v37 = vcombine.low %v6501_v30, %v6509_v60  ;;  %v10981_v9 = vcombine.high %v6501_v30, %v6509_v60  ;;  %11001 = vmatprep.mubr.msk.bf16.mxu1 %vm1927_vm0, %v14702_v56  ;;  %v16793_v34 = vld [vmem:[#allocation46_spill] sm:$0xff] }
 0x4d1   : > { %7866 = vrot.lane.b32.xlu1 %v15180_v51, %s11750_s22  ;;  %v16562_v0 = vrot.slane %v16791_v26, 4  ;;  %v6237_v49 = vrot.slane %v16793_v34, 4  ;;  %v16794_v27 = vld [vmem:[#allocation50_spill] sm:$0xff] }
 0x4d2   : > { %7957 = vrot.lane.b32.xlu0 %v15182_v55, %s11757_s11  ;;  %7269 = vmatprep.subr.bf16.mxu1 %v10981_v9  ;;  %v6423_v3 = vsel %vm434_vm1, %v16790_v13, %v6408_v61  ;;  %v6417_v56 = vsel %vm434_vm1, %v6403_v11, %v6404_v36  ;;  %v16795_v30 = vrot.slane %v16794_v27, 4  ;;  %v6243_v36 = vrot.slane %v16796_v58, 4  ;;  %v16800_v58 = vld [vmem:[#allocation36_spill] sm:$0xff] }
 0x4d3   : > { %v15197_v14 = vpop.permute.xlu1 %6303  ;;  %v6399_v42 = vpop.permute.xlu0 %6398  ;;  %v6424_v8 = vsel %vm6411_vm13, %v14894_v50, %v6423_v3  ;;  %v16792_v50 = vld [vmem:[#allocation32_spill] sm:$0xff]  ;;  %v6418_v44 = vsel %vm6411_vm13, %v15155_v32, %v6417_v56  ;;  %v16801_v32 = vrot.slane %v14759_v47, 4  ;;  %v16802_v56 = vld [vmem:[#allocation43_spill] sm:$0xff] }
 0x4d4   : > { %7270 = vmatpush1.bf16.msra.mxu1 %v10980_v37  ;;  %v6320_v52 = vrot.slane %v15197_v14, 4  ;;  %v6409_v1 = vrot.slane %v6399_v42, 4  ;;  %v10970_v6 = vcombine.low %v6416_v48, %v6424_v8  ;;  %v10971_v2 = vcombine.high %v6416_v48, %v6424_v8  ;;  %v16798_v8 = vld [vmem:[#allocation44_spill] sm:$0xff] }
 0x4d5   : > { %7876 = vrot.lane.b32.xlu1 %v15204_v62, %s11750_s22  ;;  %v6257_v60 = vsel %vm434_vm1, %v16795_v30, %v6242_v54  ;;  %v6259_v16 = vsel %vm434_vm1, %v6242_v54, %v6243_v36 }
 0x4d6   : > { %7868 = vrot.lane.b32.xlu0 %v7844_v35, %s11750_s22  ;;  %v6425_v20 = vsel %vm434_vm1, %v6408_v61, %v6409_v1  ;;  %7228 = vmatprep.subr.bf16.mxu0 %v10971_v2  ;;  %v16797_v35 = vrot.slane %v14921_v22, 4  ;;  %v6071_v1 = vrot.slane %v16798_v8, 4  ;;  %v16799_v2 = vld [vmem:[#allocation47_spill] sm:$0xff] }
 0x4d7   : > { %v6314_v37 = vpop.permute.xlu1 %6313  ;;  %7229 = vmatpush1.bf16.msra.mxu0 %v10970_v6  ;;  %v6306_v9 = vpop.permute.xlu0 %6305  ;;  %v6426_v10 = vsel %vm6411_vm13, %v6397_v59, %v6425_v20  ;;  %v6076_v30 = vrot.slane %v16799_v2, 4  ;;  %v6154_v6 = vrot.slane %v16800_v58, 4  ;;  %v6174_v59 = vsel %vm434_vm1, %v16801_v32, %v16562_v0 }
 0x4d8   : > { %v6332_v13 = vsel %vm434_vm1, %v16797_v35, %v6320_v52  ;;  %v6325_v3 = vrot.slane %v6314_v37, 4  ;;  %v6321_v42 = vrot.slane %v6306_v9, 4  ;;  %v10972_v48 = vcombine.low %v6418_v44, %v6426_v10  ;;  %v16803_v9 = vld [vmem:[#allocation39_spill] sm:$0xff] }
 0x4d9   : > { %v10973_v61 = vcombine.high %v6418_v44, %v6426_v10  ;;  %7783 = vrot.lane.b32.xlu1 %v15180_v51, %s11751_s14  ;;  %v6160_v20 = vrot.slane %v16802_v56, 4  ;;  %v6238_v44 = vrot.slane %v16803_v9, 4  ;;  %v16804_v10 = vrot.slane %v14771_v21, 4 }
 0x4da   : > { %7878 = vrot.lane.b32.xlu0 %v7849_v53, %s11750_s22  ;;  %v6340_v24 = vsel %vm434_vm1, %v6324_v38, %v6325_v3  ;;  %v6258_v32 = vsel %vm6245_vm10, %v16794_v27, %v6257_v60  ;;  %v6333_v9 = vsel %vm6328_vm14, %v14921_v22, %v6332_v13  ;;  %v6083_v54 = vsel %vm434_vm1, %v6070_v17, %v6071_v1  ;;  %v16805_v27 = vld [vmem:[#allocation48_spill] sm:$0xff]  ;;  %s16819_s22 = smov 37  }
 0x4db   : > { %v6249_v35 = vsel %vm434_vm1, %v16804_v10, %v6237_v49  ;;  %7271 = vmatprep.subr.bf16.mxu1 %v10973_v61  ;;  %v15254_v53 = vpop.permute.xlu1 %6635  ;;  %v6316_v56 = vpop.permute.xlu0 %6315  ;;  %v6341_v61 = vsel %vm6328_vm14, %v14965_v41, %v6340_v24  ;;  %v6334_v10 = vsel %vm434_vm1, %v6320_v52, %v6321_v42  ;;  %v6091_v22 = vsel %vm434_vm1, %v6075_v31, %v6076_v30  ;;  %v7766_v13 = vld [vmem:[#allocation3 + $0x4c] sm:$0xf] }
 0x4dc   : > { %7272 = vmatpush1.bf16.msra.mxu1 %v10972_v48  ;;  %v6326_v11 = vrot.slane %v6316_v56, 4  ;;  %v10962_v0 = vcombine.low %v6333_v9, %v6341_v61  ;;  %v10963_v38 = vcombine.high %v6333_v9, %v6341_v61  ;;  %v6155_v60 = vrot.slane %v16805_v27, 4 }
 0x4dd   : > { %v6250_v41 = vsel %vm6245_vm10, %v14771_v21, %v6249_v35  ;;  %7793 = vrot.lane.b32.xlu1 %v15204_v62, %s11751_s14  ;;  %v16806_v24 = vrot.slane %v14736_v63, 4  ;;  %v6251_v52 = vsel %vm434_vm1, %v6237_v49, %v6238_v44  ;;  %v6175_v42 = vsel %vm6162_vm2, %v14759_v47, %v6174_v59 }
 0x4de   : > { %7785 = vrot.lane.b32.xlu0 %v7761_v29, %s11751_s14  ;;  %v6342_v36 = vsel %vm434_vm1, %v6325_v3, %v6326_v11  ;;  %7230 = vmatprep.subr.bf16.mxu0 %v10963_v38  ;;  %v10955_v31 = vcombine.high %v6250_v41, %v6258_v32  ;;  %v6335_v29 = vsel %vm6328_vm14, %v15197_v14, %v6334_v10  ;;  %v16807_v11 = vld [vmem:[#allocation51_spill] sm:$0xff]  ;;  %v16808_v44 = vrot.slane %v16791_v26, 4 }
 0x4df   : > { %v6166_v17 = vsel %vm434_vm1, %v16806_v24, %v6154_v6  ;;  %v15284_v21 = vpop.permute.xlu1 %6645  ;;  %7231 = vmatpush1.bf16.msra.mxu0 %v10962_v0  ;;  %v15286_v48 = vpop.permute.xlu0 %6637  ;;  %v6343_v35 = vsel %vm6328_vm14, %v6314_v37, %v6342_v36  ;;  %v6260_v49 = vsel %vm6245_vm10, %v14794_v28, %v6259_v16  ;;  %v6077_v3 = vrot.slane %v16807_v11, 4  ;;  %v16809_v28 = vld [vmem:[#allocation54_spill] sm:$0xff]  ;;  %v7678_v10 = vld [vmem:[#allocation3 + $0x24] sm:$0xf] }
 0x4e0   : > { %v6176_v56 = vsel %vm434_vm1, %v16808_v44, %v6160_v20  ;;  %7232 = vmatprep.subr.bf16.mxu0 %v10955_v31  ;;  %v10964_v47 = vcombine.low %v6335_v29, %v6343_v35  ;;  %v10965_v59 = vcombine.high %v6335_v29, %v6343_v35  ;;  %v6167_v0 = vsel %vm6162_vm2, %v14736_v63, %v6166_v17 }
 0x4e1   : > { %v6252_v14 = vsel %vm6245_vm10, %v16793_v34, %v6251_v52  ;;  %v10954_v9 = vcombine.low %v6250_v41, %v6258_v32  ;;  %7700 = vrot.lane.b32.xlu1 %v15180_v51, %s11752_s4  ;;  %v6072_v16 = vrot.slane %v16809_v28, 4  ;;  %v6168_v37 = vsel %vm434_vm1, %v6154_v6, %v6155_v60 }
 0x4e2   : > { %7795 = vrot.lane.b32.xlu0 %v7766_v13, %s11751_s14  ;;  %7273 = vmatprep.subr.bf16.mxu1 %v10965_v59  ;;  %v10947_v20 = vcombine.high %v6167_v0, %v6175_v42  ;;  %v10957_v61 = vcombine.high %v6252_v14, %v6260_v49  ;;  %v16810_v38 = vrot.slane %v14678_v19, 4  ;;  %v16811_v63 = vrot.slane %v14680_v40, 4  ;;  %v7683_v13 = vld [vmem:[#allocation3 + $0x4c] sm:$0xf]  ;;  %s16820_s14 = smov 38  }
 0x4e3   : > { %v6092_v32 = vsel %vm6079_vm9, %v14724_v45, %v6091_v22  ;;  %v15313_v27 = vpop.permute.xlu1 %7860  ;;  %7233 = vmatpush1.bf16.msra.mxu0 %v10954_v9  ;;  %7274 = vmatpush1.bf16.msra.mxu1 %v10964_v47  ;;  %v6648_v41 = vpop.permute.xlu0 %6647  ;;  %v6177_v6 = vsel %vm6162_vm2, %v16791_v26, %v6176_v56  ;;  %v16812_v60 = vrot.slane %v16792_v50, 4  ;;  %v6084_v52 = vsel %vm6079_vm9, %v14694_v23, %v6083_v54 }
 0x4e4   : > { %v6008_v34 = vsel %vm434_vm1, %v16811_v63, %v16810_v38  ;;  %v16813_v24 = vmov %v16810_v38  ;;  %v6093_v45 = vsel %vm434_vm1, %v6076_v30, %v6077_v3  ;;  %v6657_v22 = vrot.slane %v15284_v21, 4  ;;  %7234 = vmatprep.subr.bf16.mxu0 %v10947_v20  ;;  %7275 = vmatprep.subr.bf16.mxu1 %v10957_v61  ;;  %v7579_v38 = vld [vmem:[#allocation3 + $0x20] sm:$0xf] }
 0x4e5   : > { %v6010_v17 = vsel %vm434_vm1, %v16813_v24, %v16812_v60  ;;  %v6169_v26 = vsel %vm6162_vm2, %v16800_v58, %v6168_v37  ;;  %v10946_v36 = vcombine.low %v6167_v0, %v6175_v42  ;;  %v10956_v50 = vcombine.low %v6252_v14, %v6260_v49  ;;  %7710 = vrot.lane.b32.xlu1 %v15204_v62, %s11752_s4 }
 0x4e6   : > { %7702 = vrot.lane.b32.xlu0 %v7678_v10, %s11752_s4  ;;  %v6085_v23 = vsel %vm434_vm1, %v6071_v1, %v6072_v16  ;;  %v6652_v30 = vrot.slane %v15254_v53, 4  ;;  %v10939_v54 = vcombine.high %v6084_v52, %v6092_v32  ;;  %v10949_v31 = vcombine.high %v6169_v26, %v6177_v6  ;;  %v15375_v10 = vld [vmem:[#allocation3 + $0x40] sm:$0xff] }
 0x4e7   : > { %v15340_v58 = vsel %vm5996_vm12, %v14672_v15, %v15207_v25  ;;  %v6009_v42 = vsel %vm5996_vm12, %v14680_v40, %v6008_v34  ;;  %v15344_v29 = vpop.permute.xlu1 %7864  ;;  %7235 = vmatpush1.bf16.msra.mxu0 %v10946_v36  ;;  %7276 = vmatpush1.bf16.msra.mxu1 %v10956_v50  ;;  %v15346_v35 = vpop.permute.xlu0 %7862  ;;  %v6094_v1 = vsel %vm6079_vm9, %v16799_v2, %v6093_v45  ;;  %v6658_v11 = vrot.slane %v6648_v41, 4  ;;  %v15353_v15 = vld [vmem:[#allocation3 + $0x18] sm:$0xff] }
 0x4e8   : > { %v6001_v49 = vsel %vm5996_vm12, %v14664_v43, %v15213_v4  ;;  %7236 = vmatprep.subr.bf16.mxu0 %v10939_v54  ;;  %7277 = vmatprep.subr.bf16.mxu1 %v10949_v31  ;;  %v16814_v40 = vrot.slane %v15067_v33, 4  ;;  %v6011_v3 = vsel %vm5996_vm12, %v14678_v19, %v6010_v17  ;;  %v6086_v44 = vsel %vm6079_vm9, %v16798_v8, %v6085_v23 }
 0x4e9   : > { %v10938_v2 = vcombine.low %v6084_v52, %v6092_v32  ;;  %v6653_v56 = vrot.slane %v15286_v48, 4  ;;  %v10948_v47 = vcombine.low %v6169_v26, %v6177_v6  ;;  %7601 = vrot.lane.b32.xlu1 %v15353_v15, %s11753_s13  ;;  %v7881_v43 = vrot.slane %v15346_v35, 4  ;;  %v7584_v26 = vld [vmem:[#allocation3 + $0x48] sm:$0xf] }
 0x4ea   : > { %v6672_v25 = vsel %vm434_vm1, %v16814_v40, %v6657_v22  ;;  %7712 = vrot.lane.b32.xlu0 %v7683_v13, %s11752_s4  ;;  %v10931_v4 = vcombine.high %v6001_v49, %v6009_v42  ;;  %v10941_v59 = vcombine.high %v6086_v44, %v6094_v1  ;;  %v16815_v0 = vrot.slane %v15002_v18, 4  ;;  %s16821_s4 = smov 39  }
 0x4eb   : > { %v10930_v14 = vcombine.low %v6001_v49, %v6009_v42  ;;  %v7873_v9 = vpop.permute.xlu1 %7872  ;;  %7237 = vmatpush1.bf16.msra.mxu0 %v10938_v2  ;;  %7278 = vmatpush1.bf16.msra.mxu1 %v10948_v47  ;;  %v7871_v8 = vpop.permute.xlu0 %7870  ;;  %v6673_v48 = vsel %vm6660_vm8, %v15067_v33, %v6672_v25  ;;  %v10933_v28 = vcombine.high %v15340_v58, %v6011_v3  ;;  %v7880_v16 = vrot.slane %v15313_v27, 4 }
 0x4ec   : > { %v6664_v19 = vsel %vm434_vm1, %v16815_v0, %v6652_v30  ;;  %v6674_v37 = vsel %vm434_vm1, %v6657_v22, %v6658_v11  ;;  %v7886_v20 = vrot.slane %v7873_v9, 4  ;;  %v7885_v61 = vrot.slane %v7871_v8, 4  ;;  %7238 = vmatprep.subr.bf16.mxu0 %v10931_v4  ;;  %7279 = vmatprep.subr.bf16.mxu1 %v10941_v59  ;;  %v7501_v4 = vld [vmem:[#allocation3 + $0x48] sm:$0xf] }
 0x4ed   : > { %v6666_v63 = vsel %vm434_vm1, %v6652_v30, %v6653_v56  ;;  %v10940_v34 = vcombine.low %v6086_v44, %v6094_v1  ;;  %7611 = vrot.lane.b32.xlu1 %v15375_v10, %s11753_s13  ;;  %v6665_v33 = vsel %vm6660_vm8, %v15002_v18, %v6664_v19  ;;  %v7882_v32 = vrot.slane %v15344_v29, 4  ;;  %v15409_v1 = vld [vmem:[#allocation8 + $0x14] ss:$8 sps:$4 sm:$0xff]  }
 0x4ee   : > { %7603 = vrot.lane.b32.xlu0 %v7579_v38, %s11753_s13  ;;  %v7890_v41 = vsel %vm434_vm1, %v7880_v16, %v7881_v43  ;;  %v7899_v6 = vsel %vm434_vm1, %v7885_v61, %v7886_v20  ;;  %v10995_v60 = vcombine.high %v6665_v33, %v6673_v48  ;;  %v6675_v45 = vsel %vm6660_vm8, %v15284_v21, %v6674_v37  ;;  %v7413_v37 = vld [vmem:[#allocation3 + $0x20] sm:$0xf] }
 0x4ef   : > { %v7900_v24 = vsel %vm7891_vm15, %v7871_v8, %v7899_v6  ;;  %v7778_v17 = vpop.permute.xlu1 %7777  ;;  %7239 = vmatpush1.bf16.msra.mxu0 %v10930_v14  ;;  %7280 = vmatpush1.bf16.msra.mxu1 %v10940_v34  ;;  %v15387_v52 = vpop.permute.xlu0 %7874  ;;  %v10932_v18 = vcombine.low %v15340_v58, %v6011_v3  ;;  %v7892_v36 = vsel %vm7891_vm15, %v15313_v27, %v7890_v41  ;;  %v7418_v41 = vld [vmem:[#allocation3 + $0x48] sm:$0xf]  ;;  %vm7725_vm12 = vcmask 1039360  }
 0x4f0   : > { %v7887_v22 = vrot.slane %v15387_v52, 4  ;;  %7254 = vmatprep.subr.bf16.mxu0 %v10995_v60  ;;  %7281 = vmatprep.subr.bf16.mxu1 %v10933_v28  ;;  %v10994_v50 = vcombine.low %v6665_v33, %v6673_v48  ;;  %v6667_v23 = vsel %vm6660_vm8, %v15254_v53, %v6666_v63  ;;  %v7893_v21 = vsel %vm434_vm1, %v7881_v43, %v7882_v32  ;;  %v7496_v53 = vld [vmem:[#allocation3 + $0x20] sm:$0xf] }
 0x4f1   : > { %7518 = vrot.lane.b32.xlu1 %v15353_v15, %s11754_s17  ;;  %v10997_v30 = vcombine.high %v6667_v23, %v6675_v45  ;;  %v11061_v54 = vcombine.high %v7892_v36, %v7900_v24  ;;  %v7894_v49 = vsel %vm7891_vm15, %v15346_v35, %v7893_v21  ;;  %v11060_v11 = vcombine.low %v7892_v36, %v7900_v24 }
 0x4f2   : > { %7613 = vrot.lane.b32.xlu0 %v7584_v26, %s11753_s13  ;;  %v7901_v31 = vsel %vm434_vm1, %v7886_v20, %v7887_v22  ;;  %v10996_v40 = vcombine.low %v6667_v23, %v6675_v45  ;;  %v7797_v25 = vrot.slane %v7778_v17, 4  ;;  %v7330_v23 = vld [vmem:[#allocation3 + $0x20] sm:$0xf]  ;;  %vm7626_vm13 = vcmask 7168   ;;  %s16822_s13 = smov 17  }
 0x4f3   : > { %v15406_v27 = vpop.permute.xlu1 %7781  ;;  %7255 = vmatpush2.bf16.msra.mxu0 %v10994_v50  ;;  %7282 = vmatpush1.bf16.msra.mxu1 %v10932_v18  ;;  %v7780_v13 = vpop.permute.xlu0 %7779  ;;  %v7902_v58 = vsel %vm7891_vm15, %v7873_v9, %v7901_v31  ;;  %vm7543_vm14 = vcmask 72704   ;;  %vm7460_vm10 = vcmask 80896   ;;  %vm7377_vm2 = vcmask 89088  }
 0x4f4   : > { %v7798_v42 = vrot.slane %v7780_v13, 4  ;;  %7297 = vmatprep.subr.bf16.mxu1 %v10997_v30  ;;  %8453 = vmatprep.subr.bf16.mxu0 %v11061_v54  ;;  %v11063_v3 = vcombine.high %v7894_v49, %v7902_v58  ;;  %v7799_v56 = vrot.slane %v15406_v27, 4  ;;  %v11062_v59 = vcombine.low %v7894_v49, %v7902_v58 }
 0x4f5   : > { %7528 = vrot.lane.b32.xlu1 %v15375_v10, %s11754_s17  ;;  %v11037_v49 = vcombine.high %v15122_v57, %v15164_v46  ;;  %vm7974_vm9 = vcmask 957440   ;;  %vm16823_vm8 = vcmask 302080  }
 0x4f6   : > { %7520 = vrot.lane.b32.xlu0 %v7496_v53, %s11754_s17  ;;  %7257 = vmatmul.mubr.bf16.vlgmr.msra.gmra.mxu0 %v15134_v39  ;;  %v7807_v35 = vsel %vm434_vm1, %v7797_v25, %v7798_v42  ;;  %v7810_v48 = vsel %vm434_vm1, %v7798_v42, %v7799_v56  ;;  %v7335_v53 = vld [vmem:[#allocation3 + $0x48] sm:$0xf] }
 0x4f7   : > { %v7790_v44 = vpop.permute.xlu1 %7789  ;;  %7298 = vmatpush2.bf16.msra.mxu1 %v10996_v40  ;;  %8454 = vmatpush1.bf16.msra.mxu0 %v11060_v11  ;;  %v7788_v2 = vpop.permute.xlu0 %7787  ;;  %v7809_v19 = vsel %vm7808_vm11, %v7778_v17, %v7807_v35  ;;  %v7811_v61 = vsel %vm7808_vm11, %v7780_v13, %v7810_v48  ;;  %v7927_v11 = vld [vmem:[#allocation3 + $0x24] sm:$0xf] }
 0x4f8   : > { %v7803_v47 = vrot.slane %v7790_v44, 4  ;;  %v7802_v43 = vrot.slane %v7788_v2, 4  ;;  %8496 = vmatprep.subr.bf16.mxu1 %v11063_v3  ;;  %11076 = vmatprep.mubr.msk.bf16.mxu0 %vm1927_vm0, %v15409_v1 }
 0x4f9   : > { %7435 = vrot.lane.b32.xlu1 %v15353_v15, %s11755_s23 }
 0x4fa   : > { %7530 = vrot.lane.b32.xlu0 %v7501_v4, %s11754_s17  ;;  %v7816_v0 = vsel %vm434_vm1, %v7802_v43, %v7803_v47  ;;  %7300 = vmatmul.mubr.bf16.vlgmr.msra.gmra.mxu1 %v15134_v39  ;;  %v11036_v43 = vcombine.low %v15122_v57, %v15164_v46 }
 0x4fb   : > { %v7817_v14 = vsel %vm7808_vm11, %v7788_v2, %v7816_v0  ;;  %v7695_v9 = vpop.permute.xlu1 %7694  ;;  %8497 = vmatpush1.bf16.msra.mxu1 %v11062_v59  ;;  %v15428_v8 = vpop.permute.xlu0 %7791  ;;  %11077 = vmatprep.mubr.msk.bf16.mxu1 %vm1927_vm0, %v15409_v1  ;;  %v11039_v59 = vcombine.high %v15139_v5, %v15162_v12  ;;  %v7932_v0 = vld [vmem:[#allocation3 + $0x4c] sm:$0xf] }
 0x4fc   : > { %v11052_v28 = vcombine.low %v7809_v19, %v7817_v14  ;;  %v7804_v16 = vrot.slane %v15428_v8, 4  ;;  %v11053_v39 = vcombine.high %v7809_v19, %v7817_v14  ;;  %v7714_v24 = vrot.slane %v7695_v9, 4 }
 0x4fd   : > { %7445 = vrot.lane.b32.xlu1 %v15375_v10, %s11755_s23 }
 0x4fe   : > { %7437 = vrot.lane.b32.xlu0 %v7413_v37, %s11755_s23  ;;  %8455 = vmatprep.subr.bf16.mxu0 %v11053_v39  ;;  %v7818_v20 = vsel %vm434_vm1, %v7803_v47, %v7804_v16 }
 0x4ff   : > { %v15443_v38 = vpop.permute.xlu1 %7698  ;;  %8456 = vmatpush1.bf16.msra.mxu0 %v11052_v28  ;;  %v7697_v63 = vpop.permute.xlu0 %7696  ;;  %v7819_v34 = vsel %vm7808_vm11, %v7790_v44, %v7818_v20 }
 0x500   : > { %v7715_v33 = vrot.slane %v7697_v63, 4  ;;  %v11054_v6 = vcombine.low %v7811_v61, %v7819_v34  ;;  %v11055_v60 = vcombine.high %v7811_v61, %v7819_v34  ;;  %v7716_v18 = vrot.slane %v15443_v38, 4 }
 0x501   : > { %7352 = vrot.lane.b32.xlu1 %v15353_v15, %s11756_s16 }
 0x502   : > { %7447 = vrot.lane.b32.xlu0 %v7418_v41, %s11755_s23  ;;  %8498 = vmatprep.subr.bf16.mxu1 %v11055_v60  ;;  %v7724_v36 = vsel %vm434_vm1, %v7714_v24, %v7715_v33  ;;  %v7727_v13 = vsel %vm434_vm1, %v7715_v33, %v7716_v18  ;;  %s11758_s23 = smov [#allocation10]  }
 0x503   : > { %v7707_v17 = vpop.permute.xlu1 %7706  ;;  %8499 = vmatpush1.bf16.msra.mxu1 %v11054_v6  ;;  %v7705_v45 = vpop.permute.xlu0 %7704  ;;  %v7726_v21 = vsel %vm7725_vm12, %v7695_v9, %v7724_v36  ;;  %v7728_v25 = vsel %vm7725_vm12, %v7697_v63, %v7727_v13 }
 0x504   : > { %v7720_v26 = vrot.slane %v7707_v17, 4  ;;  %v7719_v50 = vrot.slane %v7705_v45, 4 }
 0x505   : > { %7362 = vrot.lane.b32.xlu1 %v15375_v10, %s11756_s16 }
 0x506   : > { %7354 = vrot.lane.b32.xlu0 %v7330_v23, %s11756_s16  ;;  %v7733_v15 = vsel %vm434_vm1, %v7719_v50, %v7720_v26 }
 0x507   : > { %v7734_v30 = vsel %vm7725_vm12, %v7705_v45, %v7733_v15  ;;  %v7596_v54 = vpop.permute.xlu1 %7595  ;;  %v15457_v31 = vpop.permute.xlu0 %7708 }
 0x508   : > { %v11044_v58 = vcombine.low %v7726_v21, %v7734_v30  ;;  %v7721_v42 = vrot.slane %v15457_v31, 4  ;;  %v11045_v10 = vcombine.high %v7726_v21, %v7734_v30  ;;  %v7615_v4 = vrot.slane %v7596_v54, 4 }
 0x509   : > { %7949 = vrot.lane.b32.xlu1 %v15180_v51, %s11757_s11 }
 0x50a   : > { %7364 = vrot.lane.b32.xlu0 %v7335_v53, %s11756_s16  ;;  %8457 = vmatprep.subr.bf16.mxu0 %v11045_v10  ;;  %v7735_v40 = vsel %vm434_vm1, %v7720_v26, %v7721_v42  ;;  %s11641_s16 = sshll.u32 %s11758_s23, 4  ;;  %s11642_s16 = int_to_ptr.vmem [resolvable:$false] %s11641_s16 }
 0x50b   : > { %v15472_v3 = vpop.permute.xlu1 %7599  ;;  %8458 = vmatpush1.bf16.msra.mxu0 %v11044_v58  ;;  %v7598_v44 = vpop.permute.xlu0 %7597  ;;  %v7736_v2 = vsel %vm7725_vm12, %v7707_v17, %v7735_v40 }
 0x50c   : > { %v7616_v51 = vrot.slane %v7598_v44, 4  ;;  %8459 = vmatprep.subr.bf16.mxu0 %v11037_v49  ;;  %v11046_v47 = vcombine.low %v7728_v25, %v7736_v2  ;;  %v11047_v35 = vcombine.high %v7728_v25, %v7736_v2  ;;  %v7617_v9 = vrot.slane %v15472_v3, 4 }
 0x50d   : > { %7959 = vrot.lane.b32.xlu1 %v15204_v62, %s11757_s11  ;;  %v11038_v62 = vcombine.low %v15139_v5, %v15162_v12 }
 0x50e   : > { %7951 = vrot.lane.b32.xlu0 %v7927_v11, %s11757_s11  ;;  %8500 = vmatprep.subr.bf16.mxu1 %v11047_v35  ;;  %v7625_v28 = vsel %vm434_vm1, %v7615_v4, %v7616_v51  ;;  %v7628_v33 = vsel %vm434_vm1, %v7616_v51, %v7617_v9 }
 0x50f   : > { %v7608_v19 = vpop.permute.xlu1 %7607  ;;  %8460 = vmatpush1.bf16.msra.mxu0 %v11036_v43  ;;  %8501 = vmatpush1.bf16.msra.mxu1 %v11046_v47  ;;  %v7606_v14 = vpop.permute.xlu0 %7605  ;;  %v7627_v20 = vsel %vm7626_vm13, %v7596_v54, %v7625_v28  ;;  %v7629_v17 = vsel %vm7626_vm13, %v7598_v44, %v7628_v33 }
 0x510   : > { %v7621_v48 = vrot.slane %v7608_v19, 4  ;;  %v7620_v37 = vrot.slane %v7606_v14, 4  ;;  %8502 = vmatprep.subr.bf16.mxu1 %v11039_v59 }
 0x511   : > { %9267 = vrot.lane.b32.xlu1 %v15122_v57, %s11720_s18 }
 0x512   : > { %7961 = vrot.lane.b32.xlu0 %v7932_v0, %s11757_s11  ;;  %v7634_v39 = vsel %vm434_vm1, %v7620_v37, %v7621_v48  ;;  %s11643_s11 = scalar_lea.vmem %s11642_s16, 4096 }
 0x513   : > { %v7635_v61 = vsel %vm7626_vm13, %v7606_v14, %v7634_v39  ;;  %v7513_v63 = vpop.permute.xlu1 %7512  ;;  %8503 = vmatpush1.bf16.msra.mxu1 %v11038_v62  ;;  %v15492_v34 = vpop.permute.xlu0 %7609 }
 0x514   : > { %v11028_v41 = vcombine.low %v7627_v20, %v7635_v61  ;;  %v7622_v6 = vrot.slane %v15492_v34, 4  ;;  %v11029_v60 = vcombine.high %v7627_v20, %v7635_v61  ;;  %v7532_v21 = vrot.slane %v7513_v63, 4 }
 0x515   : > { %9271 = vrot.lane.b32.xlu1 %v15137_v7, %s11720_s18 }
 0x516   : > { %9269 = vrot.lane.b32.xlu0 %v15139_v5, %s11720_s18  ;;  %8461 = vmatprep.subr.bf16.mxu0 %v11029_v60  ;;  %v7636_v24 = vsel %vm434_vm1, %v7621_v48, %v7622_v6 }
 0x517   : > { %v15506_v45 = vpop.permute.xlu1 %7516  ;;  %8462 = vmatpush1.bf16.msra.mxu0 %v11028_v41  ;;  %v7515_v26 = vpop.permute.xlu0 %7514  ;;  %v7637_v36 = vsel %vm7626_vm13, %v7608_v19, %v7636_v24 }
 0x518   : > { %v7533_v50 = vrot.slane %v7515_v26, 4  ;;  %v11030_v23 = vcombine.low %v7629_v17, %v7637_v36  ;;  %v11031_v15 = vcombine.high %v7629_v17, %v7637_v36  ;;  %v7534_v13 = vrot.slane %v15506_v45, 4 }
 0x519   : > { %9279 = vrot.lane.b32.xlu1 %v15162_v12, %s11720_s18 }
 0x51a   : > { %9277 = vrot.lane.b32.xlu0 %v15164_v46, %s11720_s18  ;;  %8504 = vmatprep.subr.bf16.mxu1 %v11031_v15  ;;  %v7542_v53 = vsel %vm434_vm1, %v7532_v21, %v7533_v50  ;;  %v7545_v2 = vsel %vm434_vm1, %v7533_v50, %v7534_v13 }
 0x51b   : > { %v7525_v30 = vpop.permute.xlu1 %7524  ;;  %8505 = vmatpush1.bf16.msra.mxu1 %v11030_v23  ;;  %v7523_v54 = vpop.permute.xlu0 %7522  ;;  %v7544_v11 = vsel %vm7543_vm14, %v7513_v63, %v7542_v53  ;;  %v7546_v4 = vsel %vm7543_vm14, %v7515_v26, %v7545_v2 }
 0x51c   : > { %v7538_v58 = vrot.slane %v7525_v30, 4  ;;  %v7537_v10 = vrot.slane %v7523_v54, 4 }
 0x51d   : > { %9185 = vrot.lane.b32.xlu1 %v15122_v57, %s11719_s20 }
 0x51e   : > { %9281 = vrot.lane.b32.xlu0 %v15182_v55, %s11720_s18  ;;  %v7551_v49 = vsel %vm434_vm1, %v7537_v10, %v7538_v58 }
 0x51f   : > { %v7552_v40 = vsel %vm7543_vm14, %v7523_v54, %v7551_v49  ;;  %v7430_v25 = vpop.permute.xlu1 %7429  ;;  %v15522_v44 = vpop.permute.xlu0 %7526 }
 0x520   : > { %v11020_v51 = vcombine.low %v7544_v11, %v7552_v40  ;;  %v7539_v47 = vrot.slane %v15522_v44, 4  ;;  %v11021_v35 = vcombine.high %v7544_v11, %v7552_v40  ;;  %v7449_v37 = vrot.slane %v7430_v25, 4 }
 0x521   : > { %9189 = vrot.lane.b32.xlu1 %v15137_v7, %s11719_s20 }
 0x522   : > { %9187 = vrot.lane.b32.xlu0 %v15139_v5, %s11719_s20  ;;  %8463 = vmatprep.subr.bf16.mxu0 %v11021_v35  ;;  %v7553_v43 = vsel %vm434_vm1, %v7538_v58, %v7539_v47 }
 0x523   : > { %v15536_v59 = vpop.permute.xlu1 %7433  ;;  %8464 = vmatpush1.bf16.msra.mxu0 %v11020_v51  ;;  %v7432_v0 = vpop.permute.xlu0 %7431  ;;  %v7554_v19 = vsel %vm7543_vm14, %v7525_v30, %v7553_v43 }
 0x524   : > { %v7450_v14 = vrot.slane %v7432_v0, 4  ;;  %v11022_v48 = vcombine.low %v7546_v4, %v7554_v19  ;;  %v11023_v28 = vcombine.high %v7546_v4, %v7554_v19  ;;  %v7451_v20 = vrot.slane %v15536_v59, 4 }
 0x525   : > { %9197 = vrot.lane.b32.xlu1 %v15162_v12, %s11719_s20 }
 0x526   : > { %9195 = vrot.lane.b32.xlu0 %v15164_v46, %s11719_s20  ;;  %8506 = vmatprep.subr.bf16.mxu1 %v11023_v28  ;;  %v7459_v63 = vsel %vm434_vm1, %v7449_v37, %v7450_v14  ;;  %v7462_v36 = vsel %vm434_vm1, %v7450_v14, %v7451_v20 }
 0x527   : > { %v7442_v62 = vpop.permute.xlu1 %7441  ;;  %8507 = vmatpush1.bf16.msra.mxu1 %v11022_v48  ;;  %v7440_v39 = vpop.permute.xlu0 %7439  ;;  %v7461_v60 = vsel %vm7460_vm10, %v7430_v25, %v7459_v63  ;;  %v7463_v30 = vsel %vm7460_vm10, %v7432_v0, %v7462_v36 }
 0x528   : > { %v7455_v61 = vrot.slane %v7442_v62, 4  ;;  %v7454_v33 = vrot.slane %v7440_v39, 4 }
 0x529   : > { %9103 = vrot.lane.b32.xlu1 %v15122_v57, %s16816_s21 }
 0x52a   : > { %9199 = vrot.lane.b32.xlu0 %v15182_v55, %s11719_s20  ;;  %v7468_v41 = vsel %vm434_vm1, %v7454_v33, %v7455_v61 }
 0x52b   : > { %v7469_v24 = vsel %vm7460_vm10, %v7440_v39, %v7468_v41  ;;  %v7347_v17 = vpop.permute.xlu1 %7346  ;;  %v15552_v26 = vpop.permute.xlu0 %7443 }
 0x52c   : > { %v11012_v50 = vcombine.low %v7461_v60, %v7469_v24  ;;  %v7456_v23 = vrot.slane %v15552_v26, 4  ;;  %v11013_v15 = vcombine.high %v7461_v60, %v7469_v24  ;;  %v7366_v40 = vrot.slane %v7347_v17, 4 }
 0x52d   : > { %9107 = vrot.lane.b32.xlu1 %v15137_v7, %s16816_s21 }
 0x52e   : > { %9105 = vrot.lane.b32.xlu0 %v15139_v5, %s16816_s21  ;;  %8465 = vmatprep.subr.bf16.mxu0 %v11013_v15  ;;  %v7470_v21 = vsel %vm434_vm1, %v7455_v61, %v7456_v23 }
 0x52f   : > { %v15566_v54 = vpop.permute.xlu1 %7350  ;;  %8466 = vmatpush1.bf16.msra.mxu0 %v11012_v50  ;;  %v7349_v58 = vpop.permute.xlu0 %7348  ;;  %v7471_v53 = vsel %vm7460_vm10, %v7442_v62, %v7470_v21 }
 0x530   : > { %v7367_v10 = vrot.slane %v7349_v58, 4  ;;  %v11014_v49 = vcombine.low %v7463_v30, %v7471_v53  ;;  %v11015_v11 = vcombine.high %v7463_v30, %v7471_v53  ;;  %v7368_v51 = vrot.slane %v15566_v54, 4 }
 0x531   : > { %9115 = vrot.lane.b32.xlu1 %v15162_v12, %s16816_s21 }
 0x532   : > { %9113 = vrot.lane.b32.xlu0 %v15164_v46, %s16816_s21  ;;  %8508 = vmatprep.subr.bf16.mxu1 %v11015_v11  ;;  %v7376_v43 = vsel %vm434_vm1, %v7366_v40, %v7367_v10  ;;  %v7379_v37 = vsel %vm434_vm1, %v7367_v10, %v7368_v51 }
 0x533   : > { %v7359_v25 = vpop.permute.xlu1 %7358  ;;  %8509 = vmatpush1.bf16.msra.mxu1 %v11014_v49  ;;  %v7378_v19 = vsel %vm7377_vm2, %v7347_v17, %v7376_v43  ;;  %v7380_v63 = vsel %vm7377_vm2, %v7349_v58, %v7379_v37  ;;  %v15605_v49 = vld [vmem:[#allocation3 + $0x4] sm:$0xff] }
 0x534   : > { %v7357_v2 = vpop.permute.xlu0 %7356  ;;  %v7372_v35 = vrot.slane %v7359_v25, 4  ;;  %v15627_v37 = vld [vmem:[#allocation8 + $0x10] ss:$8 sps:$4 sm:$0xff]  }
 0x535   : > { %v7371_v4 = vrot.slane %v7357_v2, 4  ;;  %9021 = vrot.lane.b32.xlu1 %v15122_v57, %s16817_s15 }
 0x536   : > { %9117 = vrot.lane.b32.xlu0 %v15182_v55, %s16816_s21 }
 0x537   : > { %v7385_v0 = vsel %vm434_vm1, %v7371_v4, %v7372_v35  ;;  %v7944_v48 = vpop.permute.xlu1 %7943 }
 0x538   : > { %v7386_v14 = vsel %vm7377_vm2, %v7357_v2, %v7385_v0  ;;  %v15582_v28 = vpop.permute.xlu0 %7360  ;;  %v7963_v50 = vrot.slane %v7944_v48, 4 }
 0x539   : > { %v11004_v62 = vcombine.low %v7378_v19, %v7386_v14  ;;  %v7373_v39 = vrot.slane %v15582_v28, 4  ;;  %v11005_v57 = vcombine.high %v7378_v19, %v7386_v14  ;;  %9025 = vrot.lane.b32.xlu1 %v15137_v7, %s16817_s15 }
 0x53a   : > { %9023 = vrot.lane.b32.xlu0 %v15139_v5, %s16817_s15 }
 0x53b   : > { %8467 = vmatprep.subr.bf16.mxu0 %v11005_v57  ;;  %v7387_v61 = vsel %vm434_vm1, %v7372_v35, %v7373_v39  ;;  %v15596_v33 = vpop.permute.xlu1 %7947 }
 0x53c   : > { %8468 = vmatpush1.bf16.msra.mxu0 %v11004_v62  ;;  %v7946_v41 = vpop.permute.xlu0 %7945  ;;  %v7388_v60 = vsel %vm7377_vm2, %v7359_v25, %v7387_v61  ;;  %v7965_v15 = vrot.slane %v15596_v33, 4 }
 0x53d   : > { %v7964_v24 = vrot.slane %v7946_v41, 4  ;;  %v11006_v17 = vcombine.low %v7380_v63, %v7388_v60  ;;  %v11007_v36 = vcombine.high %v7380_v63, %v7388_v60  ;;  %9033 = vrot.lane.b32.xlu1 %v15162_v12, %s16817_s15 }
 0x53e   : > { %9031 = vrot.lane.b32.xlu0 %v15164_v46, %s16817_s15 }
 0x53f   : > { %8510 = vmatprep.subr.bf16.mxu1 %v11007_v36  ;;  %v7956_v21 = vpop.permute.xlu1 %7955  ;;  %v7973_v53 = vsel %vm434_vm1, %v7963_v50, %v7964_v24  ;;  %v7976_v40 = vsel %vm434_vm1, %v7964_v24, %v7965_v15 }
 0x540   : > { %8511 = vmatpush1.bf16.msra.mxu1 %v11006_v17  ;;  %v7954_v30 = vpop.permute.xlu0 %7953  ;;  %v7969_v58 = vrot.slane %v7956_v21, 4  ;;  %v7975_v25 = vsel %vm7974_vm9, %v7944_v48, %v7973_v53  ;;  %v7977_v62 = vsel %vm7974_vm9, %v7946_v41, %v7976_v40 }
 0x541   : > { %v7968_v10 = vrot.slane %v7954_v30, 4  ;;  %8939 = vrot.lane.b32.xlu1 %v15605_v49, %s16818_s19 }
 0x542   : > { %9035 = vrot.lane.b32.xlu0 %v15182_v55, %s16817_s15 }
 0x543   : > { %v7982_v11 = vsel %vm434_vm1, %v7968_v10, %v7969_v58  ;;  %v7867_v35 = vpop.permute.xlu1 %7866 }
 0x544   : > { %v7983_v2 = vsel %vm7974_vm9, %v7954_v30, %v7982_v11  ;;  %v15617_v43 = vpop.permute.xlu0 %7957  ;;  %v7883_v0 = vrot.slane %v7867_v35, 4 }
 0x545   : > { %v11068_v4 = vcombine.low %v7975_v25, %v7983_v2  ;;  %v7970_v19 = vrot.slane %v15617_v43, 4  ;;  %v11069_v14 = vcombine.high %v7975_v25, %v7983_v2  ;;  %8943 = vrot.lane.b32.xlu1 %v15137_v7, %s16818_s19  ;;  %v15662_v2 = vld [vmem:[#allocation3 + $0x14] sm:$0xff] }
 0x546   : > { %8941 = vrot.lane.b32.xlu0 %v15139_v5, %s16818_s19  ;;  %v7895_v7 = vsel %vm434_vm1, %v7882_v32, %v7883_v0 }
 0x547   : > { %8483 = vmatprep.subr.bf16.mxu0 %v11069_v14  ;;  %v7984_v48 = vsel %vm434_vm1, %v7969_v58, %v7970_v19  ;;  %v7877_v57 = vpop.permute.xlu1 %7876 }
 0x548   : > { %8484 = vmatpush2.bf16.msra.mxu0 %v11068_v4  ;;  %v7869_v61 = vpop.permute.xlu0 %7868  ;;  %v7985_v63 = vsel %vm7974_vm9, %v7956_v21, %v7984_v48  ;;  %v7888_v60 = vrot.slane %v7877_v57, 4  ;;  %v7896_v21 = vsel %vm7891_vm15, %v15344_v29, %v7895_v7  ;;  %v15664_v4 = vld [vmem:[#allocation3 + $0xc] sm:$0xff]  ;;  %v15678_v7 = vld [vmem:[#allocation3 + $0x34] sm:$0xff] }
 0x549   : > { %v7884_v5 = vrot.slane %v7869_v61, 4  ;;  %v11070_v24 = vcombine.low %v7977_v62, %v7985_v63  ;;  %v11071_v17 = vcombine.high %v7977_v62, %v7985_v63  ;;  %8951 = vrot.lane.b32.xlu1 %v15162_v12, %s16818_s19 }
 0x54a   : > { %8949 = vrot.lane.b32.xlu0 %v15164_v46, %s16818_s19  ;;  %v7903_v41 = vsel %vm434_vm1, %v7887_v22, %v7888_v60 }
 0x54b   : > { %8526 = vmatprep.subr.bf16.mxu1 %v11071_v17  ;;  %8486 = vmatmul.mubr.bf16.vlgmr.msra.gmra.mxu0 %v15627_v37  ;;  %v7897_v36 = vsel %vm434_vm1, %v7883_v0, %v7884_v5  ;;  %v7784_v32 = vpop.permute.xlu1 %7783  ;;  %v7904_v12 = vsel %vm7891_vm15, %v15387_v52, %v7903_v41 }
 0x54c   : > { %8527 = vmatpush2.bf16.msra.mxu1 %v11070_v24  ;;  %v7879_v50 = vpop.permute.xlu0 %7878  ;;  %11078 = vmatprep.mubr.msk.bf16.mxu0 %vm1927_vm0, %v15409_v1  ;;  %v7800_v46 = vrot.slane %v7784_v32, 4  ;;  %v11064_v58 = vcombine.low %v7896_v21, %v7904_v12  ;;  %v11065_v22 = vcombine.high %v7896_v21, %v7904_v12  ;;  %v7898_v10 = vsel %vm7891_vm15, %v7867_v35, %v7897_v36  ;;  %v15692_v12 = vld [vmem:[#allocation3 + $0x3c] sm:$0xff] }
 0x54d   : > { %v7889_v30 = vrot.slane %v7879_v50, 4  ;;  %8857 = vrot.lane.b32.xlu1 %v15605_v49, %s16819_s22 }
 0x54e   : > { %8953 = vrot.lane.b32.xlu0 %v15182_v55, %s16818_s19  ;;  %8539 = vmatprep.subr.bf16.mxu0 %v11065_v22  ;;  %v7812_v40 = vsel %vm434_vm1, %v7799_v56, %v7800_v46 }
 0x54f   : > { %v7905_v53 = vsel %vm434_vm1, %v7888_v60, %v7889_v30  ;;  %8529 = vmatmul.mubr.bf16.vlgmr.msra.gmra.mxu1 %v15627_v37  ;;  %v7794_v29 = vpop.permute.xlu1 %7793  ;;  %8540 = vmatpush1.bf16.msra.mxu0 %v11064_v58  ;;  %v7813_v62 = vsel %vm7808_vm11, %v15406_v27, %v7812_v40  ;;  %v15680_v60 = vld [vmem:[#allocation3 + $0x2c] sm:$0xff] }
 0x550   : > { %v7786_v52 = vpop.permute.xlu0 %7785  ;;  %v7906_v11 = vsel %vm7891_vm15, %v7877_v57, %v7905_v53  ;;  %11079 = vmatprep.mubr.msk.bf16.mxu1 %vm1927_vm0, %v15409_v1  ;;  %v7805_v55 = vrot.slane %v7794_v29, 4  ;;  %vm16824_vm15 = vmmov %vm16823_vm8 }
 0x551   : > { %v7801_v25 = vrot.slane %v7786_v52, 4  ;;  %v11066_v0 = vcombine.low %v7898_v10, %v7906_v11  ;;  %v11067_v14 = vcombine.high %v7898_v10, %v7906_v11  ;;  %8861 = vrot.lane.b32.xlu1 %v15662_v2, %s16819_s22 }
 0x552   : > { %8859 = vrot.lane.b32.xlu0 %v15664_v4, %s16819_s22  ;;  %v7820_v56 = vsel %vm434_vm1, %v7804_v16, %v7805_v55 }
 0x553   : > { %8582 = vmatprep.subr.bf16.mxu1 %v11067_v14  ;;  %v7814_v1 = vsel %vm434_vm1, %v7800_v46, %v7801_v25  ;;  %v7701_v35 = vpop.permute.xlu1 %7700  ;;  %v7821_v57 = vsel %vm7808_vm11, %v15428_v8, %v7820_v56  ;;  %v15715_v14 = vld [vmem:[#allocation3 + $0x44] sm:$0xff] }
 0x554   : > { %8583 = vmatpush1.bf16.msra.mxu1 %v11066_v0  ;;  %v7796_v48 = vpop.permute.xlu0 %7795  ;;  %v7717_v61 = vrot.slane %v7701_v35, 4  ;;  %v11056_v5 = vcombine.low %v7813_v62, %v7821_v57  ;;  %v11057_v24 = vcombine.high %v7813_v62, %v7821_v57  ;;  %v7815_v17 = vsel %vm7808_vm11, %v7784_v32, %v7814_v1 }
 0x555   : > { %v7806_v63 = vrot.slane %v7796_v48, 4  ;;  %8869 = vrot.lane.b32.xlu1 %v15678_v7, %s16819_s22 }
 0x556   : > { %8867 = vrot.lane.b32.xlu0 %v15680_v60, %s16819_s22  ;;  %8541 = vmatprep.subr.bf16.mxu0 %v11057_v24  ;;  %v7729_v36 = vsel %vm434_vm1, %v7716_v18, %v7717_v61 }
 0x557   : > { %v7822_v16 = vsel %vm434_vm1, %v7805_v55, %v7806_v63  ;;  %v7711_v27 = vpop.permute.xlu1 %7710  ;;  %8542 = vmatpush1.bf16.msra.mxu0 %v11056_v5  ;;  %v7730_v53 = vsel %vm7725_vm12, %v15443_v38, %v7729_v36  ;;  %v11041_v55 = vcombine.high %v15662_v2, %v15692_v12 }
 0x558   : > { %v7703_v8 = vpop.permute.xlu0 %7702  ;;  %v7823_v41 = vsel %vm7808_vm11, %v7794_v29, %v7822_v16  ;;  %v7722_v50 = vrot.slane %v7711_v27, 4  ;;  %vm16826_vm11 = vmmov %vm16823_vm8 }
 0x559   : > { %v7718_v21 = vrot.slane %v7703_v8, 4  ;;  %v11058_v46 = vcombine.low %v7815_v17, %v7823_v41  ;;  %v11059_v30 = vcombine.high %v7815_v17, %v7823_v41  ;;  %8775 = vrot.lane.b32.xlu1 %v15605_v49, %s16820_s14 }
 0x55a   : > { %8871 = vrot.lane.b32.xlu0 %v15692_v12, %s16819_s22  ;;  %v7737_v32 = vsel %vm434_vm1, %v7721_v42, %v7722_v50 }
 0x55b   : > { %8584 = vmatprep.subr.bf16.mxu1 %v11059_v30  ;;  %v7731_v58 = vsel %vm434_vm1, %v7717_v61, %v7718_v21  ;;  %v7602_v18 = vpop.permute.xlu1 %7601  ;;  %v7738_v29 = vsel %vm7725_vm12, %v15457_v31, %v7737_v32  ;;  %v11040_v61 = vcombine.low %v15662_v2, %v15692_v12 }
 0x55c   : > { %8585 = vmatpush1.bf16.msra.mxu1 %v11058_v46  ;;  %v7713_v22 = vpop.permute.xlu0 %7712  ;;  %v7618_v52 = vrot.slane %v7602_v18, 4  ;;  %v11048_v11 = vcombine.low %v7730_v53, %v7738_v29  ;;  %v11049_v40 = vcombine.high %v7730_v53, %v7738_v29  ;;  %v7732_v31 = vsel %vm7725_vm12, %v7701_v35, %v7731_v58  ;;  %v15726_v35 = vld [vmem:[#allocation3 + $0x1c] sm:$0xff] }
 0x55d   : > { %v7723_v10 = vrot.slane %v7713_v22, 4  ;;  %8779 = vrot.lane.b32.xlu1 %v15662_v2, %s16820_s14 }
 0x55e   : > { %8777 = vrot.lane.b32.xlu0 %v15664_v4, %s16820_s14  ;;  %8543 = vmatprep.subr.bf16.mxu0 %v11049_v40  ;;  %v7630_v56 = vsel %vm434_vm1, %v7617_v9, %v7618_v52  ;;  %v11043_v9 = vcombine.high %v15726_v35, %v15715_v14 }
 0x55f   : > { %v7739_v42 = vsel %vm434_vm1, %v7722_v50, %v7723_v10  ;;  %v7612_v38 = vpop.permute.xlu1 %7611  ;;  %8544 = vmatpush1.bf16.msra.mxu0 %v11048_v11 }
 0x560   : > { %v7604_v25 = vpop.permute.xlu0 %7603  ;;  %v7740_v0 = vsel %vm7725_vm12, %v7711_v27, %v7739_v42  ;;  %v7623_v1 = vrot.slane %v7612_v38, 4  ;;  %8545 = vmatprep.subr.bf16.mxu0 %v11041_v55  ;;  %v7631_v27 = vsel %vm7626_vm13, %v15472_v3, %v7630_v56  ;;  %vm16827_vm12 = vmmov %vm16823_vm8 }
 0x561   : > { %v7619_v48 = vrot.slane %v7604_v25, 4  ;;  %v11050_v62 = vcombine.low %v7732_v31, %v7740_v0  ;;  %v11051_v57 = vcombine.high %v7732_v31, %v7740_v0  ;;  %8787 = vrot.lane.b32.xlu1 %v15678_v7, %s16820_s14 }
 0x562   : > { %8785 = vrot.lane.b32.xlu0 %v15680_v60, %s16820_s14  ;;  %v7638_v63 = vsel %vm434_vm1, %v7622_v6, %v7623_v1  ;;  %v11042_v6 = vcombine.low %v15726_v35, %v15715_v14 }
 0x563   : > { %8586 = vmatprep.subr.bf16.mxu1 %v11051_v57  ;;  %v7632_v5 = vsel %vm434_vm1, %v7618_v52, %v7619_v48  ;;  %v7519_v24 = vpop.permute.xlu1 %7518  ;;  %8546 = vmatpush1.bf16.msra.mxu0 %v11040_v61  ;;  %v7639_v8 = vsel %vm7626_vm13, %v15492_v34, %v7638_v63 }
 0x564   : > { %8587 = vmatpush1.bf16.msra.mxu1 %v11050_v62  ;;  %v7614_v16 = vpop.permute.xlu0 %7613  ;;  %v7535_v17 = vrot.slane %v7519_v24, 4  ;;  %v11032_v36 = vcombine.low %v7631_v27, %v7639_v8  ;;  %v11033_v50 = vcombine.high %v7631_v27, %v7639_v8  ;;  %v7633_v46 = vsel %vm7626_vm13, %v7602_v18, %v7632_v5 }
 0x565   : > { %v7624_v41 = vrot.slane %v7614_v16, 4  ;;  %8588 = vmatprep.subr.bf16.mxu1 %v11043_v9  ;;  %8693 = vrot.lane.b32.xlu1 %v15605_v49, %s16821_s4 }
 0x566   : > { %8789 = vrot.lane.b32.xlu0 %v15692_v12, %s16820_s14  ;;  %8547 = vmatprep.subr.bf16.mxu0 %v11033_v50  ;;  %v7547_v32 = vsel %vm434_vm1, %v7534_v13, %v7535_v17 }
 0x567   : > { %v7640_v21 = vsel %vm434_vm1, %v7623_v1, %v7624_v41  ;;  %v7529_v3 = vpop.permute.xlu1 %7528  ;;  %8548 = vmatpush1.bf16.msra.mxu0 %v11032_v36  ;;  %v7548_v11 = vsel %vm7543_vm14, %v15506_v45, %v7547_v32 }
 0x568   : > { %8589 = vmatpush1.bf16.msra.mxu1 %v11042_v6  ;;  %v7521_v34 = vpop.permute.xlu0 %7520  ;;  %v7641_v30 = vsel %vm7626_vm13, %v7612_v38, %v7640_v21  ;;  %v7540_v58 = vrot.slane %v7529_v3, 4  ;;  %vm16828_vm13 = vcmask 310272  }
 0x569   : > { %v7536_v22 = vrot.slane %v7521_v34, 4  ;;  %v11034_v53 = vcombine.low %v7633_v46, %v7641_v30  ;;  %v11035_v29 = vcombine.high %v7633_v46, %v7641_v30  ;;  %8697 = vrot.lane.b32.xlu1 %v15662_v2, %s16821_s4 }
 0x56a   : > { %8695 = vrot.lane.b32.xlu0 %v15664_v4, %s16821_s4  ;;  %v7555_v18 = vsel %vm434_vm1, %v7539_v47, %v7540_v58 }
 0x56b   : > { %8590 = vmatprep.subr.bf16.mxu1 %v11035_v29  ;;  %v7549_v52 = vsel %vm434_vm1, %v7535_v17, %v7536_v22  ;;  %v7436_v10 = vpop.permute.xlu1 %7435  ;;  %v7556_v40 = vsel %vm7543_vm14, %v15522_v44, %v7555_v18  ;;  %v9251_v22 = vld [vmem:[#allocation3 + $0x24] sm:$0xf] }
 0x56c   : > { %8591 = vmatpush1.bf16.msra.mxu1 %v11034_v53  ;;  %v7531_v13 = vpop.permute.xlu0 %7530  ;;  %v7452_v42 = vrot.slane %v7436_v10, 4  ;;  %v11024_v38 = vcombine.low %v7548_v11, %v7556_v40  ;;  %v11025_v25 = vcombine.high %v7548_v11, %v7556_v40  ;;  %v7550_v45 = vsel %vm7543_vm14, %v7519_v24, %v7549_v52 }
 0x56d   : > { %v7541_v55 = vrot.slane %v7531_v13, 4  ;;  %8705 = vrot.lane.b32.xlu1 %v15678_v7, %s16821_s4 }
 0x56e   : > { %8703 = vrot.lane.b32.xlu0 %v15680_v60, %s16821_s4  ;;  %8549 = vmatprep.subr.bf16.mxu0 %v11025_v25  ;;  %v7464_v56 = vsel %vm434_vm1, %v7451_v20, %v7452_v42 }
 0x56f   : > { %v7557_v47 = vsel %vm434_vm1, %v7540_v58, %v7541_v55  ;;  %v7446_v31 = vpop.permute.xlu1 %7445  ;;  %8550 = vmatpush1.bf16.msra.mxu0 %v11024_v38  ;;  %v7465_v5 = vsel %vm7460_vm10, %v15536_v59, %v7464_v56 }
 0x570   : > { %v7438_v0 = vpop.permute.xlu0 %7437  ;;  %v7558_v44 = vsel %vm7543_vm14, %v7529_v3, %v7557_v47  ;;  %v7457_v1 = vrot.slane %v7446_v31, 4  ;;  %vm16829_vm14 = vmmov %vm16828_vm13 }
 0x571   : > { %v7453_v48 = vrot.slane %v7438_v0, 4  ;;  %v11026_v62 = vcombine.low %v7550_v45, %v7558_v44  ;;  %v11027_v57 = vcombine.high %v7550_v45, %v7558_v44  ;;  %9349 = vrot.lane.b32.xlu1 %v15605_v49, %s16822_s13  ;;  %v9169_v45 = vld [vmem:[#allocation3 + $0x24] sm:$0xf] }
 0x572   : > { %8707 = vrot.lane.b32.xlu0 %v15692_v12, %s16821_s4  ;;  %v7472_v61 = vsel %vm434_vm1, %v7456_v23, %v7457_v1 }
 0x573   : > { %8592 = vmatprep.subr.bf16.mxu1 %v11027_v57  ;;  %v7466_v9 = vsel %vm434_vm1, %v7452_v42, %v7453_v48  ;;  %v7353_v63 = vpop.permute.xlu1 %7352  ;;  %v7473_v24 = vsel %vm7460_vm10, %v15552_v26, %v7472_v61 }
 0x574   : > { %8593 = vmatpush1.bf16.msra.mxu1 %v11026_v62  ;;  %v7448_v20 = vpop.permute.xlu0 %7447  ;;  %v7369_v49 = vrot.slane %v7353_v63, 4  ;;  %v11016_v27 = vcombine.low %v7465_v5, %v7473_v24  ;;  %v11017_v8 = vcombine.high %v7465_v5, %v7473_v24  ;;  %v7467_v59 = vsel %vm7460_vm10, %v7436_v10, %v7466_v9  ;;  %v9174_v9 = vld [vmem:[#allocation3 + $0x4c] sm:$0xf] }
 0x575   : > { %v7458_v16 = vrot.slane %v7448_v20, 4  ;;  %9353 = vrot.lane.b32.xlu1 %v15662_v2, %s16822_s13 }
 0x576   : > { %9351 = vrot.lane.b32.xlu0 %v15664_v4, %s16822_s13  ;;  %8551 = vmatprep.subr.bf16.mxu0 %v11017_v8  ;;  %v7381_v36 = vsel %vm434_vm1, %v7368_v51, %v7369_v49  ;;  %v9087_v8 = vld [vmem:[#allocation3 + $0x24] sm:$0xf] }
 0x577   : > { %v7474_v23 = vsel %vm434_vm1, %v7457_v1, %v7458_v16  ;;  %v7363_v17 = vpop.permute.xlu1 %7362  ;;  %8552 = vmatpush1.bf16.msra.mxu0 %v11016_v27  ;;  %v7382_v46 = vsel %vm7377_vm2, %v15566_v54, %v7381_v36  ;;  %v15835_v1 = vld [vmem:[#allocation8 + $0x24] ss:$8 sps:$4 sm:$0xff]  }
 0x578   : > { %v7355_v41 = vpop.permute.xlu0 %7354  ;;  %v7475_v26 = vsel %vm7460_vm10, %v7446_v31, %v7474_v23  ;;  %v7374_v50 = vrot.slane %v7363_v17, 4  ;;  %vm16830_vm10 = vmmov %vm16828_vm13 }
 0x579   : > { %v7370_v6 = vrot.slane %v7355_v41, 4  ;;  %v11018_v2 = vcombine.low %v7467_v59, %v7475_v26  ;;  %v11019_v21 = vcombine.high %v7467_v59, %v7475_v26  ;;  %9361 = vrot.lane.b32.xlu1 %v15678_v7, %s16822_s13 }
 0x57a   : > { %9359 = vrot.lane.b32.xlu0 %v15680_v60, %s16822_s13  ;;  %v7389_v4 = vsel %vm434_vm1, %v7373_v39, %v7374_v50 }
 0x57b   : > { %8594 = vmatprep.subr.bf16.mxu1 %v11019_v21  ;;  %v7383_v3 = vsel %vm434_vm1, %v7369_v49, %v7370_v6  ;;  %v7950_v34 = vpop.permute.xlu1 %7949  ;;  %v7390_v30 = vsel %vm7377_vm2, %v15582_v28, %v7389_v4 }
 0x57c   : > { %8595 = vmatpush1.bf16.msra.mxu1 %v11018_v2  ;;  %v7365_v51 = vpop.permute.xlu0 %7364  ;;  %v7966_v7 = vrot.slane %v7950_v34, 4  ;;  %v11008_v58 = vcombine.low %v7382_v46, %v7390_v30  ;;  %v11009_v60 = vcombine.high %v7382_v46, %v7390_v30  ;;  %v7384_v29 = vsel %vm7377_vm2, %v7353_v63, %v7383_v3 }
 0x57d   : > { %v7375_v32 = vrot.slane %v7365_v51, 4  ;;  %9273 = vrot.lane.b32.xlu1 %v15726_v35, %s11720_s18 }
 0x57e   : > { %9363 = vrot.lane.b32.xlu0 %v15692_v12, %s16822_s13  ;;  %8553 = vmatprep.subr.bf16.mxu0 %v11009_v60  ;;  %v7978_v18 = vsel %vm434_vm1, %v7965_v15, %v7966_v7  ;;  %v9256_v12 = vld [vmem:[#allocation3 + $0x4c] sm:$0xf] }
 0x57f   : > { %v7391_v39 = vsel %vm434_vm1, %v7374_v50, %v7375_v32  ;;  %v7960_v53 = vpop.permute.xlu1 %7959  ;;  %8554 = vmatpush1.bf16.msra.mxu0 %v11008_v58  ;;  %v7979_v15 = vsel %vm7974_vm9, %v15596_v33, %v7978_v18  ;;  %v9005_v32 = vld [vmem:[#allocation3 + $0x24] sm:$0xf] }
 0x580   : > { %v7952_v54 = vpop.permute.xlu0 %7951  ;;  %v7392_v28 = vsel %vm7377_vm2, %v7363_v17, %v7391_v39  ;;  %v7971_v52 = vrot.slane %v7960_v53, 4  ;;  %vm16831_vm2 = vmmov %vm16830_vm10 }
 0x581   : > { %v7967_v10 = vrot.slane %v7952_v54, 4  ;;  %v11010_v13 = vcombine.low %v7384_v29, %v7392_v28  ;;  %v11011_v11 = vcombine.high %v7384_v29, %v7392_v28  ;;  %9283 = vrot.lane.b32.xlu1 %v15715_v14, %s11720_s18  ;;  %v9010_v28 = vld [vmem:[#allocation3 + $0x4c] sm:$0xf] }
 0x582   : > { %9275 = vrot.lane.b32.xlu0 %v9251_v22, %s11720_s18  ;;  %v7986_v40 = vsel %vm434_vm1, %v7970_v19, %v7971_v52 }
 0x583   : > { %8596 = vmatprep.subr.bf16.mxu1 %v11011_v11  ;;  %v9268_v42 = vpop.permute.xlu1 %9267  ;;  %v7987_v38 = vsel %vm7974_vm9, %v15617_v43, %v7986_v40  ;;  %v7980_v25 = vsel %vm434_vm1, %v7966_v7, %v7967_v10 }
 0x584   : > { %8597 = vmatpush1.bf16.msra.mxu1 %v11010_v13  ;;  %v7962_v55 = vpop.permute.xlu0 %7961  ;;  %v11072_v31 = vcombine.low %v7979_v15, %v7987_v38  ;;  %v11073_v0 = vcombine.high %v7979_v15, %v7987_v38  ;;  %v7981_v43 = vsel %vm7974_vm9, %v7950_v34, %v7980_v25  ;;  %v9287_v61 = vrot.slane %v9268_v42, 4 }
 0x585   : > { %v7972_v47 = vrot.slane %v7962_v55, 4  ;;  %9191 = vrot.lane.b32.xlu1 %v15726_v35, %s11719_s20  ;;  %v8923_v55 = vld [vmem:[#allocation3 + $0x24] sm:$0xf] }
 0x586   : > { %9285 = vrot.lane.b32.xlu0 %v9256_v12, %s11720_s18  ;;  %8569 = vmatprep.subr.bf16.mxu0 %v11073_v0 }
 0x587   : > { %v7988_v19 = vsel %vm434_vm1, %v7971_v52, %v7972_v47  ;;  %v15831_v44 = vpop.permute.xlu1 %9271  ;;  %8570 = vmatpush2.bf16.msra.mxu0 %v11072_v31 }
 0x588   : > { %v9270_v33 = vpop.permute.xlu0 %9269  ;;  %v7989_v56 = vsel %vm7974_vm9, %v7960_v53, %v7988_v19  ;;  %v9289_v5 = vrot.slane %v15831_v44, 4  ;;  %vm16832_vm9 = vcmask 318464  }
 0x589   : > { %v9288_v48 = vrot.slane %v9270_v33, 4  ;;  %v11074_v62 = vcombine.low %v7981_v43, %v7989_v56  ;;  %v11075_v57 = vcombine.high %v7981_v43, %v7989_v56  ;;  %9201 = vrot.lane.b32.xlu1 %v15715_v14, %s11719_s20  ;;  %v8928_v43 = vld [vmem:[#allocation3 + $0x4c] sm:$0xf] }
 0x58a   : > { %9193 = vrot.lane.b32.xlu0 %v9169_v45, %s11719_s20  ;;  %8572 = vmatmul.mubr.bf16.vlgmr.msra.gmra.mxu0 %v15627_v37 }
 0x58b   : > { %8612 = vmatprep.subr.bf16.mxu1 %v11075_v57  ;;  %v9280_v63 = vpop.permute.xlu1 %9279  ;;  %11154 = vmatprep.mubr.msk.bf16.mxu0 %vm1927_vm0, %v15835_v1  ;;  %v9297_v49 = vsel %vm434_vm1, %v9287_v61, %v9288_v48  ;;  %v9299_v26 = vsel %vm434_vm1, %v9288_v48, %v9289_v5 }
 0x58c   : > { %8613 = vmatpush2.bf16.msra.mxu1 %v11074_v62  ;;  %v9278_v20 = vpop.permute.xlu0 %9277  ;;  %v9293_v24 = vrot.slane %v9280_v63, 4  ;;  %v9298_v23 = vsel %vm1325_vm4, %v9268_v42, %v9297_v49  ;;  %v9300_v21 = vsel %vm1325_vm4, %v9270_v33, %v9299_v26 }
 0x58d   : > { %v9292_v16 = vrot.slane %v9278_v20, 4  ;;  %9109 = vrot.lane.b32.xlu1 %v15726_v35, %s16816_s21 }
 0x58e   : > { %9203 = vrot.lane.b32.xlu0 %v9174_v9, %s11719_s20 }
 0x58f   : > { %v9305_v27 = vsel %vm434_vm1, %v9292_v16, %v9293_v24  ;;  %8615 = vmatmul.mubr.bf16.vlgmr.msra.gmra.mxu1 %v15627_v37  ;;  %v9186_v41 = vpop.permute.xlu1 %9185  ;;  %v9092_v37 = vld [vmem:[#allocation3 + $0x4c] sm:$0xf] }
 0x590   : > { %v9306_v17 = vsel %vm1325_vm4, %v9278_v20, %v9305_v27  ;;  %v15852_v59 = vpop.permute.xlu0 %9281  ;;  %11155 = vmatprep.mubr.msk.bf16.mxu1 %vm1927_vm0, %v15835_v1  ;;  %v9205_v7 = vrot.slane %v9186_v41, 4  ;;  %v8841_v20 = vld [vmem:[#allocation3 + $0x24] sm:$0xf] }
 0x591   : > { %v11138_v36 = vcombine.low %v9298_v23, %v9306_v17  ;;  %v9294_v50 = vrot.slane %v15852_v59, 4  ;;  %v11139_v6 = vcombine.high %v9298_v23, %v9306_v17  ;;  %9119 = vrot.lane.b32.xlu1 %v15715_v14, %s16816_s21 }
 0x592   : > { %9111 = vrot.lane.b32.xlu0 %v9087_v8, %s16816_s21 }
 0x593   : > { %9858 = vmatprep.subr.bf16.mxu0 %v11139_v6  ;;  %v9307_v2 = vsel %vm434_vm1, %v9293_v24, %v9294_v50  ;;  %v15867_v4 = vpop.permute.xlu1 %9189 }
 0x594   : > { %9859 = vmatpush1.bf16.msra.mxu0 %v11138_v36  ;;  %v9188_v3 = vpop.permute.xlu0 %9187  ;;  %v9308_v34 = vsel %vm1325_vm4, %v9280_v63, %v9307_v2  ;;  %v9207_v39 = vrot.slane %v15867_v4, 4  ;;  %v8846_v36 = vld [vmem:[#allocation3 + $0x4c] sm:$0xf] }
 0x595   : > { %v9206_v51 = vrot.slane %v9188_v3, 4  ;;  %v11140_v46 = vcombine.low %v9300_v21, %v9308_v34  ;;  %v11141_v30 = vcombine.high %v9300_v21, %v9308_v34  ;;  %9027 = vrot.lane.b32.xlu1 %v15726_v35, %s16817_s15 }
 0x596   : > { %9121 = vrot.lane.b32.xlu0 %v9092_v37, %s16816_s21 }
 0x597   : > { %9901 = vmatprep.subr.bf16.mxu1 %v11141_v30  ;;  %v9198_v58 = vpop.permute.xlu1 %9197  ;;  %v9215_v53 = vsel %vm434_vm1, %v9205_v7, %v9206_v51  ;;  %v9217_v11 = vsel %vm434_vm1, %v9206_v51, %v9207_v39  ;;  %v8759_v30 = vld [vmem:[#allocation3 + $0x24] sm:$0xf] }
 0x598   : > { %9902 = vmatpush1.bf16.msra.mxu1 %v11140_v46  ;;  %v9196_v60 = vpop.permute.xlu0 %9195  ;;  %v9211_v22 = vrot.slane %v9198_v58, 4  ;;  %v9216_v18 = vsel %vm1198_vm3, %v9186_v41, %v9215_v53  ;;  %v9218_v38 = vsel %vm1198_vm3, %v9188_v3, %v9217_v11 }
 0x599   : > { %v9210_v54 = vrot.slane %v9196_v60, 4  ;;  %9037 = vrot.lane.b32.xlu1 %v15715_v14, %s16817_s15 }
 0x59a   : > { %9029 = vrot.lane.b32.xlu0 %v9005_v32, %s16817_s15 }
 0x59b   : > { %v9223_v29 = vsel %vm434_vm1, %v9210_v54, %v9211_v22  ;;  %v9104_v10 = vpop.permute.xlu1 %9103 }
 0x59c   : > { %v9224_v52 = vsel %vm1198_vm3, %v9196_v60, %v9223_v29  ;;  %v15881_v13 = vpop.permute.xlu0 %9199  ;;  %v9123_v33 = vrot.slane %v9104_v10, 4  ;;  %v8764_v29 = vld [vmem:[#allocation3 + $0x4c] sm:$0xf] }
 0x59d   : > { %v11130_v12 = vcombine.low %v9216_v18, %v9224_v52  ;;  %v9212_v40 = vrot.slane %v15881_v13, 4  ;;  %v11131_v42 = vcombine.high %v9216_v18, %v9224_v52  ;;  %8945 = vrot.lane.b32.xlu1 %v15726_v35, %s16818_s19 }
 0x59e   : > { %9039 = vrot.lane.b32.xlu0 %v9010_v28, %s16817_s15 }
 0x59f   : > { %9860 = vmatprep.subr.bf16.mxu0 %v11131_v42  ;;  %v9225_v15 = vsel %vm434_vm1, %v9211_v22, %v9212_v40  ;;  %v15894_v25 = vpop.permute.xlu1 %9107 }
 0x5a0   : > { %9861 = vmatpush1.bf16.msra.mxu0 %v11130_v12  ;;  %v9106_v47 = vpop.permute.xlu0 %9105  ;;  %v9226_v31 = vsel %vm1198_vm3, %v9198_v58, %v9225_v15  ;;  %v9125_v62 = vrot.slane %v15894_v25, 4 }
 0x5a1   : > { %v9124_v0 = vrot.slane %v9106_v47, 4  ;;  %v11132_v19 = vcombine.low %v9218_v38, %v9226_v31  ;;  %v11133_v45 = vcombine.high %v9218_v38, %v9226_v31  ;;  %8955 = vrot.lane.b32.xlu1 %v15715_v14, %s16818_s19  ;;  %v8677_v38 = vld [vmem:[#allocation3 + $0x24] sm:$0xf] }
 0x5a2   : > { %8947 = vrot.lane.b32.xlu0 %v8923_v55, %s16818_s19 }
 0x5a3   : > { %9903 = vmatprep.subr.bf16.mxu1 %v11133_v45  ;;  %v9116_v56 = vpop.permute.xlu1 %9115  ;;  %v9133_v61 = vsel %vm434_vm1, %v9123_v33, %v9124_v0  ;;  %v9135_v8 = vsel %vm434_vm1, %v9124_v0, %v9125_v62 }
 0x5a4   : > { %9904 = vmatpush1.bf16.msra.mxu1 %v11132_v19  ;;  %v9114_v48 = vpop.permute.xlu0 %9113  ;;  %v9129_v57 = vrot.slane %v9116_v56, 4  ;;  %v9134_v24 = vsel %vm1071_vm5, %v9104_v10, %v9133_v61  ;;  %v9136_v6 = vsel %vm1071_vm5, %v9106_v47, %v9135_v8 }
 0x5a5   : > { %v9128_v9 = vrot.slane %v9114_v48, 4  ;;  %8863 = vrot.lane.b32.xlu1 %v15726_v35, %s16819_s22 }
 0x5a6   : > { %8957 = vrot.lane.b32.xlu0 %v8928_v43, %s16818_s19  ;;  %s16825_s19 = smov 56  }
 0x5a7   : > { %v9141_v63 = vsel %vm434_vm1, %v9128_v9, %v9129_v57  ;;  %v9022_v16 = vpop.permute.xlu1 %9021 }
 0x5a8   : > { %v9142_v49 = vsel %vm1071_vm5, %v9114_v48, %v9141_v63  ;;  %v15908_v27 = vpop.permute.xlu0 %9117  ;;  %v9041_v46 = vrot.slane %v9022_v16, 4  ;;  %v8682_v48 = vld [vmem:[#allocation3 + $0x4c] sm:$0xf] }
 0x5a9   : > { %v11122_v23 = vcombine.low %v9134_v24, %v9142_v49  ;;  %v11123_v17 = vcombine.high %v9134_v24, %v9142_v49  ;;  %v9130_v41 = vrot.slane %v15908_v27, 4  ;;  %8873 = vrot.lane.b32.xlu1 %v15715_v14, %s16819_s22 }
 0x5aa   : > { %8865 = vrot.lane.b32.xlu0 %v8841_v20, %s16819_s22 }
 0x5ab   : > { %v9143_v26 = vsel %vm434_vm1, %v9129_v57, %v9130_v41  ;;  %9862 = vmatprep.subr.bf16.mxu0 %v11123_v17  ;;  %v15921_v37 = vpop.permute.xlu1 %9025 }
 0x5ac   : > { %9863 = vmatpush1.bf16.msra.mxu0 %v11122_v23  ;;  %v9024_v2 = vpop.permute.xlu0 %9023  ;;  %v9144_v21 = vsel %vm1071_vm5, %v9116_v56, %v9143_v26  ;;  %v9043_v58 = vrot.slane %v15921_v37, 4 }
 0x5ad   : > { %v9042_v3 = vrot.slane %v9024_v2, 4  ;;  %v11124_v34 = vcombine.low %v9136_v6, %v9144_v21  ;;  %v11125_v51 = vcombine.high %v9136_v6, %v9144_v21  ;;  %8781 = vrot.lane.b32.xlu1 %v15726_v35, %s16820_s14 }
 0x5ae   : > { %8875 = vrot.lane.b32.xlu0 %v8846_v36, %s16819_s22 }
 0x5af   : > { %9905 = vmatprep.subr.bf16.mxu1 %v11125_v51  ;;  %v9034_v7 = vpop.permute.xlu1 %9033  ;;  %v9051_v22 = vsel %vm434_vm1, %v9041_v46, %v9042_v3  ;;  %v9053_v11 = vsel %vm434_vm1, %v9042_v3, %v9043_v58  ;;  %v10112_v3 = vld [vmem:[%s16441_s5] sm:$0xff] }
 0x5b0   : > { %9906 = vmatpush1.bf16.msra.mxu1 %v11124_v34  ;;  %v9032_v32 = vpop.permute.xlu0 %9031  ;;  %v9047_v60 = vrot.slane %v9034_v7, 4  ;;  %v9052_v28 = vsel %vm944_vm6, %v9022_v16, %v9051_v22  ;;  %v9054_v47 = vsel %vm944_vm6, %v9024_v2, %v9053_v11  ;;  %v9333_v16 = vld [vmem:[#allocation3 + $0x24] sm:$0xf]  ;;  %v9338_v34 = vld [vmem:[#allocation3 + $0x4c] sm:$0xf] }
 0x5b1   : > { %v9046_v53 = vrot.slane %v9032_v32, 4  ;;  %8791 = vrot.lane.b32.xlu1 %v15715_v14, %s16820_s14 }
 0x5b2   : > { %8783 = vrot.lane.b32.xlu0 %v8759_v30, %s16820_s14 }
 0x5b3   : > { %v9059_v54 = vsel %vm434_vm1, %v9046_v53, %v9047_v60  ;;  %v8940_v52 = vpop.permute.xlu1 %8939  ;;  %v10140_v53 = vld [vmem:[%s16442_s6] sm:$0xff] }
 0x5b4   : > { %v9060_v18 = vsel %vm944_vm6, %v9032_v32, %v9059_v54  ;;  %v15935_v10 = vpop.permute.xlu0 %9035  ;;  %v8959_v56 = vrot.slane %v8940_v52, 4  ;;  %v10113_v54 = vld [vmem:[%s16441_s5 + $0x8] sm:$0xff] }
 0x5b5   : > { %v11114_v12 = vcombine.low %v9052_v28, %v9060_v18  ;;  %v11115_v42 = vcombine.high %v9052_v28, %v9060_v18  ;;  %v9048_v55 = vrot.slane %v15935_v10, 4  ;;  %8699 = vrot.lane.b32.xlu1 %v15726_v35, %s16821_s4 }
 0x5b6   : > { %8793 = vrot.lane.b32.xlu0 %v8764_v29, %s16820_s14  ;;  %s11441_s14 = sshll.u32 %s11827_s9, 11  ;;  %s10304_s9 = scalar_lea.sflag [#allocation7], %s11922_s24 }
 0x5b7   : > { %v9061_v15 = vsel %vm434_vm1, %v9047_v60, %v9048_v55  ;;  %9864 = vmatprep.subr.bf16.mxu0 %v11115_v42  ;;  %v15948_v31 = vpop.permute.xlu1 %8943  ;;  %s16389_s18 = scalar_lea.hbm %s16444_s8, %s11441_s14 }
 0x5b8   : > { %9865 = vmatpush1.bf16.msra.mxu0 %v11114_v12  ;;  %v8942_v0 = vpop.permute.xlu0 %8941  ;;  %v9062_v19 = vsel %vm944_vm6, %v9034_v7, %v9061_v15  ;;  %v8961_v9 = vrot.slane %v15948_v31, 4  ;;  %v10141_v15 = vld [vmem:[%s16442_s6 + $0x8] sm:$0xff] }
 0x5b9   : > { %v8960_v45 = vrot.slane %v8942_v0, 4  ;;  %v11116_v33 = vcombine.low %v9054_v47, %v9062_v19  ;;  %v11117_v43 = vcombine.high %v9054_v47, %v9062_v19  ;;  %8709 = vrot.lane.b32.xlu1 %v15715_v14, %s16821_s4 }
 0x5ba   : > { %8701 = vrot.lane.b32.xlu0 %v8677_v38, %s16821_s4  ;;  %v10078_v38 = vld [vmem:[%s11926_s10 + $0x8] sm:$0xff] }
 0x5bb   : > { %9907 = vmatprep.subr.bf16.mxu1 %v11117_v43  ;;  %v8952_v57 = vpop.permute.xlu1 %8951  ;;  %v8969_v20 = vsel %vm434_vm1, %v8959_v56, %v8960_v45  ;;  %v8971_v36 = vsel %vm434_vm1, %v8960_v45, %v8961_v9 }
 0x5bc   : > { %9908 = vmatpush1.bf16.msra.mxu1 %v11116_v33  ;;  %v8950_v61 = vpop.permute.xlu0 %8949  ;;  %v8965_v63 = vrot.slane %v8952_v57, 4  ;;  %v8970_v8 = vsel %vm817_vm7, %v8940_v52, %v8969_v20  ;;  %v8972_v51 = vsel %vm817_vm7, %v8942_v0, %v8971_v36 }
 0x5bd   : > { %v8964_v24 = vrot.slane %v8950_v61, 4  ;;  %9355 = vrot.lane.b32.xlu1 %v15726_v35, %s16822_s13 }
 0x5be   : > { %8711 = vrot.lane.b32.xlu0 %v8682_v48, %s16821_s4 }
 0x5bf   : > { %v8977_v49 = vsel %vm434_vm1, %v8964_v24, %v8965_v63  ;;  %v8858_v17 = vpop.permute.xlu1 %8857 }
 0x5c0   : > { %v8978_v23 = vsel %vm817_vm7, %v8950_v61, %v8977_v49  ;;  %v15962_v26 = vpop.permute.xlu0 %8953  ;;  %v8877_v22 = vrot.slane %v8858_v17, 4  ;;  %v10079_v61 = vld [vmem:[%s11926_s10 + $0x10] sm:$0xff] }
 0x5c1   : > { %v11106_v6 = vcombine.low %v8970_v8, %v8978_v23  ;;  %v11107_v2 = vcombine.high %v8970_v8, %v8978_v23  ;;  %v8966_v35 = vrot.slane %v15962_v26, 4  ;;  %9365 = vrot.lane.b32.xlu1 %v15715_v14, %s16822_s13 }
 0x5c2   : > { %9357 = vrot.lane.b32.xlu0 %v9333_v16, %s16822_s13 }
 0x5c3   : > { %v8979_v21 = vsel %vm434_vm1, %v8965_v63, %v8966_v35  ;;  %9866 = vmatprep.subr.bf16.mxu0 %v11107_v2  ;;  %v15978_v46 = vpop.permute.xlu1 %8861  ;;  %v10080_v63 = vld [vmem:[%s11926_s10 + $0x18] sm:$0xff]  ;;  %v10082_v2 = vld [vmem:[%s11926_s10 + $0x28] sm:$0xff] }
 0x5c4   : > { %9867 = vmatpush1.bf16.msra.mxu0 %v11106_v6  ;;  %v8860_v30 = vpop.permute.xlu0 %8859  ;;  %v8980_v14 = vsel %vm817_vm7, %v8952_v57, %v8979_v21  ;;  %v8879_v18 = vrot.slane %v15978_v46, 4  ;;  %v10081_v6 = vld [vmem:[%s11926_s10 + $0x20] sm:$0xff] }
 0x5c5   : > { %v8878_v7 = vrot.slane %v8860_v30, 4  ;;  %v11108_v32 = vcombine.low %v8972_v51, %v8980_v14  ;;  %v11109_v60 = vcombine.high %v8972_v51, %v8980_v14  ;;  %10116 = vperm.xlu1 %11554, %v10112_v3  }
 0x5c6   : > { %9367 = vrot.lane.b32.xlu0 %v9338_v34, %s16822_s13 }
 0x5c7   : > { %9909 = vmatprep.subr.bf16.mxu1 %v11109_v60  ;;  %v8870_v29 = vpop.permute.xlu1 %8869  ;;  %v8887_v11 = vsel %vm434_vm1, %v8877_v22, %v8878_v7  ;;  %v8889_v33 = vsel %vm434_vm1, %v8878_v7, %v8879_v18  ;;  %v10084_v60 = vld [vmem:[%s11926_s10 + $0x38] sm:$0xff] }
 0x5c8   : > { %9910 = vmatpush1.bf16.msra.mxu1 %v11108_v32  ;;  %v8868_v28 = vpop.permute.xlu0 %8867  ;;  %v8883_v52 = vrot.slane %v8870_v29, 4  ;;  %v8888_v47 = vsel %vm16823_vm8, %v8858_v17, %v8887_v11  ;;  %v8890_v20 = vsel %vm16826_vm11, %v8860_v30, %v8889_v33  ;;  %v10083_v32 = vld [vmem:[%s11926_s10 + $0x30] sm:$0xff]  ;;  %vm16833_vm8 = vmmov %vm16832_vm9 }
 0x5c9   : > { %v8882_v12 = vrot.slane %v8868_v28, 4  ;;  %10144 = vperm.xlu1 %11554, %v10140_v53   ;;  %vm16835_vm11 = vmmov %vm16833_vm8 }
 0x5ca   : > { %10121 = vperm.xlu0 %11553, %v10113_v54  }
 0x5cb   : > { %v8895_v42 = vsel %vm434_vm1, %v8882_v12, %v8883_v52  ;;  %v8776_v19 = vpop.permute.xlu1 %8775 }
 0x5cc   : > { %v8896_v0 = vsel %vm16824_vm15, %v8868_v28, %v8895_v42  ;;  %v15997_v45 = vpop.permute.xlu0 %8871  ;;  %v8795_v36 = vrot.slane %v8776_v19, 4  ;;  %vm16834_vm15 = vmmov %vm16833_vm8 }
 0x5cd   : > { %v11098_v43 = vcombine.low %v8888_v47, %v8896_v0  ;;  %v11099_v56 = vcombine.high %v8888_v47, %v8896_v0  ;;  %v8884_v48 = vrot.slane %v15997_v45, 4  ;;  %10186 = vrot.lane.b32.xlu1 %v10078_v38, %s16825_s19  ;;  %v10086_v38 = vld [vmem:[%s11926_s10 + $0x48] sm:$0xff] }
 0x5ce   : > { %10149 = vperm.xlu0 %11553, %v10141_v15   ;;  %v10085_v15 = vld [vmem:[%s11926_s10 + $0x40] sm:$0xff] }
 0x5cf   : > { %v8897_v57 = vsel %vm434_vm1, %v8883_v52, %v8884_v48  ;;  %9868 = vmatprep.subr.bf16.mxu0 %v11099_v56  ;;  %v16010_v24 = vpop.permute.xlu1 %8779 }
 0x5d0   : > { %9869 = vmatpush1.bf16.msra.mxu0 %v11098_v43  ;;  %v8778_v49 = vpop.permute.xlu0 %8777  ;;  %v8898_v16 = vsel %vm16827_vm12, %v8870_v29, %v8897_v57  ;;  %v8797_v34 = vrot.slane %v16010_v24, 4  ;;  %vm16836_vm12 = vcmask 138240  }
 0x5d1   : > { %v8796_v8 = vrot.slane %v8778_v49, 4  ;;  %v11100_v23 = vcombine.low %v8890_v20, %v8898_v16  ;;  %v11101_v17 = vcombine.high %v8890_v20, %v8898_v16  ;;  %10190 = vrot.lane.b32.xlu1 %v10080_v63, %s16825_s19  ;;  %v10087_v63 = vld [vmem:[%s11926_s10 + $0x60] sm:$0xff]  ;;  %v10088_v20 = vld [vmem:[%s11926_s10 + $0x68] sm:$0xff] }
 0x5d2   : > { %10188 = vrot.lane.b32.xlu0 %v10079_v61, %s16825_s19 }
 0x5d3   : > { %9911 = vmatprep.subr.bf16.mxu1 %v11101_v17  ;;  %v8788_v21 = vpop.permute.xlu1 %8787  ;;  %v8805_v30 = vsel %vm434_vm1, %v8795_v36, %v8796_v8  ;;  %v8807_v28 = vsel %vm434_vm1, %v8796_v8, %v8797_v34 }
 0x5d4   : > { %9912 = vmatpush1.bf16.msra.mxu1 %v11100_v23  ;;  %v8786_v3 = vpop.permute.xlu0 %8785  ;;  %v8801_v51 = vrot.slane %v8788_v21, 4  ;;  %v8806_v22 = vsel %vm16828_vm13, %v8776_v19, %v8805_v30  ;;  %v8808_v47 = vsel %vm16830_vm10, %v8778_v49, %v8807_v28  ;;  %v10092_v28 = vld [vmem:[%s11926_s10 + $0x88] sm:$0xff]  ;;  %vm16837_vm13 = vmmov %vm16836_vm12 }
 0x5d5   : > { %v8800_v14 = vrot.slane %v8786_v3, 4  ;;  %10194 = vrot.lane.b32.xlu1 %v10082_v2, %s16825_s19  ;;  %v10089_v2 = vld [vmem:[%s11926_s10 + $0x70] sm:$0xff]  ;;  %vm16839_vm10 = vmmov %vm16836_vm12 }
 0x5d6   : > { %10192 = vrot.lane.b32.xlu0 %v10081_v6, %s16825_s19 }
 0x5d7   : > { %v8813_v7 = vsel %vm434_vm1, %v8800_v14, %v8801_v51  ;;  %v8694_v54 = vpop.permute.xlu1 %8693 }
 0x5d8   : > { %v8814_v53 = vsel %vm16829_vm14, %v8786_v3, %v8813_v7  ;;  %v16026_v29 = vpop.permute.xlu0 %8789  ;;  %v8713_v61 = vrot.slane %v8694_v54, 4  ;;  %vm16838_vm14 = vmmov %vm16836_vm12 }
 0x5d9   : > { %v11090_v52 = vcombine.low %v8806_v22, %v8814_v53  ;;  %v11091_v11 = vcombine.high %v8806_v22, %v8814_v53  ;;  %v8802_v12 = vrot.slane %v16026_v29, 4  ;;  %10198 = vrot.lane.b32.xlu1 %v10084_v60, %s16825_s19 }
 0x5da   : > { %10196 = vrot.lane.b32.xlu0 %v10083_v32, %s16825_s19 }
 0x5db   : > { %v8815_v42 = vsel %vm434_vm1, %v8801_v51, %v8802_v12  ;;  %9870 = vmatprep.subr.bf16.mxu0 %v11091_v11  ;;  %v16040_v0 = vpop.permute.xlu1 %8697 }
 0x5dc   : > { %9871 = vmatpush1.bf16.msra.mxu0 %v11090_v52  ;;  %v8696_v19 = vpop.permute.xlu0 %8695  ;;  %v8816_v33 = vsel %vm16831_vm2, %v8788_v21, %v8815_v42  ;;  %v8715_v8 = vrot.slane %v16040_v0, 4  ;;  %v10090_v21 = vld [vmem:[%s11926_s10 + $0x78] sm:$0xff] }
 0x5dd   : > { %v8714_v43 = vrot.slane %v8696_v19, 4  ;;  %v11092_v56 = vcombine.low %v8808_v47, %v8816_v33  ;;  %v11093_v57 = vcombine.high %v8808_v47, %v8816_v33  ;;  %10202 = vrot.lane.b32.xlu1 %v10086_v38, %s16825_s19 }
 0x5de   : > { %10200 = vrot.lane.b32.xlu0 %v10085_v15, %s16825_s19 }
 0x5df   : > { %9913 = vmatprep.subr.bf16.mxu1 %v11093_v57  ;;  %v8706_v49 = vpop.permute.xlu1 %8705  ;;  %v8723_v17 = vsel %vm434_vm1, %v8713_v61, %v8714_v43  ;;  %v8725_v7 = vsel %vm434_vm1, %v8714_v43, %v8715_v8  ;;  %v10093_v57 = vld [vmem:[%s11926_s10 + $0x90] sm:$0xff] }
 0x5e0   : > { %9914 = vmatpush1.bf16.msra.mxu1 %v11092_v56  ;;  %v8704_v16 = vpop.permute.xlu0 %8703  ;;  %v8719_v23 = vrot.slane %v8706_v49, 4  ;;  %v8724_v3 = vsel %vm16832_vm9, %v8694_v54, %v8723_v17  ;;  %v10091_v54 = vld [vmem:[%s11926_s10 + $0x80] sm:$0xff]  ;;  %v8726_v52 = vsel %vm16834_vm15, %v8696_v19, %v8725_v7  ;;  %v10094_v56 = vld [vmem:[%s11926_s10 + $0x98] sm:$0xff]  ;;  %vm16846_vm9 = vmmov %vm16831_vm2 }
 0x5e1   : > { %v8718_v36 = vrot.slane %v8704_v16, 4  ;;  %10206 = vrot.lane.b32.xlu1 %v10088_v20, %s16825_s19  ;;  %v10095_v17 = vld [vmem:[%s11926_s10 + $0xa0] sm:$0xff]  ;;  %vm16847_vm15 = vmmov %vm16833_vm8  ;;  %s10407_s10 = sshll.u32 %s11922_s24, 7 }
 0x5e2   : > { %10204 = vrot.lane.b32.xlu0 %v10087_v63, %s16825_s19  ;;  %s16320_s22 = scalar_lea.vmem [#allocation10], %s10407_s10 }
 0x5e3   : > { %v8731_v6 = vsel %vm434_vm1, %v8718_v36, %v8719_v23  ;;  %v9350_v30 = vpop.permute.xlu1 %9349  ;;  %s10317_s4 = sshll.u32 %s16320_s22, 4  ;;  %s16391_s4 = int_to_ptr.vmem [resolvable:$true] %s10317_s4 }
 0x5e4   : > { %v8732_v51 = vsel %vm16833_vm8, %v8704_v16, %v8731_v6  ;;  %v16056_v14 = vpop.permute.xlu0 %8707  ;;  %v9369_v43 = vrot.slane %v9350_v30, 4  ;;  %s11637_s17 = scalar_lea.vmem %s16391_s4, 2048  ;;  %p11644_p10 = scmp.lt.s32.totalorder %s16391_s4, %s11642_s16 }
 0x5e5   : > { %v11082_v32 = vcombine.low %v8724_v3, %v8732_v51  ;;  %v11083_v60 = vcombine.high %v8724_v3, %v8732_v51  ;;  %v8720_v22 = vrot.slane %v16056_v14, 4  ;;  %10210 = vrot.lane.b32.xlu1 %v10090_v21, %s16825_s19  ;;  %p11638_p3 = scmp.ne.s32.totalorder %s16391_s4, %s11637_s17  ;;  %p11645_p2 = scmp.lt.s32.totalorder %s11643_s11, %s11637_s17 }
 0x5e6   : > { %10208 = vrot.lane.b32.xlu0 %v10089_v2, %s16825_s19 }
 0x5e7   : > { %v8733_v53 = vsel %vm434_vm1, %v8719_v23, %v8720_v22  ;;  %9872 = vmatprep.subr.bf16.mxu0 %v11083_v60  ;;  %v16070_v11 = vpop.permute.xlu1 %9353  ;;  %p11639_p7 = pnand %p11638_p3, %p16869_p11  ;;  %p11646_p13 = por %p11645_p2, %p11644_p10 }
 0x5e8   : > { %9873 = vmatpush1.bf16.msra.mxu0 %v11082_v32  ;;  %v9352_v42 = vpop.permute.xlu0 %9351  ;;  %v8734_v15 = vsel %vm16835_vm11, %v8706_v49, %v8733_v53  ;;  %v9371_v19 = vrot.slane %v16070_v11, 4  ;;  %vm16848_vm11 = vmmov %vm16833_vm8 }
 0x5e9   : > { %v9370_v38 = vrot.slane %v9352_v42, 4  ;;  %v11084_v47 = vcombine.low %v8726_v52, %v8734_v15  ;;  %v11085_v33 = vcombine.high %v8726_v52, %v8734_v15  ;;  %10214 = vrot.lane.b32.xlu1 %v10092_v28, %s16825_s19  ;;  %p11640_p12 = pneg %p11639_p7 }
 0x5ea   : > { %10212 = vrot.lane.b32.xlu0 %v10091_v54, %s16825_s19  ;;  %v16095_v54 = vld [vmem:[#allocation8 + $0x20] ss:$8 sps:$4 sm:$0xff]  }
 0x5eb   : > { %9915 = vmatprep.subr.bf16.mxu1 %v11085_v33  ;;  %v9362_v61 = vpop.permute.xlu1 %9361  ;;  %v9379_v49 = vsel %vm434_vm1, %v9369_v43, %v9370_v38  ;;  %v9381_v36 = vsel %vm434_vm1, %v9370_v38, %v9371_v19  ;;  %p11647_p0 = pnand %p11646_p13, %p11640_p12 }
 0x5ec   : > { %9916 = vmatpush1.bf16.msra.mxu1 %v11084_v47  ;;  %v9360_v63 = vpop.permute.xlu0 %9359  ;;  %v9375_v20 = vrot.slane %v9362_v61, 4  ;;  %v9380_v6 = vsel %vm16836_vm12, %v9350_v30, %v9379_v49  ;;  %v9382_v30 = vsel %vm16838_vm14, %v9352_v42, %v9381_v36  ;;  %vm16849_vm12 = vmmov %vm16833_vm8 }
 0x5ed   : > { %v9374_v16 = vrot.slane %v9360_v63, 4  ;;  %10218 = vrot.lane.b32.xlu1 %v10094_v56, %s16825_s19  ;;  %vm16851_vm14 = vmmov %vm16839_vm10 }
 0x5ee   : > { %10216 = vrot.lane.b32.xlu0 %v10093_v57, %s16825_s19 }
 0x5ef   : > { %v9387_v23 = vsel %vm434_vm1, %v9374_v16, %v9375_v20  ;;  %v9274_v21 = vpop.permute.xlu1 %9273 }
 0x5f0   : > { %v9388_v2 = vsel %vm16837_vm13, %v9360_v63, %v9387_v23  ;;  %v16088_v3 = vpop.permute.xlu0 %9363  ;;  %v9290_v32 = vrot.slane %v9274_v21, 4  ;;  %vm16850_vm13 = vmmov %vm16839_vm10 }
 0x5f1   : > { %v11146_v51 = vcombine.low %v9380_v6, %v9388_v2  ;;  %v11147_v7 = vcombine.high %v9380_v6, %v9388_v2  ;;  %v9376_v60 = vrot.slane %v16088_v3, 4 }
 0x5f2   : > { %10220 = vrot.lane.b32.xlu0 %v10095_v17, %s16825_s19  ;;  %v9301_v28 = vsel %vm434_vm1, %v9289_v5, %v9290_v32 }
 0x5f3   : > { %v9389_v53 = vsel %vm434_vm1, %v9375_v20, %v9376_v60  ;;  %9888 = vmatprep.subr.bf16.mxu0 %v11147_v7  ;;  %v9284_v52 = vpop.permute.xlu1 %9283  ;;  %v9302_v20 = vsel %vm1325_vm4, %v15831_v44, %v9301_v28 }
 0x5f4   : > { %9889 = vmatpush2.bf16.msra.mxu0 %v11146_v51  ;;  %v9276_v15 = vpop.permute.xlu0 %9275  ;;  %v9390_v38 = vsel %vm16839_vm10, %v9362_v61, %v9389_v53  ;;  %v9295_v47 = vrot.slane %v9284_v52, 4 }
 0x5f5   : > { %v9291_v33 = vrot.slane %v9276_v15, 4  ;;  %v11148_v43 = vcombine.low %v9382_v30, %v9390_v38  ;;  %v11149_v56 = vcombine.high %v9382_v30, %v9390_v38 }
 0x5f6   : > { %v9309_v57 = vsel %vm434_vm1, %v9294_v50, %v9295_v47 }
 0x5f7   : > { %9891 = vmatmul.mubr.bf16.vlgmr.msra.gmra.mxu0 %v16095_v54  ;;  %9931 = vmatprep.subr.bf16.mxu1 %v11149_v56  ;;  %v9303_v42 = vsel %vm434_vm1, %v9290_v32, %v9291_v33  ;;  %v9192_v63 = vpop.permute.xlu1 %9191  ;;  %v9310_v61 = vsel %vm1325_vm4, %v15852_v59, %v9309_v57 }
 0x5f8   : > { %9932 = vmatpush2.bf16.msra.mxu1 %v11148_v43  ;;  %v9286_v5 = vpop.permute.xlu0 %9285  ;;  %11156 = vmatprep.mubr.msk.bf16.mxu0 %vm1927_vm0, %v15835_v1  ;;  %v9208_v49 = vrot.slane %v9192_v63, 4  ;;  %v11142_v50 = vcombine.low %v9302_v20, %v9310_v61  ;;  %v11143_v23 = vcombine.high %v9302_v20, %v9310_v61  ;;  %v9304_v59 = vsel %vm1325_vm4, %v9274_v21, %v9303_v42 }
 0x5f9   : > { %v9296_v16 = vrot.slane %v9286_v5, 4 }
 0x5fa   : > { %9944 = vmatprep.subr.bf16.mxu0 %v11143_v23  ;;  %v9219_v36 = vsel %vm434_vm1, %v9207_v39, %v9208_v49 }
 0x5fb   : > { %v9311_v17 = vsel %vm434_vm1, %v9295_v47, %v9296_v16  ;;  %9934 = vmatmul.mubr.bf16.vlgmr.msra.gmra.mxu1 %v16095_v54  ;;  %v9202_v44 = vpop.permute.xlu1 %9201  ;;  %9945 = vmatpush1.bf16.msra.mxu0 %v11142_v50  ;;  %v9220_v21 = vsel %vm1198_vm3, %v15867_v4, %v9219_v36 }
 0x5fc   : > { %v9194_v6 = vpop.permute.xlu0 %9193  ;;  %v9312_v2 = vsel %vm1325_vm4, %v9284_v52, %v9311_v17  ;;  %11157 = vmatprep.mubr.msk.bf16.mxu1 %vm1927_vm0, %v15835_v1  ;;  %v9213_v51 = vrot.slane %v9202_v44, 4  ;;  %vm16840_vm0 = vcmask 302080  }
 0x5fd   : > { %v9209_v7 = vrot.slane %v9194_v6, 4  ;;  %v11144_v32 = vcombine.low %v9304_v59, %v9312_v2  ;;  %v11145_v53 = vcombine.high %v9304_v59, %v9312_v2  ;;  %vm16842_vm4 = vmmov %vm16840_vm0 }
 0x5fe   : > { %v9227_v30 = vsel %vm434_vm1, %v9212_v40, %v9213_v51 }
 0x5ff   : > { %9987 = vmatprep.subr.bf16.mxu1 %v11145_v53  ;;  %v9221_v39 = vsel %vm434_vm1, %v9208_v49, %v9209_v7  ;;  %v9110_v28 = vpop.permute.xlu1 %9109  ;;  %v9228_v1 = vsel %vm1198_vm3, %v15881_v13, %v9227_v30 }
 0x600   : > { %9988 = vmatpush1.bf16.msra.mxu1 %v11144_v32  ;;  %v9204_v15 = vpop.permute.xlu0 %9203  ;;  %v9126_v52 = vrot.slane %v9110_v28, 4  ;;  %v11134_v47 = vcombine.low %v9220_v21, %v9228_v1  ;;  %v11135_v33 = vcombine.high %v9220_v21, %v9228_v1  ;;  %v9222_v42 = vsel %vm1198_vm3, %v9192_v63, %v9221_v39 }
 0x601   : > { %v9214_v38 = vrot.slane %v9204_v15, 4 }
 0x602   : > { %9946 = vmatprep.subr.bf16.mxu0 %v11135_v33  ;;  %v9137_v40 = vsel %vm434_vm1, %v9125_v62, %v9126_v52 }
 0x603   : > { %v9229_v43 = vsel %vm434_vm1, %v9213_v51, %v9214_v38  ;;  %v9120_v56 = vpop.permute.xlu1 %9119  ;;  %9947 = vmatpush1.bf16.msra.mxu0 %v11134_v47  ;;  %v9138_v23 = vsel %vm1071_vm5, %v15894_v25, %v9137_v40 }
 0x604   : > { %v9112_v57 = vpop.permute.xlu0 %9111  ;;  %v9230_v4 = vsel %vm1198_vm3, %v9202_v44, %v9229_v43  ;;  %v9131_v5 = vrot.slane %v9120_v56, 4  ;;  %vm16841_vm3 = vmmov %vm16840_vm0 }
 0x605   : > { %v9127_v13 = vrot.slane %v9112_v57, 4  ;;  %v11136_v20 = vcombine.low %v9222_v42, %v9230_v4  ;;  %v11137_v61 = vcombine.high %v9222_v42, %v9230_v4 }
 0x606   : > { %v9145_v49 = vsel %vm434_vm1, %v9130_v41, %v9131_v5 }
 0x607   : > { %9989 = vmatprep.subr.bf16.mxu1 %v11137_v61  ;;  %v9139_v16 = vsel %vm434_vm1, %v9126_v52, %v9127_v13  ;;  %v9028_v50 = vpop.permute.xlu1 %9027  ;;  %v9146_v63 = vsel %vm1071_vm5, %v15908_v27, %v9145_v49 }
 0x608   : > { %9990 = vmatpush1.bf16.msra.mxu1 %v11136_v20  ;;  %v9122_v62 = vpop.permute.xlu0 %9121  ;;  %v9044_v17 = vrot.slane %v9028_v50, 4  ;;  %v11126_v44 = vcombine.low %v9138_v23, %v9146_v63  ;;  %v11127_v6 = vcombine.high %v9138_v23, %v9146_v63  ;;  %v9140_v7 = vsel %vm1071_vm5, %v9110_v28, %v9139_v16 }
 0x609   : > { %v9132_v36 = vrot.slane %v9122_v62, 4 }
 0x60a   : > { %9948 = vmatprep.subr.bf16.mxu0 %v11127_v6  ;;  %v9055_v41 = vsel %vm434_vm1, %v9043_v58, %v9044_v17 }
 0x60b   : > { %v9147_v59 = vsel %vm434_vm1, %v9131_v5, %v9132_v36  ;;  %v9038_v2 = vpop.permute.xlu1 %9037  ;;  %9949 = vmatpush1.bf16.msra.mxu0 %v11126_v44  ;;  %v9056_v1 = vsel %vm944_vm6, %v15921_v37, %v9055_v41 }
 0x60c   : > { %v9030_v51 = vpop.permute.xlu0 %9029  ;;  %v9148_v25 = vsel %vm1071_vm5, %v9120_v56, %v9147_v59  ;;  %v9049_v32 = vrot.slane %v9038_v2, 4  ;;  %vm16843_vm5 = vmmov %vm16840_vm0 }
 0x60d   : > { %v9045_v27 = vrot.slane %v9030_v51, 4  ;;  %v11128_v53 = vcombine.low %v9140_v7, %v9148_v25  ;;  %v11129_v30 = vcombine.high %v9140_v7, %v9148_v25 }
 0x60e   : > { %v9063_v39 = vsel %vm434_vm1, %v9048_v55, %v9049_v32 }
 0x60f   : > { %9991 = vmatprep.subr.bf16.mxu1 %v11129_v30  ;;  %v9057_v15 = vsel %vm434_vm1, %v9044_v17, %v9045_v27  ;;  %v8946_v21 = vpop.permute.xlu1 %8945  ;;  %v9064_v28 = vsel %vm944_vm6, %v15935_v10, %v9063_v39 }
 0x610   : > { %9992 = vmatpush1.bf16.msra.mxu1 %v11128_v53  ;;  %v9040_v58 = vpop.permute.xlu0 %9039  ;;  %v8962_v52 = vrot.slane %v8946_v21, 4  ;;  %v11118_v47 = vcombine.low %v9056_v1, %v9064_v28  ;;  %v11119_v33 = vcombine.high %v9056_v1, %v9064_v28  ;;  %v9058_v57 = vsel %vm944_vm6, %v9028_v50, %v9057_v15 }
 0x611   : > { %v9050_v38 = vrot.slane %v9040_v58, 4 }
 0x612   : > { %9950 = vmatprep.subr.bf16.mxu0 %v11119_v33  ;;  %v8973_v55 = vsel %vm434_vm1, %v8961_v9, %v8962_v52 }
 0x613   : > { %v9065_v43 = vsel %vm434_vm1, %v9049_v32, %v9050_v38  ;;  %v8956_v40 = vpop.permute.xlu1 %8955  ;;  %9951 = vmatpush1.bf16.msra.mxu0 %v11118_v47  ;;  %v8974_v49 = vsel %vm817_vm7, %v15948_v31, %v8973_v55 }
 0x614   : > { %v8948_v56 = vpop.permute.xlu0 %8947  ;;  %v9066_v37 = vsel %vm944_vm6, %v9038_v2, %v9065_v43  ;;  %v8967_v42 = vrot.slane %v8956_v40, 4  ;;  %vm16844_vm6 = vmmov %vm16831_vm2 }
 0x615   : > { %v8963_v10 = vrot.slane %v8948_v56, 4  ;;  %v11120_v4 = vcombine.low %v9058_v57, %v9066_v37  ;;  %v11121_v5 = vcombine.high %v9058_v57, %v9066_v37 }
 0x616   : > { %v8981_v13 = vsel %vm434_vm1, %v8966_v35, %v8967_v42 }
 0x617   : > { %9993 = vmatprep.subr.bf16.mxu1 %v11121_v5  ;;  %v8975_v20 = vsel %vm434_vm1, %v8962_v52, %v8963_v10  ;;  %v8864_v61 = vpop.permute.xlu1 %8863  ;;  %v8982_v16 = vsel %vm817_vm7, %v15962_v26, %v8981_v13 }
 0x618   : > { %9994 = vmatpush1.bf16.msra.mxu1 %v11120_v4  ;;  %v8958_v9 = vpop.permute.xlu0 %8957  ;;  %v8880_v50 = vrot.slane %v8864_v61, 4  ;;  %v11110_v23 = vcombine.low %v8974_v49, %v8982_v16  ;;  %v11111_v63 = vcombine.high %v8974_v49, %v8982_v16  ;;  %v8976_v6 = vsel %vm817_vm7, %v8946_v21, %v8975_v20 }
 0x619   : > { %v8968_v62 = vrot.slane %v8958_v9, 4 }
 0x61a   : > { %9952 = vmatprep.subr.bf16.mxu0 %v11111_v63  ;;  %v8891_v35 = vsel %vm434_vm1, %v8879_v18, %v8880_v50 }
 0x61b   : > { %v8983_v17 = vsel %vm434_vm1, %v8967_v42, %v8968_v62  ;;  %v8874_v36 = vpop.permute.xlu1 %8873  ;;  %9953 = vmatpush1.bf16.msra.mxu0 %v11110_v23  ;;  %v8892_v32 = vsel %vm16840_vm0, %v15978_v46, %v8891_v35  ;;  %vm16852_vm0 = vmmov %vm16839_vm10 }
 0x61c   : > { %v8866_v44 = vpop.permute.xlu0 %8865  ;;  %v8984_v31 = vsel %vm817_vm7, %v8956_v40, %v8983_v17  ;;  %v8885_v59 = vrot.slane %v8874_v36, 4  ;;  %vm16845_vm7 = vmmov %vm16831_vm2 }
 0x61d   : > { %v8881_v26 = vrot.slane %v8866_v44, 4  ;;  %v11112_v41 = vcombine.low %v8976_v6, %v8984_v31  ;;  %v11113_v2 = vcombine.high %v8976_v6, %v8984_v31 }
 0x61e   : > { %v8899_v51 = vsel %vm434_vm1, %v8884_v48, %v8885_v59 }
 0x61f   : > { %9995 = vmatprep.subr.bf16.mxu1 %v11113_v2  ;;  %v8893_v7 = vsel %vm434_vm1, %v8880_v50, %v8881_v26  ;;  %v8782_v25 = vpop.permute.xlu1 %8781  ;;  %v8900_v27 = vsel %vm16841_vm3, %v15997_v45, %v8899_v51 }
 0x620   : > { %9996 = vmatpush1.bf16.msra.mxu1 %v11112_v41  ;;  %v8876_v18 = vpop.permute.xlu0 %8875  ;;  %v8798_v53 = vrot.slane %v8782_v25, 4  ;;  %v11102_v39 = vcombine.low %v8892_v32, %v8900_v27  ;;  %v11103_v15 = vcombine.high %v8892_v32, %v8900_v27  ;;  %v8894_v28 = vsel %vm16842_vm4, %v8864_v61, %v8893_v7 }
 0x621   : > { %v8886_v30 = vrot.slane %v8876_v18, 4 }
 0x622   : > { %9954 = vmatprep.subr.bf16.mxu0 %v11103_v15  ;;  %v8809_v48 = vsel %vm434_vm1, %v8797_v34, %v8798_v53 }
 0x623   : > { %v8901_v21 = vsel %vm434_vm1, %v8885_v59, %v8886_v30  ;;  %v8792_v58 = vpop.permute.xlu1 %8791  ;;  %9955 = vmatpush1.bf16.msra.mxu0 %v11102_v39  ;;  %v8810_v40 = vsel %vm16844_vm6, %v16010_v24, %v8809_v48 }
 0x624   : > { %v8784_v1 = vpop.permute.xlu0 %8783  ;;  %v8902_v46 = vsel %vm16843_vm5, %v8874_v36, %v8901_v21  ;;  %v8803_v52 = vrot.slane %v8792_v58, 4 }
 0x625   : > { %v8799_v45 = vrot.slane %v8784_v1, 4  ;;  %v11104_v38 = vcombine.low %v8894_v28, %v8902_v46  ;;  %v11105_v47 = vcombine.high %v8894_v28, %v8902_v46 }
 0x626   : > { %v8817_v33 = vsel %vm434_vm1, %v8802_v12, %v8803_v52 }
 0x627   : > { %9997 = vmatprep.subr.bf16.mxu1 %v11105_v47  ;;  %v8811_v43 = vsel %vm434_vm1, %v8798_v53, %v8799_v45  ;;  %v8700_v55 = vpop.permute.xlu1 %8699  ;;  %v8818_v56 = vsel %vm16845_vm7, %v16026_v29, %v8817_v33 }
 0x628   : > { %9998 = vmatpush1.bf16.msra.mxu1 %v11104_v38  ;;  %v8794_v34 = vpop.permute.xlu0 %8793  ;;  %v8716_v57 = vrot.slane %v8700_v55, 4  ;;  %v11094_v42 = vcombine.low %v8810_v40, %v8818_v56  ;;  %v11095_v10 = vcombine.high %v8810_v40, %v8818_v56  ;;  %v8812_v20 = vsel %vm16831_vm2, %v8782_v25, %v8811_v43 }
 0x629   : > { %v8804_v37 = vrot.slane %v8794_v34, 4 }
 0x62a   : > { %9956 = vmatprep.subr.bf16.mxu0 %v11095_v10  ;;  %v8727_v12 = vsel %vm434_vm1, %v8715_v8, %v8716_v57 }
 0x62b   : > { %v8819_v4 = vsel %vm434_vm1, %v8803_v52, %v8804_v37  ;;  %v8710_v5 = vpop.permute.xlu1 %8709  ;;  %9957 = vmatpush1.bf16.msra.mxu0 %v11094_v42  ;;  %v8728_v23 = vsel %vm16833_vm8, %v16040_v0, %v8727_v12  ;;  %v7215_v37 = vpop.f32.mrf.mxu1 }
 0x62c   : > { %v8702_v13 = vpop.permute.xlu0 %8701  ;;  %v8820_v24 = vsel %vm16846_vm9, %v8792_v58, %v8819_v4  ;;  %v8721_v61 = vrot.slane %v8710_v5, 4 }
 0x62d   : > { %v8717_v29 = vrot.slane %v8702_v13, 4  ;;  %v11096_v9 = vcombine.low %v8812_v20, %v8820_v24  ;;  %v11097_v49 = vcombine.high %v8812_v20, %v8820_v24  ;;  %v7217_v10 = vpop.f32.mrf.mxu1 }
 0x62e   : > { %v8735_v16 = vsel %vm434_vm1, %v8720_v22, %v8721_v61 }
 0x62f   : > { %9999 = vmatprep.subr.bf16.mxu1 %v11097_v49  ;;  %v8729_v50 = vsel %vm434_vm1, %v8716_v57, %v8717_v29  ;;  %v9356_v62 = vpop.permute.xlu1 %9355  ;;  %v8736_v63 = vsel %vm16847_vm15, %v16056_v14, %v8735_v16  ;;  %v7172_v57 = vpop.f32.mrf.mxu0 }
 0x630   : > { %10000 = vmatpush1.bf16.msra.mxu1 %v11096_v9  ;;  %v8712_v8 = vpop.permute.xlu0 %8711  ;;  %v9372_v17 = vrot.slane %v9356_v62, 4  ;;  %v11086_v36 = vcombine.low %v8728_v23, %v8736_v63  ;;  %v11087_v44 = vcombine.high %v8728_v23, %v8736_v63  ;;  %v8730_v26 = vsel %vm16848_vm11, %v8700_v55, %v8729_v50  ;;  %v7219_v12 = vpop.f32.mrf.mxu1 }
 0x631   : > { %v8722_v35 = vrot.slane %v8712_v8, 4  ;;  %v7174_v42 = vpop.f32.mrf.mxu0 }
 0x632   : > { %9958 = vmatprep.subr.bf16.mxu0 %v11087_v44  ;;  %v9383_v22 = vsel %vm434_vm1, %v9371_v19, %v9372_v17  ;;  %v7221_v13 = vpop.f32.mrf.mxu1 }
 0x633   : > { %v8737_v6 = vsel %vm434_vm1, %v8721_v61, %v8722_v35  ;;  %v9366_v31 = vpop.permute.xlu1 %9365  ;;  %9959 = vmatpush1.bf16.msra.mxu0 %v11086_v36  ;;  %v9384_v19 = vsel %vm16850_vm13, %v16070_v11, %v9383_v22  ;;  %v7176_v4 = vpop.f32.mrf.mxu0 }
 0x634   : > { %v9358_v59 = vpop.permute.xlu0 %9357  ;;  %v8738_v0 = vsel %vm16849_vm12, %v8710_v5, %v8737_v6  ;;  %v9377_v41 = vrot.slane %v9366_v31, 4  ;;  %v16264_v24 = vpop.f32.mrf.mxu1 }
 0x635   : > { %v9373_v14 = vrot.slane %v9358_v59, 4  ;;  %v11088_v2 = vcombine.low %v8730_v26, %v8738_v0  ;;  %v11089_v51 = vcombine.high %v8730_v26, %v8738_v0  ;;  %v7178_v5 = vpop.f32.mrf.mxu0 }
 0x636   : > { %v9391_v7 = vsel %vm434_vm1, %v9376_v60, %v9377_v41  ;;  %v16268_v29 = vpop.f32.mrf.mxu1 }
 0x637   : > { %10001 = vmatprep.subr.bf16.mxu1 %v11089_v51  ;;  %v9392_v18 = vsel %vm16851_vm14, %v16088_v3, %v9391_v7  ;;  %v9385_v32 = vsel %vm434_vm1, %v9372_v17, %v9373_v14  ;;  %v16262_v20 = vpop.f32.mrf.mxu0 }
 0x638   : > { %10002 = vmatpush1.bf16.msra.mxu1 %v11088_v2  ;;  %v9368_v25 = vpop.permute.xlu0 %9367  ;;  %v11150_v53 = vcombine.low %v9384_v19, %v9392_v18  ;;  %v11151_v30 = vcombine.high %v9384_v19, %v9392_v18  ;;  %v9386_v60 = vsel %vm16839_vm10, %v9356_v62, %v9385_v32  ;;  %v16272_v49 = vpop.f32.mrf.mxu1 }
 0x639   : > { %v9378_v27 = vrot.slane %v9368_v25, 4  ;;  %v16266_v61 = vpop.f32.mrf.mxu0 }
 0x63a   : > { %9974 = vmatprep.subr.bf16.mxu0 %v11151_v30  ;;  %v16276_v50 = vpop.f32.mrf.mxu1 }
 0x63b   : > { %v9393_v39 = vsel %vm434_vm1, %v9377_v41, %v9378_v27  ;;  %9975 = vmatpush2.bf16.msra.mxu0 %v11150_v53  ;;  %vm16853_vm1 = vcmask 457728   ;;  %v16270_v9 = vpop.f32.mrf.mxu0 }
 0x63c   : > { %v9394_v15 = vsel %vm16852_vm0, %v9366_v31, %v9393_v39  ;;  %vm16854_vm3 = vmmov %vm16853_vm1  ;;  %v8530_v8 = vpop.f32.mrf.mxu1 }
 0x63d   : > { %v11152_v21 = vcombine.low %v9386_v60, %v9394_v15  ;;  %v11153_v48 = vcombine.high %v9386_v60, %v9394_v15  ;;  %vm16855_vm4 = vmmov %vm16853_vm1  ;;  %v16274_v16 = vpop.f32.mrf.mxu0  ;;  %v8643_v32 = vadd.f32 %v8530_v8, %v7215_v37 }
 0x63e   : > { %9977 = vmatmul.mubr.bf16.vlgmr.msra.gmra.mxu0 %v16095_v54  ;;  %vm16856_vm5 = vmmov %vm16853_vm1  ;;  %v8532_v63 = vpop.f32.mrf.mxu1 }
 0x63f   : > { %10017 = vmatprep.subr.bf16.mxu1 %v11153_v48  ;;  %v8487_v62 = vpop.f32.mrf.mxu0  ;;  %v8644_v60 = vadd.f32 %v8532_v63, %v7217_v10  ;;  %vm16857_vm6 = vmmov %vm16853_vm1 }
 0x640   : > { %10018 = vmatpush2.bf16.msra.mxu1 %v11152_v21  ;;  %v16232_v11 = vpop.permute.xlu1 %10116  ;;  %v8534_v35 = vpop.f32.mrf.mxu1  ;;  %v8641_v14 = vadd.f32 %v8487_v62, %v7172_v57  ;;  %vm16858_vm7 = vmmov %vm16853_vm1 }
 0x641   : > { %v8489_v23 = vpop.f32.mrf.mxu0  ;;  %vm16859_vm2 = vmmov %vm16853_vm1 }
 0x642   : > { %v8536_v6 = vpop.f32.mrf.mxu1  ;;  %v8642_v7 = vadd.f32 %v8489_v23, %v7174_v42  ;;  %v8651_v42 = vadd.f32 %v8534_v35, %v7219_v12  ;;  %vm16860_vm9 = vmmov %vm16853_vm1 }
 0x643   : > { %10020 = vmatmul.mubr.bf16.vlgmr.msra.gmra.mxu1 %v16095_v54  ;;  %v8491_v17 = vpop.f32.mrf.mxu0  ;;  %vm16861_vm8 = vmmov %vm16853_vm1 }
 0x644   : > { %v16235_v3 = vpop.permute.xlu1 %10144  ;;  %v8649_v27 = vadd.f32 %v8491_v17, %v7176_v4  ;;  %v8652_v4 = vadd.f32 %v8536_v6, %v7221_v13  ;;  %vm16862_vm15 = vmmov %vm16853_vm1 }
 0x645   : > { %v16237_v58 = vpop.permute.xlu0 %10121  ;;  %v8493_v36 = vpop.f32.mrf.mxu0  ;;  %vm16863_vm11 = vmmov %vm16853_vm1 }
 0x646   : > { %v8650_v15 = vadd.f32 %v8493_v36, %v7178_v5  ;;  %vm16864_vm12 = vmmov %vm16853_vm1 }
 0x647   : > { %vm16865_vm13 = vmmov %vm16853_vm1 }
 0x648   : > { %v10187_v28 = vpop.permute.xlu1 %10186  ;;  %vm16866_vm14 = vmmov %vm16853_vm1 }
 0x649   : > { %v16239_v1 = vpop.permute.xlu0 %10149  ;;  %vm16867_vm10 = vmmov %vm16853_vm1 }
 0x64a   : > { %v16278_v44 = vpop.f32.mrf.mxu0  ;;  %vm16868_vm0 = vmmov %vm16853_vm1 }
 0x64c   : > { %v16243_v52 = vpop.permute.xlu1 %10190  ;;  %v16282_v31 = vpop.f32.mrf.mxu0 }
 0x64d   : > { %v16241_v46 = vpop.permute.xlu0 %10188 }
 0x64e   : > { %v16286_v26 = vpop.f32.mrf.mxu0  ;;  %v10223_v21 = vsel %vm16857_vm6, %v10187_v28, %v16241_v46  ;;  %v10224_v10 = vsel %vm16858_vm7, %v16241_v46, %v16243_v52 }
 0x64f   : > { %v16280_v22 = vpop.f32.mrf.mxu1 }
 0x650   : > { %v16247_v38 = vpop.permute.xlu1 %10194  ;;  %v16290_v41 = vpop.f32.mrf.mxu0 }
 0x651   : > { %v16245_v45 = vpop.permute.xlu0 %10192  ;;  %v16284_v59 = vpop.f32.mrf.mxu1 }
 0x652   : > { %v10225_v28 = vsel %vm16859_vm2, %v16243_v52, %v16245_v45  ;;  %v10226_v12 = vsel %vm16860_vm9, %v16245_v45, %v16247_v38 }
 0x653   : > { %v16288_v0 = vpop.f32.mrf.mxu1 }
 0x654   : > { %v10199_v33 = vpop.permute.xlu1 %10198 }
 0x655   : > { %v10197_v47 = vpop.permute.xlu0 %10196  ;;  %v16292_v19 = vpop.f32.mrf.mxu1 }
 0x656   : > { %v16251_v54 = vsel %vm16853_vm1, %v16247_v38, %v10197_v47  ;;  %v16254_v43 = vsel %vm16854_vm3, %v10197_v47, %v10199_v33 }
 0x658   : > { %v10203_v34 = vpop.permute.xlu1 %10202 }
 0x659   : > { %v10201_v55 = vpop.permute.xlu0 %10200 }
 0x65a   : > { %v16257_v40 = vsel %vm16855_vm4, %v10199_v33, %v10201_v55  ;;  %v16260_v56 = vsel %vm16856_vm5, %v10201_v55, %v10203_v34 }
 0x65c   : > { %v10207_v39 = vpop.permute.xlu1 %10206 }
 0x65d   : > { %v10205_v2 = vpop.permute.xlu0 %10204 }
 0x65e   : > { %v10231_v36 = vsel %vm16861_vm8, %v10205_v2, %v10207_v39 }
 0x660   : > { %v10211_v45 = vpop.permute.xlu1 %10210 }
 0x661   : > { %v10209_v37 = vpop.permute.xlu0 %10208 }
 0x6b7   : > { %v9892_v51 = vpop.f32.mrf.mxu0 }
 0x6b8   : > { %v10046_v25 = vadd.f32 %v9892_v51, %v8641_v14 }
 0x6b9   : > { %v9894_v18 = vpop.f32.mrf.mxu0 }
 0x6ba   : > { %v10124_v53 = vmul.f32 %v16232_v11, %v10046_v25  ;;  %v10047_v30 = vadd.f32 %v9894_v18, %v8642_v7 }
 0x6bb   : > { %v9896_v48 = vpop.f32.mrf.mxu0  ;;  %v9935_v47 = vpop.f32.mrf.mxu1 }
 0x6bc   : > { %v10152_v33 = vadd.f32 %v16235_v3, %v10124_v53  ;;  %v10125_v55 = vmul.f32 %v16232_v11, %v10047_v30  ;;  %v10054_v34 = vadd.f32 %v9896_v48, %v8649_v27  ;;  %v10048_v57 = vadd.f32 %v9935_v47, %v8643_v32 }
 0x6bd   : > { %v9898_v5 = vpop.f32.mrf.mxu0  ;;  %v9937_v62 = vpop.f32.mrf.mxu1  ;;  %v10232_v27 = vsel %vm16862_vm15, %v10207_v39, %v10209_v37 }
 0x6be   : > { %v10255_v8 = vadd.f32 %v10223_v21, %v10152_v33  ;;  %v10153_v23 = vadd.f32 %v16235_v3, %v10125_v55  ;;  %v10132_v63 = vmul.f32 %v16237_v58, %v10054_v34  ;;  %v10126_v17 = vmul.f32 %v16232_v11, %v10048_v57 }
 0x6bf   : > { %v10055_v13 = vadd.f32 %v9898_v5, %v8650_v15  ;;  %v10049_v46 = vadd.f32 %v9937_v62, %v8644_v60  ;;  %v9939_v35 = vpop.f32.mrf.mxu1  ;;  %v10213_v60 = vpop.permute.xlu0 %10212  ;;  %v10233_v55 = vsel %vm16863_vm11, %v10209_v37, %v10211_v45 }
 0x6c0   : > { %v10271_v52 = vmax.f32 %v10255_v8, 0.0  ;;  %v10256_v6 = vadd.f32 %v10224_v10, %v10153_v23  ;;  %v10160_v14 = vadd.f32 %v16239_v1, %v10132_v63  ;;  %v10154_v51 = vadd.f32 %v16235_v3, %v10126_v17 }
 0x6c1   : > { %v10133_v7 = vmul.f32 %v16237_v58, %v10055_v13  ;;  %v10127_v25 = vmul.f32 %v16232_v11, %v10049_v46  ;;  %v10056_v18 = vadd.f32 %v9939_v35, %v8651_v42  ;;  %v9941_v32 = vpop.f32.mrf.mxu1  ;;  %v8645_v63 = vadd.f32 %v16278_v44, %v16262_v20 }
 0x6c2   : > { %10287 = vst [vmem:[%s16320_s22] sm:$0xff] %v10271_v52  ;;  %v10272_v38 = vmax.f32 %v10256_v6, 0.0  ;;  %v10257_v2 = vadd.f32 %v10225_v28, %v10154_v51  ;;  %v10263_v53 = vadd.f32 %v10231_v36, %v10160_v14  ;;  %v10057_v30 = vadd.f32 %v9941_v32, %v8652_v4 }
 0x6c3   : > { %v10161_v15 = vadd.f32 %v16239_v1, %v10133_v7  ;;  %v10155_v21 = vadd.f32 %v16235_v3, %v10127_v25  ;;  %v10134_v39 = vmul.f32 %v16237_v58, %v10056_v18  ;;  %v10234_v4 = vsel %vm16864_vm12, %v10211_v45, %v10213_v60 }
 0x6c4   : > { %10288 = vst [vmem:[%s16320_s22 + $0x8] sm:$0xff] %v10272_v38  ;;  %v10273_v48 = vmax.f32 %v10257_v2, 0.0  ;;  %v10279_v47 = vmax.f32 %v10263_v53, 0.0  ;;  %v10135_v33 = vmul.f32 %v16237_v58, %v10057_v30  ;;  %v8647_v35 = vadd.f32 %v16280_v22, %v16264_v24 }
 0x6c5   : > { %v10258_v34 = vadd.f32 %v10226_v12, %v10155_v21  ;;  %v10162_v57 = vadd.f32 %v16239_v1, %v10134_v39  ;;  %v10264_v42 = vadd.f32 %v10232_v27, %v10161_v15  ;;  %v8646_v12 = vadd.f32 %v16282_v31, %v16266_v61  ;;  %v10215_v61 = vpop.permute.xlu1 %10214  ;;  %v10217_v31 = vpop.permute.xlu0 %10216 }
 0x6c6   : > { %10289 = vst [vmem:[%s16320_s22 + $0x10] sm:$0xff] %v10273_v48  ;;  %10295 = vst [vmem:[%s16320_s22 + $0x40] sm:$0xff] %v10279_v47  ;;  %v10163_v10 = vadd.f32 %v16239_v1, %v10135_v33  ;;  %v8653_v36 = vadd.f32 %v16286_v26, %v16270_v9  ;;  %v8648_v18 = vadd.f32 %v16284_v59, %v16268_v29 }
 0x6c7   : > { %v10274_v28 = vmax.f32 %v10258_v34, 0.0  ;;  %v10280_v5 = vmax.f32 %v10264_v42, 0.0  ;;  %v10265_v62 = vadd.f32 %v10233_v55, %v10162_v57  ;;  %v8655_v24 = vadd.f32 %v16288_v0, %v16272_v49 }
 0x6c8   : > { %v10266_v8 = vadd.f32 %v10234_v4, %v10163_v10  ;;  %v8654_v9 = vadd.f32 %v16290_v41, %v16274_v16  ;;  %v8656_v29 = vadd.f32 %v16292_v19, %v16276_v50  ;;  %v10235_v49 = vsel %vm16865_vm13, %v10213_v60, %v10215_v61 }
 0x6c9   : > { %10290 = vst [vmem:[%s16320_s22 + $0x18] sm:$0xff] %v10274_v28  ;;  %10296 = vst [vmem:[%s16320_s22 + $0x48] sm:$0xff] %v10280_v5  ;;  %v10281_v23 = vmax.f32 %v10265_v62, 0.0  ;;  %v10236_v50 = vsel %vm16866_vm14, %v10215_v61, %v10217_v31  ;;  %v10221_v47 = vpop.permute.xlu0 %10220  ;;  %v10219_v34 = vpop.permute.xlu1 %10218 }
 0x6ca   : > { %v10282_v37 = vmax.f32 %v10266_v8, 0.0  ;;  %v10238_v5 = vsel %vm16867_vm10, %v10219_v34, %v10221_v47  ;;  %v10237_v62 = vsel %vm16868_vm0, %v10217_v31, %v10219_v34 }
 0x6cb   : > { %10297 = vst [vmem:[%s16320_s22 + $0x50] sm:$0xff] %v10281_v23 }
 0x6cc   : > { %10298 = vst [vmem:[%s16320_s22 + $0x58] sm:$0xff] %v10282_v37 }
 0x6fe   : > { %v9978_v17 = vpop.f32.mrf.mxu0 }
 0x6ff   : > { %v10050_v13 = vadd.f32 %v9978_v17, %v8645_v63 }
 0x700   : > { %v9980_v46 = vpop.f32.mrf.mxu0 }
 0x701   : > { %v10128_v52 = vmul.f32 %v16232_v11, %v10050_v13  ;;  %v10051_v6 = vadd.f32 %v9980_v46, %v8646_v12 }
 0x702   : > { %v9982_v14 = vpop.f32.mrf.mxu0 }
 0x703   : > { %v10021_v51 = vpop.f32.mrf.mxu1  ;;  %v10156_v7 = vadd.f32 %v16235_v3, %v10128_v52  ;;  %v10129_v20 = vmul.f32 %v16232_v11, %v10051_v6  ;;  %v10058_v44 = vadd.f32 %v9982_v14, %v8653_v36 }
 0x704   : > { %v10052_v25 = vadd.f32 %v10021_v51, %v8647_v35  ;;  %v9984_v22 = vpop.f32.mrf.mxu0 }
 0x705   : > { %v10023_v26 = vpop.f32.mrf.mxu1  ;;  %v10259_v32 = vadd.f32 %v16251_v54, %v10156_v7  ;;  %v10157_v27 = vadd.f32 %v16235_v3, %v10129_v20  ;;  %v10136_v45 = vmul.f32 %v16237_v58, %v10058_v44  ;;  %v10059_v59 = vadd.f32 %v9984_v22, %v8654_v9 }
 0x706   : > { %v10130_v38 = vmul.f32 %v16232_v11, %v10052_v25  ;;  %v10053_v2 = vadd.f32 %v10023_v26, %v8648_v18 }
 0x707   : > { %v10025_v0 = vpop.f32.mrf.mxu1  ;;  %v10275_v16 = vmax.f32 %v10259_v32, 0.0  ;;  %v10260_v41 = vadd.f32 %v16254_v43, %v10157_v27  ;;  %v10164_v54 = vadd.f32 %v16239_v1, %v10136_v45  ;;  %v10137_v30 = vmul.f32 %v16237_v58, %v10059_v59 }
 0x708   : > { %v10158_v53 = vadd.f32 %v16235_v3, %v10130_v38  ;;  %v10131_v15 = vmul.f32 %v16232_v11, %v10053_v2  ;;  %v10060_v21 = vadd.f32 %v10025_v0, %v8655_v24 }
 0x709   : > { %v10027_v39 = vpop.f32.mrf.mxu1  ;;  %10291 = vst [vmem:[%s16320_s22 + $0x20] sm:$0xff] %v10275_v16  ;;  %v10276_v19 = vmax.f32 %v10260_v41, 0.0  ;;  %v10267_v48 = vadd.f32 %v10235_v49, %v10164_v54  ;;  %v10165_v33 = vadd.f32 %v16239_v1, %v10137_v30 }
 0x70a   : > { %v10261_v60 = vadd.f32 %v16257_v40, %v10158_v53  ;;  %v10061_v43 = vadd.f32 %v10027_v39, %v8656_v29  ;;  %v10159_v55 = vadd.f32 %v16235_v3, %v10131_v15  ;;  %v10138_v11 = vmul.f32 %v16237_v58, %v10060_v21 }
 0x70b   : > { %10292 = vst [vmem:[%s16320_s22 + $0x28] sm:$0xff] %v10276_v19  ;;  %v10283_v42 = vmax.f32 %v10267_v48, 0.0  ;;  %v10268_v28 = vadd.f32 %v10236_v50, %v10165_v33 }
 0x70c   : > { %v10277_v57 = vmax.f32 %v10261_v60, 0.0  ;;  %v10139_v40 = vmul.f32 %v16237_v58, %v10061_v43  ;;  %v10262_v4 = vadd.f32 %v16260_v56, %v10159_v55  ;;  %v10166_v10 = vadd.f32 %v16239_v1, %v10138_v11 }
 0x70d   : > { %10299 = vst [vmem:[%s16320_s22 + $0x60] sm:$0xff] %v10283_v42  ;;  %v10284_v8 = vmax.f32 %v10268_v28, 0.0 }
 0x70e   : > { %10293 = vst [vmem:[%s16320_s22 + $0x30] sm:$0xff] %v10277_v57  ;;  %v10167_v3 = vadd.f32 %v16239_v1, %v10139_v40  ;;  %v10278_v58 = vmax.f32 %v10262_v4, 0.0  ;;  %v10269_v56 = vadd.f32 %v10237_v62, %v10166_v10 }
 0x70f   : > { %10300 = vst [vmem:[%s16320_s22 + $0x68] sm:$0xff] %v10284_v8 }
 0x710   : > { %v10270_v23 = vadd.f32 %v10238_v5, %v10167_v3  ;;  %10294 = vst [vmem:[%s16320_s22 + $0x38] sm:$0xff] %v10278_v58  ;;  %v10285_v37 = vmax.f32 %v10269_v56, 0.0 }
 0x712   : > { %v10286_v1 = vmax.f32 %v10270_v23, 0.0  ;;  %10301 = vst [vmem:[%s16320_s22 + $0x70] sm:$0xff] %v10285_v37 }
 0x714   : > { %10302 = vst [vmem:[%s16320_s22 + $0x78] sm:$0xff] %v10286_v1 }
 0x715   : > { %11650 = shalt.err (!%p11647_p0)
}
 0x716   : > { %s11651_s21 = scalar_lea.hbm %s16389_s18, 2048  ;;  %s11655_s10 = scalar_lea.hbm %s16444_s8, 4096 }
 0x717   : > { %p11652_p5 = scmp.ne.s32.totalorder %s16389_s18, %s11651_s21  ;;  %p11656_p4 = scmp.lt.s32.totalorder %s16389_s18, %s16444_s8 }
 0x718   : > { %p11657_p6 = scmp.lt.s32.totalorder %s11655_s10, %s11651_s21 }
 0x719   : > { %p11653_p9 = pnand %p11652_p5, %p16869_p11 }
 0x71a   : > { %p11658_p8 = por %p11657_p6, %p11656_p4 }
 0x71b   : > { %p11654_p1 = pneg %p11653_p9 }
 0x71d   : > { %p11659_p3 = pnand %p11658_p8, %p11654_p1 }
 0x71f   : > { %11662 = shalt.err (!%p11659_p3)
}
 0x720   : > { %s11759_s13 = smov 1024   ;;  %s11760_s20 = smov 64  }
 0x721   : > { %11451 = dma.vmem_to_hbm [thread:$0]  (%p16869_p11), %s16391_s4, 2048, %s16389_s18, %s10304_s9, %s11759_s13, %s11759_s13, %s11760_s20  }
 0x722 PF: > { %s10332_s17 = sand.u32 1, %s11693_s27   ;;  %p16870_p7 = scmp.ne.s32.totalorder %s16565_s12, 0 }
 0x723   : > { %p16871_p12 = scmp.ge.s32.totalorder %s11705_s30, 2  ;;  %s10333_s23 = scalar_lea.sflag [#allocation7], %s10332_s17 }
 0x725   : > { %p11462_p10 = pnand %p16871_p12, %p16870_p7 }
 0x727   : > { %p11463_p2 = pneg %p11462_p10 }
 0x729   : > { %11688 = dma.done.wait (%p11463_p2), %s10333_s23, 2048  }
 0x72a   : > { %11690 = vsyncadd (%p11463_p2), %s10333_s23, 4294965248  ;;  %s16872_s30 = sld [smem:[#allocation14_spill]]  ;;  %s16873_s27 = smov %s11697_s28 }
 0x72b   : > { %s16874_s28 = smov %s11701_s29  ;;  %s16875_s29 = smov %s11877_s25 }
 0x730   : > { %p22_p13 = scmp.ge.s32.totalorder %s16872_s30, 4  }
 0x732   :  { %24 = sbr.rel (!%p22_p13) target bundleno = 8 (0x8), region = 105 }
 0x737   :  { %10338 = vsyncpa [#allocation6], 1 }
 0x738   :  { %10340 = vsyncpa [#allocation6 + $0x1], 1 }
 0x739   :  { %10341 = vsyncpa [#allocation9], 1 }
 0x73a   :  { %10342 = vsyncpa [#allocation7], 1 }
 0x73b   :  { %10344 = vsyncpa [#allocation7 + $0x1], 1 }

</bundles_post_ra>
